<compile_context>
chip_gen: v7x
topology: tpu7x:2x2x1
jax: 0.10.0
libtpu: 0.0.40
codegen_flags: <defaults>
</compile_context>

<pallas_src>
import jax
import jax.numpy as jnp
from jax import lax
from jax.experimental import pallas as pl
from jax.experimental.pallas import tpu as pltpu
from jax.scipy.linalg import block_diag

# ---- small, self-consistent config ------------------------------------------
B = 2          # bsize
NTURNS = 4     # nturns
D = 32         # n_feature_dim
I = 8          # instance_dim
E = 2 * D      # transformer d_model (64)
H = 4          # nhead
DH = E // H    # head dim (16)
N = B * I      # 16 "token" rows, row index = b*I + i
W2 = 2 * E     # fused z/r gate width (128)
EPS = 1e-5
SCALE = 1.0 / float(DH) ** 0.5

# ---- packed-slab layout constants ---------------------------------------------
# W384 slab (bf16, 384 lanes): split qkv weights, rows:
INZR_H, INZR_P = 0, D            # zr gate: h rows / proj rows   (32 each, 384 lanes)
INU_H, INU_P = 2 * D, 3 * D      # u  gate: h rows / proj rows   (32 each, 192 lanes)
W384_ROWS = 4 * D                # 128

# W128 slab (bf16, 128 lanes): everything else + broadcast constants, row offsets:
WP_OFF = 0                       # (256,  32) ConvTranspose as stacked matmul
OWZR_OFF = WP_OFF + I * D        # (128, 128) fused z/r out-proj (block diag)
F1ZR_OFF = OWZR_OFF + W2         # (128,  64) fused z/r FF1
F2ZR_OFF = F1ZR_OFF + W2         # ( 64, 128) fused z/r FF2
FCZR_OFF = F2ZR_OFF + 2 * D      # (128,  64) fused z/r final linear
OWU_OFF = FCZR_OFF + W2          # ( 64,  64) u out-proj
F1U_OFF = OWU_OFF + E            # ( 64,  32) u FF1
F2U_OFF = F1U_OFF + E            # ( 32,  64) u FF2
FCU_OFF = F2U_OFF + D            # ( 64,  32) u final linear
PHZR_OFF = FCU_OFF + E           # (128, 128) head block-ones (8 x 16-lane heads)
PMZR_OFF = PHZR_OFF + W2         # (128, 128) LN segment mean matrix (2 x 64)/64
PHU_OFF = PMZR_OFF + W2          # ( 64,  64) head block-ones (4 heads)
PMU_OFF = PHU_OFF + E            # ( 64,  64) LN mean matrix (ones/64)
W128_ROWS = PMU_OFF + E          # 1312

# bias slab rows (f32, 384 lanes, one vector per row)
(BI_INZR, BI_OBZR, BI_N1WZR, BI_N1BZR, BI_F1BZR, BI_F2BZR, BI_N2WZR, BI_N2BZR,
 BI_FCBZR, BI_INU, BI_OBU, BI_N1WU, BI_N1BU, BI_F1BU, BI_F2BU, BI_N2WU,
 BI_N2BU, BI_FCBU) = range(18)
BIAS_ROWS = 24


def _layer_norm(x, w, b):
    mu = jnp.mean(x, axis=-1, keepdims=True)
    xc = x - mu
    var = jnp.mean(xc * xc, axis=-1, keepdims=True)
    return xc * lax.rsqrt(var + EPS) * w + b


# ------------------------------ Pallas kernel ----------------------------------
def soft_ctx_kernel(txt_ref, h0_ref, w384_ref, w128_ref, bias_ref, out_ref):
    bf16 = jnp.bfloat16

    # ---- load-at-point-of-use helpers (static ref slices, bf16 weights) ------
    def w128(off, rows, cols=W2):
        return w128_ref[off:off + rows, :cols]

    def w384(off, rows, cols=384):
        return w384_ref[off:off + rows, :cols]

    def bvec(row, cols):
        # full-lane-width row load, then a cheap value slice
        return bias_ref[row:row + 1, :][:, :cols]

    def mm(x, w):  # bf16 x bf16 -> f32 accumulation on the MXU
        return jnp.dot(x.astype(bf16), w, preferred_element_type=jnp.float32)

    # ---- segment LayerNorm via a single precomputed mean matrix Pm -----------
    def seg_ln(x, wrow, brow, pm_off, width):
        pm = w128(pm_off, width, width)           # block matrix, entries 1/64
        mu = mm(x, pm)                            # per-segment mean, broadcast
        xc = x - mu
        var = mm(xc * xc, pm)                     # per-segment variance, broadcast
        return xc * lax.rsqrt(var + EPS) * bvec(wrow, width) + bvec(brow, width)

    # ---- multi-head self-attention over a length-2 sequence (the bsize axis) --
    def pair_attn(qkv, width, ph_off):
        q = qkv[:, :width]
        k = qkv[:, width:2 * width]
        v = qkv[:, 2 * width:3 * width]
        q0, q1 = q[:I], q[I:]
        k0, k1 = k[:I], k[I:]
        v0, v1 = v[:I], v[I:]
        dk = k0 - k1
        dv = v0 - v1
        ph = w128(ph_off, width, width)           # block-ones over 16-lane heads
        a0 = jax.nn.sigmoid(mm(q0 * dk, ph) * SCALE)      # weight on key 0, query b=0
        a1 = jax.nn.sigmoid(mm(q1 * dk, ph) * (-SCALE))   # weight on key 1, query b=1
        out0 = v1 + a0 * dv
        out1 = v0 - a1 * dv
        return jnp.concatenate([out0, out1], axis=0)      # (N, width)

    # ---- fused z/r gate (width 2E = 128, lanes [z | r]) ------------------------
    def zr_gate(h, proj):
        qkv = (mm(h, w384(INZR_H, D)) + mm(proj, w384(INZR_P, D))
               + bvec(BI_INZR, 3 * W2))                               # (N, 384)
        att = pair_attn(qkv, W2, PHZR_OFF)                            # (N, 128)
        att = mm(att, w128(OWZR_OFF, W2, W2)) + bvec(BI_OBZR, W2)
        x_res = jnp.concatenate([h, proj, h, proj], axis=-1)          # (N, 128)
        s1 = seg_ln(x_res + att, BI_N1WZR, BI_N1BZR, PMZR_OFF, W2)
        ff = jnp.maximum(mm(s1, w128(F1ZR_OFF, W2, 2 * D)) + bvec(BI_F1BZR, 2 * D), 0.0)
        ff = mm(ff, w128(F2ZR_OFF, 2 * D, W2)) + bvec(BI_F2BZR, W2)
        s2 = seg_ln(s1 + ff, BI_N2WZR, BI_N2BZR, PMZR_OFF, W2)
        return mm(s2, w128(FCZR_OFF, W2, 2 * D)) + bvec(BI_FCBZR, 2 * D)  # (N, 2D)

    # ---- u gate (width E = 64) --------------------------------------------------
    def u_gate(rh, proj):
        qkv = (mm(rh, w384(INU_H, D, 3 * E)) + mm(proj, w384(INU_P, D, 3 * E))
               + bvec(BI_INU, 3 * E))                                 # (N, 192)
        att = pair_attn(qkv, E, PHU_OFF)                              # (N, 64)
        att = mm(att, w128(OWU_OFF, E, E)) + bvec(BI_OBU, E)
        x_res = jnp.concatenate([rh, proj], axis=-1)                  # (N, 64)
        s1 = seg_ln(x_res + att, BI_N1WU, BI_N1BU, PMU_OFF, E)
        ff = jnp.maximum(mm(s1, w128(F1U_OFF, E, D)) + bvec(BI_F1BU, D), 0.0)
        ff = mm(ff, w128(F2U_OFF, D, E)) + bvec(BI_F2BU, E)
        s2 = seg_ln(s1 + ff, BI_N2WU, BI_N2BU, PMU_OFF, E)
        return mm(s2, w128(FCU_OFF, E, D)) + bvec(BI_FCBU, D)         # (N, D)

    # ---- ConvTranspose1d(len-1 input) == matmul, already in (t, b*I+i) row order
    proj_rows = jnp.dot(txt_ref[...], w128(WP_OFF, I * D, D),
                        preferred_element_type=jnp.float32)           # (NTURNS*N, D)

    h = h0_ref[...]                                                   # (N, D) f32
    for t in range(NTURNS):                                           # unrolled GRU-style recurrence
        proj = proj_rows[t * N:(t + 1) * N]                           # (N, D)
        zr = jax.nn.sigmoid(zr_gate(h, proj))                         # (N, 2D) = [z | r]
        z = zr[:, :D]
        r = zr[:, D:]
        rh = r * h
        hhat = jnp.tanh(u_gate(rh, proj))                             # (N, D)
        h = (1.0 - z) * h + z * hhat
        out_ref[t] = h                                                # plain row store


# ------------------------------ wrapper -----------------------------------------
def _full_spec(shape):
    n = len(shape)
    return pl.BlockSpec(shape, lambda i, n=n: (0,) * n)


def pack_params(P):
    """Pack all parameters into 3 lane-aligned slabs (bf16 weights, f32 biases)."""
    bf16 = jnp.bfloat16
    inw, inb = P['inw'], P['inb']
    ow, ob = P['ow'], P['ob']
    l1w, l1b = P['l1w'], P['l1b']
    l2w, l2b = P['l2w'], P['l2b']
    n1w, n1b = P['n1w'], P['n1b']
    n2w, n2b = P['n2w'], P['n2b']
    fw, fb = P['fw'], P['fb']

    def qkv_cat(a0, a1):     # columns -> [Qz | Qr | Kz | Kr | Vz | Vr]
        return jnp.concatenate([a0[:, :E], a1[:, :E],
                                a0[:, E:2 * E], a1[:, E:2 * E],
                                a0[:, 2 * E:], a1[:, 2 * E:]], axis=1)

    # ---- wide (384-lane) slab: split qkv projection weights --------------------
    w384 = jnp.concatenate([
        qkv_cat(inw[0], inw[1]),                                # rows   0.. 63 (zr)
        jnp.pad(inw[2], ((0, 0), (0, 384 - 3 * E))),            # rows  64..127 (u)
    ], axis=0).astype(bf16)

    # ---- 128-lane slab ----------------------------------------------------------
    def pad_l(w):
        return jnp.pad(w, ((0, 0), (0, 128 - w.shape[1])))

    wp_stacked = jnp.transpose(P['wp'].reshape(D, I, D), (1, 0, 2)).reshape(I * D, D)
    idx128 = jnp.arange(W2)
    ph_zr = (idx128[:, None] // DH == idx128[None, :] // DH).astype(jnp.float32)
    pm_zr = (idx128[:, None] // E == idx128[None, :] // E).astype(jnp.float32) / E
    idx64 = jnp.arange(E)
    ph_u = (idx64[:, None] // DH == idx64[None, :] // DH).astype(jnp.float32)
    pm_u = jnp.full((E, E), 1.0 / E, jnp.float32)

    blocks = [
        wp_stacked,                       # WP_OFF
        block_diag(ow[0], ow[1]),         # OWZR_OFF
        block_diag(l1w[0], l1w[1]),       # F1ZR_OFF
        block_diag(l2w[0], l2w[1]),       # F2ZR_OFF
        block_diag(fw[0], fw[1]),         # FCZR_OFF
        ow[2],                            # OWU_OFF
        l1w[2],                           # F1U_OFF
        l2w[2],                           # F2U_OFF
        fw[2],                            # FCU_OFF
        ph_zr,                            # PHZR_OFF
        pm_zr,                            # PMZR_OFF
        ph_u,                             # PHU_OFF
        pm_u,                             # PMU_OFF
    ]
    w128 = jnp.concatenate([pad_l(b) for b in blocks], axis=0).astype(bf16)
    assert w128.shape == (W128_ROWS, 128)

    # ---- bias / LN-vector slab (one f32 row per vector, 384 lanes) -------------
    def row(v):
        v = v.reshape(1, -1)
        return jnp.pad(v, ((0, 0), (0, 384 - v.shape[1])))

    rows = [
        row(qkv_cat(inb[0], inb[1])),                        # BI_INZR
        row(jnp.concatenate([ob[0], ob[1]], axis=1)),        # BI_OBZR
        row(jnp.concatenate([n1w[0], n1w[1]], axis=1)),      # BI_N1WZR
        row(jnp.concatenate([n1b[0], n1b[1]], axis=1)),      # BI_N1BZR
        row(jnp.concatenate([l1b[0], l1b[1]], axis=1)),      # BI_F1BZR
        row(jnp.concatenate([l2b[0], l2b[1]], axis=1)),      # BI_F2BZR
        row(jnp.concatenate([n2w[0], n2w[1]], axis=1)),      # BI_N2WZR
        row(jnp.concatenate([n2b[0], n2b[1]], axis=1)),      # BI_N2BZR
        row(jnp.concatenate([fb[0], fb[1]], axis=1)),        # BI_FCBZR
        row(inb[2]),                                         # BI_INU
        row(ob[2]),                                          # BI_OBU
        row(n1w[2]),                                         # BI_N1WU
        row(n1b[2]),                                         # BI_N1BU
        row(l1b[2]),                                         # BI_F1BU
        row(l2b[2]),                                         # BI_F2BU
        row(n2w[2]),                                         # BI_N2WU
        row(n2b[2]),                                         # BI_N2BU
        row(fb[2]),                                          # BI_FCBU
    ]
    bias = jnp.concatenate(rows + [jnp.zeros((BIAS_ROWS - 18, 384), jnp.float32)],
                           axis=0).astype(jnp.float32)
    return dict(w384=w384, w128=w128, bias=bias)


def soft_context_encoder(txt_feats, hiddens, packed):
    """txt_feats (B, NTURNS, D), hiddens (B, I, D) -> (output_feats, next_hiddens)."""
    # Lane-expanded projection input: row (t, b, i), col (j*D + c) = txt[b,t,c]*[i==j].
    # This makes the in-kernel projection land directly in (t, b*I+i) row order
    # (no in-kernel relayout).  Pure layout plumbing.
    txt_t = jnp.transpose(txt_feats, (1, 0, 2))                               # (T, B, D)
    eye = jnp.eye(I, dtype=txt_feats.dtype)
    txt_exp = (txt_t[:, :, None, None, :] * eye[None, None, :, :, None])      # (T,B,I,I,D)
    txt_exp = txt_exp.reshape(NTURNS * N, I * D).astype(jnp.bfloat16)
    h0 = hiddens.reshape(N, D).astype(jnp.float32)

    operands = [txt_exp, h0, packed['w384'], packed['w128'], packed['bias']]
    out = pl.pallas_call(
        soft_ctx_kernel,
        out_shape=jax.ShapeDtypeStruct((NTURNS, N, D), jnp.float32),
        grid_spec=pltpu.PrefetchScalarGridSpec(
            num_scalar_prefetch=0,
            grid=(1,),
            in_specs=[_full_spec(op.shape) for op in operands],
            out_specs=_full_spec((NTURNS, N, D)),
        ),
        compiler_params=pltpu.CompilerParams(
            dimension_semantics=("arbitrary",)),
    )(*operands)

    output_feats = jnp.transpose(out.reshape(NTURNS, B, I, D), (1, 0, 2, 3))
    next_hiddens = out[-1].reshape(B, I, D)
    return output_feats, next_hiddens


# ------------------------ deterministic parameter init --------------------------
def init_params(key):
    ks = iter(jax.random.split(key, 64))

    def rnd(shape, scale):
        return (scale * jax.random.normal(next(ks), shape)).astype(jnp.float32)

    # ConvTranspose1d weight (in=D, out=D, kernel=I) -> (D, I*D), [c, j*D + o]
    wp = rnd((D, D, I), 0.1)
    wp_mat = jnp.transpose(wp, (0, 2, 1)).reshape(D, I * D)

    def gate_params():
        return dict(
            inw=rnd((3 * E, E), 0.08), inb=rnd((3 * E,), 0.02),
            ow=rnd((E, E), 0.08),      ob=rnd((E,), 0.02),
            l1w=rnd((D, E), 0.08),     l1b=rnd((D,), 0.02),
            l2w=rnd((E, D), 0.08),     l2b=rnd((E,), 0.02),
            n1w=jnp.ones((E,), jnp.float32),  n1b=jnp.zeros((E,), jnp.float32),
            n2w=jnp.ones((E,), jnp.float32),  n2b=jnp.zeros((E,), jnp.float32),
            fw=rnd((D, E), 0.08),      fb=rnd((D,), 0.02),
        )

    g = [gate_params() for _ in range(3)]   # order: z_gate, r_gate, u_gate
    P = dict(
        wp=wp_mat,
        inw=jnp.stack([x['inw'].T for x in g]),        # (3, E, 3E)
        inb=jnp.stack([x['inb'][None] for x in g]),    # (3, 1, 3E)
        ow=jnp.stack([x['ow'].T for x in g]),          # (3, E, E)
        ob=jnp.stack([x['ob'][None] for x in g]),
        l1w=jnp.stack([x['l1w'].T for x in g]),        # (3, E, D)
        l1b=jnp.stack([x['l1b'][None] for x in g]),
        l2w=jnp.stack([x['l2w'].T for x in g]),        # (3, D, E)
        l2b=jnp.stack([x['l2b'][None] for x in g]),
        n1w=jnp.stack([x['n1w'][None] for x in g]),
        n1b=jnp.stack([x['n1b'][None] for x in g]),
        n2w=jnp.stack([x['n2w'][None] for x in g]),
        n2b=jnp.stack([x['n2b'][None] for x in g]),
        fw=jnp.stack([x['fw'].T for x in g]),          # (3, E, D)
        fb=jnp.stack([x['fb'][None] for x in g]),
    )
    return P


# ------------------------------ pure-JAX reference ------------------------------
def reference(txt_feats, hiddens, P):
    h = hiddens
    outs = []
    for t in range(txt_feats.shape[1]):
        x = txt_feats[:, t]
        proj = (x @ P['wp']).reshape(B, I, D)

        def gate(g, inp3):
            inp2 = inp3.reshape(B * I, E)
            qkv = inp2 @ P['inw'][g] + P['inb'][g]
            q = jnp.transpose(qkv[:, :E].reshape(B, I, E), (1, 0, 2))
            k = jnp.transpose(qkv[:, E:2 * E].reshape(B, I, E), (1, 0, 2))
            v = jnp.transpose(qkv[:, 2 * E:].reshape(B, I, E), (1, 0, 2))
            heads = []
            for hh in range(H):
                sl = slice(hh * DH, (hh + 1) * DH)
                s = jnp.einsum('ibd,icd->ibc', q[..., sl], k[..., sl]) / (DH ** 0.5)
                p = jax.nn.softmax(s, axis=-1)
                heads.append(jnp.einsum('ibc,icd->ibd', p, v[..., sl]))
            attn = jnp.transpose(jnp.concatenate(heads, -1), (1, 0, 2)).reshape(B * I, E)
            attn = attn @ P['ow'][g] + P['ob'][g]
            s1 = _layer_norm(inp2 + attn, P['n1w'][g], P['n1b'][g])
            ff = jax.nn.relu(s1 @ P['l1w'][g] + P['l1b'][g]) @ P['l2w'][g] + P['l2b'][g]
            s2 = _layer_norm(s1 + ff, P['n2w'][g], P['n2b'][g])
            return (s2 @ P['fw'][g] + P['fb'][g]).reshape(B, I, D)

        z = jax.nn.sigmoid(gate(0, jnp.concatenate([h, proj], -1)))
        r = jax.nn.sigmoid(gate(1, jnp.concatenate([h, proj], -1)))
        hhat = jnp.tanh(gate(2, jnp.concatenate([r * h, proj], -1)))
        h = (1 - z) * h + z * hhat
        outs.append(h)
    return jnp.stack(outs, 1), h


# ---------------------------------- main -----------------------------------------
if __name__ == "__main__":
    key = jax.random.PRNGKey(0)
    kp, kx, kh = jax.random.split(key, 3)
    P = init_params(kp)
    packed = pack_params(P)   # pack once, reuse across calls
    txt_feats = jax.random.normal(kx, (B, NTURNS, D), dtype=jnp.float32)
    hiddens = 0.1 * jax.random.normal(kh, (B, I, D), dtype=jnp.float32)

    out_feats, next_h = soft_context_encoder(txt_feats, hiddens, packed)
    out_feats = jax.block_until_ready(out_feats)
    next_h = jax.block_until_ready(next_h)

    ref_out, ref_h = reference(txt_feats, hiddens, P)
    max_err = float(jnp.max(jnp.abs(out_feats - ref_out)))
    assert out_feats.shape == (B, NTURNS, I, D) and next_h.shape == (B, I, D)
    # bf16 MXU inputs vs. pure-f32 reference over a 4-turn recurrence
    assert jnp.allclose(out_feats, ref_out, atol=3e-2, rtol=3e-2), max_err
    assert jnp.allclose(next_h, ref_h, atol=3e-2, rtol=3e-2), max_err

    print("KERNEL_OK")
</pallas_src>

<mosaic_0001>
module attributes {stable_mosaic.version = 11 : i64} {
  func.func @soft_ctx_kernel(%arg0: i32, %arg1: memref<64x256xbf16, #tpu.memory_space<vmem>>, %arg2: memref<16x32xf32, #tpu.memory_space<vmem>>, %arg3: memref<128x384xbf16, #tpu.memory_space<vmem>>, %arg4: memref<1312x128xbf16, #tpu.memory_space<vmem>>, %arg5: memref<24x384xf32, #tpu.memory_space<vmem>>, %arg6: memref<4x16x32xf32, #tpu.memory_space<vmem>>) attributes {dimension_semantics = [#tpu.dimension_semantics<arbitrary>], iteration_bounds = array<i64: 1>, scalar_prefetch = 0 : i64, scratch_operands = 0 : i64, tpu.core_type = #tpu.core_type<tc>, window_params = [{pipeline_mode = #tpu.pipeline_mode<synchronous>, transform_indices = @transform_0, window_bounds = array<i64: 64, 256>}, {pipeline_mode = #tpu.pipeline_mode<synchronous>, transform_indices = @transform_1, window_bounds = array<i64: 16, 32>}, {pipeline_mode = #tpu.pipeline_mode<synchronous>, transform_indices = @transform_2, window_bounds = array<i64: 128, 384>}, {pipeline_mode = #tpu.pipeline_mode<synchronous>, transform_indices = @transform_3, window_bounds = array<i64: 1312, 128>}, {pipeline_mode = #tpu.pipeline_mode<synchronous>, transform_indices = @transform_4, window_bounds = array<i64: 24, 384>}, {pipeline_mode = #tpu.pipeline_mode<synchronous>, transform_indices = @transform_5, window_bounds = array<i64: 4, 16, 32>}]} {
    %c0 = arith.constant 0 : index
    %c0_0 = arith.constant 0 : index
    %0 = vector.load %arg1[%c0, %c0_0] : memref<64x256xbf16, #tpu.memory_space<vmem>>, vector<64x256xbf16>
    %c0_1 = arith.constant 0 : index
    %c0_2 = arith.constant 0 : index
    %1 = vector.load %arg4[%c0_1, %c0_2] : memref<1312x128xbf16, #tpu.memory_space<vmem>>, vector<256x32xbf16>
    %cst = arith.constant dense<0.000000e+00> : vector<64x32xf32>
    %2 = tpu.matmul %0, %1, %cst {dimension_numbers = #tpu.dot_dimension_numbers<[1], [0], [0], [1], [0, 0, 1, 1], [], []>} : vector<64x256xbf16>, vector<256x32xbf16>, vector<64x32xf32> -> vector<64x32xf32>
    %c0_3 = arith.constant 0 : index
    %c0_4 = arith.constant 0 : index
    %3 = vector.load %arg2[%c0_3, %c0_4] : memref<16x32xf32, #tpu.memory_space<vmem>>, vector<16x32xf32>
    %4 = vector.extract_strided_slice %2 {offsets = [0, 0], sizes = [16, 32], strides = [1, 1]} : vector<64x32xf32> to vector<16x32xf32>
    %c0_5 = arith.constant 0 : index
    %c0_6 = arith.constant 0 : index
    %5 = vector.load %arg3[%c0_5, %c0_6] : memref<128x384xbf16, #tpu.memory_space<vmem>>, vector<32x384xbf16>
    %6 = arith.truncf %3 : vector<16x32xf32> to vector<16x32xbf16>
    %cst_7 = arith.constant dense<0.000000e+00> : vector<16x384xf32>
    %7 = tpu.matmul %6, %5, %cst_7 {dimension_numbers = #tpu.dot_dimension_numbers<[1], [0], [0], [1], [0, 0, 1, 1], [], []>} : vector<16x32xbf16>, vector<32x384xbf16>, vector<16x384xf32> -> vector<16x384xf32>
    %c32 = arith.constant 32 : index
    %c0_8 = arith.constant 0 : index
    %8 = vector.load %arg3[%c32, %c0_8] : memref<128x384xbf16, #tpu.memory_space<vmem>>, vector<32x384xbf16>
    %9 = arith.truncf %4 : vector<16x32xf32> to vector<16x32xbf16>
    %cst_9 = arith.constant dense<0.000000e+00> : vector<16x384xf32>
    %10 = tpu.matmul %9, %8, %cst_9 {dimension_numbers = #tpu.dot_dimension_numbers<[1], [0], [0], [1], [0, 0, 1, 1], [], []>} : vector<16x32xbf16>, vector<32x384xbf16>, vector<16x384xf32> -> vector<16x384xf32>
    %11 = arith.addf %7, %10 : vector<16x384xf32>
    %c0_10 = arith.constant 0 : index
    %c0_11 = arith.constant 0 : index
    %12 = vector.load %arg5[%c0_10, %c0_11] : memref<24x384xf32, #tpu.memory_space<vmem>>, vector<1x384xf32>
    %13 = vector.broadcast %12 : vector<1x384xf32> to vector<16x384xf32>
    %14 = arith.addf %11, %13 : vector<16x384xf32>
    %15 = vector.extract_strided_slice %14 {offsets = [0, 0], sizes = [16, 128], strides = [1, 1]} : vector<16x384xf32> to vector<16x128xf32>
    %16 = vector.extract_strided_slice %14 {offsets = [0, 128], sizes = [16, 128], strides = [1, 1]} : vector<16x384xf32> to vector<16x128xf32>
    %17 = vector.extract_strided_slice %14 {offsets = [0, 256], sizes = [16, 128], strides = [1, 1]} : vector<16x384xf32> to vector<16x128xf32>
    %18 = vector.extract_strided_slice %15 {offsets = [0, 0], sizes = [8, 128], strides = [1, 1]} : vector<16x128xf32> to vector<8x128xf32>
    %19 = vector.extract_strided_slice %15 {offsets = [8, 0], sizes = [8, 128], strides = [1, 1]} : vector<16x128xf32> to vector<8x128xf32>
    %20 = vector.extract_strided_slice %16 {offsets = [0, 0], sizes = [8, 128], strides = [1, 1]} : vector<16x128xf32> to vector<8x128xf32>
    %21 = vector.extract_strided_slice %16 {offsets = [8, 0], sizes = [8, 128], strides = [1, 1]} : vector<16x128xf32> to vector<8x128xf32>
    %22 = vector.extract_strided_slice %17 {offsets = [0, 0], sizes = [8, 128], strides = [1, 1]} : vector<16x128xf32> to vector<8x128xf32>
    %23 = vector.extract_strided_slice %17 {offsets = [8, 0], sizes = [8, 128], strides = [1, 1]} : vector<16x128xf32> to vector<8x128xf32>
    %24 = arith.subf %20, %21 : vector<8x128xf32>
    %25 = arith.subf %22, %23 : vector<8x128xf32>
    %c928 = arith.constant 928 : index
    %c0_12 = arith.constant 0 : index
    %26 = vector.load %arg4[%c928, %c0_12] : memref<1312x128xbf16, #tpu.memory_space<vmem>>, vector<128x128xbf16>
    %27 = arith.mulf %18, %24 : vector<8x128xf32>
    %28 = arith.truncf %27 : vector<8x128xf32> to vector<8x128xbf16>
    %cst_13 = arith.constant dense<0.000000e+00> : vector<8x128xf32>
    %29 = tpu.matmul %28, %26, %cst_13 {dimension_numbers = #tpu.dot_dimension_numbers<[1], [0], [0], [1], [0, 0, 1, 1], [], []>} : vector<8x128xbf16>, vector<128x128xbf16>, vector<8x128xf32> -> vector<8x128xf32>
    %cst_14 = arith.constant 2.500000e-01 : f32
    %30 = vector.broadcast %cst_14 : f32 to vector<8x128xf32>
    %31 = arith.mulf %29, %30 : vector<8x128xf32>
    %32 = arith.negf %31 : vector<8x128xf32>
    %33 = math.exp %32 : vector<8x128xf32>
    %cst_15 = arith.constant 1.000000e+00 : f32
    %34 = vector.broadcast %cst_15 : f32 to vector<8x128xf32>
    %35 = arith.addf %34, %33 : vector<8x128xf32>
    %36 = arith.divf %34, %35 : vector<8x128xf32>
    %37 = arith.mulf %19, %24 : vector<8x128xf32>
    %38 = arith.truncf %37 : vector<8x128xf32> to vector<8x128xbf16>
    %cst_16 = arith.constant dense<0.000000e+00> : vector<8x128xf32>
    %39 = tpu.matmul %38, %26, %cst_16 {dimension_numbers = #tpu.dot_dimension_numbers<[1], [0], [0], [1], [0, 0, 1, 1], [], []>} : vector<8x128xbf16>, vector<128x128xbf16>, vector<8x128xf32> -> vector<8x128xf32>
    %cst_17 = arith.constant -2.500000e-01 : f32
    %40 = vector.broadcast %cst_17 : f32 to vector<8x128xf32>
    %41 = arith.mulf %39, %40 : vector<8x128xf32>
    %42 = arith.negf %41 : vector<8x128xf32>
    %43 = math.exp %42 : vector<8x128xf32>
    %cst_18 = arith.constant 1.000000e+00 : f32
    %44 = vector.broadcast %cst_18 : f32 to vector<8x128xf32>
    %45 = arith.addf %44, %43 : vector<8x128xf32>
    %46 = arith.divf %44, %45 : vector<8x128xf32>
    %47 = arith.mulf %36, %25 : vector<8x128xf32>
    %48 = arith.addf %23, %47 : vector<8x128xf32>
    %49 = arith.mulf %46, %25 : vector<8x128xf32>
    %50 = arith.subf %22, %49 : vector<8x128xf32>
    %51 = tpu.concatenate %48, %50 in 0 : vector<8x128xf32>, vector<8x128xf32> -> vector<16x128xf32>
    %c256 = arith.constant 256 : index
    %c0_19 = arith.constant 0 : index
    %52 = vector.load %arg4[%c256, %c0_19] : memref<1312x128xbf16, #tpu.memory_space<vmem>>, vector<128x128xbf16>
    %53 = arith.truncf %51 : vector<16x128xf32> to vector<16x128xbf16>
    %cst_20 = arith.constant dense<0.000000e+00> : vector<16x128xf32>
    %54 = tpu.matmul %53, %52, %cst_20 {dimension_numbers = #tpu.dot_dimension_numbers<[1], [0], [0], [1], [0, 0, 1, 1], [], []>} : vector<16x128xbf16>, vector<128x128xbf16>, vector<16x128xf32> -> vector<16x128xf32>
    %c1 = arith.constant 1 : index
    %c0_21 = arith.constant 0 : index
    %55 = vector.load %arg5[%c1, %c0_21] : memref<24x384xf32, #tpu.memory_space<vmem>>, vector<1x384xf32>
    %56 = vector.extract_strided_slice %55 {offsets = [0, 0], sizes = [1, 128], strides = [1, 1]} : vector<1x384xf32> to vector<1x128xf32>
    %57 = vector.broadcast %56 : vector<1x128xf32> to vector<16x128xf32>
    %58 = arith.addf %54, %57 : vector<16x128xf32>
    %59 = tpu.concatenate %3, %4, %3, %4 in 1 : vector<16x32xf32>, vector<16x32xf32>, vector<16x32xf32>, vector<16x32xf32> -> vector<16x128xf32>
    %60 = arith.addf %59, %58 : vector<16x128xf32>
    %c1056 = arith.constant 1056 : index
    %c0_22 = arith.constant 0 : index
    %61 = vector.load %arg4[%c1056, %c0_22] : memref<1312x128xbf16, #tpu.memory_space<vmem>>, vector<128x128xbf16>
    %62 = arith.truncf %60 : vector<16x128xf32> to vector<16x128xbf16>
    %cst_23 = arith.constant dense<0.000000e+00> : vector<16x128xf32>
    %63 = tpu.matmul %62, %61, %cst_23 {dimension_numbers = #tpu.dot_dimension_numbers<[1], [0], [0], [1], [0, 0, 1, 1], [], []>} : vector<16x128xbf16>, vector<128x128xbf16>, vector<16x128xf32> -> vector<16x128xf32>
    %64 = arith.subf %60, %63 : vector<16x128xf32>
    %65 = arith.mulf %64, %64 : vector<16x128xf32>
    %66 = arith.truncf %65 : vector<16x128xf32> to vector<16x128xbf16>
    %cst_24 = arith.constant dense<0.000000e+00> : vector<16x128xf32>
    %67 = tpu.matmul %66, %61, %cst_24 {dimension_numbers = #tpu.dot_dimension_numbers<[1], [0], [0], [1], [0, 0, 1, 1], [], []>} : vector<16x128xbf16>, vector<128x128xbf16>, vector<16x128xf32> -> vector<16x128xf32>
    %cst_25 = arith.constant 9.99999974E-6 : f32
    %68 = vector.broadcast %cst_25 : f32 to vector<16x128xf32>
    %69 = arith.addf %67, %68 : vector<16x128xf32>
    %70 = math.rsqrt %69 : vector<16x128xf32>
    %71 = arith.mulf %64, %70 : vector<16x128xf32>
    %c2 = arith.constant 2 : index
    %c0_26 = arith.constant 0 : index
    %72 = vector.load %arg5[%c2, %c0_26] : memref<24x384xf32, #tpu.memory_space<vmem>>, vector<1x384xf32>
    %73 = vector.extract_strided_slice %72 {offsets = [0, 0], sizes = [1, 128], strides = [1, 1]} : vector<1x384xf32> to vector<1x128xf32>
    %74 = vector.broadcast %73 : vector<1x128xf32> to vector<16x128xf32>
    %75 = arith.mulf %71, %74 : vector<16x128xf32>
    %c3 = arith.constant 3 : index
    %c0_27 = arith.constant 0 : index
    %76 = vector.load %arg5[%c3, %c0_27] : memref<24x384xf32, #tpu.memory_space<vmem>>, vector<1x384xf32>
    %77 = vector.extract_strided_slice %76 {offsets = [0, 0], sizes = [1, 128], strides = [1, 1]} : vector<1x384xf32> to vector<1x128xf32>
    %78 = vector.broadcast %77 : vector<1x128xf32> to vector<16x128xf32>
    %79 = arith.addf %75, %78 : vector<16x128xf32>
    %c384 = arith.constant 384 : index
    %c0_28 = arith.constant 0 : index
    %80 = vector.load %arg4[%c384, %c0_28] : memref<1312x128xbf16, #tpu.memory_space<vmem>>, vector<128x64xbf16>
    %81 = arith.truncf %79 : vector<16x128xf32> to vector<16x128xbf16>
    %cst_29 = arith.constant dense<0.000000e+00> : vector<16x64xf32>
    %82 = tpu.matmul %81, %80, %cst_29 {dimension_numbers = #tpu.dot_dimension_numbers<[1], [0], [0], [1], [0, 0, 1, 1], [], []>} : vector<16x128xbf16>, vector<128x64xbf16>, vector<16x64xf32> -> vector<16x64xf32>
    %c4 = arith.constant 4 : index
    %c0_30 = arith.constant 0 : index
    %83 = vector.load %arg5[%c4, %c0_30] : memref<24x384xf32, #tpu.memory_space<vmem>>, vector<1x384xf32>
    %84 = vector.extract_strided_slice %83 {offsets = [0, 0], sizes = [1, 64], strides = [1, 1]} : vector<1x384xf32> to vector<1x64xf32>
    %85 = vector.broadcast %84 : vector<1x64xf32> to vector<16x64xf32>
    %86 = arith.addf %82, %85 : vector<16x64xf32>
    %cst_31 = arith.constant 0.000000e+00 : f32
    %87 = vector.broadcast %cst_31 : f32 to vector<16x64xf32>
    %88 = arith.maximumf %86, %87 : vector<16x64xf32>
    %c512 = arith.constant 512 : index
    %c0_32 = arith.constant 0 : index
    %89 = vector.load %arg4[%c512, %c0_32] : memref<1312x128xbf16, #tpu.memory_space<vmem>>, vector<64x128xbf16>
    %90 = arith.truncf %88 : vector<16x64xf32> to vector<16x64xbf16>
    %cst_33 = arith.constant dense<0.000000e+00> : vector<16x128xf32>
    %91 = tpu.matmul %90, %89, %cst_33 {dimension_numbers = #tpu.dot_dimension_numbers<[1], [0], [0], [1], [0, 0, 1, 1], [], []>} : vector<16x64xbf16>, vector<64x128xbf16>, vector<16x128xf32> -> vector<16x128xf32>
    %c5 = arith.constant 5 : index
    %c0_34 = arith.constant 0 : index
    %92 = vector.load %arg5[%c5, %c0_34] : memref<24x384xf32, #tpu.memory_space<vmem>>, vector<1x384xf32>
    %93 = vector.extract_strided_slice %92 {offsets = [0, 0], sizes = [1, 128], strides = [1, 1]} : vector<1x384xf32> to vector<1x128xf32>
    %94 = vector.broadcast %93 : vector<1x128xf32> to vector<16x128xf32>
    %95 = arith.addf %91, %94 : vector<16x128xf32>
    %96 = arith.addf %79, %95 : vector<16x128xf32>
    %c1056_35 = arith.constant 1056 : index
    %c0_36 = arith.constant 0 : index
    %97 = vector.load %arg4[%c1056_35, %c0_36] : memref<1312x128xbf16, #tpu.memory_space<vmem>>, vector<128x128xbf16>
    %98 = arith.truncf %96 : vector<16x128xf32> to vector<16x128xbf16>
    %cst_37 = arith.constant dense<0.000000e+00> : vector<16x128xf32>
    %99 = tpu.matmul %98, %97, %cst_37 {dimension_numbers = #tpu.dot_dimension_numbers<[1], [0], [0], [1], [0, 0, 1, 1], [], []>} : vector<16x128xbf16>, vector<128x128xbf16>, vector<16x128xf32> -> vector<16x128xf32>
    %100 = arith.subf %96, %99 : vector<16x128xf32>
    %101 = arith.mulf %100, %100 : vector<16x128xf32>
    %102 = arith.truncf %101 : vector<16x128xf32> to vector<16x128xbf16>
    %cst_38 = arith.constant dense<0.000000e+00> : vector<16x128xf32>
    %103 = tpu.matmul %102, %97, %cst_38 {dimension_numbers = #tpu.dot_dimension_numbers<[1], [0], [0], [1], [0, 0, 1, 1], [], []>} : vector<16x128xbf16>, vector<128x128xbf16>, vector<16x128xf32> -> vector<16x128xf32>
    %cst_39 = arith.constant 9.99999974E-6 : f32
    %104 = vector.broadcast %cst_39 : f32 to vector<16x128xf32>
    %105 = arith.addf %103, %104 : vector<16x128xf32>
    %106 = math.rsqrt %105 : vector<16x128xf32>
    %107 = arith.mulf %100, %106 : vector<16x128xf32>
    %c6 = arith.constant 6 : index
    %c0_40 = arith.constant 0 : index
    %108 = vector.load %arg5[%c6, %c0_40] : memref<24x384xf32, #tpu.memory_space<vmem>>, vector<1x384xf32>
    %109 = vector.extract_strided_slice %108 {offsets = [0, 0], sizes = [1, 128], strides = [1, 1]} : vector<1x384xf32> to vector<1x128xf32>
    %110 = vector.broadcast %109 : vector<1x128xf32> to vector<16x128xf32>
    %111 = arith.mulf %107, %110 : vector<16x128xf32>
    %c7 = arith.constant 7 : index
    %c0_41 = arith.constant 0 : index
    %112 = vector.load %arg5[%c7, %c0_41] : memref<24x384xf32, #tpu.memory_space<vmem>>, vector<1x384xf32>
    %113 = vector.extract_strided_slice %112 {offsets = [0, 0], sizes = [1, 128], strides = [1, 1]} : vector<1x384xf32> to vector<1x128xf32>
    %114 = vector.broadcast %113 : vector<1x128xf32> to vector<16x128xf32>
    %115 = arith.addf %111, %114 : vector<16x128xf32>
    %c576 = arith.constant 576 : index
    %c0_42 = arith.constant 0 : index
    %116 = vector.load %arg4[%c576, %c0_42] : memref<1312x128xbf16, #tpu.memory_space<vmem>>, vector<128x64xbf16>
    %117 = arith.truncf %115 : vector<16x128xf32> to vector<16x128xbf16>
    %cst_43 = arith.constant dense<0.000000e+00> : vector<16x64xf32>
    %118 = tpu.matmul %117, %116, %cst_43 {dimension_numbers = #tpu.dot_dimension_numbers<[1], [0], [0], [1], [0, 0, 1, 1], [], []>} : vector<16x128xbf16>, vector<128x64xbf16>, vector<16x64xf32> -> vector<16x64xf32>
    %c8 = arith.constant 8 : index
    %c0_44 = arith.constant 0 : index
    %119 = vector.load %arg5[%c8, %c0_44] : memref<24x384xf32, #tpu.memory_space<vmem>>, vector<1x384xf32>
    %120 = vector.extract_strided_slice %119 {offsets = [0, 0], sizes = [1, 64], strides = [1, 1]} : vector<1x384xf32> to vector<1x64xf32>
    %121 = vector.broadcast %120 : vector<1x64xf32> to vector<16x64xf32>
    %122 = arith.addf %118, %121 : vector<16x64xf32>
    %123 = arith.negf %122 : vector<16x64xf32>
    %124 = math.exp %123 : vector<16x64xf32>
    %cst_45 = arith.constant 1.000000e+00 : f32
    %125 = vector.broadcast %cst_45 : f32 to vector<16x64xf32>
    %126 = arith.addf %125, %124 : vector<16x64xf32>
    %127 = arith.divf %125, %126 : vector<16x64xf32>
    %128 = vector.extract_strided_slice %127 {offsets = [0, 0], sizes = [16, 32], strides = [1, 1]} : vector<16x64xf32> to vector<16x32xf32>
    %129 = vector.extract_strided_slice %127 {offsets = [0, 32], sizes = [16, 32], strides = [1, 1]} : vector<16x64xf32> to vector<16x32xf32>
    %130 = arith.mulf %129, %3 : vector<16x32xf32>
    %c64 = arith.constant 64 : index
    %c0_46 = arith.constant 0 : index
    %131 = vector.load %arg3[%c64, %c0_46] : memref<128x384xbf16, #tpu.memory_space<vmem>>, vector<32x192xbf16>
    %132 = arith.truncf %130 : vector<16x32xf32> to vector<16x32xbf16>
    %cst_47 = arith.constant dense<0.000000e+00> : vector<16x192xf32>
    %133 = tpu.matmul %132, %131, %cst_47 {dimension_numbers = #tpu.dot_dimension_numbers<[1], [0], [0], [1], [0, 0, 1, 1], [], []>} : vector<16x32xbf16>, vector<32x192xbf16>, vector<16x192xf32> -> vector<16x192xf32>
    %c96 = arith.constant 96 : index
    %c0_48 = arith.constant 0 : index
    %134 = vector.load %arg3[%c96, %c0_48] : memref<128x384xbf16, #tpu.memory_space<vmem>>, vector<32x192xbf16>
    %135 = arith.truncf %4 : vector<16x32xf32> to vector<16x32xbf16>
    %cst_49 = arith.constant dense<0.000000e+00> : vector<16x192xf32>
    %136 = tpu.matmul %135, %134, %cst_49 {dimension_numbers = #tpu.dot_dimension_numbers<[1], [0], [0], [1], [0, 0, 1, 1], [], []>} : vector<16x32xbf16>, vector<32x192xbf16>, vector<16x192xf32> -> vector<16x192xf32>
    %137 = arith.addf %133, %136 : vector<16x192xf32>
    %c9 = arith.constant 9 : index
    %c0_50 = arith.constant 0 : index
    %138 = vector.load %arg5[%c9, %c0_50] : memref<24x384xf32, #tpu.memory_space<vmem>>, vector<1x384xf32>
    %139 = vector.extract_strided_slice %138 {offsets = [0, 0], sizes = [1, 192], strides = [1, 1]} : vector<1x384xf32> to vector<1x192xf32>
    %140 = vector.broadcast %139 : vector<1x192xf32> to vector<16x192xf32>
    %141 = arith.addf %137, %140 : vector<16x192xf32>
    %142 = vector.extract_strided_slice %141 {offsets = [0, 0], sizes = [16, 64], strides = [1, 1]} : vector<16x192xf32> to vector<16x64xf32>
    %143 = vector.extract_strided_slice %141 {offsets = [0, 64], sizes = [16, 64], strides = [1, 1]} : vector<16x192xf32> to vector<16x64xf32>
    %144 = vector.extract_strided_slice %141 {offsets = [0, 128], sizes = [16, 64], strides = [1, 1]} : vector<16x192xf32> to vector<16x64xf32>
    %145 = vector.extract_strided_slice %142 {offsets = [0, 0], sizes = [8, 64], strides = [1, 1]} : vector<16x64xf32> to vector<8x64xf32>
    %146 = vector.extract_strided_slice %142 {offsets = [8, 0], sizes = [8, 64], strides = [1, 1]} : vector<16x64xf32> to vector<8x64xf32>
    %147 = vector.extract_strided_slice %143 {offsets = [0, 0], sizes = [8, 64], strides = [1, 1]} : vector<16x64xf32> to vector<8x64xf32>
    %148 = vector.extract_strided_slice %143 {offsets = [8, 0], sizes = [8, 64], strides = [1, 1]} : vector<16x64xf32> to vector<8x64xf32>
    %149 = vector.extract_strided_slice %144 {offsets = [0, 0], sizes = [8, 64], strides = [1, 1]} : vector<16x64xf32> to vector<8x64xf32>
    %150 = vector.extract_strided_slice %144 {offsets = [8, 0], sizes = [8, 64], strides = [1, 1]} : vector<16x64xf32> to vector<8x64xf32>
    %151 = arith.subf %147, %148 : vector<8x64xf32>
    %152 = arith.subf %149, %150 : vector<8x64xf32>
    %c1184 = arith.constant 1184 : index
    %c0_51 = arith.constant 0 : index
    %153 = vector.load %arg4[%c1184, %c0_51] : memref<1312x128xbf16, #tpu.memory_space<vmem>>, vector<64x64xbf16>
    %154 = arith.mulf %145, %151 : vector<8x64xf32>
    %155 = arith.truncf %154 : vector<8x64xf32> to vector<8x64xbf16>
    %cst_52 = arith.constant dense<0.000000e+00> : vector<8x64xf32>
    %156 = tpu.matmul %155, %153, %cst_52 {dimension_numbers = #tpu.dot_dimension_numbers<[1], [0], [0], [1], [0, 0, 1, 1], [], []>} : vector<8x64xbf16>, vector<64x64xbf16>, vector<8x64xf32> -> vector<8x64xf32>
    %cst_53 = arith.constant 2.500000e-01 : f32
    %157 = vector.broadcast %cst_53 : f32 to vector<8x64xf32>
    %158 = arith.mulf %156, %157 : vector<8x64xf32>
    %159 = arith.negf %158 : vector<8x64xf32>
    %160 = math.exp %159 : vector<8x64xf32>
    %cst_54 = arith.constant 1.000000e+00 : f32
    %161 = vector.broadcast %cst_54 : f32 to vector<8x64xf32>
    %162 = arith.addf %161, %160 : vector<8x64xf32>
    %163 = arith.divf %161, %162 : vector<8x64xf32>
    %164 = arith.mulf %146, %151 : vector<8x64xf32>
    %165 = arith.truncf %164 : vector<8x64xf32> to vector<8x64xbf16>
    %cst_55 = arith.constant dense<0.000000e+00> : vector<8x64xf32>
    %166 = tpu.matmul %165, %153, %cst_55 {dimension_numbers = #tpu.dot_dimension_numbers<[1], [0], [0], [1], [0, 0, 1, 1], [], []>} : vector<8x64xbf16>, vector<64x64xbf16>, vector<8x64xf32> -> vector<8x64xf32>
    %cst_56 = arith.constant -2.500000e-01 : f32
    %167 = vector.broadcast %cst_56 : f32 to vector<8x64xf32>
    %168 = arith.mulf %166, %167 : vector<8x64xf32>
    %169 = arith.negf %168 : vector<8x64xf32>
    %170 = math.exp %169 : vector<8x64xf32>
    %cst_57 = arith.constant 1.000000e+00 : f32
    %171 = vector.broadcast %cst_57 : f32 to vector<8x64xf32>
    %172 = arith.addf %171, %170 : vector<8x64xf32>
    %173 = arith.divf %171, %172 : vector<8x64xf32>
    %174 = arith.mulf %163, %152 : vector<8x64xf32>
    %175 = arith.addf %150, %174 : vector<8x64xf32>
    %176 = arith.mulf %173, %152 : vector<8x64xf32>
    %177 = arith.subf %149, %176 : vector<8x64xf32>
    %178 = tpu.concatenate %175, %177 in 0 : vector<8x64xf32>, vector<8x64xf32> -> vector<16x64xf32>
    %c704 = arith.constant 704 : index
    %c0_58 = arith.constant 0 : index
    %179 = vector.load %arg4[%c704, %c0_58] : memref<1312x128xbf16, #tpu.memory_space<vmem>>, vector<64x64xbf16>
    %180 = arith.truncf %178 : vector<16x64xf32> to vector<16x64xbf16>
    %cst_59 = arith.constant dense<0.000000e+00> : vector<16x64xf32>
    %181 = tpu.matmul %180, %179, %cst_59 {dimension_numbers = #tpu.dot_dimension_numbers<[1], [0], [0], [1], [0, 0, 1, 1], [], []>} : vector<16x64xbf16>, vector<64x64xbf16>, vector<16x64xf32> -> vector<16x64xf32>
    %c10 = arith.constant 10 : index
    %c0_60 = arith.constant 0 : index
    %182 = vector.load %arg5[%c10, %c0_60] : memref<24x384xf32, #tpu.memory_space<vmem>>, vector<1x384xf32>
    %183 = vector.extract_strided_slice %182 {offsets = [0, 0], sizes = [1, 64], strides = [1, 1]} : vector<1x384xf32> to vector<1x64xf32>
    %184 = vector.broadcast %183 : vector<1x64xf32> to vector<16x64xf32>
    %185 = arith.addf %181, %184 : vector<16x64xf32>
    %186 = tpu.concatenate %130, %4 in 1 : vector<16x32xf32>, vector<16x32xf32> -> vector<16x64xf32>
    %187 = arith.addf %186, %185 : vector<16x64xf32>
    %c1248 = arith.constant 1248 : index
    %c0_61 = arith.constant 0 : index
    %188 = vector.load %arg4[%c1248, %c0_61] : memref<1312x128xbf16, #tpu.memory_space<vmem>>, vector<64x64xbf16>
    %189 = arith.truncf %187 : vector<16x64xf32> to vector<16x64xbf16>
    %cst_62 = arith.constant dense<0.000000e+00> : vector<16x64xf32>
    %190 = tpu.matmul %189, %188, %cst_62 {dimension_numbers = #tpu.dot_dimension_numbers<[1], [0], [0], [1], [0, 0, 1, 1], [], []>} : vector<16x64xbf16>, vector<64x64xbf16>, vector<16x64xf32> -> vector<16x64xf32>
    %191 = arith.subf %187, %190 : vector<16x64xf32>
    %192 = arith.mulf %191, %191 : vector<16x64xf32>
    %193 = arith.truncf %192 : vector<16x64xf32> to vector<16x64xbf16>
    %cst_63 = arith.constant dense<0.000000e+00> : vector<16x64xf32>
    %194 = tpu.matmul %193, %188, %cst_63 {dimension_numbers = #tpu.dot_dimension_numbers<[1], [0], [0], [1], [0, 0, 1, 1], [], []>} : vector<16x64xbf16>, vector<64x64xbf16>, vector<16x64xf32> -> vector<16x64xf32>
    %cst_64 = arith.constant 9.99999974E-6 : f32
    %195 = vector.broadcast %cst_64 : f32 to vector<16x64xf32>
    %196 = arith.addf %194, %195 : vector<16x64xf32>
    %197 = math.rsqrt %196 : vector<16x64xf32>
    %198 = arith.mulf %191, %197 : vector<16x64xf32>
    %c11 = arith.constant 11 : index
    %c0_65 = arith.constant 0 : index
    %199 = vector.load %arg5[%c11, %c0_65] : memref<24x384xf32, #tpu.memory_space<vmem>>, vector<1x384xf32>
    %200 = vector.extract_strided_slice %199 {offsets = [0, 0], sizes = [1, 64], strides = [1, 1]} : vector<1x384xf32> to vector<1x64xf32>
    %201 = vector.broadcast %200 : vector<1x64xf32> to vector<16x64xf32>
    %202 = arith.mulf %198, %201 : vector<16x64xf32>
    %c12 = arith.constant 12 : index
    %c0_66 = arith.constant 0 : index
    %203 = vector.load %arg5[%c12, %c0_66] : memref<24x384xf32, #tpu.memory_space<vmem>>, vector<1x384xf32>
    %204 = vector.extract_strided_slice %203 {offsets = [0, 0], sizes = [1, 64], strides = [1, 1]} : vector<1x384xf32> to vector<1x64xf32>
    %205 = vector.broadcast %204 : vector<1x64xf32> to vector<16x64xf32>
    %206 = arith.addf %202, %205 : vector<16x64xf32>
    %c768 = arith.constant 768 : index
    %c0_67 = arith.constant 0 : index
    %207 = vector.load %arg4[%c768, %c0_67] : memref<1312x128xbf16, #tpu.memory_space<vmem>>, vector<64x32xbf16>
    %208 = arith.truncf %206 : vector<16x64xf32> to vector<16x64xbf16>
    %cst_68 = arith.constant dense<0.000000e+00> : vector<16x32xf32>
    %209 = tpu.matmul %208, %207, %cst_68 {dimension_numbers = #tpu.dot_dimension_numbers<[1], [0], [0], [1], [0, 0, 1, 1], [], []>} : vector<16x64xbf16>, vector<64x32xbf16>, vector<16x32xf32> -> vector<16x32xf32>
    %c13 = arith.constant 13 : index
    %c0_69 = arith.constant 0 : index
    %210 = vector.load %arg5[%c13, %c0_69] : memref<24x384xf32, #tpu.memory_space<vmem>>, vector<1x384xf32>
    %211 = vector.extract_strided_slice %210 {offsets = [0, 0], sizes = [1, 32], strides = [1, 1]} : vector<1x384xf32> to vector<1x32xf32>
    %212 = vector.broadcast %211 : vector<1x32xf32> to vector<16x32xf32>
    %213 = arith.addf %209, %212 : vector<16x32xf32>
    %cst_70 = arith.constant 0.000000e+00 : f32
    %214 = vector.broadcast %cst_70 : f32 to vector<16x32xf32>
    %215 = arith.maximumf %213, %214 : vector<16x32xf32>
    %c832 = arith.constant 832 : index
    %c0_71 = arith.constant 0 : index
    %216 = vector.load %arg4[%c832, %c0_71] : memref<1312x128xbf16, #tpu.memory_space<vmem>>, vector<32x64xbf16>
    %217 = arith.truncf %215 : vector<16x32xf32> to vector<16x32xbf16>
    %cst_72 = arith.constant dense<0.000000e+00> : vector<16x64xf32>
    %218 = tpu.matmul %217, %216, %cst_72 {dimension_numbers = #tpu.dot_dimension_numbers<[1], [0], [0], [1], [0, 0, 1, 1], [], []>} : vector<16x32xbf16>, vector<32x64xbf16>, vector<16x64xf32> -> vector<16x64xf32>
    %c14 = arith.constant 14 : index
    %c0_73 = arith.constant 0 : index
    %219 = vector.load %arg5[%c14, %c0_73] : memref<24x384xf32, #tpu.memory_space<vmem>>, vector<1x384xf32>
    %220 = vector.extract_strided_slice %219 {offsets = [0, 0], sizes = [1, 64], strides = [1, 1]} : vector<1x384xf32> to vector<1x64xf32>
    %221 = vector.broadcast %220 : vector<1x64xf32> to vector<16x64xf32>
    %222 = arith.addf %218, %221 : vector<16x64xf32>
    %223 = arith.addf %206, %222 : vector<16x64xf32>
    %c1248_74 = arith.constant 1248 : index
    %c0_75 = arith.constant 0 : index
    %224 = vector.load %arg4[%c1248_74, %c0_75] : memref<1312x128xbf16, #tpu.memory_space<vmem>>, vector<64x64xbf16>
    %225 = arith.truncf %223 : vector<16x64xf32> to vector<16x64xbf16>
    %cst_76 = arith.constant dense<0.000000e+00> : vector<16x64xf32>
    %226 = tpu.matmul %225, %224, %cst_76 {dimension_numbers = #tpu.dot_dimension_numbers<[1], [0], [0], [1], [0, 0, 1, 1], [], []>} : vector<16x64xbf16>, vector<64x64xbf16>, vector<16x64xf32> -> vector<16x64xf32>
    %227 = arith.subf %223, %226 : vector<16x64xf32>
    %228 = arith.mulf %227, %227 : vector<16x64xf32>
    %229 = arith.truncf %228 : vector<16x64xf32> to vector<16x64xbf16>
    %cst_77 = arith.constant dense<0.000000e+00> : vector<16x64xf32>
    %230 = tpu.matmul %229, %224, %cst_77 {dimension_numbers = #tpu.dot_dimension_numbers<[1], [0], [0], [1], [0, 0, 1, 1], [], []>} : vector<16x64xbf16>, vector<64x64xbf16>, vector<16x64xf32> -> vector<16x64xf32>
    %cst_78 = arith.constant 9.99999974E-6 : f32
    %231 = vector.broadcast %cst_78 : f32 to vector<16x64xf32>
    %232 = arith.addf %230, %231 : vector<16x64xf32>
    %233 = math.rsqrt %232 : vector<16x64xf32>
    %234 = arith.mulf %227, %233 : vector<16x64xf32>
    %c15 = arith.constant 15 : index
    %c0_79 = arith.constant 0 : index
    %235 = vector.load %arg5[%c15, %c0_79] : memref<24x384xf32, #tpu.memory_space<vmem>>, vector<1x384xf32>
    %236 = vector.extract_strided_slice %235 {offsets = [0, 0], sizes = [1, 64], strides = [1, 1]} : vector<1x384xf32> to vector<1x64xf32>
    %237 = vector.broadcast %236 : vector<1x64xf32> to vector<16x64xf32>
    %238 = arith.mulf %234, %237 : vector<16x64xf32>
    %c16 = arith.constant 16 : index
    %c0_80 = arith.constant 0 : index
    %239 = vector.load %arg5[%c16, %c0_80] : memref<24x384xf32, #tpu.memory_space<vmem>>, vector<1x384xf32>
    %240 = vector.extract_strided_slice %239 {offsets = [0, 0], sizes = [1, 64], strides = [1, 1]} : vector<1x384xf32> to vector<1x64xf32>
    %241 = vector.broadcast %240 : vector<1x64xf32> to vector<16x64xf32>
    %242 = arith.addf %238, %241 : vector<16x64xf32>
    %c864 = arith.constant 864 : index
    %c0_81 = arith.constant 0 : index
    %243 = vector.load %arg4[%c864, %c0_81] : memref<1312x128xbf16, #tpu.memory_space<vmem>>, vector<64x32xbf16>
    %244 = arith.truncf %242 : vector<16x64xf32> to vector<16x64xbf16>
    %cst_82 = arith.constant dense<0.000000e+00> : vector<16x32xf32>
    %245 = tpu.matmul %244, %243, %cst_82 {dimension_numbers = #tpu.dot_dimension_numbers<[1], [0], [0], [1], [0, 0, 1, 1], [], []>} : vector<16x64xbf16>, vector<64x32xbf16>, vector<16x32xf32> -> vector<16x32xf32>
    %c17 = arith.constant 17 : index
    %c0_83 = arith.constant 0 : index
    %246 = vector.load %arg5[%c17, %c0_83] : memref<24x384xf32, #tpu.memory_space<vmem>>, vector<1x384xf32>
    %247 = vector.extract_strided_slice %246 {offsets = [0, 0], sizes = [1, 32], strides = [1, 1]} : vector<1x384xf32> to vector<1x32xf32>
    %248 = vector.broadcast %247 : vector<1x32xf32> to vector<16x32xf32>
    %249 = arith.addf %245, %248 : vector<16x32xf32>
    %250 = math.tanh %249 : vector<16x32xf32>
    %cst_84 = arith.constant 1.000000e+00 : f32
    %251 = vector.broadcast %cst_84 : f32 to vector<16x32xf32>
    %252 = arith.subf %251, %128 : vector<16x32xf32>
    %253 = arith.mulf %252, %3 : vector<16x32xf32>
    %254 = arith.mulf %128, %250 : vector<16x32xf32>
    %255 = arith.addf %253, %254 : vector<16x32xf32>
    %c0_85 = arith.constant 0 : index
    %c0_86 = arith.constant 0 : index
    %c0_87 = arith.constant 0 : index
    %256 = vector.load %arg6[%c0_85, %c0_86, %c0_87] : memref<4x16x32xf32, #tpu.memory_space<vmem>>, vector<1x16x32xf32>
    %257 = vector.shape_cast %256 : vector<1x16x32xf32> to vector<16x32xf32>
    %258 = vector.shape_cast %255 : vector<16x32xf32> to vector<1x16x32xf32>
    tpu.vector_store %arg6[%c0_85, %c0_86, %c0_87], %258 {strides = array<i32>} : memref<4x16x32xf32, #tpu.memory_space<vmem>>, vector<1x16x32xf32>,
    %259 = vector.extract_strided_slice %2 {offsets = [16, 0], sizes = [16, 32], strides = [1, 1]} : vector<64x32xf32> to vector<16x32xf32>
    %c0_88 = arith.constant 0 : index
    %c0_89 = arith.constant 0 : index
    %260 = vector.load %arg3[%c0_88, %c0_89] : memref<128x384xbf16, #tpu.memory_space<vmem>>, vector<32x384xbf16>
    %261 = arith.truncf %255 : vector<16x32xf32> to vector<16x32xbf16>
    %cst_90 = arith.constant dense<0.000000e+00> : vector<16x384xf32>
    %262 = tpu.matmul %261, %260, %cst_90 {dimension_numbers = #tpu.dot_dimension_numbers<[1], [0], [0], [1], [0, 0, 1, 1], [], []>} : vector<16x32xbf16>, vector<32x384xbf16>, vector<16x384xf32> -> vector<16x384xf32>
    %c32_91 = arith.constant 32 : index
    %c0_92 = arith.constant 0 : index
    %263 = vector.load %arg3[%c32_91, %c0_92] : memref<128x384xbf16, #tpu.memory_space<vmem>>, vector<32x384xbf16>
    %264 = arith.truncf %259 : vector<16x32xf32> to vector<16x32xbf16>
    %cst_93 = arith.constant dense<0.000000e+00> : vector<16x384xf32>
    %265 = tpu.matmul %264, %263, %cst_93 {dimension_numbers = #tpu.dot_dimension_numbers<[1], [0], [0], [1], [0, 0, 1, 1], [], []>} : vector<16x32xbf16>, vector<32x384xbf16>, vector<16x384xf32> -> vector<16x384xf32>
    %266 = arith.addf %262, %265 : vector<16x384xf32>
    %c0_94 = arith.constant 0 : index
    %c0_95 = arith.constant 0 : index
    %267 = vector.load %arg5[%c0_94, %c0_95] : memref<24x384xf32, #tpu.memory_space<vmem>>, vector<1x384xf32>
    %268 = vector.broadcast %267 : vector<1x384xf32> to vector<16x384xf32>
    %269 = arith.addf %266, %268 : vector<16x384xf32>
    %270 = vector.extract_strided_slice %269 {offsets = [0, 0], sizes = [16, 128], strides = [1, 1]} : vector<16x384xf32> to vector<16x128xf32>
    %271 = vector.extract_strided_slice %269 {offsets = [0, 128], sizes = [16, 128], strides = [1, 1]} : vector<16x384xf32> to vector<16x128xf32>
    %272 = vector.extract_strided_slice %269 {offsets = [0, 256], sizes = [16, 128], strides = [1, 1]} : vector<16x384xf32> to vector<16x128xf32>
    %273 = vector.extract_strided_slice %270 {offsets = [0, 0], sizes = [8, 128], strides = [1, 1]} : vector<16x128xf32> to vector<8x128xf32>
    %274 = vector.extract_strided_slice %270 {offsets = [8, 0], sizes = [8, 128], strides = [1, 1]} : vector<16x128xf32> to vector<8x128xf32>
    %275 = vector.extract_strided_slice %271 {offsets = [0, 0], sizes = [8, 128], strides = [1, 1]} : vector<16x128xf32> to vector<8x128xf32>
    %276 = vector.extract_strided_slice %271 {offsets = [8, 0], sizes = [8, 128], strides = [1, 1]} : vector<16x128xf32> to vector<8x128xf32>
    %277 = vector.extract_strided_slice %272 {offsets = [0, 0], sizes = [8, 128], strides = [1, 1]} : vector<16x128xf32> to vector<8x128xf32>
    %278 = vector.extract_strided_slice %272 {offsets = [8, 0], sizes = [8, 128], strides = [1, 1]} : vector<16x128xf32> to vector<8x128xf32>
    %279 = arith.subf %275, %276 : vector<8x128xf32>
    %280 = arith.subf %277, %278 : vector<8x128xf32>
    %c928_96 = arith.constant 928 : index
    %c0_97 = arith.constant 0 : index
    %281 = vector.load %arg4[%c928_96, %c0_97] : memref<1312x128xbf16, #tpu.memory_space<vmem>>, vector<128x128xbf16>
    %282 = arith.mulf %273, %279 : vector<8x128xf32>
    %283 = arith.truncf %282 : vector<8x128xf32> to vector<8x128xbf16>
    %cst_98 = arith.constant dense<0.000000e+00> : vector<8x128xf32>
    %284 = tpu.matmul %283, %281, %cst_98 {dimension_numbers = #tpu.dot_dimension_numbers<[1], [0], [0], [1], [0, 0, 1, 1], [], []>} : vector<8x128xbf16>, vector<128x128xbf16>, vector<8x128xf32> -> vector<8x128xf32>
    %cst_99 = arith.constant 2.500000e-01 : f32
    %285 = vector.broadcast %cst_99 : f32 to vector<8x128xf32>
    %286 = arith.mulf %284, %285 : vector<8x128xf32>
    %287 = arith.negf %286 : vector<8x128xf32>
    %288 = math.exp %287 : vector<8x128xf32>
    %cst_100 = arith.constant 1.000000e+00 : f32
    %289 = vector.broadcast %cst_100 : f32 to vector<8x128xf32>
    %290 = arith.addf %289, %288 : vector<8x128xf32>
    %291 = arith.divf %289, %290 : vector<8x128xf32>
    %292 = arith.mulf %274, %279 : vector<8x128xf32>
    %293 = arith.truncf %292 : vector<8x128xf32> to vector<8x128xbf16>
    %cst_101 = arith.constant dense<0.000000e+00> : vector<8x128xf32>
    %294 = tpu.matmul %293, %281, %cst_101 {dimension_numbers = #tpu.dot_dimension_numbers<[1], [0], [0], [1], [0, 0, 1, 1], [], []>} : vector<8x128xbf16>, vector<128x128xbf16>, vector<8x128xf32> -> vector<8x128xf32>
    %cst_102 = arith.constant -2.500000e-01 : f32
    %295 = vector.broadcast %cst_102 : f32 to vector<8x128xf32>
    %296 = arith.mulf %294, %295 : vector<8x128xf32>
    %297 = arith.negf %296 : vector<8x128xf32>
    %298 = math.exp %297 : vector<8x128xf32>
    %cst_103 = arith.constant 1.000000e+00 : f32
    %299 = vector.broadcast %cst_103 : f32 to vector<8x128xf32>
    %300 = arith.addf %299, %298 : vector<8x128xf32>
    %301 = arith.divf %299, %300 : vector<8x128xf32>
    %302 = arith.mulf %291, %280 : vector<8x128xf32>
    %303 = arith.addf %278, %302 : vector<8x128xf32>
    %304 = arith.mulf %301, %280 : vector<8x128xf32>
    %305 = arith.subf %277, %304 : vector<8x128xf32>
    %306 = tpu.concatenate %303, %305 in 0 : vector<8x128xf32>, vector<8x128xf32> -> vector<16x128xf32>
    %c256_104 = arith.constant 256 : index
    %c0_105 = arith.constant 0 : index
    %307 = vector.load %arg4[%c256_104, %c0_105] : memref<1312x128xbf16, #tpu.memory_space<vmem>>, vector<128x128xbf16>
    %308 = arith.truncf %306 : vector<16x128xf32> to vector<16x128xbf16>
    %cst_106 = arith.constant dense<0.000000e+00> : vector<16x128xf32>
    %309 = tpu.matmul %308, %307, %cst_106 {dimension_numbers = #tpu.dot_dimension_numbers<[1], [0], [0], [1], [0, 0, 1, 1], [], []>} : vector<16x128xbf16>, vector<128x128xbf16>, vector<16x128xf32> -> vector<16x128xf32>
    %c1_107 = arith.constant 1 : index
    %c0_108 = arith.constant 0 : index
    %310 = vector.load %arg5[%c1_107, %c0_108] : memref<24x384xf32, #tpu.memory_space<vmem>>, vector<1x384xf32>
    %311 = vector.extract_strided_slice %310 {offsets = [0, 0], sizes = [1, 128], strides = [1, 1]} : vector<1x384xf32> to vector<1x128xf32>
    %312 = vector.broadcast %311 : vector<1x128xf32> to vector<16x128xf32>
    %313 = arith.addf %309, %312 : vector<16x128xf32>
    %314 = tpu.concatenate %255, %259, %255, %259 in 1 : vector<16x32xf32>, vector<16x32xf32>, vector<16x32xf32>, vector<16x32xf32> -> vector<16x128xf32>
    %315 = arith.addf %314, %313 : vector<16x128xf32>
    %c1056_109 = arith.constant 1056 : index
    %c0_110 = arith.constant 0 : index
    %316 = vector.load %arg4[%c1056_109, %c0_110] : memref<1312x128xbf16, #tpu.memory_space<vmem>>, vector<128x128xbf16>
    %317 = arith.truncf %315 : vector<16x128xf32> to vector<16x128xbf16>
    %cst_111 = arith.constant dense<0.000000e+00> : vector<16x128xf32>
    %318 = tpu.matmul %317, %316, %cst_111 {dimension_numbers = #tpu.dot_dimension_numbers<[1], [0], [0], [1], [0, 0, 1, 1], [], []>} : vector<16x128xbf16>, vector<128x128xbf16>, vector<16x128xf32> -> vector<16x128xf32>
    %319 = arith.subf %315, %318 : vector<16x128xf32>
    %320 = arith.mulf %319, %319 : vector<16x128xf32>
    %321 = arith.truncf %320 : vector<16x128xf32> to vector<16x128xbf16>
    %cst_112 = arith.constant dense<0.000000e+00> : vector<16x128xf32>
    %322 = tpu.matmul %321, %316, %cst_112 {dimension_numbers = #tpu.dot_dimension_numbers<[1], [0], [0], [1], [0, 0, 1, 1], [], []>} : vector<16x128xbf16>, vector<128x128xbf16>, vector<16x128xf32> -> vector<16x128xf32>
    %cst_113 = arith.constant 9.99999974E-6 : f32
    %323 = vector.broadcast %cst_113 : f32 to vector<16x128xf32>
    %324 = arith.addf %322, %323 : vector<16x128xf32>
    %325 = math.rsqrt %324 : vector<16x128xf32>
    %326 = arith.mulf %319, %325 : vector<16x128xf32>
    %c2_114 = arith.constant 2 : index
    %c0_115 = arith.constant 0 : index
    %327 = vector.load %arg5[%c2_114, %c0_115] : memref<24x384xf32, #tpu.memory_space<vmem>>, vector<1x384xf32>
    %328 = vector.extract_strided_slice %327 {offsets = [0, 0], sizes = [1, 128], strides = [1, 1]} : vector<1x384xf32> to vector<1x128xf32>
    %329 = vector.broadcast %328 : vector<1x128xf32> to vector<16x128xf32>
    %330 = arith.mulf %326, %329 : vector<16x128xf32>
    %c3_116 = arith.constant 3 : index
    %c0_117 = arith.constant 0 : index
    %331 = vector.load %arg5[%c3_116, %c0_117] : memref<24x384xf32, #tpu.memory_space<vmem>>, vector<1x384xf32>
    %332 = vector.extract_strided_slice %331 {offsets = [0, 0], sizes = [1, 128], strides = [1, 1]} : vector<1x384xf32> to vector<1x128xf32>
    %333 = vector.broadcast %332 : vector<1x128xf32> to vector<16x128xf32>
    %334 = arith.addf %330, %333 : vector<16x128xf32>
    %c384_118 = arith.constant 384 : index
    %c0_119 = arith.constant 0 : index
    %335 = vector.load %arg4[%c384_118, %c0_119] : memref<1312x128xbf16, #tpu.memory_space<vmem>>, vector<128x64xbf16>
    %336 = arith.truncf %334 : vector<16x128xf32> to vector<16x128xbf16>
    %cst_120 = arith.constant dense<0.000000e+00> : vector<16x64xf32>
    %337 = tpu.matmul %336, %335, %cst_120 {dimension_numbers = #tpu.dot_dimension_numbers<[1], [0], [0], [1], [0, 0, 1, 1], [], []>} : vector<16x128xbf16>, vector<128x64xbf16>, vector<16x64xf32> -> vector<16x64xf32>
    %c4_121 = arith.constant 4 : index
    %c0_122 = arith.constant 0 : index
    %338 = vector.load %arg5[%c4_121, %c0_122] : memref<24x384xf32, #tpu.memory_space<vmem>>, vector<1x384xf32>
    %339 = vector.extract_strided_slice %338 {offsets = [0, 0], sizes = [1, 64], strides = [1, 1]} : vector<1x384xf32> to vector<1x64xf32>
    %340 = vector.broadcast %339 : vector<1x64xf32> to vector<16x64xf32>
    %341 = arith.addf %337, %340 : vector<16x64xf32>
    %cst_123 = arith.constant 0.000000e+00 : f32
    %342 = vector.broadcast %cst_123 : f32 to vector<16x64xf32>
    %343 = arith.maximumf %341, %342 : vector<16x64xf32>
    %c512_124 = arith.constant 512 : index
    %c0_125 = arith.constant 0 : index
    %344 = vector.load %arg4[%c512_124, %c0_125] : memref<1312x128xbf16, #tpu.memory_space<vmem>>, vector<64x128xbf16>
    %345 = arith.truncf %343 : vector<16x64xf32> to vector<16x64xbf16>
    %cst_126 = arith.constant dense<0.000000e+00> : vector<16x128xf32>
    %346 = tpu.matmul %345, %344, %cst_126 {dimension_numbers = #tpu.dot_dimension_numbers<[1], [0], [0], [1], [0, 0, 1, 1], [], []>} : vector<16x64xbf16>, vector<64x128xbf16>, vector<16x128xf32> -> vector<16x128xf32>
    %c5_127 = arith.constant 5 : index
    %c0_128 = arith.constant 0 : index
    %347 = vector.load %arg5[%c5_127, %c0_128] : memref<24x384xf32, #tpu.memory_space<vmem>>, vector<1x384xf32>
    %348 = vector.extract_strided_slice %347 {offsets = [0, 0], sizes = [1, 128], strides = [1, 1]} : vector<1x384xf32> to vector<1x128xf32>
    %349 = vector.broadcast %348 : vector<1x128xf32> to vector<16x128xf32>
    %350 = arith.addf %346, %349 : vector<16x128xf32>
    %351 = arith.addf %334, %350 : vector<16x128xf32>
    %c1056_129 = arith.constant 1056 : index
    %c0_130 = arith.constant 0 : index
    %352 = vector.load %arg4[%c1056_129, %c0_130] : memref<1312x128xbf16, #tpu.memory_space<vmem>>, vector<128x128xbf16>
    %353 = arith.truncf %351 : vector<16x128xf32> to vector<16x128xbf16>
    %cst_131 = arith.constant dense<0.000000e+00> : vector<16x128xf32>
    %354 = tpu.matmul %353, %352, %cst_131 {dimension_numbers = #tpu.dot_dimension_numbers<[1], [0], [0], [1], [0, 0, 1, 1], [], []>} : vector<16x128xbf16>, vector<128x128xbf16>, vector<16x128xf32> -> vector<16x128xf32>
    %355 = arith.subf %351, %354 : vector<16x128xf32>
    %356 = arith.mulf %355, %355 : vector<16x128xf32>
    %357 = arith.truncf %356 : vector<16x128xf32> to vector<16x128xbf16>
    %cst_132 = arith.constant dense<0.000000e+00> : vector<16x128xf32>
    %358 = tpu.matmul %357, %352, %cst_132 {dimension_numbers = #tpu.dot_dimension_numbers<[1], [0], [0], [1], [0, 0, 1, 1], [], []>} : vector<16x128xbf16>, vector<128x128xbf16>, vector<16x128xf32> -> vector<16x128xf32>
    %cst_133 = arith.constant 9.99999974E-6 : f32
    %359 = vector.broadcast %cst_133 : f32 to vector<16x128xf32>
    %360 = arith.addf %358, %359 : vector<16x128xf32>
    %361 = math.rsqrt %360 : vector<16x128xf32>
    %362 = arith.mulf %355, %361 : vector<16x128xf32>
    %c6_134 = arith.constant 6 : index
    %c0_135 = arith.constant 0 : index
    %363 = vector.load %arg5[%c6_134, %c0_135] : memref<24x384xf32, #tpu.memory_space<vmem>>, vector<1x384xf32>
    %364 = vector.extract_strided_slice %363 {offsets = [0, 0], sizes = [1, 128], strides = [1, 1]} : vector<1x384xf32> to vector<1x128xf32>
    %365 = vector.broadcast %364 : vector<1x128xf32> to vector<16x128xf32>
    %366 = arith.mulf %362, %365 : vector<16x128xf32>
    %c7_136 = arith.constant 7 : index
    %c0_137 = arith.constant 0 : index
    %367 = vector.load %arg5[%c7_136, %c0_137] : memref<24x384xf32, #tpu.memory_space<vmem>>, vector<1x384xf32>
    %368 = vector.extract_strided_slice %367 {offsets = [0, 0], sizes = [1, 128], strides = [1, 1]} : vector<1x384xf32> to vector<1x128xf32>
    %369 = vector.broadcast %368 : vector<1x128xf32> to vector<16x128xf32>
    %370 = arith.addf %366, %369 : vector<16x128xf32>
    %c576_138 = arith.constant 576 : index
    %c0_139 = arith.constant 0 : index
    %371 = vector.load %arg4[%c576_138, %c0_139] : memref<1312x128xbf16, #tpu.memory_space<vmem>>, vector<128x64xbf16>
    %372 = arith.truncf %370 : vector<16x128xf32> to vector<16x128xbf16>
    %cst_140 = arith.constant dense<0.000000e+00> : vector<16x64xf32>
    %373 = tpu.matmul %372, %371, %cst_140 {dimension_numbers = #tpu.dot_dimension_numbers<[1], [0], [0], [1], [0, 0, 1, 1], [], []>} : vector<16x128xbf16>, vector<128x64xbf16>, vector<16x64xf32> -> vector<16x64xf32>
    %c8_141 = arith.constant 8 : index
    %c0_142 = arith.constant 0 : index
    %374 = vector.load %arg5[%c8_141, %c0_142] : memref<24x384xf32, #tpu.memory_space<vmem>>, vector<1x384xf32>
    %375 = vector.extract_strided_slice %374 {offsets = [0, 0], sizes = [1, 64], strides = [1, 1]} : vector<1x384xf32> to vector<1x64xf32>
    %376 = vector.broadcast %375 : vector<1x64xf32> to vector<16x64xf32>
    %377 = arith.addf %373, %376 : vector<16x64xf32>
    %378 = arith.negf %377 : vector<16x64xf32>
    %379 = math.exp %378 : vector<16x64xf32>
    %cst_143 = arith.constant 1.000000e+00 : f32
    %380 = vector.broadcast %cst_143 : f32 to vector<16x64xf32>
    %381 = arith.addf %380, %379 : vector<16x64xf32>
    %382 = arith.divf %380, %381 : vector<16x64xf32>
    %383 = vector.extract_strided_slice %382 {offsets = [0, 0], sizes = [16, 32], strides = [1, 1]} : vector<16x64xf32> to vector<16x32xf32>
    %384 = vector.extract_strided_slice %382 {offsets = [0, 32], sizes = [16, 32], strides = [1, 1]} : vector<16x64xf32> to vector<16x32xf32>
    %385 = arith.mulf %384, %255 : vector<16x32xf32>
    %c64_144 = arith.constant 64 : index
    %c0_145 = arith.constant 0 : index
    %386 = vector.load %arg3[%c64_144, %c0_145] : memref<128x384xbf16, #tpu.memory_space<vmem>>, vector<32x192xbf16>
    %387 = arith.truncf %385 : vector<16x32xf32> to vector<16x32xbf16>
    %cst_146 = arith.constant dense<0.000000e+00> : vector<16x192xf32>
    %388 = tpu.matmul %387, %386, %cst_146 {dimension_numbers = #tpu.dot_dimension_numbers<[1], [0], [0], [1], [0, 0, 1, 1], [], []>} : vector<16x32xbf16>, vector<32x192xbf16>, vector<16x192xf32> -> vector<16x192xf32>
    %c96_147 = arith.constant 96 : index
    %c0_148 = arith.constant 0 : index
    %389 = vector.load %arg3[%c96_147, %c0_148] : memref<128x384xbf16, #tpu.memory_space<vmem>>, vector<32x192xbf16>
    %390 = arith.truncf %259 : vector<16x32xf32> to vector<16x32xbf16>
    %cst_149 = arith.constant dense<0.000000e+00> : vector<16x192xf32>
    %391 = tpu.matmul %390, %389, %cst_149 {dimension_numbers = #tpu.dot_dimension_numbers<[1], [0], [0], [1], [0, 0, 1, 1], [], []>} : vector<16x32xbf16>, vector<32x192xbf16>, vector<16x192xf32> -> vector<16x192xf32>
    %392 = arith.addf %388, %391 : vector<16x192xf32>
    %c9_150 = arith.constant 9 : index
    %c0_151 = arith.constant 0 : index
    %393 = vector.load %arg5[%c9_150, %c0_151] : memref<24x384xf32, #tpu.memory_space<vmem>>, vector<1x384xf32>
    %394 = vector.extract_strided_slice %393 {offsets = [0, 0], sizes = [1, 192], strides = [1, 1]} : vector<1x384xf32> to vector<1x192xf32>
    %395 = vector.broadcast %394 : vector<1x192xf32> to vector<16x192xf32>
    %396 = arith.addf %392, %395 : vector<16x192xf32>
    %397 = vector.extract_strided_slice %396 {offsets = [0, 0], sizes = [16, 64], strides = [1, 1]} : vector<16x192xf32> to vector<16x64xf32>
    %398 = vector.extract_strided_slice %396 {offsets = [0, 64], sizes = [16, 64], strides = [1, 1]} : vector<16x192xf32> to vector<16x64xf32>
    %399 = vector.extract_strided_slice %396 {offsets = [0, 128], sizes = [16, 64], strides = [1, 1]} : vector<16x192xf32> to vector<16x64xf32>
    %400 = vector.extract_strided_slice %397 {offsets = [0, 0], sizes = [8, 64], strides = [1, 1]} : vector<16x64xf32> to vector<8x64xf32>
    %401 = vector.extract_strided_slice %397 {offsets = [8, 0], sizes = [8, 64], strides = [1, 1]} : vector<16x64xf32> to vector<8x64xf32>
    %402 = vector.extract_strided_slice %398 {offsets = [0, 0], sizes = [8, 64], strides = [1, 1]} : vector<16x64xf32> to vector<8x64xf32>
    %403 = vector.extract_strided_slice %398 {offsets = [8, 0], sizes = [8, 64], strides = [1, 1]} : vector<16x64xf32> to vector<8x64xf32>
    %404 = vector.extract_strided_slice %399 {offsets = [0, 0], sizes = [8, 64], strides = [1, 1]} : vector<16x64xf32> to vector<8x64xf32>
    %405 = vector.extract_strided_slice %399 {offsets = [8, 0], sizes = [8, 64], strides = [1, 1]} : vector<16x64xf32> to vector<8x64xf32>
    %406 = arith.subf %402, %403 : vector<8x64xf32>
    %407 = arith.subf %404, %405 : vector<8x64xf32>
    %c1184_152 = arith.constant 1184 : index
    %c0_153 = arith.constant 0 : index
    %408 = vector.load %arg4[%c1184_152, %c0_153] : memref<1312x128xbf16, #tpu.memory_space<vmem>>, vector<64x64xbf16>
    %409 = arith.mulf %400, %406 : vector<8x64xf32>
    %410 = arith.truncf %409 : vector<8x64xf32> to vector<8x64xbf16>
    %cst_154 = arith.constant dense<0.000000e+00> : vector<8x64xf32>
    %411 = tpu.matmul %410, %408, %cst_154 {dimension_numbers = #tpu.dot_dimension_numbers<[1], [0], [0], [1], [0, 0, 1, 1], [], []>} : vector<8x64xbf16>, vector<64x64xbf16>, vector<8x64xf32> -> vector<8x64xf32>
    %cst_155 = arith.constant 2.500000e-01 : f32
    %412 = vector.broadcast %cst_155 : f32 to vector<8x64xf32>
    %413 = arith.mulf %411, %412 : vector<8x64xf32>
    %414 = arith.negf %413 : vector<8x64xf32>
    %415 = math.exp %414 : vector<8x64xf32>
    %cst_156 = arith.constant 1.000000e+00 : f32
    %416 = vector.broadcast %cst_156 : f32 to vector<8x64xf32>
    %417 = arith.addf %416, %415 : vector<8x64xf32>
    %418 = arith.divf %416, %417 : vector<8x64xf32>
    %419 = arith.mulf %401, %406 : vector<8x64xf32>
    %420 = arith.truncf %419 : vector<8x64xf32> to vector<8x64xbf16>
    %cst_157 = arith.constant dense<0.000000e+00> : vector<8x64xf32>
    %421 = tpu.matmul %420, %408, %cst_157 {dimension_numbers = #tpu.dot_dimension_numbers<[1], [0], [0], [1], [0, 0, 1, 1], [], []>} : vector<8x64xbf16>, vector<64x64xbf16>, vector<8x64xf32> -> vector<8x64xf32>
    %cst_158 = arith.constant -2.500000e-01 : f32
    %422 = vector.broadcast %cst_158 : f32 to vector<8x64xf32>
    %423 = arith.mulf %421, %422 : vector<8x64xf32>
    %424 = arith.negf %423 : vector<8x64xf32>
    %425 = math.exp %424 : vector<8x64xf32>
    %cst_159 = arith.constant 1.000000e+00 : f32
    %426 = vector.broadcast %cst_159 : f32 to vector<8x64xf32>
    %427 = arith.addf %426, %425 : vector<8x64xf32>
    %428 = arith.divf %426, %427 : vector<8x64xf32>
    %429 = arith.mulf %418, %407 : vector<8x64xf32>
    %430 = arith.addf %405, %429 : vector<8x64xf32>
    %431 = arith.mulf %428, %407 : vector<8x64xf32>
    %432 = arith.subf %404, %431 : vector<8x64xf32>
    %433 = tpu.concatenate %430, %432 in 0 : vector<8x64xf32>, vector<8x64xf32> -> vector<16x64xf32>
    %c704_160 = arith.constant 704 : index
    %c0_161 = arith.constant 0 : index
    %434 = vector.load %arg4[%c704_160, %c0_161] : memref<1312x128xbf16, #tpu.memory_space<vmem>>, vector<64x64xbf16>
    %435 = arith.truncf %433 : vector<16x64xf32> to vector<16x64xbf16>
    %cst_162 = arith.constant dense<0.000000e+00> : vector<16x64xf32>
    %436 = tpu.matmul %435, %434, %cst_162 {dimension_numbers = #tpu.dot_dimension_numbers<[1], [0], [0], [1], [0, 0, 1, 1], [], []>} : vector<16x64xbf16>, vector<64x64xbf16>, vector<16x64xf32> -> vector<16x64xf32>
    %c10_163 = arith.constant 10 : index
    %c0_164 = arith.constant 0 : index
    %437 = vector.load %arg5[%c10_163, %c0_164] : memref<24x384xf32, #tpu.memory_space<vmem>>, vector<1x384xf32>
    %438 = vector.extract_strided_slice %437 {offsets = [0, 0], sizes = [1, 64], strides = [1, 1]} : vector<1x384xf32> to vector<1x64xf32>
    %439 = vector.broadcast %438 : vector<1x64xf32> to vector<16x64xf32>
    %440 = arith.addf %436, %439 : vector<16x64xf32>
    %441 = tpu.concatenate %385, %259 in 1 : vector<16x32xf32>, vector<16x32xf32> -> vector<16x64xf32>
    %442 = arith.addf %441, %440 : vector<16x64xf32>
    %c1248_165 = arith.constant 1248 : index
    %c0_166 = arith.constant 0 : index
    %443 = vector.load %arg4[%c1248_165, %c0_166] : memref<1312x128xbf16, #tpu.memory_space<vmem>>, vector<64x64xbf16>
    %444 = arith.truncf %442 : vector<16x64xf32> to vector<16x64xbf16>
    %cst_167 = arith.constant dense<0.000000e+00> : vector<16x64xf32>
    %445 = tpu.matmul %444, %443, %cst_167 {dimension_numbers = #tpu.dot_dimension_numbers<[1], [0], [0], [1], [0, 0, 1, 1], [], []>} : vector<16x64xbf16>, vector<64x64xbf16>, vector<16x64xf32> -> vector<16x64xf32>
    %446 = arith.subf %442, %445 : vector<16x64xf32>
    %447 = arith.mulf %446, %446 : vector<16x64xf32>
    %448 = arith.truncf %447 : vector<16x64xf32> to vector<16x64xbf16>
    %cst_168 = arith.constant dense<0.000000e+00> : vector<16x64xf32>
    %449 = tpu.matmul %448, %443, %cst_168 {dimension_numbers = #tpu.dot_dimension_numbers<[1], [0], [0], [1], [0, 0, 1, 1], [], []>} : vector<16x64xbf16>, vector<64x64xbf16>, vector<16x64xf32> -> vector<16x64xf32>
    %cst_169 = arith.constant 9.99999974E-6 : f32
    %450 = vector.broadcast %cst_169 : f32 to vector<16x64xf32>
    %451 = arith.addf %449, %450 : vector<16x64xf32>
    %452 = math.rsqrt %451 : vector<16x64xf32>
    %453 = arith.mulf %446, %452 : vector<16x64xf32>
    %c11_170 = arith.constant 11 : index
    %c0_171 = arith.constant 0 : index
    %454 = vector.load %arg5[%c11_170, %c0_171] : memref<24x384xf32, #tpu.memory_space<vmem>>, vector<1x384xf32>
    %455 = vector.extract_strided_slice %454 {offsets = [0, 0], sizes = [1, 64], strides = [1, 1]} : vector<1x384xf32> to vector<1x64xf32>
    %456 = vector.broadcast %455 : vector<1x64xf32> to vector<16x64xf32>
    %457 = arith.mulf %453, %456 : vector<16x64xf32>
    %c12_172 = arith.constant 12 : index
    %c0_173 = arith.constant 0 : index
    %458 = vector.load %arg5[%c12_172, %c0_173] : memref<24x384xf32, #tpu.memory_space<vmem>>, vector<1x384xf32>
    %459 = vector.extract_strided_slice %458 {offsets = [0, 0], sizes = [1, 64], strides = [1, 1]} : vector<1x384xf32> to vector<1x64xf32>
    %460 = vector.broadcast %459 : vector<1x64xf32> to vector<16x64xf32>
    %461 = arith.addf %457, %460 : vector<16x64xf32>
    %c768_174 = arith.constant 768 : index
    %c0_175 = arith.constant 0 : index
    %462 = vector.load %arg4[%c768_174, %c0_175] : memref<1312x128xbf16, #tpu.memory_space<vmem>>, vector<64x32xbf16>
    %463 = arith.truncf %461 : vector<16x64xf32> to vector<16x64xbf16>
    %cst_176 = arith.constant dense<0.000000e+00> : vector<16x32xf32>
    %464 = tpu.matmul %463, %462, %cst_176 {dimension_numbers = #tpu.dot_dimension_numbers<[1], [0], [0], [1], [0, 0, 1, 1], [], []>} : vector<16x64xbf16>, vector<64x32xbf16>, vector<16x32xf32> -> vector<16x32xf32>
    %c13_177 = arith.constant 13 : index
    %c0_178 = arith.constant 0 : index
    %465 = vector.load %arg5[%c13_177, %c0_178] : memref<24x384xf32, #tpu.memory_space<vmem>>, vector<1x384xf32>
    %466 = vector.extract_strided_slice %465 {offsets = [0, 0], sizes = [1, 32], strides = [1, 1]} : vector<1x384xf32> to vector<1x32xf32>
    %467 = vector.broadcast %466 : vector<1x32xf32> to vector<16x32xf32>
    %468 = arith.addf %464, %467 : vector<16x32xf32>
    %cst_179 = arith.constant 0.000000e+00 : f32
    %469 = vector.broadcast %cst_179 : f32 to vector<16x32xf32>
    %470 = arith.maximumf %468, %469 : vector<16x32xf32>
    %c832_180 = arith.constant 832 : index
    %c0_181 = arith.constant 0 : index
    %471 = vector.load %arg4[%c832_180, %c0_181] : memref<1312x128xbf16, #tpu.memory_space<vmem>>, vector<32x64xbf16>
    %472 = arith.truncf %470 : vector<16x32xf32> to vector<16x32xbf16>
    %cst_182 = arith.constant dense<0.000000e+00> : vector<16x64xf32>
    %473 = tpu.matmul %472, %471, %cst_182 {dimension_numbers = #tpu.dot_dimension_numbers<[1], [0], [0], [1], [0, 0, 1, 1], [], []>} : vector<16x32xbf16>, vector<32x64xbf16>, vector<16x64xf32> -> vector<16x64xf32>
    %c14_183 = arith.constant 14 : index
    %c0_184 = arith.constant 0 : index
    %474 = vector.load %arg5[%c14_183, %c0_184] : memref<24x384xf32, #tpu.memory_space<vmem>>, vector<1x384xf32>
    %475 = vector.extract_strided_slice %474 {offsets = [0, 0], sizes = [1, 64], strides = [1, 1]} : vector<1x384xf32> to vector<1x64xf32>
    %476 = vector.broadcast %475 : vector<1x64xf32> to vector<16x64xf32>
    %477 = arith.addf %473, %476 : vector<16x64xf32>
    %478 = arith.addf %461, %477 : vector<16x64xf32>
    %c1248_185 = arith.constant 1248 : index
    %c0_186 = arith.constant 0 : index
    %479 = vector.load %arg4[%c1248_185, %c0_186] : memref<1312x128xbf16, #tpu.memory_space<vmem>>, vector<64x64xbf16>
    %480 = arith.truncf %478 : vector<16x64xf32> to vector<16x64xbf16>
    %cst_187 = arith.constant dense<0.000000e+00> : vector<16x64xf32>
    %481 = tpu.matmul %480, %479, %cst_187 {dimension_numbers = #tpu.dot_dimension_numbers<[1], [0], [0], [1], [0, 0, 1, 1], [], []>} : vector<16x64xbf16>, vector<64x64xbf16>, vector<16x64xf32> -> vector<16x64xf32>
    %482 = arith.subf %478, %481 : vector<16x64xf32>
    %483 = arith.mulf %482, %482 : vector<16x64xf32>
    %484 = arith.truncf %483 : vector<16x64xf32> to vector<16x64xbf16>
    %cst_188 = arith.constant dense<0.000000e+00> : vector<16x64xf32>
    %485 = tpu.matmul %484, %479, %cst_188 {dimension_numbers = #tpu.dot_dimension_numbers<[1], [0], [0], [1], [0, 0, 1, 1], [], []>} : vector<16x64xbf16>, vector<64x64xbf16>, vector<16x64xf32> -> vector<16x64xf32>
    %cst_189 = arith.constant 9.99999974E-6 : f32
    %486 = vector.broadcast %cst_189 : f32 to vector<16x64xf32>
    %487 = arith.addf %485, %486 : vector<16x64xf32>
    %488 = math.rsqrt %487 : vector<16x64xf32>
    %489 = arith.mulf %482, %488 : vector<16x64xf32>
    %c15_190 = arith.constant 15 : index
    %c0_191 = arith.constant 0 : index
    %490 = vector.load %arg5[%c15_190, %c0_191] : memref<24x384xf32, #tpu.memory_space<vmem>>, vector<1x384xf32>
    %491 = vector.extract_strided_slice %490 {offsets = [0, 0], sizes = [1, 64], strides = [1, 1]} : vector<1x384xf32> to vector<1x64xf32>
    %492 = vector.broadcast %491 : vector<1x64xf32> to vector<16x64xf32>
    %493 = arith.mulf %489, %492 : vector<16x64xf32>
    %c16_192 = arith.constant 16 : index
    %c0_193 = arith.constant 0 : index
    %494 = vector.load %arg5[%c16_192, %c0_193] : memref<24x384xf32, #tpu.memory_space<vmem>>, vector<1x384xf32>
    %495 = vector.extract_strided_slice %494 {offsets = [0, 0], sizes = [1, 64], strides = [1, 1]} : vector<1x384xf32> to vector<1x64xf32>
    %496 = vector.broadcast %495 : vector<1x64xf32> to vector<16x64xf32>
    %497 = arith.addf %493, %496 : vector<16x64xf32>
    %c864_194 = arith.constant 864 : index
    %c0_195 = arith.constant 0 : index
    %498 = vector.load %arg4[%c864_194, %c0_195] : memref<1312x128xbf16, #tpu.memory_space<vmem>>, vector<64x32xbf16>
    %499 = arith.truncf %497 : vector<16x64xf32> to vector<16x64xbf16>
    %cst_196 = arith.constant dense<0.000000e+00> : vector<16x32xf32>
    %500 = tpu.matmul %499, %498, %cst_196 {dimension_numbers = #tpu.dot_dimension_numbers<[1], [0], [0], [1], [0, 0, 1, 1], [], []>} : vector<16x64xbf16>, vector<64x32xbf16>, vector<16x32xf32> -> vector<16x32xf32>
    %c17_197 = arith.constant 17 : index
    %c0_198 = arith.constant 0 : index
    %501 = vector.load %arg5[%c17_197, %c0_198] : memref<24x384xf32, #tpu.memory_space<vmem>>, vector<1x384xf32>
    %502 = vector.extract_strided_slice %501 {offsets = [0, 0], sizes = [1, 32], strides = [1, 1]} : vector<1x384xf32> to vector<1x32xf32>
    %503 = vector.broadcast %502 : vector<1x32xf32> to vector<16x32xf32>
    %504 = arith.addf %500, %503 : vector<16x32xf32>
    %505 = math.tanh %504 : vector<16x32xf32>
    %cst_199 = arith.constant 1.000000e+00 : f32
    %506 = vector.broadcast %cst_199 : f32 to vector<16x32xf32>
    %507 = arith.subf %506, %383 : vector<16x32xf32>
    %508 = arith.mulf %507, %255 : vector<16x32xf32>
    %509 = arith.mulf %383, %505 : vector<16x32xf32>
    %510 = arith.addf %508, %509 : vector<16x32xf32>
    %c1_200 = arith.constant 1 : index
    %c0_201 = arith.constant 0 : index
    %c0_202 = arith.constant 0 : index
    %511 = vector.load %arg6[%c1_200, %c0_201, %c0_202] : memref<4x16x32xf32, #tpu.memory_space<vmem>>, vector<1x16x32xf32>
    %512 = vector.shape_cast %511 : vector<1x16x32xf32> to vector<16x32xf32>
    %513 = vector.shape_cast %510 : vector<16x32xf32> to vector<1x16x32xf32>
    tpu.vector_store %arg6[%c1_200, %c0_201, %c0_202], %513 {strides = array<i32>} : memref<4x16x32xf32, #tpu.memory_space<vmem>>, vector<1x16x32xf32>,
    %514 = vector.extract_strided_slice %2 {offsets = [32, 0], sizes = [16, 32], strides = [1, 1]} : vector<64x32xf32> to vector<16x32xf32>
    %c0_203 = arith.constant 0 : index
    %c0_204 = arith.constant 0 : index
    %515 = vector.load %arg3[%c0_203, %c0_204] : memref<128x384xbf16, #tpu.memory_space<vmem>>, vector<32x384xbf16>
    %516 = arith.truncf %510 : vector<16x32xf32> to vector<16x32xbf16>
    %cst_205 = arith.constant dense<0.000000e+00> : vector<16x384xf32>
    %517 = tpu.matmul %516, %515, %cst_205 {dimension_numbers = #tpu.dot_dimension_numbers<[1], [0], [0], [1], [0, 0, 1, 1], [], []>} : vector<16x32xbf16>, vector<32x384xbf16>, vector<16x384xf32> -> vector<16x384xf32>
    %c32_206 = arith.constant 32 : index
    %c0_207 = arith.constant 0 : index
    %518 = vector.load %arg3[%c32_206, %c0_207] : memref<128x384xbf16, #tpu.memory_space<vmem>>, vector<32x384xbf16>
    %519 = arith.truncf %514 : vector<16x32xf32> to vector<16x32xbf16>
    %cst_208 = arith.constant dense<0.000000e+00> : vector<16x384xf32>
    %520 = tpu.matmul %519, %518, %cst_208 {dimension_numbers = #tpu.dot_dimension_numbers<[1], [0], [0], [1], [0, 0, 1, 1], [], []>} : vector<16x32xbf16>, vector<32x384xbf16>, vector<16x384xf32> -> vector<16x384xf32>
    %521 = arith.addf %517, %520 : vector<16x384xf32>
    %c0_209 = arith.constant 0 : index
    %c0_210 = arith.constant 0 : index
    %522 = vector.load %arg5[%c0_209, %c0_210] : memref<24x384xf32, #tpu.memory_space<vmem>>, vector<1x384xf32>
    %523 = vector.broadcast %522 : vector<1x384xf32> to vector<16x384xf32>
    %524 = arith.addf %521, %523 : vector<16x384xf32>
    %525 = vector.extract_strided_slice %524 {offsets = [0, 0], sizes = [16, 128], strides = [1, 1]} : vector<16x384xf32> to vector<16x128xf32>
    %526 = vector.extract_strided_slice %524 {offsets = [0, 128], sizes = [16, 128], strides = [1, 1]} : vector<16x384xf32> to vector<16x128xf32>
    %527 = vector.extract_strided_slice %524 {offsets = [0, 256], sizes = [16, 128], strides = [1, 1]} : vector<16x384xf32> to vector<16x128xf32>
    %528 = vector.extract_strided_slice %525 {offsets = [0, 0], sizes = [8, 128], strides = [1, 1]} : vector<16x128xf32> to vector<8x128xf32>
    %529 = vector.extract_strided_slice %525 {offsets = [8, 0], sizes = [8, 128], strides = [1, 1]} : vector<16x128xf32> to vector<8x128xf32>
    %530 = vector.extract_strided_slice %526 {offsets = [0, 0], sizes = [8, 128], strides = [1, 1]} : vector<16x128xf32> to vector<8x128xf32>
    %531 = vector.extract_strided_slice %526 {offsets = [8, 0], sizes = [8, 128], strides = [1, 1]} : vector<16x128xf32> to vector<8x128xf32>
    %532 = vector.extract_strided_slice %527 {offsets = [0, 0], sizes = [8, 128], strides = [1, 1]} : vector<16x128xf32> to vector<8x128xf32>
    %533 = vector.extract_strided_slice %527 {offsets = [8, 0], sizes = [8, 128], strides = [1, 1]} : vector<16x128xf32> to vector<8x128xf32>
    %534 = arith.subf %530, %531 : vector<8x128xf32>
    %535 = arith.subf %532, %533 : vector<8x128xf32>
    %c928_211 = arith.constant 928 : index
    %c0_212 = arith.constant 0 : index
    %536 = vector.load %arg4[%c928_211, %c0_212] : memref<1312x128xbf16, #tpu.memory_space<vmem>>, vector<128x128xbf16>
    %537 = arith.mulf %528, %534 : vector<8x128xf32>
    %538 = arith.truncf %537 : vector<8x128xf32> to vector<8x128xbf16>
    %cst_213 = arith.constant dense<0.000000e+00> : vector<8x128xf32>
    %539 = tpu.matmul %538, %536, %cst_213 {dimension_numbers = #tpu.dot_dimension_numbers<[1], [0], [0], [1], [0, 0, 1, 1], [], []>} : vector<8x128xbf16>, vector<128x128xbf16>, vector<8x128xf32> -> vector<8x128xf32>
    %cst_214 = arith.constant 2.500000e-01 : f32
    %540 = vector.broadcast %cst_214 : f32 to vector<8x128xf32>
    %541 = arith.mulf %539, %540 : vector<8x128xf32>
    %542 = arith.negf %541 : vector<8x128xf32>
    %543 = math.exp %542 : vector<8x128xf32>
    %cst_215 = arith.constant 1.000000e+00 : f32
    %544 = vector.broadcast %cst_215 : f32 to vector<8x128xf32>
    %545 = arith.addf %544, %543 : vector<8x128xf32>
    %546 = arith.divf %544, %545 : vector<8x128xf32>
    %547 = arith.mulf %529, %534 : vector<8x128xf32>
    %548 = arith.truncf %547 : vector<8x128xf32> to vector<8x128xbf16>
    %cst_216 = arith.constant dense<0.000000e+00> : vector<8x128xf32>
    %549 = tpu.matmul %548, %536, %cst_216 {dimension_numbers = #tpu.dot_dimension_numbers<[1], [0], [0], [1], [0, 0, 1, 1], [], []>} : vector<8x128xbf16>, vector<128x128xbf16>, vector<8x128xf32> -> vector<8x128xf32>
    %cst_217 = arith.constant -2.500000e-01 : f32
    %550 = vector.broadcast %cst_217 : f32 to vector<8x128xf32>
    %551 = arith.mulf %549, %550 : vector<8x128xf32>
    %552 = arith.negf %551 : vector<8x128xf32>
    %553 = math.exp %552 : vector<8x128xf32>
    %cst_218 = arith.constant 1.000000e+00 : f32
    %554 = vector.broadcast %cst_218 : f32 to vector<8x128xf32>
    %555 = arith.addf %554, %553 : vector<8x128xf32>
    %556 = arith.divf %554, %555 : vector<8x128xf32>
    %557 = arith.mulf %546, %535 : vector<8x128xf32>
    %558 = arith.addf %533, %557 : vector<8x128xf32>
    %559 = arith.mulf %556, %535 : vector<8x128xf32>
    %560 = arith.subf %532, %559 : vector<8x128xf32>
    %561 = tpu.concatenate %558, %560 in 0 : vector<8x128xf32>, vector<8x128xf32> -> vector<16x128xf32>
    %c256_219 = arith.constant 256 : index
    %c0_220 = arith.constant 0 : index
    %562 = vector.load %arg4[%c256_219, %c0_220] : memref<1312x128xbf16, #tpu.memory_space<vmem>>, vector<128x128xbf16>
    %563 = arith.truncf %561 : vector<16x128xf32> to vector<16x128xbf16>
    %cst_221 = arith.constant dense<0.000000e+00> : vector<16x128xf32>
    %564 = tpu.matmul %563, %562, %cst_221 {dimension_numbers = #tpu.dot_dimension_numbers<[1], [0], [0], [1], [0, 0, 1, 1], [], []>} : vector<16x128xbf16>, vector<128x128xbf16>, vector<16x128xf32> -> vector<16x128xf32>
    %c1_222 = arith.constant 1 : index
    %c0_223 = arith.constant 0 : index
    %565 = vector.load %arg5[%c1_222, %c0_223] : memref<24x384xf32, #tpu.memory_space<vmem>>, vector<1x384xf32>
    %566 = vector.extract_strided_slice %565 {offsets = [0, 0], sizes = [1, 128], strides = [1, 1]} : vector<1x384xf32> to vector<1x128xf32>
    %567 = vector.broadcast %566 : vector<1x128xf32> to vector<16x128xf32>
    %568 = arith.addf %564, %567 : vector<16x128xf32>
    %569 = tpu.concatenate %510, %514, %510, %514 in 1 : vector<16x32xf32>, vector<16x32xf32>, vector<16x32xf32>, vector<16x32xf32> -> vector<16x128xf32>
    %570 = arith.addf %569, %568 : vector<16x128xf32>
    %c1056_224 = arith.constant 1056 : index
    %c0_225 = arith.constant 0 : index
    %571 = vector.load %arg4[%c1056_224, %c0_225] : memref<1312x128xbf16, #tpu.memory_space<vmem>>, vector<128x128xbf16>
    %572 = arith.truncf %570 : vector<16x128xf32> to vector<16x128xbf16>
    %cst_226 = arith.constant dense<0.000000e+00> : vector<16x128xf32>
    %573 = tpu.matmul %572, %571, %cst_226 {dimension_numbers = #tpu.dot_dimension_numbers<[1], [0], [0], [1], [0, 0, 1, 1], [], []>} : vector<16x128xbf16>, vector<128x128xbf16>, vector<16x128xf32> -> vector<16x128xf32>
    %574 = arith.subf %570, %573 : vector<16x128xf32>
    %575 = arith.mulf %574, %574 : vector<16x128xf32>
    %576 = arith.truncf %575 : vector<16x128xf32> to vector<16x128xbf16>
    %cst_227 = arith.constant dense<0.000000e+00> : vector<16x128xf32>
    %577 = tpu.matmul %576, %571, %cst_227 {dimension_numbers = #tpu.dot_dimension_numbers<[1], [0], [0], [1], [0, 0, 1, 1], [], []>} : vector<16x128xbf16>, vector<128x128xbf16>, vector<16x128xf32> -> vector<16x128xf32>
    %cst_228 = arith.constant 9.99999974E-6 : f32
    %578 = vector.broadcast %cst_228 : f32 to vector<16x128xf32>
    %579 = arith.addf %577, %578 : vector<16x128xf32>
    %580 = math.rsqrt %579 : vector<16x128xf32>
    %581 = arith.mulf %574, %580 : vector<16x128xf32>
    %c2_229 = arith.constant 2 : index
    %c0_230 = arith.constant 0 : index
    %582 = vector.load %arg5[%c2_229, %c0_230] : memref<24x384xf32, #tpu.memory_space<vmem>>, vector<1x384xf32>
    %583 = vector.extract_strided_slice %582 {offsets = [0, 0], sizes = [1, 128], strides = [1, 1]} : vector<1x384xf32> to vector<1x128xf32>
    %584 = vector.broadcast %583 : vector<1x128xf32> to vector<16x128xf32>
    %585 = arith.mulf %581, %584 : vector<16x128xf32>
    %c3_231 = arith.constant 3 : index
    %c0_232 = arith.constant 0 : index
    %586 = vector.load %arg5[%c3_231, %c0_232] : memref<24x384xf32, #tpu.memory_space<vmem>>, vector<1x384xf32>
    %587 = vector.extract_strided_slice %586 {offsets = [0, 0], sizes = [1, 128], strides = [1, 1]} : vector<1x384xf32> to vector<1x128xf32>
    %588 = vector.broadcast %587 : vector<1x128xf32> to vector<16x128xf32>
    %589 = arith.addf %585, %588 : vector<16x128xf32>
    %c384_233 = arith.constant 384 : index
    %c0_234 = arith.constant 0 : index
    %590 = vector.load %arg4[%c384_233, %c0_234] : memref<1312x128xbf16, #tpu.memory_space<vmem>>, vector<128x64xbf16>
    %591 = arith.truncf %589 : vector<16x128xf32> to vector<16x128xbf16>
    %cst_235 = arith.constant dense<0.000000e+00> : vector<16x64xf32>
    %592 = tpu.matmul %591, %590, %cst_235 {dimension_numbers = #tpu.dot_dimension_numbers<[1], [0], [0], [1], [0, 0, 1, 1], [], []>} : vector<16x128xbf16>, vector<128x64xbf16>, vector<16x64xf32> -> vector<16x64xf32>
    %c4_236 = arith.constant 4 : index
    %c0_237 = arith.constant 0 : index
    %593 = vector.load %arg5[%c4_236, %c0_237] : memref<24x384xf32, #tpu.memory_space<vmem>>, vector<1x384xf32>
    %594 = vector.extract_strided_slice %593 {offsets = [0, 0], sizes = [1, 64], strides = [1, 1]} : vector<1x384xf32> to vector<1x64xf32>
    %595 = vector.broadcast %594 : vector<1x64xf32> to vector<16x64xf32>
    %596 = arith.addf %592, %595 : vector<16x64xf32>
    %cst_238 = arith.constant 0.000000e+00 : f32
    %597 = vector.broadcast %cst_238 : f32 to vector<16x64xf32>
    %598 = arith.maximumf %596, %597 : vector<16x64xf32>
    %c512_239 = arith.constant 512 : index
    %c0_240 = arith.constant 0 : index
    %599 = vector.load %arg4[%c512_239, %c0_240] : memref<1312x128xbf16, #tpu.memory_space<vmem>>, vector<64x128xbf16>
    %600 = arith.truncf %598 : vector<16x64xf32> to vector<16x64xbf16>
    %cst_241 = arith.constant dense<0.000000e+00> : vector<16x128xf32>
    %601 = tpu.matmul %600, %599, %cst_241 {dimension_numbers = #tpu.dot_dimension_numbers<[1], [0], [0], [1], [0, 0, 1, 1], [], []>} : vector<16x64xbf16>, vector<64x128xbf16>, vector<16x128xf32> -> vector<16x128xf32>
    %c5_242 = arith.constant 5 : index
    %c0_243 = arith.constant 0 : index
    %602 = vector.load %arg5[%c5_242, %c0_243] : memref<24x384xf32, #tpu.memory_space<vmem>>, vector<1x384xf32>
    %603 = vector.extract_strided_slice %602 {offsets = [0, 0], sizes = [1, 128], strides = [1, 1]} : vector<1x384xf32> to vector<1x128xf32>
    %604 = vector.broadcast %603 : vector<1x128xf32> to vector<16x128xf32>
    %605 = arith.addf %601, %604 : vector<16x128xf32>
    %606 = arith.addf %589, %605 : vector<16x128xf32>
    %c1056_244 = arith.constant 1056 : index
    %c0_245 = arith.constant 0 : index
    %607 = vector.load %arg4[%c1056_244, %c0_245] : memref<1312x128xbf16, #tpu.memory_space<vmem>>, vector<128x128xbf16>
    %608 = arith.truncf %606 : vector<16x128xf32> to vector<16x128xbf16>
    %cst_246 = arith.constant dense<0.000000e+00> : vector<16x128xf32>
    %609 = tpu.matmul %608, %607, %cst_246 {dimension_numbers = #tpu.dot_dimension_numbers<[1], [0], [0], [1], [0, 0, 1, 1], [], []>} : vector<16x128xbf16>, vector<128x128xbf16>, vector<16x128xf32> -> vector<16x128xf32>
    %610 = arith.subf %606, %609 : vector<16x128xf32>
    %611 = arith.mulf %610, %610 : vector<16x128xf32>
    %612 = arith.truncf %611 : vector<16x128xf32> to vector<16x128xbf16>
    %cst_247 = arith.constant dense<0.000000e+00> : vector<16x128xf32>
    %613 = tpu.matmul %612, %607, %cst_247 {dimension_numbers = #tpu.dot_dimension_numbers<[1], [0], [0], [1], [0, 0, 1, 1], [], []>} : vector<16x128xbf16>, vector<128x128xbf16>, vector<16x128xf32> -> vector<16x128xf32>
    %cst_248 = arith.constant 9.99999974E-6 : f32
    %614 = vector.broadcast %cst_248 : f32 to vector<16x128xf32>
    %615 = arith.addf %613, %614 : vector<16x128xf32>
    %616 = math.rsqrt %615 : vector<16x128xf32>
    %617 = arith.mulf %610, %616 : vector<16x128xf32>
    %c6_249 = arith.constant 6 : index
    %c0_250 = arith.constant 0 : index
    %618 = vector.load %arg5[%c6_249, %c0_250] : memref<24x384xf32, #tpu.memory_space<vmem>>, vector<1x384xf32>
    %619 = vector.extract_strided_slice %618 {offsets = [0, 0], sizes = [1, 128], strides = [1, 1]} : vector<1x384xf32> to vector<1x128xf32>
    %620 = vector.broadcast %619 : vector<1x128xf32> to vector<16x128xf32>
    %621 = arith.mulf %617, %620 : vector<16x128xf32>
    %c7_251 = arith.constant 7 : index
    %c0_252 = arith.constant 0 : index
    %622 = vector.load %arg5[%c7_251, %c0_252] : memref<24x384xf32, #tpu.memory_space<vmem>>, vector<1x384xf32>
    %623 = vector.extract_strided_slice %622 {offsets = [0, 0], sizes = [1, 128], strides = [1, 1]} : vector<1x384xf32> to vector<1x128xf32>
    %624 = vector.broadcast %623 : vector<1x128xf32> to vector<16x128xf32>
    %625 = arith.addf %621, %624 : vector<16x128xf32>
    %c576_253 = arith.constant 576 : index
    %c0_254 = arith.constant 0 : index
    %626 = vector.load %arg4[%c576_253, %c0_254] : memref<1312x128xbf16, #tpu.memory_space<vmem>>, vector<128x64xbf16>
    %627 = arith.truncf %625 : vector<16x128xf32> to vector<16x128xbf16>
    %cst_255 = arith.constant dense<0.000000e+00> : vector<16x64xf32>
    %628 = tpu.matmul %627, %626, %cst_255 {dimension_numbers = #tpu.dot_dimension_numbers<[1], [0], [0], [1], [0, 0, 1, 1], [], []>} : vector<16x128xbf16>, vector<128x64xbf16>, vector<16x64xf32> -> vector<16x64xf32>
    %c8_256 = arith.constant 8 : index
    %c0_257 = arith.constant 0 : index
    %629 = vector.load %arg5[%c8_256, %c0_257] : memref<24x384xf32, #tpu.memory_space<vmem>>, vector<1x384xf32>
    %630 = vector.extract_strided_slice %629 {offsets = [0, 0], sizes = [1, 64], strides = [1, 1]} : vector<1x384xf32> to vector<1x64xf32>
    %631 = vector.broadcast %630 : vector<1x64xf32> to vector<16x64xf32>
    %632 = arith.addf %628, %631 : vector<16x64xf32>
    %633 = arith.negf %632 : vector<16x64xf32>
    %634 = math.exp %633 : vector<16x64xf32>
    %cst_258 = arith.constant 1.000000e+00 : f32
    %635 = vector.broadcast %cst_258 : f32 to vector<16x64xf32>
    %636 = arith.addf %635, %634 : vector<16x64xf32>
    %637 = arith.divf %635, %636 : vector<16x64xf32>
    %638 = vector.extract_strided_slice %637 {offsets = [0, 0], sizes = [16, 32], strides = [1, 1]} : vector<16x64xf32> to vector<16x32xf32>
    %639 = vector.extract_strided_slice %637 {offsets = [0, 32], sizes = [16, 32], strides = [1, 1]} : vector<16x64xf32> to vector<16x32xf32>
    %640 = arith.mulf %639, %510 : vector<16x32xf32>
    %c64_259 = arith.constant 64 : index
    %c0_260 = arith.constant 0 : index
    %641 = vector.load %arg3[%c64_259, %c0_260] : memref<128x384xbf16, #tpu.memory_space<vmem>>, vector<32x192xbf16>
    %642 = arith.truncf %640 : vector<16x32xf32> to vector<16x32xbf16>
    %cst_261 = arith.constant dense<0.000000e+00> : vector<16x192xf32>
    %643 = tpu.matmul %642, %641, %cst_261 {dimension_numbers = #tpu.dot_dimension_numbers<[1], [0], [0], [1], [0, 0, 1, 1], [], []>} : vector<16x32xbf16>, vector<32x192xbf16>, vector<16x192xf32> -> vector<16x192xf32>
    %c96_262 = arith.constant 96 : index
    %c0_263 = arith.constant 0 : index
    %644 = vector.load %arg3[%c96_262, %c0_263] : memref<128x384xbf16, #tpu.memory_space<vmem>>, vector<32x192xbf16>
    %645 = arith.truncf %514 : vector<16x32xf32> to vector<16x32xbf16>
    %cst_264 = arith.constant dense<0.000000e+00> : vector<16x192xf32>
    %646 = tpu.matmul %645, %644, %cst_264 {dimension_numbers = #tpu.dot_dimension_numbers<[1], [0], [0], [1], [0, 0, 1, 1], [], []>} : vector<16x32xbf16>, vector<32x192xbf16>, vector<16x192xf32> -> vector<16x192xf32>
    %647 = arith.addf %643, %646 : vector<16x192xf32>
    %c9_265 = arith.constant 9 : index
    %c0_266 = arith.constant 0 : index
    %648 = vector.load %arg5[%c9_265, %c0_266] : memref<24x384xf32, #tpu.memory_space<vmem>>, vector<1x384xf32>
    %649 = vector.extract_strided_slice %648 {offsets = [0, 0], sizes = [1, 192], strides = [1, 1]} : vector<1x384xf32> to vector<1x192xf32>
    %650 = vector.broadcast %649 : vector<1x192xf32> to vector<16x192xf32>
    %651 = arith.addf %647, %650 : vector<16x192xf32>
    %652 = vector.extract_strided_slice %651 {offsets = [0, 0], sizes = [16, 64], strides = [1, 1]} : vector<16x192xf32> to vector<16x64xf32>
    %653 = vector.extract_strided_slice %651 {offsets = [0, 64], sizes = [16, 64], strides = [1, 1]} : vector<16x192xf32> to vector<16x64xf32>
    %654 = vector.extract_strided_slice %651 {offsets = [0, 128], sizes = [16, 64], strides = [1, 1]} : vector<16x192xf32> to vector<16x64xf32>
    %655 = vector.extract_strided_slice %652 {offsets = [0, 0], sizes = [8, 64], strides = [1, 1]} : vector<16x64xf32> to vector<8x64xf32>
    %656 = vector.extract_strided_slice %652 {offsets = [8, 0], sizes = [8, 64], strides = [1, 1]} : vector<16x64xf32> to vector<8x64xf32>
    %657 = vector.extract_strided_slice %653 {offsets = [0, 0], sizes = [8, 64], strides = [1, 1]} : vector<16x64xf32> to vector<8x64xf32>
    %658 = vector.extract_strided_slice %653 {offsets = [8, 0], sizes = [8, 64], strides = [1, 1]} : vector<16x64xf32> to vector<8x64xf32>
    %659 = vector.extract_strided_slice %654 {offsets = [0, 0], sizes = [8, 64], strides = [1, 1]} : vector<16x64xf32> to vector<8x64xf32>
    %660 = vector.extract_strided_slice %654 {offsets = [8, 0], sizes = [8, 64], strides = [1, 1]} : vector<16x64xf32> to vector<8x64xf32>
    %661 = arith.subf %657, %658 : vector<8x64xf32>
    %662 = arith.subf %659, %660 : vector<8x64xf32>
    %c1184_267 = arith.constant 1184 : index
    %c0_268 = arith.constant 0 : index
    %663 = vector.load %arg4[%c1184_267, %c0_268] : memref<1312x128xbf16, #tpu.memory_space<vmem>>, vector<64x64xbf16>
    %664 = arith.mulf %655, %661 : vector<8x64xf32>
    %665 = arith.truncf %664 : vector<8x64xf32> to vector<8x64xbf16>
    %cst_269 = arith.constant dense<0.000000e+00> : vector<8x64xf32>
    %666 = tpu.matmul %665, %663, %cst_269 {dimension_numbers = #tpu.dot_dimension_numbers<[1], [0], [0], [1], [0, 0, 1, 1], [], []>} : vector<8x64xbf16>, vector<64x64xbf16>, vector<8x64xf32> -> vector<8x64xf32>
    %cst_270 = arith.constant 2.500000e-01 : f32
    %667 = vector.broadcast %cst_270 : f32 to vector<8x64xf32>
    %668 = arith.mulf %666, %667 : vector<8x64xf32>
    %669 = arith.negf %668 : vector<8x64xf32>
    %670 = math.exp %669 : vector<8x64xf32>
    %cst_271 = arith.constant 1.000000e+00 : f32
    %671 = vector.broadcast %cst_271 : f32 to vector<8x64xf32>
    %672 = arith.addf %671, %670 : vector<8x64xf32>
    %673 = arith.divf %671, %672 : vector<8x64xf32>
    %674 = arith.mulf %656, %661 : vector<8x64xf32>
    %675 = arith.truncf %674 : vector<8x64xf32> to vector<8x64xbf16>
    %cst_272 = arith.constant dense<0.000000e+00> : vector<8x64xf32>
    %676 = tpu.matmul %675, %663, %cst_272 {dimension_numbers = #tpu.dot_dimension_numbers<[1], [0], [0], [1], [0, 0, 1, 1], [], []>} : vector<8x64xbf16>, vector<64x64xbf16>, vector<8x64xf32> -> vector<8x64xf32>
    %cst_273 = arith.constant -2.500000e-01 : f32
    %677 = vector.broadcast %cst_273 : f32 to vector<8x64xf32>
    %678 = arith.mulf %676, %677 : vector<8x64xf32>
    %679 = arith.negf %678 : vector<8x64xf32>
    %680 = math.exp %679 : vector<8x64xf32>
    %cst_274 = arith.constant 1.000000e+00 : f32
    %681 = vector.broadcast %cst_274 : f32 to vector<8x64xf32>
    %682 = arith.addf %681, %680 : vector<8x64xf32>
    %683 = arith.divf %681, %682 : vector<8x64xf32>
    %684 = arith.mulf %673, %662 : vector<8x64xf32>
    %685 = arith.addf %660, %684 : vector<8x64xf32>
    %686 = arith.mulf %683, %662 : vector<8x64xf32>
    %687 = arith.subf %659, %686 : vector<8x64xf32>
    %688 = tpu.concatenate %685, %687 in 0 : vector<8x64xf32>, vector<8x64xf32> -> vector<16x64xf32>
    %c704_275 = arith.constant 704 : index
    %c0_276 = arith.constant 0 : index
    %689 = vector.load %arg4[%c704_275, %c0_276] : memref<1312x128xbf16, #tpu.memory_space<vmem>>, vector<64x64xbf16>
    %690 = arith.truncf %688 : vector<16x64xf32> to vector<16x64xbf16>
    %cst_277 = arith.constant dense<0.000000e+00> : vector<16x64xf32>
    %691 = tpu.matmul %690, %689, %cst_277 {dimension_numbers = #tpu.dot_dimension_numbers<[1], [0], [0], [1], [0, 0, 1, 1], [], []>} : vector<16x64xbf16>, vector<64x64xbf16>, vector<16x64xf32> -> vector<16x64xf32>
    %c10_278 = arith.constant 10 : index
    %c0_279 = arith.constant 0 : index
    %692 = vector.load %arg5[%c10_278, %c0_279] : memref<24x384xf32, #tpu.memory_space<vmem>>, vector<1x384xf32>
    %693 = vector.extract_strided_slice %692 {offsets = [0, 0], sizes = [1, 64], strides = [1, 1]} : vector<1x384xf32> to vector<1x64xf32>
    %694 = vector.broadcast %693 : vector<1x64xf32> to vector<16x64xf32>
    %695 = arith.addf %691, %694 : vector<16x64xf32>
    %696 = tpu.concatenate %640, %514 in 1 : vector<16x32xf32>, vector<16x32xf32> -> vector<16x64xf32>
    %697 = arith.addf %696, %695 : vector<16x64xf32>
    %c1248_280 = arith.constant 1248 : index
    %c0_281 = arith.constant 0 : index
    %698 = vector.load %arg4[%c1248_280, %c0_281] : memref<1312x128xbf16, #tpu.memory_space<vmem>>, vector<64x64xbf16>
    %699 = arith.truncf %697 : vector<16x64xf32> to vector<16x64xbf16>
    %cst_282 = arith.constant dense<0.000000e+00> : vector<16x64xf32>
    %700 = tpu.matmul %699, %698, %cst_282 {dimension_numbers = #tpu.dot_dimension_numbers<[1], [0], [0], [1], [0, 0, 1, 1], [], []>} : vector<16x64xbf16>, vector<64x64xbf16>, vector<16x64xf32> -> vector<16x64xf32>
    %701 = arith.subf %697, %700 : vector<16x64xf32>
    %702 = arith.mulf %701, %701 : vector<16x64xf32>
    %703 = arith.truncf %702 : vector<16x64xf32> to vector<16x64xbf16>
    %cst_283 = arith.constant dense<0.000000e+00> : vector<16x64xf32>
    %704 = tpu.matmul %703, %698, %cst_283 {dimension_numbers = #tpu.dot_dimension_numbers<[1], [0], [0], [1], [0, 0, 1, 1], [], []>} : vector<16x64xbf16>, vector<64x64xbf16>, vector<16x64xf32> -> vector<16x64xf32>
    %cst_284 = arith.constant 9.99999974E-6 : f32
    %705 = vector.broadcast %cst_284 : f32 to vector<16x64xf32>
    %706 = arith.addf %704, %705 : vector<16x64xf32>
    %707 = math.rsqrt %706 : vector<16x64xf32>
    %708 = arith.mulf %701, %707 : vector<16x64xf32>
    %c11_285 = arith.constant 11 : index
    %c0_286 = arith.constant 0 : index
    %709 = vector.load %arg5[%c11_285, %c0_286] : memref<24x384xf32, #tpu.memory_space<vmem>>, vector<1x384xf32>
    %710 = vector.extract_strided_slice %709 {offsets = [0, 0], sizes = [1, 64], strides = [1, 1]} : vector<1x384xf32> to vector<1x64xf32>
    %711 = vector.broadcast %710 : vector<1x64xf32> to vector<16x64xf32>
    %712 = arith.mulf %708, %711 : vector<16x64xf32>
    %c12_287 = arith.constant 12 : index
    %c0_288 = arith.constant 0 : index
    %713 = vector.load %arg5[%c12_287, %c0_288] : memref<24x384xf32, #tpu.memory_space<vmem>>, vector<1x384xf32>
    %714 = vector.extract_strided_slice %713 {offsets = [0, 0], sizes = [1, 64], strides = [1, 1]} : vector<1x384xf32> to vector<1x64xf32>
    %715 = vector.broadcast %714 : vector<1x64xf32> to vector<16x64xf32>
    %716 = arith.addf %712, %715 : vector<16x64xf32>
    %c768_289 = arith.constant 768 : index
    %c0_290 = arith.constant 0 : index
    %717 = vector.load %arg4[%c768_289, %c0_290] : memref<1312x128xbf16, #tpu.memory_space<vmem>>, vector<64x32xbf16>
    %718 = arith.truncf %716 : vector<16x64xf32> to vector<16x64xbf16>
    %cst_291 = arith.constant dense<0.000000e+00> : vector<16x32xf32>
    %719 = tpu.matmul %718, %717, %cst_291 {dimension_numbers = #tpu.dot_dimension_numbers<[1], [0], [0], [1], [0, 0, 1, 1], [], []>} : vector<16x64xbf16>, vector<64x32xbf16>, vector<16x32xf32> -> vector<16x32xf32>
    %c13_292 = arith.constant 13 : index
    %c0_293 = arith.constant 0 : index
    %720 = vector.load %arg5[%c13_292, %c0_293] : memref<24x384xf32, #tpu.memory_space<vmem>>, vector<1x384xf32>
    %721 = vector.extract_strided_slice %720 {offsets = [0, 0], sizes = [1, 32], strides = [1, 1]} : vector<1x384xf32> to vector<1x32xf32>
    %722 = vector.broadcast %721 : vector<1x32xf32> to vector<16x32xf32>
    %723 = arith.addf %719, %722 : vector<16x32xf32>
    %cst_294 = arith.constant 0.000000e+00 : f32
    %724 = vector.broadcast %cst_294 : f32 to vector<16x32xf32>
    %725 = arith.maximumf %723, %724 : vector<16x32xf32>
    %c832_295 = arith.constant 832 : index
    %c0_296 = arith.constant 0 : index
    %726 = vector.load %arg4[%c832_295, %c0_296] : memref<1312x128xbf16, #tpu.memory_space<vmem>>, vector<32x64xbf16>
    %727 = arith.truncf %725 : vector<16x32xf32> to vector<16x32xbf16>
    %cst_297 = arith.constant dense<0.000000e+00> : vector<16x64xf32>
    %728 = tpu.matmul %727, %726, %cst_297 {dimension_numbers = #tpu.dot_dimension_numbers<[1], [0], [0], [1], [0, 0, 1, 1], [], []>} : vector<16x32xbf16>, vector<32x64xbf16>, vector<16x64xf32> -> vector<16x64xf32>
    %c14_298 = arith.constant 14 : index
    %c0_299 = arith.constant 0 : index
    %729 = vector.load %arg5[%c14_298, %c0_299] : memref<24x384xf32, #tpu.memory_space<vmem>>, vector<1x384xf32>
    %730 = vector.extract_strided_slice %729 {offsets = [0, 0], sizes = [1, 64], strides = [1, 1]} : vector<1x384xf32> to vector<1x64xf32>
    %731 = vector.broadcast %730 : vector<1x64xf32> to vector<16x64xf32>
    %732 = arith.addf %728, %731 : vector<16x64xf32>
    %733 = arith.addf %716, %732 : vector<16x64xf32>
    %c1248_300 = arith.constant 1248 : index
    %c0_301 = arith.constant 0 : index
    %734 = vector.load %arg4[%c1248_300, %c0_301] : memref<1312x128xbf16, #tpu.memory_space<vmem>>, vector<64x64xbf16>
    %735 = arith.truncf %733 : vector<16x64xf32> to vector<16x64xbf16>
    %cst_302 = arith.constant dense<0.000000e+00> : vector<16x64xf32>
    %736 = tpu.matmul %735, %734, %cst_302 {dimension_numbers = #tpu.dot_dimension_numbers<[1], [0], [0], [1], [0, 0, 1, 1], [], []>} : vector<16x64xbf16>, vector<64x64xbf16>, vector<16x64xf32> -> vector<16x64xf32>
    %737 = arith.subf %733, %736 : vector<16x64xf32>
    %738 = arith.mulf %737, %737 : vector<16x64xf32>
    %739 = arith.truncf %738 : vector<16x64xf32> to vector<16x64xbf16>
    %cst_303 = arith.constant dense<0.000000e+00> : vector<16x64xf32>
    %740 = tpu.matmul %739, %734, %cst_303 {dimension_numbers = #tpu.dot_dimension_numbers<[1], [0], [0], [1], [0, 0, 1, 1], [], []>} : vector<16x64xbf16>, vector<64x64xbf16>, vector<16x64xf32> -> vector<16x64xf32>
    %cst_304 = arith.constant 9.99999974E-6 : f32
    %741 = vector.broadcast %cst_304 : f32 to vector<16x64xf32>
    %742 = arith.addf %740, %741 : vector<16x64xf32>
    %743 = math.rsqrt %742 : vector<16x64xf32>
    %744 = arith.mulf %737, %743 : vector<16x64xf32>
    %c15_305 = arith.constant 15 : index
    %c0_306 = arith.constant 0 : index
    %745 = vector.load %arg5[%c15_305, %c0_306] : memref<24x384xf32, #tpu.memory_space<vmem>>, vector<1x384xf32>
    %746 = vector.extract_strided_slice %745 {offsets = [0, 0], sizes = [1, 64], strides = [1, 1]} : vector<1x384xf32> to vector<1x64xf32>
    %747 = vector.broadcast %746 : vector<1x64xf32> to vector<16x64xf32>
    %748 = arith.mulf %744, %747 : vector<16x64xf32>
    %c16_307 = arith.constant 16 : index
    %c0_308 = arith.constant 0 : index
    %749 = vector.load %arg5[%c16_307, %c0_308] : memref<24x384xf32, #tpu.memory_space<vmem>>, vector<1x384xf32>
    %750 = vector.extract_strided_slice %749 {offsets = [0, 0], sizes = [1, 64], strides = [1, 1]} : vector<1x384xf32> to vector<1x64xf32>
    %751 = vector.broadcast %750 : vector<1x64xf32> to vector<16x64xf32>
    %752 = arith.addf %748, %751 : vector<16x64xf32>
    %c864_309 = arith.constant 864 : index
    %c0_310 = arith.constant 0 : index
    %753 = vector.load %arg4[%c864_309, %c0_310] : memref<1312x128xbf16, #tpu.memory_space<vmem>>, vector<64x32xbf16>
    %754 = arith.truncf %752 : vector<16x64xf32> to vector<16x64xbf16>
    %cst_311 = arith.constant dense<0.000000e+00> : vector<16x32xf32>
    %755 = tpu.matmul %754, %753, %cst_311 {dimension_numbers = #tpu.dot_dimension_numbers<[1], [0], [0], [1], [0, 0, 1, 1], [], []>} : vector<16x64xbf16>, vector<64x32xbf16>, vector<16x32xf32> -> vector<16x32xf32>
    %c17_312 = arith.constant 17 : index
    %c0_313 = arith.constant 0 : index
    %756 = vector.load %arg5[%c17_312, %c0_313] : memref<24x384xf32, #tpu.memory_space<vmem>>, vector<1x384xf32>
    %757 = vector.extract_strided_slice %756 {offsets = [0, 0], sizes = [1, 32], strides = [1, 1]} : vector<1x384xf32> to vector<1x32xf32>
    %758 = vector.broadcast %757 : vector<1x32xf32> to vector<16x32xf32>
    %759 = arith.addf %755, %758 : vector<16x32xf32>
    %760 = math.tanh %759 : vector<16x32xf32>
    %cst_314 = arith.constant 1.000000e+00 : f32
    %761 = vector.broadcast %cst_314 : f32 to vector<16x32xf32>
    %762 = arith.subf %761, %638 : vector<16x32xf32>
    %763 = arith.mulf %762, %510 : vector<16x32xf32>
    %764 = arith.mulf %638, %760 : vector<16x32xf32>
    %765 = arith.addf %763, %764 : vector<16x32xf32>
    %c2_315 = arith.constant 2 : index
    %c0_316 = arith.constant 0 : index
    %c0_317 = arith.constant 0 : index
    %766 = vector.load %arg6[%c2_315, %c0_316, %c0_317] : memref<4x16x32xf32, #tpu.memory_space<vmem>>, vector<1x16x32xf32>
    %767 = vector.shape_cast %766 : vector<1x16x32xf32> to vector<16x32xf32>
    %768 = vector.shape_cast %765 : vector<16x32xf32> to vector<1x16x32xf32>
    tpu.vector_store %arg6[%c2_315, %c0_316, %c0_317], %768 {strides = array<i32>} : memref<4x16x32xf32, #tpu.memory_space<vmem>>, vector<1x16x32xf32>,
    %769 = vector.extract_strided_slice %2 {offsets = [48, 0], sizes = [16, 32], strides = [1, 1]} : vector<64x32xf32> to vector<16x32xf32>
    %c0_318 = arith.constant 0 : index
    %c0_319 = arith.constant 0 : index
    %770 = vector.load %arg3[%c0_318, %c0_319] : memref<128x384xbf16, #tpu.memory_space<vmem>>, vector<32x384xbf16>
    %771 = arith.truncf %765 : vector<16x32xf32> to vector<16x32xbf16>
    %cst_320 = arith.constant dense<0.000000e+00> : vector<16x384xf32>
    %772 = tpu.matmul %771, %770, %cst_320 {dimension_numbers = #tpu.dot_dimension_numbers<[1], [0], [0], [1], [0, 0, 1, 1], [], []>} : vector<16x32xbf16>, vector<32x384xbf16>, vector<16x384xf32> -> vector<16x384xf32>
    %c32_321 = arith.constant 32 : index
    %c0_322 = arith.constant 0 : index
    %773 = vector.load %arg3[%c32_321, %c0_322] : memref<128x384xbf16, #tpu.memory_space<vmem>>, vector<32x384xbf16>
    %774 = arith.truncf %769 : vector<16x32xf32> to vector<16x32xbf16>
    %cst_323 = arith.constant dense<0.000000e+00> : vector<16x384xf32>
    %775 = tpu.matmul %774, %773, %cst_323 {dimension_numbers = #tpu.dot_dimension_numbers<[1], [0], [0], [1], [0, 0, 1, 1], [], []>} : vector<16x32xbf16>, vector<32x384xbf16>, vector<16x384xf32> -> vector<16x384xf32>
    %776 = arith.addf %772, %775 : vector<16x384xf32>
    %c0_324 = arith.constant 0 : index
    %c0_325 = arith.constant 0 : index
    %777 = vector.load %arg5[%c0_324, %c0_325] : memref<24x384xf32, #tpu.memory_space<vmem>>, vector<1x384xf32>
    %778 = vector.broadcast %777 : vector<1x384xf32> to vector<16x384xf32>
    %779 = arith.addf %776, %778 : vector<16x384xf32>
    %780 = vector.extract_strided_slice %779 {offsets = [0, 0], sizes = [16, 128], strides = [1, 1]} : vector<16x384xf32> to vector<16x128xf32>
    %781 = vector.extract_strided_slice %779 {offsets = [0, 128], sizes = [16, 128], strides = [1, 1]} : vector<16x384xf32> to vector<16x128xf32>
    %782 = vector.extract_strided_slice %779 {offsets = [0, 256], sizes = [16, 128], strides = [1, 1]} : vector<16x384xf32> to vector<16x128xf32>
    %783 = vector.extract_strided_slice %780 {offsets = [0, 0], sizes = [8, 128], strides = [1, 1]} : vector<16x128xf32> to vector<8x128xf32>
    %784 = vector.extract_strided_slice %780 {offsets = [8, 0], sizes = [8, 128], strides = [1, 1]} : vector<16x128xf32> to vector<8x128xf32>
    %785 = vector.extract_strided_slice %781 {offsets = [0, 0], sizes = [8, 128], strides = [1, 1]} : vector<16x128xf32> to vector<8x128xf32>
    %786 = vector.extract_strided_slice %781 {offsets = [8, 0], sizes = [8, 128], strides = [1, 1]} : vector<16x128xf32> to vector<8x128xf32>
    %787 = vector.extract_strided_slice %782 {offsets = [0, 0], sizes = [8, 128], strides = [1, 1]} : vector<16x128xf32> to vector<8x128xf32>
    %788 = vector.extract_strided_slice %782 {offsets = [8, 0], sizes = [8, 128], strides = [1, 1]} : vector<16x128xf32> to vector<8x128xf32>
    %789 = arith.subf %785, %786 : vector<8x128xf32>
    %790 = arith.subf %787, %788 : vector<8x128xf32>
    %c928_326 = arith.constant 928 : index
    %c0_327 = arith.constant 0 : index
    %791 = vector.load %arg4[%c928_326, %c0_327] : memref<1312x128xbf16, #tpu.memory_space<vmem>>, vector<128x128xbf16>
    %792 = arith.mulf %783, %789 : vector<8x128xf32>
    %793 = arith.truncf %792 : vector<8x128xf32> to vector<8x128xbf16>
    %cst_328 = arith.constant dense<0.000000e+00> : vector<8x128xf32>
    %794 = tpu.matmul %793, %791, %cst_328 {dimension_numbers = #tpu.dot_dimension_numbers<[1], [0], [0], [1], [0, 0, 1, 1], [], []>} : vector<8x128xbf16>, vector<128x128xbf16>, vector<8x128xf32> -> vector<8x128xf32>
    %cst_329 = arith.constant 2.500000e-01 : f32
    %795 = vector.broadcast %cst_329 : f32 to vector<8x128xf32>
    %796 = arith.mulf %794, %795 : vector<8x128xf32>
    %797 = arith.negf %796 : vector<8x128xf32>
    %798 = math.exp %797 : vector<8x128xf32>
    %cst_330 = arith.constant 1.000000e+00 : f32
    %799 = vector.broadcast %cst_330 : f32 to vector<8x128xf32>
    %800 = arith.addf %799, %798 : vector<8x128xf32>
    %801 = arith.divf %799, %800 : vector<8x128xf32>
    %802 = arith.mulf %784, %789 : vector<8x128xf32>
    %803 = arith.truncf %802 : vector<8x128xf32> to vector<8x128xbf16>
    %cst_331 = arith.constant dense<0.000000e+00> : vector<8x128xf32>
    %804 = tpu.matmul %803, %791, %cst_331 {dimension_numbers = #tpu.dot_dimension_numbers<[1], [0], [0], [1], [0, 0, 1, 1], [], []>} : vector<8x128xbf16>, vector<128x128xbf16>, vector<8x128xf32> -> vector<8x128xf32>
    %cst_332 = arith.constant -2.500000e-01 : f32
    %805 = vector.broadcast %cst_332 : f32 to vector<8x128xf32>
    %806 = arith.mulf %804, %805 : vector<8x128xf32>
    %807 = arith.negf %806 : vector<8x128xf32>
    %808 = math.exp %807 : vector<8x128xf32>
    %cst_333 = arith.constant 1.000000e+00 : f32
    %809 = vector.broadcast %cst_333 : f32 to vector<8x128xf32>
    %810 = arith.addf %809, %808 : vector<8x128xf32>
    %811 = arith.divf %809, %810 : vector<8x128xf32>
    %812 = arith.mulf %801, %790 : vector<8x128xf32>
    %813 = arith.addf %788, %812 : vector<8x128xf32>
    %814 = arith.mulf %811, %790 : vector<8x128xf32>
    %815 = arith.subf %787, %814 : vector<8x128xf32>
    %816 = tpu.concatenate %813, %815 in 0 : vector<8x128xf32>, vector<8x128xf32> -> vector<16x128xf32>
    %c256_334 = arith.constant 256 : index
    %c0_335 = arith.constant 0 : index
    %817 = vector.load %arg4[%c256_334, %c0_335] : memref<1312x128xbf16, #tpu.memory_space<vmem>>, vector<128x128xbf16>
    %818 = arith.truncf %816 : vector<16x128xf32> to vector<16x128xbf16>
    %cst_336 = arith.constant dense<0.000000e+00> : vector<16x128xf32>
    %819 = tpu.matmul %818, %817, %cst_336 {dimension_numbers = #tpu.dot_dimension_numbers<[1], [0], [0], [1], [0, 0, 1, 1], [], []>} : vector<16x128xbf16>, vector<128x128xbf16>, vector<16x128xf32> -> vector<16x128xf32>
    %c1_337 = arith.constant 1 : index
    %c0_338 = arith.constant 0 : index
    %820 = vector.load %arg5[%c1_337, %c0_338] : memref<24x384xf32, #tpu.memory_space<vmem>>, vector<1x384xf32>
    %821 = vector.extract_strided_slice %820 {offsets = [0, 0], sizes = [1, 128], strides = [1, 1]} : vector<1x384xf32> to vector<1x128xf32>
    %822 = vector.broadcast %821 : vector<1x128xf32> to vector<16x128xf32>
    %823 = arith.addf %819, %822 : vector<16x128xf32>
    %824 = tpu.concatenate %765, %769, %765, %769 in 1 : vector<16x32xf32>, vector<16x32xf32>, vector<16x32xf32>, vector<16x32xf32> -> vector<16x128xf32>
    %825 = arith.addf %824, %823 : vector<16x128xf32>
    %c1056_339 = arith.constant 1056 : index
    %c0_340 = arith.constant 0 : index
    %826 = vector.load %arg4[%c1056_339, %c0_340] : memref<1312x128xbf16, #tpu.memory_space<vmem>>, vector<128x128xbf16>
    %827 = arith.truncf %825 : vector<16x128xf32> to vector<16x128xbf16>
    %cst_341 = arith.constant dense<0.000000e+00> : vector<16x128xf32>
    %828 = tpu.matmul %827, %826, %cst_341 {dimension_numbers = #tpu.dot_dimension_numbers<[1], [0], [0], [1], [0, 0, 1, 1], [], []>} : vector<16x128xbf16>, vector<128x128xbf16>, vector<16x128xf32> -> vector<16x128xf32>
    %829 = arith.subf %825, %828 : vector<16x128xf32>
    %830 = arith.mulf %829, %829 : vector<16x128xf32>
    %831 = arith.truncf %830 : vector<16x128xf32> to vector<16x128xbf16>
    %cst_342 = arith.constant dense<0.000000e+00> : vector<16x128xf32>
    %832 = tpu.matmul %831, %826, %cst_342 {dimension_numbers = #tpu.dot_dimension_numbers<[1], [0], [0], [1], [0, 0, 1, 1], [], []>} : vector<16x128xbf16>, vector<128x128xbf16>, vector<16x128xf32> -> vector<16x128xf32>
    %cst_343 = arith.constant 9.99999974E-6 : f32
    %833 = vector.broadcast %cst_343 : f32 to vector<16x128xf32>
    %834 = arith.addf %832, %833 : vector<16x128xf32>
    %835 = math.rsqrt %834 : vector<16x128xf32>
    %836 = arith.mulf %829, %835 : vector<16x128xf32>
    %c2_344 = arith.constant 2 : index
    %c0_345 = arith.constant 0 : index
    %837 = vector.load %arg5[%c2_344, %c0_345] : memref<24x384xf32, #tpu.memory_space<vmem>>, vector<1x384xf32>
    %838 = vector.extract_strided_slice %837 {offsets = [0, 0], sizes = [1, 128], strides = [1, 1]} : vector<1x384xf32> to vector<1x128xf32>
    %839 = vector.broadcast %838 : vector<1x128xf32> to vector<16x128xf32>
    %840 = arith.mulf %836, %839 : vector<16x128xf32>
    %c3_346 = arith.constant 3 : index
    %c0_347 = arith.constant 0 : index
    %841 = vector.load %arg5[%c3_346, %c0_347] : memref<24x384xf32, #tpu.memory_space<vmem>>, vector<1x384xf32>
    %842 = vector.extract_strided_slice %841 {offsets = [0, 0], sizes = [1, 128], strides = [1, 1]} : vector<1x384xf32> to vector<1x128xf32>
    %843 = vector.broadcast %842 : vector<1x128xf32> to vector<16x128xf32>
    %844 = arith.addf %840, %843 : vector<16x128xf32>
    %c384_348 = arith.constant 384 : index
    %c0_349 = arith.constant 0 : index
    %845 = vector.load %arg4[%c384_348, %c0_349] : memref<1312x128xbf16, #tpu.memory_space<vmem>>, vector<128x64xbf16>
    %846 = arith.truncf %844 : vector<16x128xf32> to vector<16x128xbf16>
    %cst_350 = arith.constant dense<0.000000e+00> : vector<16x64xf32>
    %847 = tpu.matmul %846, %845, %cst_350 {dimension_numbers = #tpu.dot_dimension_numbers<[1], [0], [0], [1], [0, 0, 1, 1], [], []>} : vector<16x128xbf16>, vector<128x64xbf16>, vector<16x64xf32> -> vector<16x64xf32>
    %c4_351 = arith.constant 4 : index
    %c0_352 = arith.constant 0 : index
    %848 = vector.load %arg5[%c4_351, %c0_352] : memref<24x384xf32, #tpu.memory_space<vmem>>, vector<1x384xf32>
    %849 = vector.extract_strided_slice %848 {offsets = [0, 0], sizes = [1, 64], strides = [1, 1]} : vector<1x384xf32> to vector<1x64xf32>
    %850 = vector.broadcast %849 : vector<1x64xf32> to vector<16x64xf32>
    %851 = arith.addf %847, %850 : vector<16x64xf32>
    %cst_353 = arith.constant 0.000000e+00 : f32
    %852 = vector.broadcast %cst_353 : f32 to vector<16x64xf32>
    %853 = arith.maximumf %851, %852 : vector<16x64xf32>
    %c512_354 = arith.constant 512 : index
    %c0_355 = arith.constant 0 : index
    %854 = vector.load %arg4[%c512_354, %c0_355] : memref<1312x128xbf16, #tpu.memory_space<vmem>>, vector<64x128xbf16>
    %855 = arith.truncf %853 : vector<16x64xf32> to vector<16x64xbf16>
    %cst_356 = arith.constant dense<0.000000e+00> : vector<16x128xf32>
    %856 = tpu.matmul %855, %854, %cst_356 {dimension_numbers = #tpu.dot_dimension_numbers<[1], [0], [0], [1], [0, 0, 1, 1], [], []>} : vector<16x64xbf16>, vector<64x128xbf16>, vector<16x128xf32> -> vector<16x128xf32>
    %c5_357 = arith.constant 5 : index
    %c0_358 = arith.constant 0 : index
    %857 = vector.load %arg5[%c5_357, %c0_358] : memref<24x384xf32, #tpu.memory_space<vmem>>, vector<1x384xf32>
    %858 = vector.extract_strided_slice %857 {offsets = [0, 0], sizes = [1, 128], strides = [1, 1]} : vector<1x384xf32> to vector<1x128xf32>
    %859 = vector.broadcast %858 : vector<1x128xf32> to vector<16x128xf32>
    %860 = arith.addf %856, %859 : vector<16x128xf32>
    %861 = arith.addf %844, %860 : vector<16x128xf32>
    %c1056_359 = arith.constant 1056 : index
    %c0_360 = arith.constant 0 : index
    %862 = vector.load %arg4[%c1056_359, %c0_360] : memref<1312x128xbf16, #tpu.memory_space<vmem>>, vector<128x128xbf16>
    %863 = arith.truncf %861 : vector<16x128xf32> to vector<16x128xbf16>
    %cst_361 = arith.constant dense<0.000000e+00> : vector<16x128xf32>
    %864 = tpu.matmul %863, %862, %cst_361 {dimension_numbers = #tpu.dot_dimension_numbers<[1], [0], [0], [1], [0, 0, 1, 1], [], []>} : vector<16x128xbf16>, vector<128x128xbf16>, vector<16x128xf32> -> vector<16x128xf32>
    %865 = arith.subf %861, %864 : vector<16x128xf32>
    %866 = arith.mulf %865, %865 : vector<16x128xf32>
    %867 = arith.truncf %866 : vector<16x128xf32> to vector<16x128xbf16>
    %cst_362 = arith.constant dense<0.000000e+00> : vector<16x128xf32>
    %868 = tpu.matmul %867, %862, %cst_362 {dimension_numbers = #tpu.dot_dimension_numbers<[1], [0], [0], [1], [0, 0, 1, 1], [], []>} : vector<16x128xbf16>, vector<128x128xbf16>, vector<16x128xf32> -> vector<16x128xf32>
    %cst_363 = arith.constant 9.99999974E-6 : f32
    %869 = vector.broadcast %cst_363 : f32 to vector<16x128xf32>
    %870 = arith.addf %868, %869 : vector<16x128xf32>
    %871 = math.rsqrt %870 : vector<16x128xf32>
    %872 = arith.mulf %865, %871 : vector<16x128xf32>
    %c6_364 = arith.constant 6 : index
    %c0_365 = arith.constant 0 : index
    %873 = vector.load %arg5[%c6_364, %c0_365] : memref<24x384xf32, #tpu.memory_space<vmem>>, vector<1x384xf32>
    %874 = vector.extract_strided_slice %873 {offsets = [0, 0], sizes = [1, 128], strides = [1, 1]} : vector<1x384xf32> to vector<1x128xf32>
    %875 = vector.broadcast %874 : vector<1x128xf32> to vector<16x128xf32>
    %876 = arith.mulf %872, %875 : vector<16x128xf32>
    %c7_366 = arith.constant 7 : index
    %c0_367 = arith.constant 0 : index
    %877 = vector.load %arg5[%c7_366, %c0_367] : memref<24x384xf32, #tpu.memory_space<vmem>>, vector<1x384xf32>
    %878 = vector.extract_strided_slice %877 {offsets = [0, 0], sizes = [1, 128], strides = [1, 1]} : vector<1x384xf32> to vector<1x128xf32>
    %879 = vector.broadcast %878 : vector<1x128xf32> to vector<16x128xf32>
    %880 = arith.addf %876, %879 : vector<16x128xf32>
    %c576_368 = arith.constant 576 : index
    %c0_369 = arith.constant 0 : index
    %881 = vector.load %arg4[%c576_368, %c0_369] : memref<1312x128xbf16, #tpu.memory_space<vmem>>, vector<128x64xbf16>
    %882 = arith.truncf %880 : vector<16x128xf32> to vector<16x128xbf16>
    %cst_370 = arith.constant dense<0.000000e+00> : vector<16x64xf32>
    %883 = tpu.matmul %882, %881, %cst_370 {dimension_numbers = #tpu.dot_dimension_numbers<[1], [0], [0], [1], [0, 0, 1, 1], [], []>} : vector<16x128xbf16>, vector<128x64xbf16>, vector<16x64xf32> -> vector<16x64xf32>
    %c8_371 = arith.constant 8 : index
    %c0_372 = arith.constant 0 : index
    %884 = vector.load %arg5[%c8_371, %c0_372] : memref<24x384xf32, #tpu.memory_space<vmem>>, vector<1x384xf32>
    %885 = vector.extract_strided_slice %884 {offsets = [0, 0], sizes = [1, 64], strides = [1, 1]} : vector<1x384xf32> to vector<1x64xf32>
    %886 = vector.broadcast %885 : vector<1x64xf32> to vector<16x64xf32>
    %887 = arith.addf %883, %886 : vector<16x64xf32>
    %888 = arith.negf %887 : vector<16x64xf32>
    %889 = math.exp %888 : vector<16x64xf32>
    %cst_373 = arith.constant 1.000000e+00 : f32
    %890 = vector.broadcast %cst_373 : f32 to vector<16x64xf32>
    %891 = arith.addf %890, %889 : vector<16x64xf32>
    %892 = arith.divf %890, %891 : vector<16x64xf32>
    %893 = vector.extract_strided_slice %892 {offsets = [0, 0], sizes = [16, 32], strides = [1, 1]} : vector<16x64xf32> to vector<16x32xf32>
    %894 = vector.extract_strided_slice %892 {offsets = [0, 32], sizes = [16, 32], strides = [1, 1]} : vector<16x64xf32> to vector<16x32xf32>
    %895 = arith.mulf %894, %765 : vector<16x32xf32>
    %c64_374 = arith.constant 64 : index
    %c0_375 = arith.constant 0 : index
    %896 = vector.load %arg3[%c64_374, %c0_375] : memref<128x384xbf16, #tpu.memory_space<vmem>>, vector<32x192xbf16>
    %897 = arith.truncf %895 : vector<16x32xf32> to vector<16x32xbf16>
    %cst_376 = arith.constant dense<0.000000e+00> : vector<16x192xf32>
    %898 = tpu.matmul %897, %896, %cst_376 {dimension_numbers = #tpu.dot_dimension_numbers<[1], [0], [0], [1], [0, 0, 1, 1], [], []>} : vector<16x32xbf16>, vector<32x192xbf16>, vector<16x192xf32> -> vector<16x192xf32>
    %c96_377 = arith.constant 96 : index
    %c0_378 = arith.constant 0 : index
    %899 = vector.load %arg3[%c96_377, %c0_378] : memref<128x384xbf16, #tpu.memory_space<vmem>>, vector<32x192xbf16>
    %900 = arith.truncf %769 : vector<16x32xf32> to vector<16x32xbf16>
    %cst_379 = arith.constant dense<0.000000e+00> : vector<16x192xf32>
    %901 = tpu.matmul %900, %899, %cst_379 {dimension_numbers = #tpu.dot_dimension_numbers<[1], [0], [0], [1], [0, 0, 1, 1], [], []>} : vector<16x32xbf16>, vector<32x192xbf16>, vector<16x192xf32> -> vector<16x192xf32>
    %902 = arith.addf %898, %901 : vector<16x192xf32>
    %c9_380 = arith.constant 9 : index
    %c0_381 = arith.constant 0 : index
    %903 = vector.load %arg5[%c9_380, %c0_381] : memref<24x384xf32, #tpu.memory_space<vmem>>, vector<1x384xf32>
    %904 = vector.extract_strided_slice %903 {offsets = [0, 0], sizes = [1, 192], strides = [1, 1]} : vector<1x384xf32> to vector<1x192xf32>
    %905 = vector.broadcast %904 : vector<1x192xf32> to vector<16x192xf32>
    %906 = arith.addf %902, %905 : vector<16x192xf32>
    %907 = vector.extract_strided_slice %906 {offsets = [0, 0], sizes = [16, 64], strides = [1, 1]} : vector<16x192xf32> to vector<16x64xf32>
    %908 = vector.extract_strided_slice %906 {offsets = [0, 64], sizes = [16, 64], strides = [1, 1]} : vector<16x192xf32> to vector<16x64xf32>
    %909 = vector.extract_strided_slice %906 {offsets = [0, 128], sizes = [16, 64], strides = [1, 1]} : vector<16x192xf32> to vector<16x64xf32>
    %910 = vector.extract_strided_slice %907 {offsets = [0, 0], sizes = [8, 64], strides = [1, 1]} : vector<16x64xf32> to vector<8x64xf32>
    %911 = vector.extract_strided_slice %907 {offsets = [8, 0], sizes = [8, 64], strides = [1, 1]} : vector<16x64xf32> to vector<8x64xf32>
    %912 = vector.extract_strided_slice %908 {offsets = [0, 0], sizes = [8, 64], strides = [1, 1]} : vector<16x64xf32> to vector<8x64xf32>
    %913 = vector.extract_strided_slice %908 {offsets = [8, 0], sizes = [8, 64], strides = [1, 1]} : vector<16x64xf32> to vector<8x64xf32>
    %914 = vector.extract_strided_slice %909 {offsets = [0, 0], sizes = [8, 64], strides = [1, 1]} : vector<16x64xf32> to vector<8x64xf32>
    %915 = vector.extract_strided_slice %909 {offsets = [8, 0], sizes = [8, 64], strides = [1, 1]} : vector<16x64xf32> to vector<8x64xf32>
    %916 = arith.subf %912, %913 : vector<8x64xf32>
    %917 = arith.subf %914, %915 : vector<8x64xf32>
    %c1184_382 = arith.constant 1184 : index
    %c0_383 = arith.constant 0 : index
    %918 = vector.load %arg4[%c1184_382, %c0_383] : memref<1312x128xbf16, #tpu.memory_space<vmem>>, vector<64x64xbf16>
    %919 = arith.mulf %910, %916 : vector<8x64xf32>
    %920 = arith.truncf %919 : vector<8x64xf32> to vector<8x64xbf16>
    %cst_384 = arith.constant dense<0.000000e+00> : vector<8x64xf32>
    %921 = tpu.matmul %920, %918, %cst_384 {dimension_numbers = #tpu.dot_dimension_numbers<[1], [0], [0], [1], [0, 0, 1, 1], [], []>} : vector<8x64xbf16>, vector<64x64xbf16>, vector<8x64xf32> -> vector<8x64xf32>
    %cst_385 = arith.constant 2.500000e-01 : f32
    %922 = vector.broadcast %cst_385 : f32 to vector<8x64xf32>
    %923 = arith.mulf %921, %922 : vector<8x64xf32>
    %924 = arith.negf %923 : vector<8x64xf32>
    %925 = math.exp %924 : vector<8x64xf32>
    %cst_386 = arith.constant 1.000000e+00 : f32
    %926 = vector.broadcast %cst_386 : f32 to vector<8x64xf32>
    %927 = arith.addf %926, %925 : vector<8x64xf32>
    %928 = arith.divf %926, %927 : vector<8x64xf32>
    %929 = arith.mulf %911, %916 : vector<8x64xf32>
    %930 = arith.truncf %929 : vector<8x64xf32> to vector<8x64xbf16>
    %cst_387 = arith.constant dense<0.000000e+00> : vector<8x64xf32>
    %931 = tpu.matmul %930, %918, %cst_387 {dimension_numbers = #tpu.dot_dimension_numbers<[1], [0], [0], [1], [0, 0, 1, 1], [], []>} : vector<8x64xbf16>, vector<64x64xbf16>, vector<8x64xf32> -> vector<8x64xf32>
    %cst_388 = arith.constant -2.500000e-01 : f32
    %932 = vector.broadcast %cst_388 : f32 to vector<8x64xf32>
    %933 = arith.mulf %931, %932 : vector<8x64xf32>
    %934 = arith.negf %933 : vector<8x64xf32>
    %935 = math.exp %934 : vector<8x64xf32>
    %cst_389 = arith.constant 1.000000e+00 : f32
    %936 = vector.broadcast %cst_389 : f32 to vector<8x64xf32>
    %937 = arith.addf %936, %935 : vector<8x64xf32>
    %938 = arith.divf %936, %937 : vector<8x64xf32>
    %939 = arith.mulf %928, %917 : vector<8x64xf32>
    %940 = arith.addf %915, %939 : vector<8x64xf32>
    %941 = arith.mulf %938, %917 : vector<8x64xf32>
    %942 = arith.subf %914, %941 : vector<8x64xf32>
    %943 = tpu.concatenate %940, %942 in 0 : vector<8x64xf32>, vector<8x64xf32> -> vector<16x64xf32>
    %c704_390 = arith.constant 704 : index
    %c0_391 = arith.constant 0 : index
    %944 = vector.load %arg4[%c704_390, %c0_391] : memref<1312x128xbf16, #tpu.memory_space<vmem>>, vector<64x64xbf16>
    %945 = arith.truncf %943 : vector<16x64xf32> to vector<16x64xbf16>
    %cst_392 = arith.constant dense<0.000000e+00> : vector<16x64xf32>
    %946 = tpu.matmul %945, %944, %cst_392 {dimension_numbers = #tpu.dot_dimension_numbers<[1], [0], [0], [1], [0, 0, 1, 1], [], []>} : vector<16x64xbf16>, vector<64x64xbf16>, vector<16x64xf32> -> vector<16x64xf32>
    %c10_393 = arith.constant 10 : index
    %c0_394 = arith.constant 0 : index
    %947 = vector.load %arg5[%c10_393, %c0_394] : memref<24x384xf32, #tpu.memory_space<vmem>>, vector<1x384xf32>
    %948 = vector.extract_strided_slice %947 {offsets = [0, 0], sizes = [1, 64], strides = [1, 1]} : vector<1x384xf32> to vector<1x64xf32>
    %949 = vector.broadcast %948 : vector<1x64xf32> to vector<16x64xf32>
    %950 = arith.addf %946, %949 : vector<16x64xf32>
    %951 = tpu.concatenate %895, %769 in 1 : vector<16x32xf32>, vector<16x32xf32> -> vector<16x64xf32>
    %952 = arith.addf %951, %950 : vector<16x64xf32>
    %c1248_395 = arith.constant 1248 : index
    %c0_396 = arith.constant 0 : index
    %953 = vector.load %arg4[%c1248_395, %c0_396] : memref<1312x128xbf16, #tpu.memory_space<vmem>>, vector<64x64xbf16>
    %954 = arith.truncf %952 : vector<16x64xf32> to vector<16x64xbf16>
    %cst_397 = arith.constant dense<0.000000e+00> : vector<16x64xf32>
    %955 = tpu.matmul %954, %953, %cst_397 {dimension_numbers = #tpu.dot_dimension_numbers<[1], [0], [0], [1], [0, 0, 1, 1], [], []>} : vector<16x64xbf16>, vector<64x64xbf16>, vector<16x64xf32> -> vector<16x64xf32>
    %956 = arith.subf %952, %955 : vector<16x64xf32>
    %957 = arith.mulf %956, %956 : vector<16x64xf32>
    %958 = arith.truncf %957 : vector<16x64xf32> to vector<16x64xbf16>
    %cst_398 = arith.constant dense<0.000000e+00> : vector<16x64xf32>
    %959 = tpu.matmul %958, %953, %cst_398 {dimension_numbers = #tpu.dot_dimension_numbers<[1], [0], [0], [1], [0, 0, 1, 1], [], []>} : vector<16x64xbf16>, vector<64x64xbf16>, vector<16x64xf32> -> vector<16x64xf32>
    %cst_399 = arith.constant 9.99999974E-6 : f32
    %960 = vector.broadcast %cst_399 : f32 to vector<16x64xf32>
    %961 = arith.addf %959, %960 : vector<16x64xf32>
    %962 = math.rsqrt %961 : vector<16x64xf32>
    %963 = arith.mulf %956, %962 : vector<16x64xf32>
    %c11_400 = arith.constant 11 : index
    %c0_401 = arith.constant 0 : index
    %964 = vector.load %arg5[%c11_400, %c0_401] : memref<24x384xf32, #tpu.memory_space<vmem>>, vector<1x384xf32>
    %965 = vector.extract_strided_slice %964 {offsets = [0, 0], sizes = [1, 64], strides = [1, 1]} : vector<1x384xf32> to vector<1x64xf32>
    %966 = vector.broadcast %965 : vector<1x64xf32> to vector<16x64xf32>
    %967 = arith.mulf %963, %966 : vector<16x64xf32>
    %c12_402 = arith.constant 12 : index
    %c0_403 = arith.constant 0 : index
    %968 = vector.load %arg5[%c12_402, %c0_403] : memref<24x384xf32, #tpu.memory_space<vmem>>, vector<1x384xf32>
    %969 = vector.extract_strided_slice %968 {offsets = [0, 0], sizes = [1, 64], strides = [1, 1]} : vector<1x384xf32> to vector<1x64xf32>
    %970 = vector.broadcast %969 : vector<1x64xf32> to vector<16x64xf32>
    %971 = arith.addf %967, %970 : vector<16x64xf32>
    %c768_404 = arith.constant 768 : index
    %c0_405 = arith.constant 0 : index
    %972 = vector.load %arg4[%c768_404, %c0_405] : memref<1312x128xbf16, #tpu.memory_space<vmem>>, vector<64x32xbf16>
    %973 = arith.truncf %971 : vector<16x64xf32> to vector<16x64xbf16>
    %cst_406 = arith.constant dense<0.000000e+00> : vector<16x32xf32>
    %974 = tpu.matmul %973, %972, %cst_406 {dimension_numbers = #tpu.dot_dimension_numbers<[1], [0], [0], [1], [0, 0, 1, 1], [], []>} : vector<16x64xbf16>, vector<64x32xbf16>, vector<16x32xf32> -> vector<16x32xf32>
    %c13_407 = arith.constant 13 : index
    %c0_408 = arith.constant 0 : index
    %975 = vector.load %arg5[%c13_407, %c0_408] : memref<24x384xf32, #tpu.memory_space<vmem>>, vector<1x384xf32>
    %976 = vector.extract_strided_slice %975 {offsets = [0, 0], sizes = [1, 32], strides = [1, 1]} : vector<1x384xf32> to vector<1x32xf32>
    %977 = vector.broadcast %976 : vector<1x32xf32> to vector<16x32xf32>
    %978 = arith.addf %974, %977 : vector<16x32xf32>
    %cst_409 = arith.constant 0.000000e+00 : f32
    %979 = vector.broadcast %cst_409 : f32 to vector<16x32xf32>
    %980 = arith.maximumf %978, %979 : vector<16x32xf32>
    %c832_410 = arith.constant 832 : index
    %c0_411 = arith.constant 0 : index
    %981 = vector.load %arg4[%c832_410, %c0_411] : memref<1312x128xbf16, #tpu.memory_space<vmem>>, vector<32x64xbf16>
    %982 = arith.truncf %980 : vector<16x32xf32> to vector<16x32xbf16>
    %cst_412 = arith.constant dense<0.000000e+00> : vector<16x64xf32>
    %983 = tpu.matmul %982, %981, %cst_412 {dimension_numbers = #tpu.dot_dimension_numbers<[1], [0], [0], [1], [0, 0, 1, 1], [], []>} : vector<16x32xbf16>, vector<32x64xbf16>, vector<16x64xf32> -> vector<16x64xf32>
    %c14_413 = arith.constant 14 : index
    %c0_414 = arith.constant 0 : index
    %984 = vector.load %arg5[%c14_413, %c0_414] : memref<24x384xf32, #tpu.memory_space<vmem>>, vector<1x384xf32>
    %985 = vector.extract_strided_slice %984 {offsets = [0, 0], sizes = [1, 64], strides = [1, 1]} : vector<1x384xf32> to vector<1x64xf32>
    %986 = vector.broadcast %985 : vector<1x64xf32> to vector<16x64xf32>
    %987 = arith.addf %983, %986 : vector<16x64xf32>
    %988 = arith.addf %971, %987 : vector<16x64xf32>
    %c1248_415 = arith.constant 1248 : index
    %c0_416 = arith.constant 0 : index
    %989 = vector.load %arg4[%c1248_415, %c0_416] : memref<1312x128xbf16, #tpu.memory_space<vmem>>, vector<64x64xbf16>
    %990 = arith.truncf %988 : vector<16x64xf32> to vector<16x64xbf16>
    %cst_417 = arith.constant dense<0.000000e+00> : vector<16x64xf32>
    %991 = tpu.matmul %990, %989, %cst_417 {dimension_numbers = #tpu.dot_dimension_numbers<[1], [0], [0], [1], [0, 0, 1, 1], [], []>} : vector<16x64xbf16>, vector<64x64xbf16>, vector<16x64xf32> -> vector<16x64xf32>
    %992 = arith.subf %988, %991 : vector<16x64xf32>
    %993 = arith.mulf %992, %992 : vector<16x64xf32>
    %994 = arith.truncf %993 : vector<16x64xf32> to vector<16x64xbf16>
    %cst_418 = arith.constant dense<0.000000e+00> : vector<16x64xf32>
    %995 = tpu.matmul %994, %989, %cst_418 {dimension_numbers = #tpu.dot_dimension_numbers<[1], [0], [0], [1], [0, 0, 1, 1], [], []>} : vector<16x64xbf16>, vector<64x64xbf16>, vector<16x64xf32> -> vector<16x64xf32>
    %cst_419 = arith.constant 9.99999974E-6 : f32
    %996 = vector.broadcast %cst_419 : f32 to vector<16x64xf32>
    %997 = arith.addf %995, %996 : vector<16x64xf32>
    %998 = math.rsqrt %997 : vector<16x64xf32>
    %999 = arith.mulf %992, %998 : vector<16x64xf32>
    %c15_420 = arith.constant 15 : index
    %c0_421 = arith.constant 0 : index
    %1000 = vector.load %arg5[%c15_420, %c0_421] : memref<24x384xf32, #tpu.memory_space<vmem>>, vector<1x384xf32>
    %1001 = vector.extract_strided_slice %1000 {offsets = [0, 0], sizes = [1, 64], strides = [1, 1]} : vector<1x384xf32> to vector<1x64xf32>
    %1002 = vector.broadcast %1001 : vector<1x64xf32> to vector<16x64xf32>
    %1003 = arith.mulf %999, %1002 : vector<16x64xf32>
    %c16_422 = arith.constant 16 : index
    %c0_423 = arith.constant 0 : index
    %1004 = vector.load %arg5[%c16_422, %c0_423] : memref<24x384xf32, #tpu.memory_space<vmem>>, vector<1x384xf32>
    %1005 = vector.extract_strided_slice %1004 {offsets = [0, 0], sizes = [1, 64], strides = [1, 1]} : vector<1x384xf32> to vector<1x64xf32>
    %1006 = vector.broadcast %1005 : vector<1x64xf32> to vector<16x64xf32>
    %1007 = arith.addf %1003, %1006 : vector<16x64xf32>
    %c864_424 = arith.constant 864 : index
    %c0_425 = arith.constant 0 : index
    %1008 = vector.load %arg4[%c864_424, %c0_425] : memref<1312x128xbf16, #tpu.memory_space<vmem>>, vector<64x32xbf16>
    %1009 = arith.truncf %1007 : vector<16x64xf32> to vector<16x64xbf16>
    %cst_426 = arith.constant dense<0.000000e+00> : vector<16x32xf32>
    %1010 = tpu.matmul %1009, %1008, %cst_426 {dimension_numbers = #tpu.dot_dimension_numbers<[1], [0], [0], [1], [0, 0, 1, 1], [], []>} : vector<16x64xbf16>, vector<64x32xbf16>, vector<16x32xf32> -> vector<16x32xf32>
    %c17_427 = arith.constant 17 : index
    %c0_428 = arith.constant 0 : index
    %1011 = vector.load %arg5[%c17_427, %c0_428] : memref<24x384xf32, #tpu.memory_space<vmem>>, vector<1x384xf32>
    %1012 = vector.extract_strided_slice %1011 {offsets = [0, 0], sizes = [1, 32], strides = [1, 1]} : vector<1x384xf32> to vector<1x32xf32>
    %1013 = vector.broadcast %1012 : vector<1x32xf32> to vector<16x32xf32>
    %1014 = arith.addf %1010, %1013 : vector<16x32xf32>
    %1015 = math.tanh %1014 : vector<16x32xf32>
    %cst_429 = arith.constant 1.000000e+00 : f32
    %1016 = vector.broadcast %cst_429 : f32 to vector<16x32xf32>
    %1017 = arith.subf %1016, %893 : vector<16x32xf32>
    %1018 = arith.mulf %1017, %765 : vector<16x32xf32>
    %1019 = arith.mulf %893, %1015 : vector<16x32xf32>
    %1020 = arith.addf %1018, %1019 : vector<16x32xf32>
    %c3_430 = arith.constant 3 : index
    %c0_431 = arith.constant 0 : index
    %c0_432 = arith.constant 0 : index
    %1021 = vector.load %arg6[%c3_430, %c0_431, %c0_432] : memref<4x16x32xf32, #tpu.memory_space<vmem>>, vector<1x16x32xf32>
    %1022 = vector.shape_cast %1021 : vector<1x16x32xf32> to vector<16x32xf32>
    %1023 = vector.shape_cast %1020 : vector<16x32xf32> to vector<1x16x32xf32>
    tpu.vector_store %arg6[%c3_430, %c0_431, %c0_432], %1023 {strides = array<i32>} : memref<4x16x32xf32, #tpu.memory_space<vmem>>, vector<1x16x32xf32>,
    return
  }
  func.func @transform_0(%arg0: i32) -> (i32, i32) {
    %c0_i32 = arith.constant 0 : i32
    %c0_i32_0 = arith.constant 0 : i32
    %c0_i32_1 = arith.constant 0 : i32
    return %c0_i32, %c0_i32_0 : i32, i32
  }
  func.func @transform_1(%arg0: i32) -> (i32, i32) {
    %c0_i32 = arith.constant 0 : i32
    %c0_i32_0 = arith.constant 0 : i32
    %c0_i32_1 = arith.constant 0 : i32
    return %c0_i32, %c0_i32_0 : i32, i32
  }
  func.func @transform_2(%arg0: i32) -> (i32, i32) {
    %c0_i32 = arith.constant 0 : i32
    %c0_i32_0 = arith.constant 0 : i32
    %c0_i32_1 = arith.constant 0 : i32
    return %c0_i32, %c0_i32_0 : i32, i32
  }
  func.func @transform_3(%arg0: i32) -> (i32, i32) {
    %c0_i32 = arith.constant 0 : i32
    %c0_i32_0 = arith.constant 0 : i32
    %c0_i32_1 = arith.constant 0 : i32
    return %c0_i32, %c0_i32_0 : i32, i32
  }
  func.func @transform_4(%arg0: i32) -> (i32, i32) {
    %c0_i32 = arith.constant 0 : i32
    %c0_i32_0 = arith.constant 0 : i32
    %c0_i32_1 = arith.constant 0 : i32
    return %c0_i32, %c0_i32_0 : i32, i32
  }
  func.func @transform_5(%arg0: i32) -> (i32, i32, i32) {
    %c0_i32 = arith.constant 0 : i32
    %c0_i32_0 = arith.constant 0 : i32
    %c0_i32_1 = arith.constant 0 : i32
    %c0_i32_2 = arith.constant 0 : i32
    return %c0_i32, %c0_i32_0, %c0_i32_1 : i32, i32, i32
  }
}

</mosaic_0001>

<bundles_post_ra>
// kernel: tpu_custom_call.1
= control target key start
LH: loop header
LB: loop body
LE: loop exit
PB: predicated region body
PF: predicated region fallthrough
CT: control target
= control target key end

     0   :  { %10 = vsyncpa [#allocation3], 0  ;;  %s13631_s0 = inlined_call_operand.hbm [shape: bf16[64,256], index: 0, kind: input, shape index: {}]   ;;  %s13632_s1 = inlined_call_operand.hbm [shape: f32[16,32], index: 1, kind: input, shape index: {}]   ;;  %s13633_s2 = inlined_call_operand.hbm [shape: bf16[128,384], index: 2, kind: input, shape index: {}]   ;;  %s13634_s3 = inlined_call_operand.hbm [shape: bf16[1312,128], index: 3, kind: input, shape index: {}]   ;;  %s13635_s4 = inlined_call_operand.hbm [shape: f32[24,384], index: 4, kind: input, shape index: {}]   ;;  %s13636_s5 = inlined_call_operand.hbm [shape: f32[4,16,32], index: 5, kind: output, shape index: {}]  }
   0x1   :  { %11 = vsyncpa [#allocation6], 0 }
   0x2   :  { %12 = vsyncpa [#allocation9], 0 }
   0x3   :  { %13 = vsyncpa [#allocation4], 0  ;;  %s11998_s18 = smov [#allocation5]   ;;  %s11999_s20 = smov [#allocation8]  }
   0x4   :  { %s31_s19 = sshll.u32 %s11998_s18, 4  ;;  %s55_s21 = sshll.u32 %s11999_s20, 4  ;;  %s32_s19 = int_to_ptr.vmem [resolvable:$true] %s31_s19  ;;  %s12047_s21 = int_to_ptr.vmem [resolvable:$true] %s55_s21 }
   0x5   :  { %s11858_s24 = scalar_lea.hbm %s13632_s1, 256 }
   0x6   :  { %p11859_p0 = scmp.ne.s32.totalorder %s13632_s1, %s11858_s24  ;;  %p11862_p1 = scmp.lt.u32.totalorder %s11858_s24, %s13632_s1 }
   0x8   :  { %p11864_p2 = pnand %p11862_p1, %p11859_p0 }
   0xa   :  { %11867 = shalt.err (!%p11864_p2)
}
   0xb   :  { %s11868_s29 = scalar_lea.vmem %s32_s19, 256  ;;  %p11873_p4 = scmp.lt.s32.totalorder %s32_s19, %s32_s19 }
   0xc   :  { %p11869_p3 = scmp.ne.s32.totalorder %s32_s19, %s11868_s29  ;;  %p11874_p5 = scmp.lt.s32.totalorder %s11868_s29, %s11868_s29 }
   0xe   :  { %p11875_p6 = por %p11874_p5, %p11873_p4 }
  0x10   :  { %p11876_p7 = pnand %p11875_p6, %p11869_p3 }
  0x12   :  { %11879 = shalt.err (!%p11876_p7)
}
  0x13   :  { %s12000_s30 = smov 128   ;;  %s12001_s6 = smov 8  }
  0x14   :  { %37 = dma.hbm_to_vmem [thread:$0]  %s13632_s1, 256, %s32_s19, [#allocation6], %s12000_s30, %s12000_s30, %s12001_s6  }
  0x15   :  { %s11880_s11 = scalar_lea.hbm %s13634_s3, 10496 }
  0x16   :  { %p11881_p8 = scmp.ne.s32.totalorder %s13634_s3, %s11880_s11  ;;  %p11884_p9 = scmp.lt.u32.totalorder %s11880_s11, %s13634_s3 }
  0x18   :  { %p11886_p10 = pnand %p11884_p9, %p11881_p8 }
  0x1a   :  { %11889 = shalt.err (!%p11886_p10)
}
  0x1b   :  { %s11890_s16 = scalar_lea.vmem %s12047_s21, 10496  ;;  %p11895_p12 = scmp.lt.s32.totalorder %s12047_s21, %s12047_s21 }
  0x1c   :  { %p11891_p11 = scmp.ne.s32.totalorder %s12047_s21, %s11890_s16  ;;  %p11896_p13 = scmp.lt.s32.totalorder %s11890_s16, %s11890_s16 }
  0x1e   :  { %p11897_p0 = por %p11896_p13, %p11895_p12 }
  0x20   :  { %p11898_p1 = pnand %p11897_p0, %p11891_p11 }
  0x22   :  { %11901 = shalt.err (!%p11898_p1)
}
  0x23   :  { %s12002_s1 = smov 64   ;;  %s12003_s17 = smov 4  }
  0x24   :  { %61 = dma.hbm_to_vmem [thread:$0]  %s13634_s3, 10496, %s12047_s21, [#allocation9], %s12002_s1, %s12002_s1, %s12003_s17  }
  0x25   :  { %s12004_s20 = smov [#allocation2]   ;;  %s12005_s23 = smov [#allocation7]  }
  0x26   :  { %s19_s22 = sshll.u32 %s12004_s20, 4  ;;  %s43_s24 = sshll.u32 %s12005_s23, 4  ;;  %s20_s22 = int_to_ptr.vmem [resolvable:$true] %s19_s22  ;;  %s12083_s24 = int_to_ptr.vmem [resolvable:$true] %s43_s24 }
  0x27   :  { %s11902_s27 = scalar_lea.hbm %s13631_s0, 1024 }
  0x28   :  { %p11903_p2 = scmp.ne.s32.totalorder %s13631_s0, %s11902_s27  ;;  %p11906_p3 = scmp.lt.u32.totalorder %s11902_s27, %s13631_s0 }
  0x2a   :  { %p11908_p4 = pnand %p11906_p3, %p11903_p2 }
  0x2c   :  { %11911 = shalt.err (!%p11908_p4)
}
  0x2d   :  { %s11912_s3 = scalar_lea.vmem %s20_s22, 1024  ;;  %p11917_p6 = scmp.lt.s32.totalorder %s20_s22, %s20_s22 }
  0x2e   :  { %p11913_p5 = scmp.ne.s32.totalorder %s20_s22, %s11912_s3  ;;  %p11918_p7 = scmp.lt.s32.totalorder %s11912_s3, %s11912_s3 }
  0x30   :  { %p11919_p8 = por %p11918_p7, %p11917_p6 }
  0x32   :  { %p11920_p9 = pnand %p11919_p8, %p11913_p5 }
  0x34   :  { %11923 = shalt.err (!%p11920_p9)
}
  0x35   :  { %25 = dma.hbm_to_vmem [thread:$0]  %s13631_s0, 1024, %s20_s22, [#allocation3], %s12000_s30, %s12000_s30, %s12001_s6  }
  0x36   :  { %s11924_s12 = scalar_lea.hbm %s13633_s2, 3072 }
  0x37   :  { %p11925_p10 = scmp.ne.s32.totalorder %s13633_s2, %s11924_s12  ;;  %p11928_p11 = scmp.lt.u32.totalorder %s11924_s12, %s13633_s2 }
  0x39   :  { %p11930_p12 = pnand %p11928_p11, %p11925_p10 }
  0x3b   :  { %11933 = shalt.err (!%p11930_p12)
}
  0x3c   :  { %s11934_s17 = scalar_lea.vmem %s12083_s24, 3072  ;;  %p11939_p0 = scmp.lt.s32.totalorder %s12083_s24, %s12083_s24 }
  0x3d   :  { %p11935_p13 = scmp.ne.s32.totalorder %s12083_s24, %s11934_s17  ;;  %p11940_p1 = scmp.lt.s32.totalorder %s11934_s17, %s11934_s17 }
  0x3f   :  { %p11941_p2 = por %p11940_p1, %p11939_p0 }
  0x41   :  { %p11942_p3 = pnand %p11941_p2, %p11935_p13 }
  0x43   :  { %11945 = shalt.err (!%p11942_p3)
}
  0x44   :  { %s12006_s0 = smov 192   ;;  %s12007_s18 = smov 12  }
  0x45   :  { %49 = dma.hbm_to_vmem [thread:$0]  %s13633_s2, 3072, %s12083_s24, [#allocation6], %s12006_s0, %s12006_s0, %s12007_s18  }
  0x46   :  { %s12008_s22 = smov [#allocation10]   ;;  %s11946_s27 = scalar_lea.hbm %s13635_s4, 1152 }
  0x47   :  { %s67_s23 = sshll.u32 %s12008_s22, 4  ;;  %p11947_p4 = scmp.ne.s32.totalorder %s13635_s4, %s11946_s27  ;;  %s68_s23 = int_to_ptr.vmem [resolvable:$true] %s67_s23 }
  0x48   :  { %p11950_p5 = scmp.lt.u32.totalorder %s11946_s27, %s13635_s4 }
  0x4a   :  { %p11952_p6 = pnand %p11950_p5, %p11947_p4 }
  0x4c   :  { %11955 = shalt.err (!%p11952_p6)
}
  0x4d   :  { %s11956_s3 = scalar_lea.vmem %s68_s23, 1152  ;;  %p11961_p8 = scmp.lt.s32.totalorder %s68_s23, %s68_s23 }
  0x4e   :  { %p11957_p7 = scmp.ne.s32.totalorder %s68_s23, %s11956_s3  ;;  %p11962_p9 = scmp.lt.s32.totalorder %s11956_s3, %s11956_s3 }
  0x50   :  { %p11963_p10 = por %p11962_p9, %p11961_p8 }
  0x52   :  { %p11964_p11 = pnand %p11963_p10, %p11957_p7 }
  0x54   :  { %11967 = shalt.err (!%p11964_p11)
}
  0x55   :  { %s12009_s2 = smov 384   ;;  %s12010_s24 = smov 24  }
  0x56   :  { %73 = dma.hbm_to_vmem [thread:$0]  %s13635_s4, 1152, %s68_s23, [#allocation9], %s12009_s2, %s12009_s2, %s12010_s24  }
  0x57   :  { %11990 = dma.done.wait [#allocation3], 1024  }
  0x58   :  { %11991 = vsyncadd [#allocation3], 4294966272 }
  0x59   :  { %11992 = dma.done.wait [#allocation6], 3328  }
  0x5a   :  { %11993 = vsyncadd [#allocation6], 4294963968 }
  0x5b   :  { %11994 = dma.done.wait [#allocation9], 11648  }
  0x5c   :  { %11995 = vsyncadd [#allocation9], 4294955648  ;;  %v11274_v0 = vld [vmem:[#allocation8 + $0x40] sm:$0xff]   ;;  %v11276_v2 = vld [vmem:[#allocation8 + $0x48] sm:$0xff]   ;;  %v12011_v24 = vmov 0   ;;  %v12012_v25 = vmov 0.0   ;;  %v592_v63 = vlaneseq }
  0x5d   :  { %v11275_v1 = vld [vmem:[#allocation8] sm:$0xff]   ;;  %9327 = vmatprep.subr.bf16.mxu0 %v11274_v0  ;;  %v11277_v3 = vld [vmem:[#allocation8 + $0x8] sm:$0xff]   ;;  %v11278_v4 = vld [vmem:[#allocation8 + $0x50] sm:$0xff]   ;;  %419 = vmatprep.mubr.bf16.mxu1 %v12011_v24  ;;  %s12013_s4 = smov 32   ;;  %vm383_vm0 = vcmask 261120   ;;  %s12014_s10 = smov 96  }
  0x5e   :  { %9328 = vmatpush3.bf16.msra.mxu0 %v11275_v1  ;;  %v11279_v5 = vld [vmem:[#allocation8 + $0x10] sm:$0xff]   ;;  %v11280_v6 = vld [vmem:[#allocation8 + $0x58] sm:$0xff]   ;;  %v11282_v8 = vld [vmem:[#allocation8 + $0x60] sm:$0xff]   ;;  %vm12015_vm1 = vmmov 0   ;;  %v593_v1 = vshrl.u32 %v592_v63, 7  ;;  %vm919_vm2 = vcmask 523264  }
  0x5f   :  { %9329 = vmatprep.subr.bf16.mxu0 %v11276_v2  ;;  %v11281_v7 = vld [vmem:[#allocation8 + $0x18] sm:$0xff]   ;;  %v11283_v9 = vld [vmem:[#allocation8 + $0x20] sm:$0xff]   ;;  %v11284_v10 = vld [vmem:[#allocation8 + $0x68] sm:$0xff]   ;;  %vm922_vm3 = vcmask 785408  }
  0x60   :  { %v11285_v11 = vld [vmem:[#allocation8 + $0x28] sm:$0xff]   ;;  %v11292_v12 = vld [vmem:[#allocation2 + $0x4] ss:$8 sps:$4 sm:$0xff]   ;;  %v11290_v19 = vld [vmem:[#allocation2] ss:$8 sps:$4 sm:$0xff]  }
  0x61   :  { %v331_v13 = vld [vmem:[#allocation5] sm:$0xff]  ;;  %298 = vmatprep.mubr.bf16.mxu0 %v11292_v12  ;;  %v11288_v17 = vld [vmem:[#allocation8 + $0x78] sm:$0xff]   ;;  %v11310_v27 = vld [vmem:[#allocation2 + $0x14] ss:$8 sps:$4 sm:$0xff]  }
  0x62   :  { %9330 = vmatpush3.bf16.msra.mxu0 %v11277_v3  ;;  %v11286_v14 = vld [vmem:[#allocation8 + $0x70] sm:$0xff]   ;;  %905 = vrot.lane.b32.xlu1 %v331_v13, %s12002_s1  ;;  %v11289_v18 = vld [vmem:[#allocation8 + $0x38] sm:$0xff]   ;;  %v11313_v29 = vld [vmem:[#allocation2 + $0x10] ss:$8 sps:$4 sm:$0xff]  }
  0x63   :  { %9331 = vmatprep.subr.bf16.mxu0 %v11278_v4  ;;  %v11293_v15 = vld [vmem:[#allocation7 + $0x34] ss:$12 sps:$4 sm:$0xff]   ;;  %v11295_v20 = vld [vmem:[#allocation7 + $0x30] ss:$12 sps:$4 sm:$0xff]   ;;  %v11296_v22 = vld [vmem:[#allocation7 + $0x4c] ss:$12 sps:$4 sm:$0xff]  }
  0x64   :  { %387 = vmatprep.subr.bf16.mxu1 %v11293_v15  ;;  %v11287_v16 = vld [vmem:[#allocation8 + $0x30] sm:$0xff]   ;;  %v332_v21 = vld [vmem:[#allocation5 + $0x8] sm:$0xff]  ;;  %v11314_v39 = vld [vmem:[#allocation8 + $0x1e0] sm:$0xff]  }
  0x65   :  { %388 = vmatpush1.bf16.msra.mxu1 %v11295_v20  ;;  %v11298_v23 = vld [vmem:[#allocation7 + $0x48] ss:$12 sps:$4 sm:$0xff]   ;;  %v11312_v32 = vld [vmem:[#allocation8 + $0x1d8] sm:$0xff]   ;;  %v11303_v41 = vld [vmem:[#allocation7 + $0x4] ss:$12 sps:$4 sm:$0xff]  }
  0x66   :  { %9332 = vmatpush3.bf16.msra.mxu0 %v11279_v5  ;;  %907 = vrot.lane.b32.xlu1 %v332_v21, %s12002_s1  ;;  %v11309_v26 = vld [vmem:[#allocation8 + $0x1d0] sm:$0xff]   ;;  %v11299_v37 = vld [vmem:[#allocation7 + $0x38] ss:$12 sps:$4 sm:$0xff]   ;;  %v11301_v42 = vld [vmem:[#allocation7] ss:$12 sps:$4 sm:$0xff]   ;;  %v12185_v5 = vsub.s32 1, %v593_v1 }
  0x67   :  { %9333 = vmatprep.subr.bf16.mxu0 %v11280_v6  ;;  %389 = vmatprep.subr.bf16.mxu1 %v11296_v22  ;;  %v11315_v30 = vld [vmem:[#allocation2 + $0x24] ss:$8 sps:$4 sm:$0xff]   ;;  %v11304_v45 = vld [vmem:[#allocation7 + $0x18] ss:$12 sps:$4 sm:$0xff]   ;;  %v11308_v48 = vld [vmem:[#allocation7 + $0x20] ss:$12 sps:$4 sm:$0xff]  }
  0x68   :  { %v11300_v40 = vld [vmem:[#allocation7 + $0x50] ss:$12 sps:$4 sm:$0xff]   ;;  %v11307_v47 = vld [vmem:[#allocation7 + $0x8] ss:$12 sps:$4 sm:$0xff]   ;;  %v11320_v52 = vld [vmem:[#allocation2 + $0x34] ss:$8 sps:$4 sm:$0xff]  }
  0x69   :  { %390 = vmatpush1.bf16.msra.mxu1 %v11298_v23  ;;  %v11306_v43 = vld [vmem:[#allocation7 + $0x1c] ss:$12 sps:$4 sm:$0xff]   ;;  %v12151_v44 = vld [vmem:[#allocation5] sm:$0xff]  ;;  %v11324_v55 = vld [vmem:[#allocation8 + $0x200] sm:$0xff]  }
  0x6a   :  { %9334 = vmatpush3.bf16.msra.mxu0 %v11281_v7  ;;  %9927 = vmatprep.subr.bf16.mxu1 %v12012_v25  ;;  %v341_v46 = vpack.c.bf16 %v332_v21, %v12151_v44  ;;  %v11317_v49 = vld [vmem:[#allocation8 + $0x1e8] sm:$0xff]   ;;  %v11318_v50 = vld [vmem:[#allocation2 + $0x20] ss:$8 sps:$4 sm:$0xff]   ;;  %v12187_v7 = vsub.s32 0, %v593_v1 }
  0x6b   :  { %9335 = vmatprep.subr.bf16.mxu0 %v11282_v8  ;;  %v11319_v51 = vld [vmem:[#allocation8 + $0x1f0] sm:$0xff]   ;;  %v11322_v53 = vld [vmem:[#allocation8 + $0x1f8] sm:$0xff]   ;;  %v11323_v54 = vld [vmem:[#allocation2 + $0x30] ss:$8 sps:$4 sm:$0xff]  }
  0x6c   :  { %v11325_v56 = vld [vmem:[#allocation8 + $0x208] sm:$0xff]   ;;  %v590_v6 = vld [vmem:[#allocation10] ss:$8 sm:$0x7] }
  0x6d   :  { %v12233_v63 = vld [vmem:[#allocation8 + $0x228] sm:$0xff]  }
  0x6e   :  { %9336 = vmatpush3.bf16.msra.mxu0 %v11283_v9  ;;  %v599_v9 = vrot.slane %v590_v6, %v12185_v5 }
  0x6f   :  { %9337 = vmatprep.subr.bf16.mxu0 %v11284_v10 }
  0x72   :  { %9338 = vmatpush3.bf16.msra.mxu0 %v11285_v11  ;;  %v595_v11 = vrot.slane %v590_v6, %v12187_v7 }
  0x73   :  { %9339 = vmatprep.subr.bf16.mxu0 %v11286_v14  ;;  %v12191_v14 = vsub.s32 2, %v593_v1  ;;  %v12241_v1 = vld [vmem:[#allocation8 + $0x238] sm:$0xff]  }
  0x75   :  { %v603_v20 = vrot.slane %v590_v6, %v12191_v14 }
  0x76   :  { %9340 = vmatpush3.bf16.msra.mxu0 %v11287_v16 }
  0x77   :  { %9341 = vmatprep.subr.bf16.mxu0 %v11288_v17 }
  0x7a   :  { %9342 = vmatpush3.bf16.msra.mxu0 %v11289_v18 }
  0x7b   :  { %9943 = vmatprep.subr.bf16.mxu0 %v12012_v25 }
  0x7d   :  { %299 = vmatmul.mubr.bf16.vlgmr.msra.gmra.mrb[0].mxu0 %v11290_v19 }
  0x7e   :  { %9944 = vmatpush3.bf16.msra.mxu0 %v11309_v26  ;;  %306 = vmatprep.mubr.bf16.mxu0 %v11310_v27 }
  0x7f   :  { %9945 = vmatprep.subr.bf16.mxu0 %v12012_v25 }
  0x82   :  { %9946 = vmatpush3.bf16.msra.mxu0 %v11312_v32 }
  0x83   :  { %9947 = vmatprep.subr.bf16.mxu0 %v12012_v25 }
  0x85   :  { %307 = vmatmul.mubr.bf16.gmra.mrb[4].mxu0 %v11313_v29 }
  0x86   :  { %314 = vmatprep.mubr.bf16.mxu0 %v11315_v30  ;;  %9948 = vmatpush3.bf16.msra.mxu0 %v11314_v39 }
  0x87   :  { %9949 = vmatprep.subr.bf16.mxu0 %v12012_v25 }
  0x8a   :  { %9950 = vmatpush3.bf16.msra.mxu0 %v11317_v49 }
  0x8b   :  { %9951 = vmatprep.subr.bf16.mxu0 %v12012_v25 }
  0x8d   :  { %315 = vmatmul.mubr.bf16.gmra.mrb[8].mxu0 %v11318_v50  ;;  %v11326_v50 = vld [vmem:[#allocation8 + $0x80] sm:$0xff]  }
  0x8e   :  { %9952 = vmatpush3.bf16.msra.mxu0 %v11319_v51  ;;  %322 = vmatprep.mubr.bf16.mxu0 %v11320_v52  ;;  %v11328_v52 = vld [vmem:[#allocation8 + $0x90] sm:$0xff]  }
  0x8f   :  { %9953 = vmatprep.subr.bf16.mxu0 %v12012_v25 }
  0x92   :  { %9954 = vmatpush3.bf16.msra.mxu0 %v11322_v53 }
  0x93   :  { %9955 = vmatprep.subr.bf16.mxu0 %v12012_v25 }
  0x95   :  { %323 = vmatmul.mubr.bf16.gmra.mrb[12].mxu0 %v11323_v54  ;;  %v11330_v54 = vld [vmem:[#allocation8 + $0xa0] sm:$0xff]  }
  0x96   :  { %9959 = vmatprep.mubr.msk.bf16.mxu0 %vm12015_vm1, %v12012_v25  ;;  %9956 = vmatpush3.bf16.msra.mxu0 %v11324_v55 }
  0x97   :  { %9957 = vmatprep.subr.bf16.mxu0 %v12012_v25 }
  0x9a   :  { %9958 = vmatpush3.bf16.msra.mxu0 %v11325_v56 }
  0x9b   :  { %9983 = vmatprep.subr.bf16.mxu0 %v12012_v25 }
 0x150   :  { %v9343_v28 = vpop.f32.mrb[0].mxu0 }
 0x151   :  { %v9344_v31 = vpop.f32.mrb[1].mxu0 }
 0x152   :  { %v9345_v33 = vadd.f32 %v9344_v31, %v9343_v28  ;;  %v9346_v34 = vpop.f32.mrb[2].mxu0 }
 0x153   :  { %v9347_v35 = vpop.f32.mrb[3].mxu0 }
 0x154   :  { %v9348_v36 = vadd.f32 %v9347_v35, %v9346_v34  ;;  %897 = vrot.lane.b32.xlu0 %v9345_v33, %s12013_s4 }
 0x156   :  { %v12136_v38 = vpack.c.bf16 %v9348_v36, %v9345_v33  ;;  %913 = vrot.lane.b32.xlu1 %v9348_v36, %s12014_s10 }
 0x158   :  { %899 = vrot.lane.b32.xlu0 %v9348_v36, %s12013_s4  ;;  %8897 = vmatmul.mubr.msk.bf16.vlgmr.msra.gmra.mrb[0].mxu1 %vm383_vm0, %v12136_v38  ;;  %v9349_v57 = vpop.f32.mrb[4].mxu0 }
 0x159   :  { %9928 = vmatpush3.bf16.msra.mxu1 %v11299_v37  ;;  %9931 = vmatprep.mubr.msk.bf16.mxu1 %vm12015_vm1, %v12012_v25  ;;  %v9350_v58 = vpop.f32.mrb[5].mxu0 }
 0x15a   :  { %9929 = vmatprep.subr.bf16.mxu1 %v12012_v25  ;;  %1546 = vrot.lane.b32.xlu1 %v332_v21, %s12013_s4  ;;  %v12181_v59 = vadd.f32 %v9350_v58, %v9349_v57  ;;  %v9352_v60 = vpop.f32.mrb[6].mxu0  ;;  %v11333_v57 = vld [vmem:[#allocation8 + $0xb8] sm:$0xff]   ;;  %v12222_v58 = vld [vmem:[#allocation8 + $0x210] sm:$0xff]  }
 0x15b   :  { %v9353_v61 = vpop.f32.mrb[7].mxu0 }
 0x15c   :  { %911 = vrot.lane.b32.xlu0 %v9345_v33, %s12014_s10  ;;  %v12183_v62 = vadd.f32 %v9353_v61, %v9352_v60  ;;  %v12225_v60 = vld [vmem:[#allocation8 + $0x218] sm:$0xff]   ;;  %v12229_v61 = vld [vmem:[#allocation8 + $0x220] sm:$0xff]  }
 0x15d   :  { %9930 = vmatpush3.bf16.msra.mxu1 %v11300_v40 }
 0x15e   :  { %506 = vmatprep.subr.bf16.mxu1 %v11303_v41 }
 0x160   :  { %9932 = vmatmul.mubr.msk.bf16.vlgmr.msra.gmra.mrb[4].mxu1 %vm383_vm0, %v12136_v38  ;;  %1544 = vrot.lane.b32.xlu0 %v12151_v44, %s12013_s4  ;;  %v9355_v36 = vpop.f32.mrb[8].mxu0 }
 0x161   :  { %507 = vmatpush1.bf16.msra.mxu1 %v11301_v42  ;;  %538 = vmatprep.mubr.bf16.mxu1 %v12011_v24  ;;  %v9356_v37 = vpop.f32.mrb[9].mxu0 }
 0x162   :  { %508 = vmatprep.subr.bf16.mxu1 %v11306_v43  ;;  %v9358_v40 = vpop.f32.mrb[10].mxu0 }
 0x163   :  { %v9359_v41 = vpop.f32.mrb[11].mxu0 }
 0x164   :  { %v12208_v42 = vadd.f32 %v9359_v41, %v9358_v40  ;;  %v11855_v40 = vld [vmem:[#allocation5 + $0x8] sm:$0xff] }
 0x165   :  { %509 = vmatpush1.bf16.msra.mxu1 %v11304_v45 }
 0x166   :  { %9935 = vmatprep.subr.bf16.mxu1 %v12012_v25 }
 0x168   :  { %8905 = vmatmul.mubr.msk.bf16.vlgmr.msra.gmra.mrb[0].mxu1 %vm383_vm0, %v341_v46  ;;  %v9361_v43 = vpop.f32.mrb[12].mxu0 }
 0x169   :  { %9936 = vmatpush3.bf16.msra.mxu1 %v11307_v47  ;;  %9939 = vmatprep.mubr.msk.bf16.mxu1 %vm12015_vm1, %v12012_v25  ;;  %v9362_v45 = vpop.f32.mrb[13].mxu0 }
 0x16a   :  { %9937 = vmatprep.subr.bf16.mxu1 %v12012_v25  ;;  %v9364_v47 = vpop.f32.mrb[14].mxu0 }
 0x16d   :  { %9938 = vmatpush3.bf16.msra.mxu1 %v11308_v48  ;;  %v9365_v48 = vpop.f32.mrb[15].mxu0 }
 0x16e   :  { %9963 = vmatprep.subr.bf16.mxu1 %v12012_v25 }
 0x170   :  { %9940 = vmatmul.mubr.msk.bf16.vlgmr.msra.gmra.mrb[8].mxu1 %vm383_vm0, %v341_v46  ;;  %v12210_v46 = vadd.f32 %v9362_v45, %v9361_v43 }
 0x171   :  { %9964 = vmatpush3.bf16.msra.mxu1 %v11309_v26  ;;  %9979 = vmatprep.mubr.msk.bf16.mxu1 %vm12015_vm1, %v12012_v25 }
 0x172   :  { %9965 = vmatprep.subr.bf16.mxu1 %v12012_v25 }
 0x175   :  { %9966 = vmatpush3.bf16.msra.mxu1 %v11312_v32 }
 0x176   :  { %9967 = vmatprep.subr.bf16.mxu1 %v12012_v25 }
 0x179   :  { %9968 = vmatpush3.bf16.msra.mxu1 %v11314_v39  ;;  %v12206_v39 = vadd.f32 %v9356_v37, %v9355_v36 }
 0x17a   :  { %9969 = vmatprep.subr.bf16.mxu1 %v12012_v25 }
 0x17d   :  { %9970 = vmatpush3.bf16.msra.mxu1 %v11317_v49  ;;  %v12212_v49 = vadd.f32 %v9365_v48, %v9364_v47 }
 0x17e   :  { %9971 = vmatprep.subr.bf16.mxu1 %v12012_v25 }
 0x181   :  { %9972 = vmatpush3.bf16.msra.mxu1 %v11319_v51  ;;  %v11327_v51 = vld [vmem:[#allocation8 + $0x88] sm:$0xff]  }
 0x182   :  { %9973 = vmatprep.subr.bf16.mxu1 %v12012_v25 }
 0x185   :  { %9974 = vmatpush3.bf16.msra.mxu1 %v11322_v53  ;;  %v11329_v53 = vld [vmem:[#allocation8 + $0x98] sm:$0xff]  }
 0x186   :  { %9975 = vmatprep.subr.bf16.mxu1 %v12012_v25 }
 0x189   :  { %9976 = vmatpush3.bf16.msra.mxu1 %v11324_v55  ;;  %v11331_v55 = vld [vmem:[#allocation8 + $0xa8] sm:$0xff]  }
 0x18a   :  { %9977 = vmatprep.subr.bf16.mxu1 %v12012_v25 }
 0x18d   :  { %9978 = vmatpush3.bf16.msra.mxu1 %v11325_v56  ;;  %v11332_v56 = vld [vmem:[#allocation8 + $0xb0] sm:$0xff]  }
 0x18e   :  { %10003 = vmatprep.subr.bf16.mxu1 %v12012_v25 }
 0x233   :  { %v464_v0 = vpop.f32.mrb[4].mxu1 }
 0x234   :  { %v9933_v2 = vpop.f32.mrb[5].mxu1 }
 0x235   :  { %v467_v3 = vpop.f32.mrb[6].mxu1 }
 0x236   :  { %v9934_v4 = vpop.f32.mrb[7].mxu1 }
 0x23b   :  { %v540_v8 = vpop.f32.mrb[0].mxu1 }
 0x23c   :  { %v542_v10 = vpop.f32.mrb[1].mxu1  ;;  %v607_v17 = vadd.f32 %v595_v11, %v540_v8 }
 0x23d   :  { %v544_v12 = vpop.f32.mrb[2].mxu1  ;;  %v608_v15 = vadd.f32 %v599_v9, %v542_v10 }
 0x23e   :  { %v546_v13 = vpop.f32.mrb[3].mxu1  ;;  %v610_v18 = vadd.f32 %v595_v11, %v544_v12 }
 0x23f   :  { %v611_v16 = vadd.f32 %v599_v9, %v546_v13 }
 0x241   :  { %v613_v19 = vsub.f32 %v608_v15, %v611_v16 }
 0x243   :  { %v631_v21 = vmul.f32 %v613_v19, %v607_v17  ;;  %v728_v22 = vmul.f32 %v613_v19, %v610_v18  ;;  %v583_v23 = vpop.f32.mrb[8].mxu1 }
 0x244   :  { %v584_v26 = vadd.f32 %v583_v23, %v464_v0  ;;  %v9941_v27 = vpop.f32.mrb[9].mxu1  ;;  %v12237_v0 = vld [vmem:[#allocation8 + $0x230] sm:$0xff]  }
 0x245   :  { %v632_v28 = vpack.c.bf16 %v631_v21, %v631_v21  ;;  %v729_v29 = vpack.c.bf16 %v728_v22, %v728_v22  ;;  %v586_v30 = vpop.f32.mrb[10].mxu1 }
 0x246   :  { %v12194_v31 = vadd.f32 %v603_v20, %v584_v26  ;;  %v587_v32 = vadd.f32 %v586_v30, %v467_v3  ;;  %v9942_v33 = vpop.f32.mrb[11].mxu1  ;;  %v12264_v30 = vld [vmem:[#allocation8 + $0x240] sm:$0xff]  }
 0x247   :  { %9960 = vmatmul.mubr.bf16.vlgmr.msra.gmra.mrb[16].mxu0 %v632_v28  ;;  %9980 = vmatmul.mubr.bf16.vlgmr.msra.gmra.mrb[12].mxu1 %v729_v29  ;;  %v906_v33 = vpop.permute.xlu1 %905 }
 0x248   :  { %v12196_v34 = vadd.f32 %v603_v20, %v587_v32  ;;  %9999 = vmatprep.mubr.msk.bf16.mxu0 %vm12015_vm1, %v12012_v25  ;;  %10019 = vmatprep.mubr.msk.bf16.mxu1 %vm12015_vm1, %v12012_v25  ;;  %v12276_v32 = vpop.permute.xlu0 %897 }
 0x249   :  { %9984 = vmatpush3.bf16.msra.mxu0 %v11326_v50  ;;  %10004 = vmatpush3.bf16.msra.mxu1 %v12222_v58  ;;  %v917_v43 = vsel %vm383_vm0, %v12151_v44, %v12276_v32 }
 0x24a   :  { %v12204_v35 = vsub.f32 %v12194_v31, %v12196_v34  ;;  %9985 = vmatprep.subr.bf16.mxu0 %v12012_v25  ;;  %10005 = vmatprep.subr.bf16.mxu1 %v12012_v25 }
 0x24b   :  { %v908_v36 = vpop.permute.xlu1 %907 }
 0x24d   :  { %9986 = vmatpush3.bf16.msra.mxu0 %v11327_v51  ;;  %10006 = vmatpush3.bf16.msra.mxu1 %v12225_v60 }
 0x24e   :  { %9987 = vmatprep.subr.bf16.mxu0 %v12012_v25  ;;  %10007 = vmatprep.subr.bf16.mxu1 %v12012_v25 }
 0x251   :  { %9988 = vmatpush3.bf16.msra.mxu0 %v11328_v52  ;;  %10008 = vmatpush3.bf16.msra.mxu1 %v12229_v61 }
 0x252   :  { %9989 = vmatprep.subr.bf16.mxu0 %v12012_v25  ;;  %10009 = vmatprep.subr.bf16.mxu1 %v12012_v25 }
 0x255   :  { %9990 = vmatpush3.bf16.msra.mxu0 %v11329_v53  ;;  %10010 = vmatpush3.bf16.msra.mxu1 %v12233_v63  ;;  %v914_v53 = vpop.permute.xlu1 %913 }
 0x256   :  { %9991 = vmatprep.subr.bf16.mxu0 %v12012_v25  ;;  %10011 = vmatprep.subr.bf16.mxu1 %v12012_v25 }
 0x259   :  { %9992 = vmatpush3.bf16.msra.mxu0 %v11330_v54  ;;  %10012 = vmatpush3.bf16.msra.mxu1 %v12237_v0  ;;  %v920_v54 = vsel %vm919_vm2, %v917_v43, %v906_v33 }
 0x25a   :  { %9993 = vmatprep.subr.bf16.mxu0 %v12012_v25  ;;  %10013 = vmatprep.subr.bf16.mxu1 %v12012_v25 }
 0x25d   :  { %9994 = vmatpush3.bf16.msra.mxu0 %v11331_v55  ;;  %10014 = vmatpush3.bf16.msra.mxu1 %v12241_v1 }
 0x25e   :  { %9995 = vmatprep.subr.bf16.mxu0 %v12012_v25  ;;  %10015 = vmatprep.subr.bf16.mxu1 %v12012_v25 }
 0x261   :  { %9996 = vmatpush3.bf16.msra.mxu0 %v11332_v56  ;;  %10016 = vmatpush3.bf16.msra.mxu1 %v12264_v30 }
 0x262   :  { %9997 = vmatprep.subr.bf16.mxu0 %v12012_v25  ;;  %10017 = vmatprep.subr.bf16.mxu1 %v12012_v25 }
 0x265   :  { %9998 = vmatpush3.bf16.msra.mxu0 %v11333_v57 }
 0x266   :  { %10023 = vmatprep.subr.bf16.mxu0 %v12012_v25 }
 0x31a   :  { %v715_v2 = vpop.f32.mrb[16].mxu0  ;;  %v764_v3 = vpop.f32.mrb[12].mxu1 }
 0x31b   :  { %v8915_v4 = vmul.f32 -0.25, %v715_v2  ;;  %v8916_v6 = vmul.f32 0.25, %v764_v3  ;;  %v9961_v8 = vpop.f32.mrb[17].mxu0  ;;  %v9981_v9 = vpop.f32.mrb[13].mxu1 }
 0x31c   :  { %v718_v10 = vpop.f32.mrb[18].mxu0  ;;  %v767_v11 = vpop.f32.mrb[14].mxu1  ;;  %v11343_v8 = vld [vmem:[#allocation8 + $0xc8] sm:$0xff]  }
 0x31d   :  { %v723_v12 = vmul.f32 1.442695, %v8915_v4  ;;  %v772_v13 = vmul.f32 1.442695, %v8916_v6  ;;  %v9962_v15 = vpop.f32.mrb[19].mxu0  ;;  %v9982_v16 = vpop.f32.mrb[15].mxu1 }
 0x31e   :  { %v11342_v6 = vld [vmem:[#allocation8 + $0xc0] sm:$0xff]  }
 0x31f   :  { %11678 = vpow2.f32 %v723_v12 }
 0x320   :  { %11680 = vpow2.f32 %v772_v13 }
 0x329   :  { %v11679_v17 = vpop.eup %11678 }
 0x32a   :  { %v11681_v18 = vpop.eup %11680  ;;  %v725_v19 = vadd.f32 1.0, %v11679_v17 }
 0x32b   :  { %v774_v20 = vadd.f32 1.0, %v11681_v18 }
 0x32c   :  { %11682 = vrcp.f32 %v725_v19  ;;  %v11344_v19 = vld [vmem:[#allocation8 + $0xd0] sm:$0xff]  }
 0x32d   :  { %11684 = vrcp.f32 %v774_v20  ;;  %v11345_v20 = vld [vmem:[#allocation8 + $0xd8] sm:$0xff]  }
 0x336   :  { %v11683_v21 = vpop.eup %11682 }
 0x337   :  { %v11685_v22 = vpop.eup %11684  ;;  %v777_v23 = vmul.f32 %v11683_v21, %v12204_v35  ;;  %v11346_v21 = vld [vmem:[#allocation8 + $0xe0] sm:$0xff]  }
 0x338   :  { %v779_v26 = vmul.f32 %v11685_v22, %v12204_v35  ;;  %v12278_v35 = vpop.permute.xlu0 %899  ;;  %v11347_v22 = vld [vmem:[#allocation8 + $0xe8] sm:$0xff]  }
 0x339   :  { %v778_v27 = vadd.f32 %v777_v23, %v12196_v34  ;;  %v799_v34 = vld [vmem:[#allocation10 + $0x1] ss:$8 sm:$0x7]  ;;  %v918_v41 = vsel %vm383_vm0, %v11855_v40, %v12278_v35 }
 0x33a   :  { %v780_v28 = vsub.f32 %v12194_v31, %v779_v26  ;;  %v12270_v31 = vld [vmem:[#allocation8 + $0x248] sm:$0xff]   ;;  %v804_v37 = vrot.slane %v799_v34, %v12187_v7  ;;  %v921_v47 = vsel %vm919_vm2, %v918_v41, %v908_v36  ;;  %v11348_v23 = vld [vmem:[#allocation8 + $0xf0] sm:$0xff]   ;;  %v11349_v26 = vld [vmem:[#allocation8 + $0xf8] sm:$0xff]  }
 0x33b   :  { %10018 = vmatpush3.bf16.msra.mxu1 %v12270_v31  ;;  %v924_v2 = vsel %vm922_vm3, %v921_v47, %v914_v53  ;;  %v1084_v41 = vld [vmem:[#allocation10 + $0x2] ss:$8 sm:$0x7]  ;;  %v1094_v47 = vld [vmem:[#allocation10 + $0x3] ss:$8 sm:$0x7] }
 0x33c   :  { %v797_v29 = vpack.c.bf16 %v780_v28, %v778_v27  ;;  %10043 = vmatprep.subr.bf16.mxu1 %v12012_v25  ;;  %v912_v48 = vpop.permute.xlu0 %911  ;;  %v11350_v27 = vld [vmem:[#allocation8 + $0x100] sm:$0xff]   ;;  %v11351_v28 = vld [vmem:[#allocation8 + $0x108] sm:$0xff]   ;;  %v1089_v43 = vrot.slane %v1084_v41, %v12187_v7  ;;  %v1099_v53 = vrot.slane %v1094_v47, %v12187_v7  ;;  %v11361_v47 = vld [vmem:[#allocation8 + $0x158] sm:$0xff]  }
 0x33d   :  { %v923_v57 = vsel %vm922_vm3, %v920_v54, %v912_v48  ;;  %v11358_v41 = vld [vmem:[#allocation8 + $0x140] sm:$0xff]  }
 0x33e   :  { %10000 = vmatmul.mubr.bf16.vlgmr.msra.gmra.mrb[20].mxu0 %v797_v29 }
 0x33f   :  { %10024 = vmatpush3.bf16.msra.mxu0 %v12222_v58  ;;  %10039 = vmatprep.mubr.msk.bf16.mxu0 %vm12015_vm1, %v12012_v25 }
 0x340   :  { %10025 = vmatprep.subr.bf16.mxu0 %v12012_v25 }
 0x343   :  { %10026 = vmatpush3.bf16.msra.mxu0 %v12225_v60 }
 0x344   :  { %10027 = vmatprep.subr.bf16.mxu0 %v12012_v25 }
 0x347   :  { %10028 = vmatpush3.bf16.msra.mxu0 %v12229_v61 }
 0x348   :  { %10029 = vmatprep.subr.bf16.mxu0 %v12012_v25 }
 0x34b   :  { %10030 = vmatpush3.bf16.msra.mxu0 %v12233_v63 }
 0x34c   :  { %10031 = vmatprep.subr.bf16.mxu0 %v12012_v25 }
 0x34f   :  { %10032 = vmatpush3.bf16.msra.mxu0 %v12237_v0 }
 0x350   :  { %10033 = vmatprep.subr.bf16.mxu0 %v12012_v25 }
 0x353   :  { %10034 = vmatpush3.bf16.msra.mxu0 %v12241_v1 }
 0x354   :  { %10035 = vmatprep.subr.bf16.mxu0 %v12012_v25 }
 0x357   :  { %10036 = vmatpush3.bf16.msra.mxu0 %v12264_v30 }
 0x358   :  { %10037 = vmatprep.subr.bf16.mxu0 %v12012_v25 }
 0x35b   :  { %10038 = vmatpush3.bf16.msra.mxu0 %v12270_v31 }
 0x35c   :  { %10063 = vmatprep.subr.bf16.mxu0 %v12012_v25 }
 0x411   :  { %v888_v45 = vpop.f32.mrb[20].mxu0 }
 0x412   :  { %v889_v50 = vadd.f32 %v888_v45, %v804_v37  ;;  %v10001_v51 = vpop.f32.mrb[21].mxu0 }
 0x413   :  { %v891_v52 = vpop.f32.mrb[22].mxu0 }
 0x414   :  { %v892_v55 = vadd.f32 %v891_v52, %v804_v37  ;;  %v10002_v56 = vpop.f32.mrb[23].mxu0  ;;  %v925_v3 = vadd.f32 %v923_v57, %v889_v50 }
 0x416   :  { %v926_v44 = vadd.f32 %v924_v2, %v892_v55  ;;  %v11352_v2 = vld [vmem:[#allocation8 + $0x110] sm:$0xff]  }
 0x418   :  { %v943_v4 = vpack.c.bf16 %v926_v44, %v925_v3 }
 0x41a   :  { %10020 = vmatmul.mubr.bf16.vlgmr.msra.gmra.mrb[16].mxu1 %v943_v4 }
 0x41b   :  { %10059 = vmatprep.mubr.msk.bf16.mxu1 %vm12015_vm1, %v12012_v25  ;;  %10044 = vmatpush3.bf16.msra.mxu1 %v11342_v6 }
 0x41c   :  { %10045 = vmatprep.subr.bf16.mxu1 %v12012_v25 }
 0x41f   :  { %10046 = vmatpush3.bf16.msra.mxu1 %v11343_v8 }
 0x420   :  { %10047 = vmatprep.subr.bf16.mxu1 %v12012_v25 }
 0x423   :  { %10048 = vmatpush3.bf16.msra.mxu1 %v11344_v19 }
 0x424   :  { %10049 = vmatprep.subr.bf16.mxu1 %v12012_v25 }
 0x427   :  { %10050 = vmatpush3.bf16.msra.mxu1 %v11345_v20 }
 0x428   :  { %10051 = vmatprep.subr.bf16.mxu1 %v12012_v25 }
 0x42b   :  { %10052 = vmatpush3.bf16.msra.mxu1 %v11346_v21 }
 0x42c   :  { %10053 = vmatprep.subr.bf16.mxu1 %v12012_v25 }
 0x42f   :  { %10054 = vmatpush3.bf16.msra.mxu1 %v11347_v22 }
 0x430   :  { %10055 = vmatprep.subr.bf16.mxu1 %v12012_v25 }
 0x433   :  { %10056 = vmatpush3.bf16.msra.mxu1 %v11348_v23 }
 0x434   :  { %10057 = vmatprep.subr.bf16.mxu1 %v12012_v25 }
 0x437   :  { %10058 = vmatpush3.bf16.msra.mxu1 %v11349_v26 }
 0x438   :  { %10075 = vmatprep.subr.bf16.mxu1 %v12012_v25 }
 0x4ed   :  { %v1026_v9 = vpop.f32.mrb[16].mxu1 }
 0x4ee   :  { %v1033_v10 = vsub.f32 %v925_v3, %v1026_v9  ;;  %v10021_v11 = vpop.f32.mrb[17].mxu1  ;;  %v11353_v3 = vld [vmem:[#allocation8 + $0x118] sm:$0xff]  }
 0x4ef   :  { %v1029_v12 = vpop.f32.mrb[18].mxu1 }
 0x4f0   :  { %v1034_v13 = vsub.f32 %v926_v44, %v1029_v12  ;;  %v10022_v15 = vpop.f32.mrb[19].mxu1  ;;  %v1035_v16 = vmul.f32 %v1033_v10, %v1033_v10  ;;  %v1121_v44 = vld [vmem:[#allocation10 + $0x4] ss:$8 sm:$0x7] }
 0x4f1   :  { %v1126_v4 = vrot.slane %v1121_v44, %v12187_v7 }
 0x4f2   :  { %v1036_v17 = vmul.f32 %v1034_v13, %v1034_v13 }
 0x4f4   :  { %v1037_v18 = vpack.c.bf16 %v1036_v17, %v1035_v16 }
 0x4f6   :  { %10040 = vmatmul.mubr.bf16.vlgmr.msra.gmra.mrb[24].mxu0 %v1037_v18 }
 0x4f7   :  { %10071 = vmatprep.mubr.msk.bf16.mxu0 %vm12015_vm1, %v12012_v25  ;;  %10064 = vmatpush3.bf16.msra.mxu0 %v11350_v27 }
 0x4f8   :  { %10065 = vmatprep.subr.bf16.mxu0 %v12012_v25 }
 0x4fb   :  { %10066 = vmatpush3.bf16.msra.mxu0 %v11351_v28 }
 0x4fc   :  { %10067 = vmatprep.subr.bf16.mxu0 %v12012_v25 }
 0x4ff   :  { %10068 = vmatpush3.bf16.msra.mxu0 %v11352_v2 }
 0x500   :  { %10069 = vmatprep.subr.bf16.mxu0 %v12012_v25 }
 0x503   :  { %10070 = vmatpush3.bf16.msra.mxu0 %v11353_v3  ;;  %v1409_v3 = vld [vmem:[#allocation10 + $0x7] ss:$8 sm:$0x7] }
 0x504   :  { %10095 = vmatprep.subr.bf16.mxu0 %v12012_v25 }
 0x5c9   :  { %v1072_v29 = vpop.f32.mrb[24].mxu0 }
 0x5ca   :  { %v1073_v33 = vadd.f32 1e-05, %v1072_v29  ;;  %v10041_v34 = vpop.f32.mrb[25].mxu0 }
 0x5cb   :  { %v1075_v36 = vpop.f32.mrb[26].mxu0 }
 0x5cc   :  { %11686 = vrsqrt.f32 %v1073_v33  ;;  %v1076_v37 = vadd.f32 1e-05, %v1075_v36  ;;  %v10042_v40 = vpop.f32.mrb[27].mxu0 }
 0x5cd   :  { %v11357_v40 = vld [vmem:[#allocation8 + $0x138] sm:$0xff]  }
 0x5ce   :  { %11688 = vrsqrt.f32 %v1076_v37  ;;  %v11356_v37 = vld [vmem:[#allocation8 + $0x130] sm:$0xff]  }
 0x5d6   :  { %v11687_v45 = vpop.eup %11686 }
 0x5d7   :  { %v1081_v48 = vmul.f32 %v11687_v45, %v1033_v10  ;;  %v11360_v45 = vld [vmem:[#allocation8 + $0x150] sm:$0xff]  }
 0x5d8   :  { %v11689_v50 = vpop.eup %11688 }
 0x5d9   :  { %v1082_v51 = vmul.f32 %v11689_v50, %v1034_v13  ;;  %v1091_v52 = vmul.f32 %v1089_v43, %v1081_v48  ;;  %v11364_v48 = vld [vmem:[#allocation7 + $0x94] ss:$12 sps:$4 sm:$0xff]  }
 0x5db   :  { %v1092_v54 = vmul.f32 %v1089_v43, %v1082_v51  ;;  %v12306_v55 = vadd.f32 %v1099_v53, %v1091_v52  ;;  %v11359_v43 = vld [vmem:[#allocation8 + $0x148] sm:$0xff]  }
 0x5dd   :  { %v12308_v56 = vadd.f32 %v1099_v53, %v1092_v54 }
 0x5df   :  { %v1119_v57 = vpack.c.bf16 %v12308_v56, %v12306_v55 }
 0x5e1   :  { %10060 = vmatmul.mubr.bf16.vlgmr.msra.gmra.mrb[20].mxu1 %v1119_v57 }
 0x5e2   :  { %10076 = vmatpush3.bf16.msra.mxu1 %v12222_v58  ;;  %10091 = vmatprep.mubr.msk.bf16.mxu1 %vm12015_vm1, %v12012_v25 }
 0x5e3   :  { %10077 = vmatprep.subr.bf16.mxu1 %v12012_v25 }
 0x5e6   :  { %10078 = vmatpush3.bf16.msra.mxu1 %v12225_v60 }
 0x5e7   :  { %10079 = vmatprep.subr.bf16.mxu1 %v12012_v25 }
 0x5ea   :  { %10080 = vmatpush3.bf16.msra.mxu1 %v12229_v61 }
 0x5eb   :  { %10081 = vmatprep.subr.bf16.mxu1 %v12012_v25 }
 0x5ee   :  { %10082 = vmatpush3.bf16.msra.mxu1 %v12233_v63 }
 0x5ef   :  { %10083 = vmatprep.subr.bf16.mxu1 %v12012_v25 }
 0x5f2   :  { %10084 = vmatpush3.bf16.msra.mxu1 %v12237_v0 }
 0x5f3   :  { %10085 = vmatprep.subr.bf16.mxu1 %v12012_v25 }
 0x5f6   :  { %10086 = vmatpush3.bf16.msra.mxu1 %v12241_v1 }
 0x5f7   :  { %10087 = vmatprep.subr.bf16.mxu1 %v12012_v25 }
 0x5fa   :  { %10088 = vmatpush3.bf16.msra.mxu1 %v12264_v30 }
 0x5fb   :  { %10089 = vmatprep.subr.bf16.mxu1 %v12012_v25 }
 0x5fe   :  { %10090 = vmatpush3.bf16.msra.mxu1 %v12270_v31 }
 0x5ff   :  { %10115 = vmatprep.subr.bf16.mxu1 %v12012_v25 }
 0x6b4   :  { %v1210_v6 = vpop.f32.mrb[20].mxu1 }
 0x6b5   :  { %v1211_v8 = vadd.f32 %v1210_v6, %v1126_v4  ;;  %v10061_v9 = vpop.f32.mrb[21].mxu1 }
 0x6b6   :  { %v1213_v10 = vpop.f32.mrb[22].mxu1  ;;  %v1414_v9 = vrot.slane %v1409_v3, %v12187_v7 }
 0x6b7   :  { %v1214_v11 = vadd.f32 %v1213_v10, %v1126_v4  ;;  %v10062_v12 = vpop.f32.mrb[23].mxu1  ;;  %v1217_v13 = vmax.f32 %v1211_v8, 0.0 }
 0x6b9   :  { %v1218_v15 = vmax.f32 %v1214_v11, 0.0 }
 0x6bb   :  { %v1227_v16 = vpack.c.bf16 %v1218_v15, %v1217_v13  ;;  %v11362_v13 = vld [vmem:[#allocation7 + $0x90] ss:$12 sps:$4 sm:$0xff]  }
 0x6bd   :  { %10072 = vmatmul.mubr.msk.bf16.vlgmr.msra.gmra.mrb[28].mxu0 %vm919_vm2, %v1227_v16  ;;  %v11367_v16 = vld [vmem:[#allocation7 + $0xac] ss:$12 sps:$4 sm:$0xff]  }
 0x6be   :  { %10096 = vmatpush3.bf16.msra.mxu0 %v12222_v58  ;;  %10111 = vmatprep.mubr.msk.bf16.mxu0 %vm12015_vm1, %v12012_v25  ;;  %v1229_v58 = vld [vmem:[#allocation10 + $0x5] ss:$8 sm:$0x7] }
 0x6bf   :  { %10097 = vmatprep.subr.bf16.mxu0 %v12012_v25 }
 0x6c2   :  { %10098 = vmatpush3.bf16.msra.mxu0 %v12225_v60  ;;  %v1234_v60 = vrot.slane %v1229_v58, %v12187_v7  ;;  %v11365_v58 = vld [vmem:[#allocation7 + $0xa8] ss:$12 sps:$4 sm:$0xff]  }
 0x6c3   :  { %10099 = vmatprep.subr.bf16.mxu0 %v12012_v25 }
 0x6c6   :  { %10100 = vmatpush3.bf16.msra.mxu0 %v12229_v61 }
 0x6c7   :  { %10101 = vmatprep.subr.bf16.mxu0 %v12012_v25 }
 0x6ca   :  { %10102 = vmatpush3.bf16.msra.mxu0 %v12233_v63 }
 0x6cb   :  { %10103 = vmatprep.subr.bf16.mxu0 %v12012_v25 }
 0x6ce   :  { %10104 = vmatpush3.bf16.msra.mxu0 %v12237_v0 }
 0x6cf   :  { %10105 = vmatprep.subr.bf16.mxu0 %v12012_v25 }
 0x6d2   :  { %10106 = vmatpush3.bf16.msra.mxu0 %v12241_v1 }
 0x6d3   :  { %10107 = vmatprep.subr.bf16.mxu0 %v12012_v25 }
 0x6d6   :  { %10108 = vmatpush3.bf16.msra.mxu0 %v12264_v30  ;;  %v11354_v30 = vld [vmem:[#allocation8 + $0x120] sm:$0xff]  }
 0x6d7   :  { %10109 = vmatprep.subr.bf16.mxu0 %v12012_v25 }
 0x6da   :  { %10110 = vmatpush3.bf16.msra.mxu0 %v12270_v31  ;;  %v11355_v31 = vld [vmem:[#allocation8 + $0x128] sm:$0xff]  }
 0x790   :  { %v1297_v61 = vpop.f32.mrb[28].mxu0 }
 0x791   :  { %v1298_v63 = vadd.f32 %v1297_v61, %v1234_v60  ;;  %v10073_v17 = vpop.f32.mrb[29].mxu0  ;;  %v11370_v61 = vld [vmem:[#allocation7 + $0x64] ss:$12 sps:$4 sm:$0xff]  }
 0x792   :  { %v1300_v18 = vpop.f32.mrb[30].mxu0  ;;  %1650 = vmatprep.subr.bf16.mxu0 %v11370_v61  ;;  %v11371_v17 = vld [vmem:[#allocation7 + $0x78] ss:$12 sps:$4 sm:$0xff]  }
 0x793   :  { %v1301_v0 = vadd.f32 %v1300_v18, %v1234_v60  ;;  %v10074_v19 = vpop.f32.mrb[31].mxu0  ;;  %v1304_v20 = vadd.f32 %v1298_v63, %v12306_v55  ;;  %v11368_v60 = vld [vmem:[#allocation7 + $0x60] ss:$12 sps:$4 sm:$0xff]   ;;  %v11373_v63 = vld [vmem:[#allocation7 + $0x7c] ss:$12 sps:$4 sm:$0xff]  }
 0x794   :  { %v1436_v18 = vld [vmem:[#allocation10 + $0x18] ss:$8 sm:$0x7] }
 0x795   :  { %v1305_v1 = vadd.f32 %v1301_v0, %v12308_v56  ;;  %v1399_v56 = vld [vmem:[#allocation10 + $0x6] ss:$8 sm:$0x7]  ;;  %v1441_v0 = vrot.slane %v1436_v18, %v12187_v7 }
 0x796   :  { %v1404_v57 = vrot.slane %v1399_v56, %v12187_v7 }
 0x797   :  { %v1306_v21 = vpack.c.bf16 %v1305_v1, %v1304_v20 }
 0x799   :  { %10092 = vmatmul.mubr.bf16.vlgmr.msra.gmra.mrb[24].mxu1 %v1306_v21 }
 0x79a   :  { %10131 = vmatprep.mubr.msk.bf16.mxu1 %vm12015_vm1, %v12012_v25  ;;  %10116 = vmatpush3.bf16.msra.mxu1 %v11354_v30 }
 0x79b   :  { %10117 = vmatprep.subr.bf16.mxu1 %v12012_v25 }
 0x79e   :  { %10118 = vmatpush3.bf16.msra.mxu1 %v11355_v31 }
 0x79f   :  { %10119 = vmatprep.subr.bf16.mxu1 %v12012_v25 }
 0x7a2   :  { %10120 = vmatpush3.bf16.msra.mxu1 %v11356_v37 }
 0x7a3   :  { %10121 = vmatprep.subr.bf16.mxu1 %v12012_v25 }
 0x7a6   :  { %10122 = vmatpush3.bf16.msra.mxu1 %v11357_v40  ;;  %v1545_v40 = vpop.permute.xlu0 %1544 }
 0x7a7   :  { %10123 = vmatprep.subr.bf16.mxu1 %v12012_v25 }
 0x7aa   :  { %10124 = vmatpush3.bf16.msra.mxu1 %v11358_v41  ;;  %v1547_v41 = vpop.permute.xlu1 %1546 }
 0x7ab   :  { %10125 = vmatprep.subr.bf16.mxu1 %v12012_v25 }
 0x7ae   :  { %10126 = vmatpush3.bf16.msra.mxu1 %v11359_v43 }
 0x7af   :  { %10127 = vmatprep.subr.bf16.mxu1 %v12012_v25 }
 0x7b2   :  { %10128 = vmatpush3.bf16.msra.mxu1 %v11360_v45 }
 0x7b3   :  { %10129 = vmatprep.subr.bf16.mxu1 %v12012_v25 }
 0x7b6   :  { %10130 = vmatpush3.bf16.msra.mxu1 %v11361_v47 }
 0x7b7   :  { %1581 = vmatprep.subr.bf16.mxu1 %v11364_v48 }
 0x86c   :  { %v1341_v22 = vpop.f32.mrb[24].mxu1 }
 0x86d   :  { %v1348_v23 = vsub.f32 %v1304_v20, %v1341_v22  ;;  %v10093_v26 = vpop.f32.mrb[25].mxu1 }
 0x86e   :  { %v1344_v27 = vpop.f32.mrb[26].mxu1 }
 0x86f   :  { %v1349_v28 = vsub.f32 %v1305_v1, %v1344_v27  ;;  %v10094_v29 = vpop.f32.mrb[27].mxu1  ;;  %v1350_v33 = vmul.f32 %v1348_v23, %v1348_v23 }
 0x871   :  { %v1351_v34 = vmul.f32 %v1349_v28, %v1349_v28 }
 0x873   :  { %v1352_v36 = vpack.c.bf16 %v1351_v34, %v1350_v33 }
 0x875   :  { %10112 = vmatmul.mubr.bf16.vlgmr.msra.gmra.mrb[32].mxu0 %v1352_v36 }
 0x876   :  { %1682 = vmatprep.mubr.bf16.mxu0 %v12011_v24  ;;  %1651 = vmatpush1.bf16.msra.mxu0 %v11368_v60 }
 0x877   :  { %1652 = vmatprep.subr.bf16.mxu0 %v11373_v63 }
 0x87a   :  { %1653 = vmatpush1.bf16.msra.mxu0 %v11371_v17 }
 0x87b   :  { %10135 = vmatprep.subr.bf16.mxu0 %v12012_v25 }
 0x948   :  { %v1387_v50 = vpop.f32.mrb[32].mxu0 }
 0x949   :  { %v1388_v51 = vadd.f32 1e-05, %v1387_v50  ;;  %v10113_v52 = vpop.f32.mrb[33].mxu0 }
 0x94a   :  { %v1390_v53 = vpop.f32.mrb[34].mxu0  ;;  %v11375_v52 = vld [vmem:[#allocation8 + $0x258] sm:$0xff]  }
 0x94b   :  { %11690 = vrsqrt.f32 %v1388_v51  ;;  %v1391_v54 = vadd.f32 1e-05, %v1390_v53  ;;  %v10114_v55 = vpop.f32.mrb[35].mxu0  ;;  %v11374_v51 = vld [vmem:[#allocation8 + $0x250] sm:$0xff]   ;;  %v11376_v53 = vld [vmem:[#allocation8 + $0x260] sm:$0xff]  }
 0x94c   :  { %v1694_v55 = vld [vmem:[#allocation10 + $0x19] ss:$8 sm:$0x7] }
 0x94d   :  { %11692 = vrsqrt.f32 %v1391_v54  ;;  %v11377_v54 = vld [vmem:[#allocation8 + $0x268] sm:$0xff]   ;;  %v1699_v3 = vrot.slane %v1694_v55, %v12187_v7 }
 0x955   :  { %v11691_v2 = vpop.eup %11690 }
 0x956   :  { %v1396_v44 = vmul.f32 %v11691_v2, %v1348_v23 }
 0x957   :  { %v11693_v4 = vpop.eup %11692 }
 0x958   :  { %v1397_v6 = vmul.f32 %v11693_v4, %v1349_v28  ;;  %v1406_v8 = vmul.f32 %v1404_v57, %v1396_v44 }
 0x95a   :  { %v1407_v10 = vmul.f32 %v1404_v57, %v1397_v6  ;;  %v1416_v11 = vadd.f32 %v1414_v9, %v1406_v8  ;;  %v1703_v57 = vrot.slane %v1694_v55, %v12185_v5 }
 0x95c   :  { %v1417_v12 = vadd.f32 %v1414_v9, %v1407_v10 }
 0x95e   :  { %v1434_v15 = vpack.c.bf16 %v1417_v12, %v1416_v11 }
 0x960   :  { %10132 = vmatmul.mubr.bf16.vlgmr.msra.gmra.mrb[28].mxu1 %v1434_v15 }
 0x961   :  { %1582 = vmatpush1.bf16.msra.mxu1 %v11362_v13  ;;  %1613 = vmatprep.mubr.bf16.mxu1 %v12011_v24 }
 0x962   :  { %1583 = vmatprep.subr.bf16.mxu1 %v11367_v16 }
 0x965   :  { %1584 = vmatpush1.bf16.msra.mxu1 %v11365_v58 }
 0x966   :  { %10147 = vmatprep.subr.bf16.mxu1 %v12012_v25 }
 0x968   :  { %8960 = vmatmul.mubr.msk.bf16.vlgmr.msra.gmra.mrb[32].mxu1 %vm383_vm0, %v12136_v38 }
 0x969   :  { %10155 = vmatprep.mubr.msk.bf16.mxu1 %vm12015_vm1, %v12012_v25  ;;  %10148 = vmatpush3.bf16.msra.mxu1 %v11374_v51 }
 0x96a   :  { %10149 = vmatprep.subr.bf16.mxu1 %v12012_v25 }
 0x96d   :  { %10150 = vmatpush3.bf16.msra.mxu1 %v11375_v52 }
 0x96e   :  { %10151 = vmatprep.subr.bf16.mxu1 %v12012_v25 }
 0x971   :  { %10152 = vmatpush3.bf16.msra.mxu1 %v11376_v53 }
 0x972   :  { %10153 = vmatprep.subr.bf16.mxu1 %v12012_v25 }
 0x975   :  { %10154 = vmatpush3.bf16.msra.mxu1 %v11377_v54 }
 0x976   :  { %10171 = vmatprep.subr.bf16.mxu1 %v12012_v25 }
 0xa33   :  { %v1525_v19 = vpop.f32.mrb[28].mxu1 }
 0xa34   :  { %v1526_v20 = vadd.f32 %v1525_v19, %v1441_v0  ;;  %v10133_v1 = vpop.f32.mrb[29].mxu1  ;;  %v11379_v19 = vld [vmem:[#allocation8 + $0x168] sm:$0xff]  }
 0xa35   :  { %v1528_v38 = vpop.f32.mrb[30].mxu1  ;;  %v11381_v1 = vld [vmem:[#allocation8 + $0x178] sm:$0xff]  }
 0xa36   :  { %v8954_v21 = vmul.f32 -1.442695, %v1526_v20  ;;  %v1529_v30 = vadd.f32 %v1528_v38, %v1441_v0  ;;  %v10134_v31 = vpop.f32.mrb[31].mxu1  ;;  %v11378_v0 = vld [vmem:[#allocation8 + $0x160] sm:$0xff]   ;;  %v11380_v20 = vld [vmem:[#allocation8 + $0x170] sm:$0xff]  }
 0xa37   :  { %v12414_v38 = vld [vmem:[#allocation8 + $0x270] sm:$0xff]  }
 0xa38   :  { %11694 = vpow2.f32 %v8954_v21  ;;  %v8955_v22 = vmul.f32 -1.442695, %v1529_v30  ;;  %v12417_v21 = vld [vmem:[#allocation8 + $0x278] sm:$0xff]  }
 0xa3a   :  { %11696 = vpow2.f32 %v8955_v22 }
 0xa3b   :  { %v1615_v23 = vpop.f32.mrb[32].mxu1 }
 0xa3c   :  { %v1617_v26 = vpop.f32.mrb[33].mxu1 }
 0xa3d   :  { %v1619_v27 = vpop.f32.mrb[34].mxu1 }
 0xa3e   :  { %v1621_v28 = vpop.f32.mrb[35].mxu1 }
 0xa42   :  { %v11695_v29 = vpop.eup %11694 }
 0xa43   :  { %v1538_v33 = vadd.f32 1.0, %v11695_v29 }
 0xa44   :  { %v11697_v34 = vpop.eup %11696 }
 0xa45   :  { %11698 = vrcp.f32 %v1538_v33  ;;  %v1539_v36 = vadd.f32 1.0, %v11697_v34 }
 0xa47   :  { %11700 = vrcp.f32 %v1539_v36 }
 0xa4f   :  { %v12374_v37 = vpop.eup %11698 }
 0xa50   :  { %v1550_v45 = vmul.f32 %v12374_v37, %v1545_v40 }
 0xa51   :  { %v12376_v43 = vpop.eup %11700 }
 0xa52   :  { %v1551_v47 = vmul.f32 %v12376_v43, %v1547_v41 }
 0xa54   :  { %v1556_v48 = vpack.c.bf16 %v1551_v47, %v1550_v45 }
 0xa56   :  { %1625 = vrot.lane.b32.xlu0 %v1556_v48, %s12014_s10 }
 0xa5a   :  { %1943 = vrot.lane.b32.xlu0 %v1550_v45, %s12014_s10 }
 0xa5e   :  { %3038 = vrot.lane.b32.xlu0 %v12181_v59, %s12013_s4 }
 0xac8   :  { %v1626_v50 = vpop.permute.xlu0 %1625 }
 0xac9   :  { %8965 = vmatmul.mubr.msk.bf16.vlgmr.msra.gmra.mrb[36].mxu0 %vm383_vm0, %v1626_v50 }
 0xaca   :  { %10143 = vmatprep.mubr.msk.bf16.mxu0 %vm12015_vm1, %v12012_v25  ;;  %10136 = vmatpush3.bf16.msra.mxu0 %v11374_v51 }
 0xacb   :  { %10137 = vmatprep.subr.bf16.mxu0 %v12012_v25 }
 0xace   :  { %10138 = vmatpush3.bf16.msra.mxu0 %v11375_v52 }
 0xacf   :  { %10139 = vmatprep.subr.bf16.mxu0 %v12012_v25 }
 0xad2   :  { %10140 = vmatpush3.bf16.msra.mxu0 %v11376_v53 }
 0xad3   :  { %10141 = vmatprep.subr.bf16.mxu0 %v12012_v25 }
 0xad6   :  { %10142 = vmatpush3.bf16.msra.mxu0 %v11377_v54 }
 0xad7   :  { %10159 = vmatprep.subr.bf16.mxu0 %v12012_v25 }
 0xb9c   :  { %v1684_v56 = vpop.f32.mrb[36].mxu0 }
 0xb9d   :  { %v1685_v2 = vadd.f32 %v1684_v56, %v1615_v23  ;;  %v1686_v44 = vpop.f32.mrb[37].mxu0 }
 0xb9e   :  { %v1687_v4 = vadd.f32 %v1686_v44, %v1617_v26  ;;  %v1688_v6 = vpop.f32.mrb[38].mxu0 }
 0xb9f   :  { %v1689_v8 = vadd.f32 %v1688_v6, %v1619_v27  ;;  %v1690_v9 = vpop.f32.mrb[39].mxu0  ;;  %v1706_v12 = vadd.f32 %v1699_v3, %v1685_v2  ;;  %v12436_v2 = vld [vmem:[#allocation8 + $0x288] sm:$0xff]  }
 0xba0   :  { %v12397_v10 = vadd.f32 %v1703_v57, %v1687_v4  ;;  %v1691_v11 = vadd.f32 %v1690_v9, %v1621_v28  ;;  %v1944_v4 = vpop.permute.xlu0 %1943 }
 0xba1   :  { %v1708_v13 = vadd.f32 %v1699_v3, %v1689_v8  ;;  %v1866_v3 = vld [vmem:[#allocation10 + $0x1a] ss:$8 sm:$0x7] }
 0xba2   :  { %v1709_v15 = vadd.f32 %v1703_v57, %v1691_v11  ;;  %v12430_v57 = vld [vmem:[#allocation8 + $0x280] sm:$0xff]   ;;  %v1871_v44 = vrot.slane %v1866_v3, %v12187_v7 }
 0xba3   :  { %v1710_v16 = vsub.f32 %v1706_v12, %v1708_v13  ;;  %v11390_v3 = vld [vmem:[#allocation8 + $0x1a0] sm:$0xff]  }
 0xba4   :  { %v1711_v58 = vsub.f32 %v12397_v10, %v1709_v15 }
 0xba5   :  { %1721 = vrot.lane.b32.xlu1 %v1710_v16, %s12002_s1 }
 0xba9   :  { %1945 = vrot.lane.b32.xlu1 %v1551_v47, %s12014_s10 }
 0xbad   :  { %3040 = vrot.lane.b32.xlu1 %v12183_v62, %s12013_s4 }
 0xc17   :  { %v1722_v60 = vpop.permute.xlu1 %1721 }
 0xc18   :  { %v1724_v61 = vmul.f32 %v1722_v60, %v1706_v12  ;;  %v1800_v63 = vmul.f32 %v1722_v60, %v1708_v13 }
 0xc1a   :  { %v1725_v17 = vpack.c.bf16 %v1724_v61, %v1724_v61  ;;  %v1801_v18 = vpack.c.bf16 %v1800_v63, %v1800_v63 }
 0xc1b   :  { %v1946_v8 = vpop.permute.xlu1 %1945 }
 0xc1c   :  { %10144 = vmatmul.mubr.msk.bf16.vlgmr.msra.gmra.mrb[40].mxu0 %vm919_vm2, %v1725_v17  ;;  %10156 = vmatmul.mubr.msk.bf16.vlgmr.msra.gmra.mrb[36].mxu1 %vm919_vm2, %v1801_v18  ;;  %v1950_v16 = vsel %vm383_vm0, %v1946_v8, %v12278_v35  ;;  %v11386_v35 = vld [vmem:[#allocation8 + $0x180] sm:$0xff]  }
 0xc1d   :  { %10167 = vmatprep.mubr.msk.bf16.mxu0 %vm12015_vm1, %v12012_v25  ;;  %10179 = vmatprep.mubr.msk.bf16.mxu1 %vm12015_vm1, %v12012_v25 }
 0xc1e   :  { %10160 = vmatpush3.bf16.msra.mxu0 %v11378_v0  ;;  %10172 = vmatpush3.bf16.msra.mxu1 %v12414_v38 }
 0xc1f   :  { %10161 = vmatprep.subr.bf16.mxu0 %v12012_v25  ;;  %10173 = vmatprep.subr.bf16.mxu1 %v12012_v25 }
 0xc22   :  { %10162 = vmatpush3.bf16.msra.mxu0 %v11379_v19  ;;  %10174 = vmatpush3.bf16.msra.mxu1 %v12417_v21 }
 0xc23   :  { %10163 = vmatprep.subr.bf16.mxu0 %v12012_v25  ;;  %10175 = vmatprep.subr.bf16.mxu1 %v12012_v25 }
 0xc26   :  { %10164 = vmatpush3.bf16.msra.mxu0 %v11380_v20  ;;  %10176 = vmatpush3.bf16.msra.mxu1 %v12430_v57 }
 0xc27   :  { %10165 = vmatprep.subr.bf16.mxu0 %v12012_v25  ;;  %10177 = vmatprep.subr.bf16.mxu1 %v12012_v25 }
 0xc2a   :  { %10166 = vmatpush3.bf16.msra.mxu0 %v11381_v1  ;;  %10178 = vmatpush3.bf16.msra.mxu1 %v12436_v2 }
 0xc2b   :  { %10183 = vmatprep.subr.bf16.mxu0 %v12012_v25  ;;  %10195 = vmatprep.subr.bf16.mxu1 %v12012_v25 }
 0xcef   :  { %v1787_v30 = vpop.f32.mrb[40].mxu0  ;;  %v1839_v31 = vpop.f32.mrb[36].mxu1 }
 0xcf0   :  { %v8971_v22 = vmul.f32 -0.25, %v1787_v30  ;;  %v8973_v23 = vmul.f32 0.25, %v1839_v31  ;;  %v10145_v26 = vpop.f32.mrb[41].mxu0  ;;  %v10157_v27 = vpop.f32.mrb[37].mxu1  ;;  %v11387_v31 = vld [vmem:[#allocation8 + $0x188] sm:$0xff]  }
 0xcf1   :  { %v1790_v28 = vpop.f32.mrb[42].mxu0  ;;  %v1842_v29 = vpop.f32.mrb[38].mxu1 }
 0xcf2   :  { %v1795_v33 = vmul.f32 1.442695, %v8971_v22  ;;  %v1847_v34 = vmul.f32 1.442695, %v8973_v23  ;;  %v10146_v36 = vpop.f32.mrb[43].mxu0  ;;  %v10158_v40 = vpop.f32.mrb[39].mxu1 }
 0xcf3   :  { %v11388_v22 = vld [vmem:[#allocation8 + $0x190] sm:$0xff]   ;;  %v11389_v23 = vld [vmem:[#allocation8 + $0x198] sm:$0xff]  }
 0xcf4   :  { %11702 = vpow2.f32 %v1795_v33  ;;  %v2084_v36 = vld [vmem:[#allocation10 + $0x1b] ss:$8 sm:$0x7] }
 0xcf5   :  { %11704 = vpow2.f32 %v1847_v34  ;;  %v2089_v40 = vrot.slane %v2084_v36, %v12187_v7  ;;  %v12491_v36 = vpack.c.bf16 %v12183_v62, %v12181_v59 }
 0xcfe   :  { %v11703_v41 = vpop.eup %11702 }
 0xcff   :  { %v11705_v45 = vpop.eup %11704  ;;  %v1797_v47 = vadd.f32 1.0, %v11703_v41 }
 0xd00   :  { %v1849_v48 = vadd.f32 1.0, %v11705_v45  ;;  %v2094_v45 = vld [vmem:[#allocation10 + $0x1c] ss:$8 sm:$0x7] }
 0xd01   :  { %11706 = vrcp.f32 %v1797_v47 }
 0xd02   :  { %11708 = vrcp.f32 %v1849_v48 }
 0xd0b   :  { %v11707_v50 = vpop.eup %11706 }
 0xd0c   :  { %v11709_v51 = vpop.eup %11708  ;;  %v1852_v52 = vmul.f32 %v11707_v50, %v1711_v58 }
 0xd0d   :  { %v1854_v53 = vmul.f32 %v11709_v51, %v1711_v58 }
 0xd0e   :  { %v1853_v54 = vadd.f32 %v1852_v52, %v1709_v15  ;;  %v1949_v15 = vsel %vm383_vm0, %v1944_v4, %v12276_v32  ;;  %v2099_v52 = vrot.slane %v2094_v45, %v12187_v7  ;;  %v2113_v4 = vld [vmem:[#allocation10 + $0x1d] ss:$8 sm:$0x7] }
 0xd0f   :  { %v1855_v55 = vsub.f32 %v12397_v10, %v1854_v53  ;;  %v11401_v45 = vld [vmem:[#allocation8 + $0x1b8] sm:$0xff]  }
 0xd11   :  { %v1864_v56 = vpack.c.bf16 %v1855_v55, %v1853_v54 }
 0xd13   :  { %10168 = vmatmul.mubr.msk.bf16.vlgmr.msra.gmra.mrb[44].mxu0 %vm919_vm2, %v1864_v56 }
 0xd14   :  { %10184 = vmatpush3.bf16.msra.mxu0 %v12414_v38  ;;  %10191 = vmatprep.mubr.msk.bf16.mxu0 %vm12015_vm1, %v12012_v25 }
 0xd15   :  { %10185 = vmatprep.subr.bf16.mxu0 %v12012_v25 }
 0xd18   :  { %10186 = vmatpush3.bf16.msra.mxu0 %v12417_v21 }
 0xd19   :  { %10187 = vmatprep.subr.bf16.mxu0 %v12012_v25 }
 0xd1c   :  { %10188 = vmatpush3.bf16.msra.mxu0 %v12430_v57 }
 0xd1d   :  { %10189 = vmatprep.subr.bf16.mxu0 %v12012_v25 }
 0xd20   :  { %10190 = vmatpush3.bf16.msra.mxu0 %v12436_v2 }
 0xd21   :  { %10207 = vmatprep.subr.bf16.mxu0 %v12012_v25 }
 0xde6   :  { %v1934_v6 = vpop.f32.mrb[44].mxu0 }
 0xde7   :  { %v1935_v9 = vadd.f32 %v1934_v6, %v1871_v44  ;;  %v10169_v10 = vpop.f32.mrb[45].mxu0  ;;  %v2118_v6 = vrot.slane %v2113_v4, %v12187_v7  ;;  %v2370_v4 = vld [vmem:[#allocation10 + $0x30] ss:$8 sm:$0x7] }
 0xde8   :  { %v1937_v11 = vpop.f32.mrb[46].mxu0 }
 0xde9   :  { %v1938_v12 = vadd.f32 %v1937_v11, %v1871_v44  ;;  %v10170_v13 = vpop.f32.mrb[47].mxu0  ;;  %v1951_v58 = vadd.f32 %v1949_v15, %v1935_v9  ;;  %v11391_v44 = vld [vmem:[#allocation8 + $0x1a8] sm:$0xff]  }
 0xdeb   :  { %v1952_v60 = vadd.f32 %v1950_v16, %v1938_v12 }
 0xded   :  { %v1961_v61 = vpack.c.bf16 %v1952_v60, %v1951_v58 }
 0xdef   :  { %10180 = vmatmul.mubr.msk.bf16.vlgmr.msra.gmra.mrb[40].mxu1 %vm919_vm2, %v1961_v61 }
 0xdf0   :  { %10203 = vmatprep.mubr.msk.bf16.mxu1 %vm12015_vm1, %v12012_v25  ;;  %10196 = vmatpush3.bf16.msra.mxu1 %v11386_v35 }
 0xdf1   :  { %10197 = vmatprep.subr.bf16.mxu1 %v12012_v25 }
 0xdf4   :  { %10198 = vmatpush3.bf16.msra.mxu1 %v11387_v31 }
 0xdf5   :  { %10199 = vmatprep.subr.bf16.mxu1 %v12012_v25 }
 0xdf8   :  { %10200 = vmatpush3.bf16.msra.mxu1 %v11388_v22 }
 0xdf9   :  { %10201 = vmatprep.subr.bf16.mxu1 %v12012_v25 }
 0xdfc   :  { %10202 = vmatpush3.bf16.msra.mxu1 %v11389_v23 }
 0xdfd   :  { %10215 = vmatprep.subr.bf16.mxu1 %v12012_v25 }
 0xec2   :  { %v2023_v63 = vpop.f32.mrb[40].mxu1 }
 0xec3   :  { %v2030_v17 = vsub.f32 %v1951_v58, %v2023_v63  ;;  %v10181_v18 = vpop.f32.mrb[41].mxu1 }
 0xec4   :  { %v2026_v0 = vpop.f32.mrb[42].mxu1 }
 0xec5   :  { %v2031_v19 = vsub.f32 %v1952_v60, %v2026_v0  ;;  %v10182_v20 = vpop.f32.mrb[43].mxu1  ;;  %v2032_v1 = vmul.f32 %v2030_v17, %v2030_v17  ;;  %v2196_v60 = vld [vmem:[#allocation10 + $0x1e] ss:$8 sm:$0x7] }
 0xec6   :  { %v2201_v61 = vrot.slane %v2196_v60, %v12187_v7 }
 0xec7   :  { %v2033_v30 = vmul.f32 %v2031_v19, %v2031_v19 }
 0xec9   :  { %v2034_v32 = vpack.c.bf16 %v2033_v30, %v2032_v1 }
 0xecb   :  { %10192 = vmatmul.mubr.msk.bf16.vlgmr.msra.gmra.mrb[48].mxu0 %vm919_vm2, %v2034_v32 }
 0xecc   :  { %10211 = vmatprep.mubr.msk.bf16.mxu0 %vm12015_vm1, %v12012_v25  ;;  %10208 = vmatpush3.bf16.msra.mxu0 %v11390_v3 }
 0xecd   :  { %10209 = vmatprep.subr.bf16.mxu0 %v12012_v25 }
 0xed0   :  { %10210 = vmatpush3.bf16.msra.mxu0 %v11391_v44 }
 0xed1   :  { %10227 = vmatprep.subr.bf16.mxu0 %v12012_v25 }
 0xf9e   :  { %v2072_v26 = vpop.f32.mrb[48].mxu0 }
 0xf9f   :  { %v2073_v27 = vadd.f32 1e-05, %v2072_v26  ;;  %v10193_v28 = vpop.f32.mrb[49].mxu0 }
 0xfa0   :  { %v2075_v29 = vpop.f32.mrb[50].mxu0 }
 0xfa1   :  { %11710 = vrsqrt.f32 %v2073_v27  ;;  %v2076_v33 = vadd.f32 1e-05, %v2075_v29  ;;  %v10194_v34 = vpop.f32.mrb[51].mxu0  ;;  %v11392_v27 = vld [vmem:[#allocation7 + $0x30] ss:$12 sps:$4 sm:$0xff]  }
 0xfa2   :  { %v11397_v29 = vld [vmem:[#allocation7 + $0x4c] ss:$12 sps:$4 sm:$0xff]  }
 0xfa3   :  { %11712 = vrsqrt.f32 %v2076_v33  ;;  %v11395_v33 = vld [vmem:[#allocation7 + $0x48] ss:$12 sps:$4 sm:$0xff]   ;;  %v11398_v34 = vld [vmem:[#allocation7 + $0x38] ss:$12 sps:$4 sm:$0xff]  }
 0xfab   :  { %v11711_v41 = vpop.eup %11710 }
 0xfac   :  { %v2081_v47 = vmul.f32 %v11711_v41, %v2030_v17  ;;  %v11400_v41 = vld [vmem:[#allocation8 + $0x1b0] sm:$0xff]  }
 0xfad   :  { %v11713_v48 = vpop.eup %11712 }
 0xfae   :  { %v2091_v50 = vmul.f32 %v2089_v40, %v2081_v47  ;;  %v2082_v51 = vmul.f32 %v11713_v48, %v2031_v19  ;;  %v11402_v47 = vld [vmem:[#allocation8 + $0x1c0] sm:$0xff]   ;;  %v11403_v48 = vld [vmem:[#allocation8 + $0x1c8] sm:$0xff]  }
 0xfb0   :  { %v2092_v53 = vmul.f32 %v2089_v40, %v2082_v51  ;;  %v2101_v54 = vadd.f32 %v2099_v52, %v2091_v50  ;;  %v11399_v40 = vld [vmem:[#allocation7 + $0x50] ss:$12 sps:$4 sm:$0xff]  }
 0xfb2   :  { %v2102_v55 = vadd.f32 %v2099_v52, %v2092_v53 }
 0xfb4   :  { %v2111_v56 = vpack.c.bf16 %v2102_v55, %v2101_v54 }
 0xfb6   :  { %10204 = vmatmul.mubr.msk.bf16.vlgmr.msra.gmra.mrb[44].mxu1 %vm919_vm2, %v2111_v56  ;;  %v2360_v56 = vld [vmem:[#allocation10 + $0x1f] ss:$8 sm:$0x7] }
 0xfb7   :  { %10216 = vmatpush3.bf16.msra.mxu1 %v12414_v38  ;;  %10223 = vmatprep.mubr.msk.bf16.mxu1 %vm12015_vm1, %v12012_v25  ;;  %v2365_v3 = vrot.slane %v2360_v56, %v12187_v7 }
 0xfb8   :  { %10217 = vmatprep.subr.bf16.mxu1 %v12012_v25 }
 0xfbb   :  { %10218 = vmatpush3.bf16.msra.mxu1 %v12417_v21 }
 0xfbc   :  { %10219 = vmatprep.subr.bf16.mxu1 %v12012_v25 }
 0xfbf   :  { %10220 = vmatpush3.bf16.msra.mxu1 %v12430_v57 }
 0xfc0   :  { %10221 = vmatprep.subr.bf16.mxu1 %v12012_v25 }
 0xfc3   :  { %10222 = vmatpush3.bf16.msra.mxu1 %v12436_v2 }
 0xfc4   :  { %10239 = vmatprep.subr.bf16.mxu1 %v12012_v25 }
0x1089   :  { %v2181_v8 = vpop.f32.mrb[44].mxu1 }
0x108a   :  { %v2182_v9 = vadd.f32 %v2181_v8, %v2118_v6  ;;  %v10205_v10 = vpop.f32.mrb[45].mxu1 }
0x108b   :  { %v2184_v11 = vpop.f32.mrb[46].mxu1 }
0x108c   :  { %v2185_v12 = vadd.f32 %v2184_v11, %v2118_v6  ;;  %v10206_v13 = vpop.f32.mrb[47].mxu1  ;;  %v2188_v15 = vmax.f32 %v2182_v9, 0.0 }
0x108e   :  { %v2189_v16 = vmax.f32 %v2185_v12, 0.0  ;;  %v2375_v12 = vrot.slane %v2370_v4, %v12187_v7 }
0x1090   :  { %v2194_v58 = vpack.c.bf16 %v2189_v16, %v2188_v15 }
0x1092   :  { %10212 = vmatmul.mubr.msk.bf16.vlgmr.msra.gmra.mrb[52].mxu0 %vm383_vm0, %v2194_v58 }
0x1093   :  { %10228 = vmatpush3.bf16.msra.mxu0 %v12414_v38  ;;  %10235 = vmatprep.mubr.msk.bf16.mxu0 %vm12015_vm1, %v12012_v25 }
0x1094   :  { %10229 = vmatprep.subr.bf16.mxu0 %v12012_v25 }
0x1097   :  { %10230 = vmatpush3.bf16.msra.mxu0 %v12417_v21 }
0x1098   :  { %10231 = vmatprep.subr.bf16.mxu0 %v12012_v25 }
0x109b   :  { %10232 = vmatpush3.bf16.msra.mxu0 %v12430_v57  ;;  %v11394_v57 = vld [vmem:[#allocation7 + $0x34] ss:$12 sps:$4 sm:$0xff]  }
0x109c   :  { %10233 = vmatprep.subr.bf16.mxu0 %v12012_v25 }
0x109f   :  { %10234 = vmatpush3.bf16.msra.mxu0 %v12436_v2 }
0x10a0   :  { %2529 = vmatprep.subr.bf16.mxu0 %v11394_v57 }
0x1165   :  { %v2252_v63 = vpop.f32.mrb[52].mxu0 }
0x1166   :  { %v2253_v38 = vadd.f32 %v2252_v63, %v2201_v61  ;;  %v10213_v17 = vpop.f32.mrb[53].mxu0 }
0x1167   :  { %v2255_v18 = vpop.f32.mrb[54].mxu0  ;;  %v11404_v17 = vld [vmem:[#allocation7] ss:$12 sps:$4 sm:$0xff]  }
0x1168   :  { %v2256_v0 = vadd.f32 %v2255_v18, %v2201_v61  ;;  %v10214_v19 = vpop.f32.mrb[55].mxu0  ;;  %v2259_v20 = vadd.f32 %v2253_v38, %v2101_v54  ;;  %v11406_v38 = vld [vmem:[#allocation7 + $0x4] ss:$12 sps:$4 sm:$0xff]   ;;  %v11407_v18 = vld [vmem:[#allocation7 + $0x8] ss:$12 sps:$4 sm:$0xff]  }
0x1169   :  { %v11408_v19 = vld [vmem:[#allocation7 + $0x18] ss:$12 sps:$4 sm:$0xff]  }
0x116a   :  { %v2260_v1 = vadd.f32 %v2256_v0, %v2102_v55  ;;  %v11410_v0 = vld [vmem:[#allocation7 + $0x1c] ss:$12 sps:$4 sm:$0xff]  }
0x116c   :  { %v2261_v21 = vpack.c.bf16 %v2260_v1, %v2259_v20 }
0x116e   :  { %10224 = vmatmul.mubr.msk.bf16.vlgmr.msra.gmra.mrb[48].mxu1 %vm919_vm2, %v2261_v21 }
0x116f   :  { %10247 = vmatprep.mubr.msk.bf16.mxu1 %vm12015_vm1, %v12012_v25  ;;  %10240 = vmatpush3.bf16.msra.mxu1 %v11400_v41 }
0x1170   :  { %10241 = vmatprep.subr.bf16.mxu1 %v12012_v25 }
0x1173   :  { %10242 = vmatpush3.bf16.msra.mxu1 %v11401_v45 }
0x1174   :  { %10243 = vmatprep.subr.bf16.mxu1 %v12012_v25 }
0x1177   :  { %10244 = vmatpush3.bf16.msra.mxu1 %v11402_v47 }
0x1178   :  { %10245 = vmatprep.subr.bf16.mxu1 %v12012_v25 }
0x117b   :  { %10246 = vmatpush3.bf16.msra.mxu1 %v11403_v48  ;;  %v11412_v48 = vld [vmem:[#allocation8 + $0x1d0] sm:$0xff]  }
0x117c   :  { %10259 = vmatprep.subr.bf16.mxu1 %v12012_v25 }
0x1241   :  { %v2299_v2 = vpop.f32.mrb[48].mxu1 }
0x1242   :  { %v2306_v30 = vsub.f32 %v2259_v20, %v2299_v2  ;;  %v10225_v32 = vpop.f32.mrb[49].mxu1  ;;  %v11411_v20 = vld [vmem:[#allocation7 + $0x20] ss:$12 sps:$4 sm:$0xff]  }
0x1243   :  { %v2302_v35 = vpop.f32.mrb[50].mxu1 }
0x1244   :  { %v2307_v31 = vsub.f32 %v2260_v1, %v2302_v35  ;;  %v10226_v22 = vpop.f32.mrb[51].mxu1  ;;  %v2308_v23 = vmul.f32 %v2306_v30, %v2306_v30  ;;  %v2389_v1 = vld [vmem:[#allocation10 + $0x31] ss:$8 sm:$0x7] }
0x1245   :  { %v2394_v21 = vrot.slane %v2389_v1, %v12187_v7  ;;  %v2466_v22 = vsub.f32 1.0, %v12374_v37 }
0x1246   :  { %v2309_v26 = vmul.f32 %v2307_v31, %v2307_v31 }
0x1248   :  { %v2310_v28 = vpack.c.bf16 %v2309_v26, %v2308_v23  ;;  %v2467_v23 = vsub.f32 1.0, %v12376_v43 }
0x124a   :  { %10236 = vmatmul.mubr.msk.bf16.vlgmr.msra.gmra.mrb[56].mxu0 %vm919_vm2, %v2310_v28 }
0x124b   :  { %2530 = vmatpush1.bf16.msra.mxu0 %v11392_v27  ;;  %2561 = vmatprep.mubr.bf16.mxu0 %v12011_v24  ;;  %v11856_v27 = vld [vmem:[#allocation5] sm:$0xff] }
0x124c   :  { %2531 = vmatprep.subr.bf16.mxu0 %v11397_v29  ;;  %v2468_v28 = vmul.f32 %v11856_v27, %v2466_v22  ;;  %v11427_v22 = vld [vmem:[#allocation8 + $0xb8] sm:$0xff]   ;;  %v12599_v27 = vld [vmem:[#allocation8 + $0x220] sm:$0xff]  }
0x124f   :  { %2532 = vmatpush1.bf16.msra.mxu0 %v11395_v33 }
0x1250   :  { %10251 = vmatprep.subr.bf16.mxu0 %v12012_v25 }
0x1252   :  { %9006 = vmatmul.mubr.msk.bf16.vlgmr.msra.gmra.mrb[60].mxu0 %vm383_vm0, %v12491_v36 }
0x1253   :  { %10252 = vmatpush3.bf16.msra.mxu0 %v11398_v34  ;;  %10255 = vmatprep.mubr.msk.bf16.mxu0 %vm12015_vm1, %v12012_v25 }
0x1254   :  { %10253 = vmatprep.subr.bf16.mxu0 %v12012_v25 }
0x1257   :  { %10254 = vmatpush3.bf16.msra.mxu0 %v11399_v40  ;;  %v11857_v40 = vld [vmem:[#allocation5 + $0x8] sm:$0xff] }
0x1258   :  { %2648 = vmatprep.subr.bf16.mxu0 %v11406_v38  ;;  %v2469_v41 = vmul.f32 %v11857_v40, %v2467_v23  ;;  %v12592_v23 = vld [vmem:[#allocation8 + $0x210] sm:$0xff]  }
0x125a   :  { %10256 = vmatmul.mubr.msk.bf16.vlgmr.msra.gmra.mrb[64].mxu0 %vm383_vm0, %v12491_v36 }
0x125b   :  { %2680 = vmatprep.mubr.bf16.mxu0 %v12011_v24  ;;  %2649 = vmatpush1.bf16.msra.mxu0 %v11404_v17 }
0x125c   :  { %2650 = vmatprep.subr.bf16.mxu0 %v11410_v0 }
0x125f   :  { %2651 = vmatpush1.bf16.msra.mxu0 %v11408_v19 }
0x1260   :  { %10287 = vmatprep.subr.bf16.mxu0 %v12012_v25 }
0x131d   :  { %v2348_v50 = vpop.f32.mrb[56].mxu0 }
0x131e   :  { %v2349_v51 = vadd.f32 1e-05, %v2348_v50  ;;  %v10237_v52 = vpop.f32.mrb[57].mxu0  ;;  %v11416_v50 = vld [vmem:[#allocation8 + $0x1f0] sm:$0xff]  }
0x131f   :  { %v2351_v53 = vpop.f32.mrb[58].mxu0  ;;  %v11418_v52 = vld [vmem:[#allocation8 + $0x200] sm:$0xff]  }
0x1320   :  { %11714 = vrsqrt.f32 %v2349_v51  ;;  %v2352_v54 = vadd.f32 1e-05, %v2351_v53  ;;  %v10238_v55 = vpop.f32.mrb[59].mxu0  ;;  %v11417_v51 = vld [vmem:[#allocation8 + $0x1f8] sm:$0xff]   ;;  %v11419_v53 = vld [vmem:[#allocation8 + $0x208] sm:$0xff]  }
0x1322   :  { %11716 = vrsqrt.f32 %v2352_v54  ;;  %v2732_v54 = vld [vmem:[#allocation10] ss:$8 sm:$0x7] }
0x1323   :  { %v2745_v56 = vrot.slane %v2732_v54, %v12191_v14 }
0x132a   :  { %v11715_v44 = vpop.eup %11714 }
0x132b   :  { %v2357_v6 = vmul.f32 %v11715_v44, %v2306_v30 }
0x132c   :  { %v11717_v8 = vpop.eup %11716 }
0x132d   :  { %v2367_v9 = vmul.f32 %v2365_v3, %v2357_v6  ;;  %v2358_v10 = vmul.f32 %v11717_v8, %v2307_v31  ;;  %v12507_v11 = vpop.f32.mrb[64].mxu0  ;;  %v2737_v6 = vrot.slane %v2732_v54, %v12187_v7 }
0x132e   :  { %v10257_v13 = vpop.f32.mrb[65].mxu0 }
0x132f   :  { %v2368_v15 = vmul.f32 %v2365_v3, %v2358_v10  ;;  %v12510_v16 = vpop.f32.mrb[66].mxu0  ;;  %v2377_v60 = vadd.f32 %v2375_v12, %v2367_v9  ;;  %v2741_v3 = vrot.slane %v2732_v54, %v12185_v5 }
0x1330   :  { %v10258_v58 = vpop.f32.mrb[67].mxu0 }
0x1331   :  { %v2378_v61 = vadd.f32 %v2375_v12, %v2368_v15 }
0x1333   :  { %v2387_v63 = vpack.c.bf16 %v2378_v61, %v2377_v60 }
0x1335   :  { %10248 = vmatmul.mubr.msk.bf16.vlgmr.msra.gmra.mrb[52].mxu1 %vm919_vm2, %v2387_v63 }
0x1336   :  { %10263 = vmatprep.mubr.msk.bf16.mxu1 %vm12015_vm1, %v12012_v25  ;;  %10260 = vmatpush3.bf16.msra.mxu1 %v11407_v18 }
0x1337   :  { %10261 = vmatprep.subr.bf16.mxu1 %v12012_v25 }
0x133a   :  { %10262 = vmatpush3.bf16.msra.mxu1 %v11411_v20 }
0x133b   :  { %10267 = vmatprep.subr.bf16.mxu1 %v12012_v25 }
0x1408   :  { %v2457_v57 = vpop.f32.mrb[52].mxu1 }
0x1409   :  { %v2458_v2 = vadd.f32 %v2457_v57, %v2394_v21  ;;  %v10249_v30 = vpop.f32.mrb[53].mxu1  ;;  %v11421_v57 = vld [vmem:[#allocation8 + $0x88] sm:$0xff]  }
0x140a   :  { %v2460_v32 = vpop.f32.mrb[54].mxu1  ;;  %v11423_v30 = vld [vmem:[#allocation8 + $0x98] sm:$0xff]  }
0x140b   :  { %11718 = vtanh.f32 %v2458_v2  ;;  %v2461_v35 = vadd.f32 %v2460_v32, %v2394_v21  ;;  %v10250_v31 = vpop.f32.mrb[55].mxu1  ;;  %v11422_v2 = vld [vmem:[#allocation8 + $0x90] sm:$0xff]   ;;  %v11424_v32 = vld [vmem:[#allocation8 + $0xa0] sm:$0xff]  }
0x140c   :  { %v11426_v31 = vld [vmem:[#allocation8 + $0xb0] sm:$0xff]  }
0x140d   :  { %11720 = vtanh.f32 %v2461_v35  ;;  %v11425_v35 = vld [vmem:[#allocation8 + $0xa8] sm:$0xff]  }
0x1415   :  { %v11719_v26 = vpop.eup %11718 }
0x1416   :  { %v2470_v29 = vmul.f32 %v11719_v26, %v12374_v37  ;;  %v12595_v26 = vld [vmem:[#allocation8 + $0x218] sm:$0xff]  }
0x1417   :  { %v11721_v33 = vpop.eup %11720 }
0x1418   :  { %v12522_v34 = vadd.f32 %v2470_v29, %v2468_v28  ;;  %v2471_v45 = vmul.f32 %v11721_v33, %v12376_v43  ;;  %v11413_v43 = vld [vmem:[#allocation8 + $0x1d8] sm:$0xff]   ;;  %v12603_v28 = vld [vmem:[#allocation8 + $0x228] sm:$0xff]   ;;  %v12607_v29 = vld [vmem:[#allocation8 + $0x230] sm:$0xff]  }
0x1419   :  { %v12611_v33 = vld [vmem:[#allocation8 + $0x238] sm:$0xff]  }
0x141a   :  { %2474 = vst.msk [vmem:[#allocation11] sm:$0xff] %vm383_vm0, %v12522_v34  ;;  %v12527_v47 = vadd.f32 %v2471_v45, %v2469_v41  ;;  %3046 = vrot.lane.b32.xlu0 %v12522_v34, %s12002_s1 }
0x141c   :  { %2475 = vst.msk [vmem:[#allocation11 + $0x8] sm:$0xff] %vm383_vm0, %v12527_v47  ;;  %3048 = vrot.lane.b32.xlu1 %v12527_v47, %s12002_s1  ;;  %v2484_v37 = vpack.c.bf16 %v12527_v47, %v12522_v34 }
0x141e   :  { %3052 = vrot.lane.b32.xlu0 %v12181_v59, %s12014_s10  ;;  %9014 = vmatmul.mubr.msk.bf16.vlgmr.msra.gmra.mrb[60].mxu0 %vm383_vm0, %v2484_v37  ;;  %v11414_v59 = vld [vmem:[#allocation8 + $0x1e0] sm:$0xff]  }
0x141f   :  { %10264 = vmatmul.mubr.msk.bf16.vlgmr.msra.gmra.mrb[56].mxu1 %vm383_vm0, %v2484_v37  ;;  %10288 = vmatpush3.bf16.msra.mxu0 %v11412_v48 }
0x1420   :  { %3054 = vrot.lane.b32.xlu1 %v12183_v62, %s12014_s10  ;;  %10268 = vmatpush3.bf16.msra.mxu1 %v11412_v48  ;;  %v11415_v62 = vld [vmem:[#allocation8 + $0x1e8] sm:$0xff]  }
0x1421   :  { %10269 = vmatprep.subr.bf16.mxu1 %v12012_v25  ;;  %10289 = vmatprep.subr.bf16.mxu0 %v12012_v25 }
0x1422   :  { %3676 = vrot.lane.b32.xlu0 %v12522_v34, %s12013_s4  ;;  %10283 = vmatprep.mubr.msk.bf16.mxu1 %vm12015_vm1, %v12012_v25 }
0x1423   :  { %10290 = vmatpush3.bf16.msra.mxu0 %v11413_v43  ;;  %10303 = vmatprep.mubr.msk.bf16.mxu0 %vm12015_vm1, %v12012_v25 }
0x1424   :  { %3678 = vrot.lane.b32.xlu1 %v12527_v47, %s12013_s4  ;;  %10270 = vmatpush3.bf16.msra.mxu1 %v11413_v43 }
0x1425   :  { %10271 = vmatprep.subr.bf16.mxu1 %v12012_v25  ;;  %10291 = vmatprep.subr.bf16.mxu0 %v12012_v25 }
0x1427   :  { %10292 = vmatpush3.bf16.msra.mxu0 %v11414_v59 }
0x1428   :  { %10272 = vmatpush3.bf16.msra.mxu1 %v11414_v59  ;;  %10293 = vmatprep.subr.bf16.mxu0 %v12012_v25 }
0x1429   :  { %10273 = vmatprep.subr.bf16.mxu1 %v12012_v25 }
0x142b   :  { %10294 = vmatpush3.bf16.msra.mxu0 %v11415_v62 }
0x142c   :  { %10274 = vmatpush3.bf16.msra.mxu1 %v11415_v62  ;;  %10295 = vmatprep.subr.bf16.mxu0 %v12012_v25 }
0x142d   :  { %10275 = vmatprep.subr.bf16.mxu1 %v12012_v25 }
0x142f   :  { %10296 = vmatpush3.bf16.msra.mxu0 %v11416_v50 }
0x1430   :  { %10276 = vmatpush3.bf16.msra.mxu1 %v11416_v50  ;;  %10297 = vmatprep.subr.bf16.mxu0 %v12012_v25 }
0x1431   :  { %10277 = vmatprep.subr.bf16.mxu1 %v12012_v25 }
0x1433   :  { %10298 = vmatpush3.bf16.msra.mxu0 %v11417_v51 }
0x1434   :  { %10278 = vmatpush3.bf16.msra.mxu1 %v11417_v51  ;;  %10299 = vmatprep.subr.bf16.mxu0 %v12012_v25 }
0x1435   :  { %10279 = vmatprep.subr.bf16.mxu1 %v12012_v25 }
0x1437   :  { %10300 = vmatpush3.bf16.msra.mxu0 %v11418_v52 }
0x1438   :  { %10280 = vmatpush3.bf16.msra.mxu1 %v11418_v52  ;;  %10301 = vmatprep.subr.bf16.mxu0 %v12012_v25 }
0x1439   :  { %10281 = vmatprep.subr.bf16.mxu1 %v12012_v25 }
0x143b   :  { %10302 = vmatpush3.bf16.msra.mxu0 %v11419_v53 }
0x143c   :  { %10282 = vmatpush3.bf16.msra.mxu1 %v11419_v53  ;;  %10327 = vmatprep.subr.bf16.mxu0 %v12012_v25 }
0x143d   :  { %10307 = vmatprep.subr.bf16.mxu1 %v12012_v25 }
0x14f1   :  { %v2682_v55 = vpop.f32.mrb[60].mxu0 }
0x14f2   :  { %v2725_v44 = vpop.f32.mrb[56].mxu1  ;;  %v2684_v4 = vpop.f32.mrb[61].mxu0  ;;  %v2749_v38 = vadd.f32 %v2737_v6, %v2682_v55 }
0x14f3   :  { %v2726_v8 = vadd.f32 %v2725_v44, %v12507_v11  ;;  %v10265_v9 = vpop.f32.mrb[57].mxu1  ;;  %v2686_v10 = vpop.f32.mrb[62].mxu0  ;;  %v2750_v58 = vadd.f32 %v2741_v3, %v2684_v4 }
0x14f4   :  { %v2728_v12 = vpop.f32.mrb[58].mxu1  ;;  %v2688_v13 = vpop.f32.mrb[63].mxu0  ;;  %v2752_v17 = vadd.f32 %v2737_v6, %v2686_v10 }
0x14f5   :  { %v12571_v15 = vadd.f32 %v2745_v56, %v2726_v8  ;;  %v2729_v60 = vadd.f32 %v2728_v12, %v12510_v16  ;;  %v2753_v61 = vadd.f32 %v2741_v3, %v2688_v13  ;;  %v10266_v63 = vpop.f32.mrb[59].mxu1  ;;  %v11420_v16 = vld [vmem:[#allocation8 + $0x80] sm:$0xff]  }
0x14f6   :  { %v12634_v13 = vld [vmem:[#allocation8 + $0x240] sm:$0xff]  }
0x14f7   :  { %v12574_v18 = vadd.f32 %v2745_v56, %v2729_v60  ;;  %v2755_v0 = vsub.f32 %v2750_v58, %v2753_v61  ;;  %v12646_v58 = vpop.permute.xlu0 %3038  ;;  %v12648_v60 = vpop.permute.xlu1 %3040  ;;  %v2940_v63 = vld [vmem:[#allocation10 + $0x1] ss:$8 sm:$0x7] }
0x14f9   :  { %v12578_v19 = vsub.f32 %v12571_v15, %v12574_v18  ;;  %v2773_v11 = vmul.f32 %v2755_v0, %v2749_v38  ;;  %v2870_v20 = vmul.f32 %v2755_v0, %v2752_v17  ;;  %v2945_v17 = vrot.slane %v2940_v63, %v12187_v7 }
0x14fb   :  { %v2774_v1 = vpack.c.bf16 %v2773_v11, %v2773_v11  ;;  %v2871_v21 = vpack.c.bf16 %v2870_v20, %v2870_v20  ;;  %v3047_v61 = vpop.permute.xlu0 %3046  ;;  %v3049_v38 = vpop.permute.xlu1 %3048 }
0x14fd   :  { %10284 = vmatmul.mubr.bf16.vlgmr.msra.gmra.mrb[60].mxu1 %v2774_v1  ;;  %10304 = vmatmul.mubr.bf16.vlgmr.msra.gmra.mrb[68].mxu0 %v2871_v21  ;;  %v3058_v1 = vsel %vm383_vm0, %v12522_v34, %v12646_v58  ;;  %v3059_v21 = vsel %vm383_vm0, %v12527_v47, %v12648_v60 }
0x14fe   :  { %10323 = vmatprep.mubr.msk.bf16.mxu1 %vm12015_vm1, %v12012_v25  ;;  %10343 = vmatprep.mubr.msk.bf16.mxu0 %vm12015_vm1, %v12012_v25 }
0x14ff   :  { %10308 = vmatpush3.bf16.msra.mxu1 %v11420_v16  ;;  %10328 = vmatpush3.bf16.msra.mxu0 %v12592_v23 }
0x1500   :  { %10309 = vmatprep.subr.bf16.mxu1 %v12012_v25  ;;  %10329 = vmatprep.subr.bf16.mxu0 %v12012_v25 }
0x1503   :  { %10310 = vmatpush3.bf16.msra.mxu1 %v11421_v57  ;;  %10330 = vmatpush3.bf16.msra.mxu0 %v12595_v26  ;;  %v3060_v57 = vsel %vm919_vm2, %v3058_v1, %v3047_v61 }
0x1504   :  { %10311 = vmatprep.subr.bf16.mxu1 %v12012_v25  ;;  %10331 = vmatprep.subr.bf16.mxu0 %v12012_v25 }
0x1507   :  { %10312 = vmatpush3.bf16.msra.mxu1 %v11422_v2  ;;  %10332 = vmatpush3.bf16.msra.mxu0 %v12599_v27  ;;  %v3061_v2 = vsel %vm919_vm2, %v3059_v21, %v3049_v38 }
0x1508   :  { %10313 = vmatprep.subr.bf16.mxu1 %v12012_v25  ;;  %10333 = vmatprep.subr.bf16.mxu0 %v12012_v25 }
0x150b   :  { %10314 = vmatpush3.bf16.msra.mxu1 %v11423_v30  ;;  %10334 = vmatpush3.bf16.msra.mxu0 %v12603_v28 }
0x150c   :  { %10315 = vmatprep.subr.bf16.mxu1 %v12012_v25  ;;  %10335 = vmatprep.subr.bf16.mxu0 %v12012_v25 }
0x150f   :  { %10316 = vmatpush3.bf16.msra.mxu1 %v11424_v32  ;;  %10336 = vmatpush3.bf16.msra.mxu0 %v12607_v29 }
0x1510   :  { %10317 = vmatprep.subr.bf16.mxu1 %v12012_v25  ;;  %10337 = vmatprep.subr.bf16.mxu0 %v12012_v25 }
0x1513   :  { %10318 = vmatpush3.bf16.msra.mxu1 %v11425_v35  ;;  %10338 = vmatpush3.bf16.msra.mxu0 %v12611_v33 }
0x1514   :  { %10319 = vmatprep.subr.bf16.mxu1 %v12012_v25  ;;  %10339 = vmatprep.subr.bf16.mxu0 %v12012_v25 }
0x1517   :  { %10320 = vmatpush3.bf16.msra.mxu1 %v11426_v31  ;;  %10340 = vmatpush3.bf16.msra.mxu0 %v12634_v13 }
0x1518   :  { %10321 = vmatprep.subr.bf16.mxu1 %v12012_v25  ;;  %10341 = vmatprep.subr.bf16.mxu0 %v12012_v25 }
0x151b   :  { %10322 = vmatpush3.bf16.msra.mxu1 %v11427_v22 }
0x151c   :  { %10347 = vmatprep.subr.bf16.mxu1 %v12012_v25 }
0x15d0   :  { %v2857_v40 = vpop.f32.mrb[60].mxu1  ;;  %v2906_v41 = vpop.f32.mrb[68].mxu0 }
0x15d1   :  { %v9024_v45 = vmul.f32 -0.25, %v2857_v40  ;;  %v9025_v48 = vmul.f32 0.25, %v2906_v41  ;;  %v10285_v37 = vpop.f32.mrb[61].mxu1  ;;  %v10305_v43 = vpop.f32.mrb[69].mxu0 }
0x15d2   :  { %v2860_v59 = vpop.f32.mrb[62].mxu1  ;;  %v2909_v62 = vpop.f32.mrb[70].mxu0 }
0x15d3   :  { %v2865_v50 = vmul.f32 1.442695, %v9024_v45  ;;  %v2914_v51 = vmul.f32 1.442695, %v9025_v48  ;;  %v10286_v52 = vpop.f32.mrb[63].mxu1  ;;  %v10306_v53 = vpop.f32.mrb[71].mxu0 }
0x15d4   :  { %v11436_v45 = vld [vmem:[#allocation8 + $0xc0] sm:$0xff]   ;;  %v11437_v48 = vld [vmem:[#allocation8 + $0xc8] sm:$0xff]  }
0x15d5   :  { %11722 = vpow2.f32 %v2865_v50 }
0x15d6   :  { %11724 = vpow2.f32 %v2914_v51 }
0x15df   :  { %v11723_v54 = vpop.eup %11722 }
0x15e0   :  { %v11725_v55 = vpop.eup %11724  ;;  %v2867_v56 = vadd.f32 1.0, %v11723_v54 }
0x15e1   :  { %v2916_v3 = vadd.f32 1.0, %v11725_v55  ;;  %v11438_v55 = vld [vmem:[#allocation8 + $0xd0] sm:$0xff]  }
0x15e2   :  { %11726 = vrcp.f32 %v2867_v56  ;;  %v11439_v56 = vld [vmem:[#allocation8 + $0xd8] sm:$0xff]  }
0x15e3   :  { %11728 = vrcp.f32 %v2916_v3  ;;  %v11440_v3 = vld [vmem:[#allocation8 + $0xe0] sm:$0xff]  }
0x15ec   :  { %v11727_v44 = vpop.eup %11726 }
0x15ed   :  { %v11729_v4 = vpop.eup %11728  ;;  %v2919_v6 = vmul.f32 %v11727_v44, %v12578_v19  ;;  %v11441_v44 = vld [vmem:[#allocation8 + $0xe8] sm:$0xff]  }
0x15ee   :  { %v2921_v8 = vmul.f32 %v11729_v4, %v12578_v19  ;;  %v3055_v19 = vpop.permute.xlu1 %3054  ;;  %v11442_v4 = vld [vmem:[#allocation8 + $0xf0] sm:$0xff]  }
0x15ef   :  { %v2920_v9 = vadd.f32 %v2919_v6, %v12574_v18  ;;  %v3053_v18 = vpop.permute.xlu0 %3052  ;;  %v3063_v31 = vsel %vm922_vm3, %v3061_v2, %v3055_v19  ;;  %v11443_v6 = vld [vmem:[#allocation8 + $0xf8] sm:$0xff]  }
0x15f0   :  { %v2922_v10 = vsub.f32 %v12571_v15, %v2921_v8  ;;  %v12640_v15 = vld [vmem:[#allocation8 + $0x248] sm:$0xff]   ;;  %v3062_v35 = vsel %vm922_vm3, %v3060_v57, %v3053_v18  ;;  %v11444_v8 = vld [vmem:[#allocation8 + $0x100] sm:$0xff]  }
0x15f1   :  { %10342 = vmatpush3.bf16.msra.mxu0 %v12640_v15  ;;  %v3222_v18 = vld [vmem:[#allocation10 + $0x2] ss:$8 sm:$0x7] }
0x15f2   :  { %v2939_v12 = vpack.c.bf16 %v2922_v10, %v2920_v9  ;;  %10367 = vmatprep.subr.bf16.mxu0 %v12012_v25  ;;  %v11445_v9 = vld [vmem:[#allocation8 + $0x108] sm:$0xff]  }
0x15f4   :  { %10324 = vmatmul.mubr.bf16.vlgmr.msra.gmra.mrb[64].mxu1 %v2939_v12 }
0x15f5   :  { %10348 = vmatpush3.bf16.msra.mxu1 %v12592_v23  ;;  %10363 = vmatprep.mubr.msk.bf16.mxu1 %vm12015_vm1, %v12012_v25 }
0x15f6   :  { %10349 = vmatprep.subr.bf16.mxu1 %v12012_v25 }
0x15f9   :  { %10350 = vmatpush3.bf16.msra.mxu1 %v12595_v26 }
0x15fa   :  { %10351 = vmatprep.subr.bf16.mxu1 %v12012_v25 }
0x15fd   :  { %10352 = vmatpush3.bf16.msra.mxu1 %v12599_v27 }
0x15fe   :  { %10353 = vmatprep.subr.bf16.mxu1 %v12012_v25 }
0x1601   :  { %10354 = vmatpush3.bf16.msra.mxu1 %v12603_v28 }
0x1602   :  { %10355 = vmatprep.subr.bf16.mxu1 %v12012_v25 }
0x1605   :  { %10356 = vmatpush3.bf16.msra.mxu1 %v12607_v29 }
0x1606   :  { %10357 = vmatprep.subr.bf16.mxu1 %v12012_v25 }
0x1609   :  { %10358 = vmatpush3.bf16.msra.mxu1 %v12611_v33 }
0x160a   :  { %10359 = vmatprep.subr.bf16.mxu1 %v12012_v25 }
0x160d   :  { %10360 = vmatpush3.bf16.msra.mxu1 %v12634_v13 }
0x160e   :  { %10361 = vmatprep.subr.bf16.mxu1 %v12012_v25 }
0x1611   :  { %10362 = vmatpush3.bf16.msra.mxu1 %v12640_v15 }
0x1612   :  { %10387 = vmatprep.subr.bf16.mxu1 %v12012_v25 }
0x16c7   :  { %v3029_v0 = vpop.f32.mrb[64].mxu1 }
0x16c8   :  { %v3030_v11 = vadd.f32 %v3029_v0, %v2945_v17  ;;  %v10325_v20 = vpop.f32.mrb[65].mxu1  ;;  %v3227_v0 = vrot.slane %v3222_v18, %v12187_v7  ;;  %v11453_v18 = vld [vmem:[#allocation7 + $0xac] ss:$12 sps:$4 sm:$0xff]  }
0x16c9   :  { %v3032_v16 = vpop.f32.mrb[66].mxu1 }
0x16ca   :  { %v3033_v30 = vadd.f32 %v3032_v16, %v2945_v17  ;;  %v10326_v32 = vpop.f32.mrb[67].mxu1  ;;  %v3064_v22 = vadd.f32 %v3062_v35, %v3030_v11  ;;  %v3231_v11 = vld [vmem:[#allocation10 + $0x3] ss:$8 sm:$0x7] }
0x16cb   :  { %v3236_v57 = vrot.slane %v3231_v11, %v12187_v7  ;;  %v11457_v11 = vld [vmem:[#allocation8 + $0x138] sm:$0xff]  }
0x16cc   :  { %v3065_v40 = vadd.f32 %v3063_v31, %v3033_v30  ;;  %v11446_v31 = vld [vmem:[#allocation8 + $0x110] sm:$0xff]  }
0x16ce   :  { %v3082_v41 = vpack.c.bf16 %v3065_v40, %v3064_v22 }
0x16d0   :  { %10344 = vmatmul.mubr.bf16.vlgmr.msra.gmra.mrb[72].mxu0 %v3082_v41 }
0x16d1   :  { %10383 = vmatprep.mubr.msk.bf16.mxu0 %vm12015_vm1, %v12012_v25  ;;  %10368 = vmatpush3.bf16.msra.mxu0 %v11436_v45 }
0x16d2   :  { %10369 = vmatprep.subr.bf16.mxu0 %v12012_v25 }
0x16d5   :  { %10370 = vmatpush3.bf16.msra.mxu0 %v11437_v48 }
0x16d6   :  { %10371 = vmatprep.subr.bf16.mxu0 %v12012_v25 }
0x16d9   :  { %10372 = vmatpush3.bf16.msra.mxu0 %v11438_v55 }
0x16da   :  { %10373 = vmatprep.subr.bf16.mxu0 %v12012_v25 }
0x16dd   :  { %10374 = vmatpush3.bf16.msra.mxu0 %v11439_v56 }
0x16de   :  { %10375 = vmatprep.subr.bf16.mxu0 %v12012_v25 }
0x16e1   :  { %10376 = vmatpush3.bf16.msra.mxu0 %v11440_v3 }
0x16e2   :  { %10377 = vmatprep.subr.bf16.mxu0 %v12012_v25 }
0x16e5   :  { %10378 = vmatpush3.bf16.msra.mxu0 %v11441_v44  ;;  %v11455_v44 = vld [vmem:[#allocation8 + $0x128] sm:$0xff]  }
0x16e6   :  { %10379 = vmatprep.subr.bf16.mxu0 %v12012_v25 }
0x16e9   :  { %10380 = vmatpush3.bf16.msra.mxu0 %v11442_v4 }
0x16ea   :  { %10381 = vmatprep.subr.bf16.mxu0 %v12012_v25 }
0x16ed   :  { %10382 = vmatpush3.bf16.msra.mxu0 %v11443_v6 }
0x16ee   :  { %10399 = vmatprep.subr.bf16.mxu0 %v12012_v25 }
0x17a3   :  { %v3165_v37 = vpop.f32.mrb[72].mxu0 }
0x17a4   :  { %v3172_v43 = vsub.f32 %v3064_v22, %v3165_v37  ;;  %v10345_v59 = vpop.f32.mrb[73].mxu0  ;;  %v11447_v22 = vld [vmem:[#allocation8 + $0x118] sm:$0xff]  }
0x17a5   :  { %v3168_v62 = vpop.f32.mrb[74].mxu0 }
0x17a6   :  { %v3173_v50 = vsub.f32 %v3065_v40, %v3168_v62  ;;  %v10346_v51 = vpop.f32.mrb[75].mxu0  ;;  %v3174_v52 = vmul.f32 %v3172_v43, %v3172_v43  ;;  %v3257_v40 = vld [vmem:[#allocation10 + $0x4] ss:$8 sm:$0x7] }
0x17a7   :  { %v3262_v41 = vrot.slane %v3257_v40, %v12187_v7 }
0x17a8   :  { %v3175_v53 = vmul.f32 %v3173_v50, %v3173_v50 }
0x17aa   :  { %v3176_v54 = vpack.c.bf16 %v3175_v53, %v3174_v52 }
0x17ac   :  { %10364 = vmatmul.mubr.bf16.vlgmr.msra.gmra.mrb[68].mxu1 %v3176_v54 }
0x17ad   :  { %10395 = vmatprep.mubr.msk.bf16.mxu1 %vm12015_vm1, %v12012_v25  ;;  %10388 = vmatpush3.bf16.msra.mxu1 %v11444_v8 }
0x17ae   :  { %10389 = vmatprep.subr.bf16.mxu1 %v12012_v25 }
0x17b1   :  { %10390 = vmatpush3.bf16.msra.mxu1 %v11445_v9 }
0x17b2   :  { %10391 = vmatprep.subr.bf16.mxu1 %v12012_v25 }
0x17b5   :  { %10392 = vmatpush3.bf16.msra.mxu1 %v11446_v31  ;;  %v3533_v31 = vld [vmem:[#allocation10 + $0x6] ss:$8 sm:$0x7] }
0x17b6   :  { %10393 = vmatprep.subr.bf16.mxu1 %v12012_v25 }
0x17b9   :  { %10394 = vmatpush3.bf16.msra.mxu1 %v11447_v22  ;;  %v3538_v22 = vrot.slane %v3533_v31, %v12187_v7 }
0x17ba   :  { %10419 = vmatprep.subr.bf16.mxu1 %v12012_v25 }
0x187f   :  { %v3211_v10 = vpop.f32.mrb[68].mxu1 }
0x1880   :  { %v3212_v12 = vadd.f32 1e-05, %v3211_v10  ;;  %v10365_v61 = vpop.f32.mrb[69].mxu1 }
0x1881   :  { %v3214_v63 = vpop.f32.mrb[70].mxu1 }
0x1882   :  { %11730 = vrsqrt.f32 %v3212_v12  ;;  %v3215_v38 = vadd.f32 1e-05, %v3214_v63  ;;  %v10366_v17 = vpop.f32.mrb[71].mxu1 }
0x1884   :  { %11732 = vrsqrt.f32 %v3215_v38  ;;  %v11448_v38 = vld [vmem:[#allocation7 + $0x90] ss:$12 sps:$4 sm:$0xff]  }
0x188c   :  { %v11731_v19 = vpop.eup %11730 }
0x188d   :  { %v3220_v20 = vmul.f32 %v11731_v19, %v3172_v43  ;;  %v11456_v19 = vld [vmem:[#allocation8 + $0x130] sm:$0xff]  }
0x188e   :  { %v11733_v1 = vpop.eup %11732 }
0x188f   :  { %v3221_v21 = vmul.f32 %v11733_v1, %v3173_v50  ;;  %v3229_v16 = vmul.f32 %v3227_v0, %v3220_v20  ;;  %v11458_v20 = vld [vmem:[#allocation8 + $0x140] sm:$0xff]   ;;  %v11459_v1 = vld [vmem:[#allocation8 + $0x148] sm:$0xff]  }
0x1891   :  { %v3230_v2 = vmul.f32 %v3227_v0, %v3221_v21  ;;  %v12677_v30 = vadd.f32 %v3236_v57, %v3229_v16  ;;  %v11451_v0 = vld [vmem:[#allocation7 + $0xa8] ss:$12 sps:$4 sm:$0xff]  }
0x1892   :  { %v11460_v21 = vld [vmem:[#allocation8 + $0x150] sm:$0xff]  }
0x1893   :  { %v12679_v32 = vadd.f32 %v3236_v57, %v3230_v2 }
0x1895   :  { %v3256_v35 = vpack.c.bf16 %v12679_v32, %v12677_v30 }
0x1897   :  { %10384 = vmatmul.mubr.bf16.vlgmr.msra.gmra.mrb[76].mxu0 %v3256_v35 }
0x1898   :  { %10400 = vmatpush3.bf16.msra.mxu0 %v12592_v23  ;;  %10415 = vmatprep.mubr.msk.bf16.mxu0 %vm12015_vm1, %v12012_v25 }
0x1899   :  { %10401 = vmatprep.subr.bf16.mxu0 %v12012_v25 }
0x189c   :  { %10402 = vmatpush3.bf16.msra.mxu0 %v12595_v26 }
0x189d   :  { %10403 = vmatprep.subr.bf16.mxu0 %v12012_v25 }
0x18a0   :  { %10404 = vmatpush3.bf16.msra.mxu0 %v12599_v27 }
0x18a1   :  { %10405 = vmatprep.subr.bf16.mxu0 %v12012_v25 }
0x18a4   :  { %10406 = vmatpush3.bf16.msra.mxu0 %v12603_v28 }
0x18a5   :  { %10407 = vmatprep.subr.bf16.mxu0 %v12012_v25 }
0x18a8   :  { %10408 = vmatpush3.bf16.msra.mxu0 %v12607_v29 }
0x18a9   :  { %10409 = vmatprep.subr.bf16.mxu0 %v12012_v25 }
0x18ac   :  { %10410 = vmatpush3.bf16.msra.mxu0 %v12611_v33 }
0x18ad   :  { %10411 = vmatprep.subr.bf16.mxu0 %v12012_v25 }
0x18b0   :  { %10412 = vmatpush3.bf16.msra.mxu0 %v12634_v13 }
0x18b1   :  { %10413 = vmatprep.subr.bf16.mxu0 %v12012_v25 }
0x18b4   :  { %10414 = vmatpush3.bf16.msra.mxu0 %v12640_v15 }
0x18b5   :  { %10439 = vmatprep.subr.bf16.mxu0 %v12012_v25 }
0x196a   :  { %v3346_v45 = vpop.f32.mrb[76].mxu0 }
0x196b   :  { %v3347_v48 = vadd.f32 %v3346_v45, %v3262_v41  ;;  %v10385_v37 = vpop.f32.mrb[77].mxu0 }
0x196c   :  { %v3349_v43 = vpop.f32.mrb[78].mxu0 }
0x196d   :  { %v3350_v59 = vadd.f32 %v3349_v43, %v3262_v41  ;;  %v10386_v62 = vpop.f32.mrb[79].mxu0  ;;  %v3353_v50 = vmax.f32 %v3347_v48, 0.0  ;;  %v3542_v41 = vld [vmem:[#allocation10 + $0x7] ss:$8 sm:$0x7] }
0x196f   :  { %v3354_v51 = vmax.f32 %v3350_v59, 0.0  ;;  %v3547_v59 = vrot.slane %v3542_v41, %v12187_v7 }
0x1971   :  { %v3363_v52 = vpack.c.bf16 %v3354_v51, %v3353_v50 }
0x1973   :  { %10396 = vmatmul.mubr.msk.bf16.vlgmr.msra.gmra.mrb[72].mxu1 %vm919_vm2, %v3363_v52 }
0x1974   :  { %10420 = vmatpush3.bf16.msra.mxu1 %v12592_v23  ;;  %10435 = vmatprep.mubr.msk.bf16.mxu1 %vm12015_vm1, %v12012_v25  ;;  %v3364_v23 = vld [vmem:[#allocation10 + $0x5] ss:$8 sm:$0x7] }
0x1975   :  { %10421 = vmatprep.subr.bf16.mxu1 %v12012_v25 }
0x1978   :  { %10422 = vmatpush3.bf16.msra.mxu1 %v12595_v26  ;;  %v3369_v26 = vrot.slane %v3364_v23, %v12187_v7  ;;  %v11462_v23 = vld [vmem:[#allocation7 + $0x60] ss:$12 sps:$4 sm:$0xff]  }
0x1979   :  { %10423 = vmatprep.subr.bf16.mxu1 %v12012_v25 }
0x197c   :  { %10424 = vmatpush3.bf16.msra.mxu1 %v12599_v27 }
0x197d   :  { %10425 = vmatprep.subr.bf16.mxu1 %v12012_v25 }
0x1980   :  { %10426 = vmatpush3.bf16.msra.mxu1 %v12603_v28 }
0x1981   :  { %10427 = vmatprep.subr.bf16.mxu1 %v12012_v25 }
0x1984   :  { %10428 = vmatpush3.bf16.msra.mxu1 %v12607_v29 }
0x1985   :  { %10429 = vmatprep.subr.bf16.mxu1 %v12012_v25 }
0x1988   :  { %10430 = vmatpush3.bf16.msra.mxu1 %v12611_v33 }
0x1989   :  { %10431 = vmatprep.subr.bf16.mxu1 %v12012_v25 }
0x198c   :  { %10432 = vmatpush3.bf16.msra.mxu1 %v12634_v13  ;;  %v11450_v13 = vld [vmem:[#allocation7 + $0x94] ss:$12 sps:$4 sm:$0xff]  }
0x198d   :  { %10433 = vmatprep.subr.bf16.mxu1 %v12012_v25 }
0x1990   :  { %10434 = vmatpush3.bf16.msra.mxu1 %v12640_v15  ;;  %v11454_v15 = vld [vmem:[#allocation8 + $0x120] sm:$0xff]  }
0x1991   :  { %3713 = vmatprep.subr.bf16.mxu1 %v11450_v13 }
0x1a46   :  { %v3432_v27 = vpop.f32.mrb[72].mxu1 }
0x1a47   :  { %v3433_v28 = vadd.f32 %v3432_v27, %v3369_v26  ;;  %v10397_v53 = vpop.f32.mrb[73].mxu1  ;;  %v11467_v27 = vld [vmem:[#allocation7 + $0x7c] ss:$12 sps:$4 sm:$0xff]  }
0x1a48   :  { %v3435_v54 = vpop.f32.mrb[74].mxu1  ;;  %v3568_v53 = vld [vmem:[#allocation10 + $0x18] ss:$8 sm:$0x7] }
0x1a49   :  { %v3436_v29 = vadd.f32 %v3435_v54, %v3369_v26  ;;  %v10398_v55 = vpop.f32.mrb[75].mxu1  ;;  %v3439_v56 = vadd.f32 %v3433_v28, %v12677_v30  ;;  %v11464_v26 = vld [vmem:[#allocation7 + $0x64] ss:$12 sps:$4 sm:$0xff]   ;;  %v3573_v54 = vrot.slane %v3568_v53, %v12187_v7 }
0x1a4a   :  { %v11465_v28 = vld [vmem:[#allocation7 + $0x78] ss:$12 sps:$4 sm:$0xff]  }
0x1a4b   :  { %v3440_v33 = vadd.f32 %v3436_v29, %v12679_v32 }
0x1a4d   :  { %v3441_v3 = vpack.c.bf16 %v3440_v33, %v3439_v56 }
0x1a4f   :  { %10416 = vmatmul.mubr.bf16.vlgmr.msra.gmra.mrb[80].mxu0 %v3441_v3 }
0x1a50   :  { %10455 = vmatprep.mubr.msk.bf16.mxu0 %vm12015_vm1, %v12012_v25  ;;  %10440 = vmatpush3.bf16.msra.mxu0 %v11454_v15 }
0x1a51   :  { %10441 = vmatprep.subr.bf16.mxu0 %v12012_v25 }
0x1a54   :  { %10442 = vmatpush3.bf16.msra.mxu0 %v11455_v44 }
0x1a55   :  { %10443 = vmatprep.subr.bf16.mxu0 %v12012_v25 }
0x1a58   :  { %10444 = vmatpush3.bf16.msra.mxu0 %v11456_v19  ;;  %v11468_v19 = vld [vmem:[#allocation8 + $0x250] sm:$0xff]  }
0x1a59   :  { %10445 = vmatprep.subr.bf16.mxu0 %v12012_v25 }
0x1a5c   :  { %10446 = vmatpush3.bf16.msra.mxu0 %v11457_v11  ;;  %v11469_v11 = vld [vmem:[#allocation8 + $0x258] sm:$0xff]  }
0x1a5d   :  { %10447 = vmatprep.subr.bf16.mxu0 %v12012_v25 }
0x1a60   :  { %10448 = vmatpush3.bf16.msra.mxu0 %v11458_v20  ;;  %v11470_v20 = vld [vmem:[#allocation8 + $0x260] sm:$0xff]  }
0x1a61   :  { %10449 = vmatprep.subr.bf16.mxu0 %v12012_v25 }
0x1a64   :  { %10450 = vmatpush3.bf16.msra.mxu0 %v11459_v1  ;;  %v11471_v1 = vld [vmem:[#allocation8 + $0x268] sm:$0xff]  }
0x1a65   :  { %10451 = vmatprep.subr.bf16.mxu0 %v12012_v25 }
0x1a68   :  { %10452 = vmatpush3.bf16.msra.mxu0 %v11460_v21  ;;  %v3825_v21 = vld [vmem:[#allocation10 + $0x19] ss:$8 sm:$0x7] }
0x1a69   :  { %10453 = vmatprep.subr.bf16.mxu0 %v12012_v25 }
0x1b22   :  { %v3476_v4 = vpop.f32.mrb[80].mxu0 }
0x1b23   :  { %v3483_v6 = vsub.f32 %v3439_v56, %v3476_v4  ;;  %v10417_v8 = vpop.f32.mrb[81].mxu0 }
0x1b24   :  { %v3479_v9 = vpop.f32.mrb[82].mxu0 }
0x1b25   :  { %v3484_v10 = vsub.f32 %v3440_v33, %v3479_v9  ;;  %v10418_v12 = vpop.f32.mrb[83].mxu0  ;;  %v3485_v61 = vmul.f32 %v3483_v6, %v3483_v6 }
0x1b27   :  { %v3486_v63 = vmul.f32 %v3484_v10, %v3484_v10 }
0x1b29   :  { %v3487_v17 = vpack.c.bf16 %v3486_v63, %v3485_v61  ;;  %v3677_v61 = vpop.permute.xlu0 %3676  ;;  %v3679_v63 = vpop.permute.xlu1 %3678 }
0x1b2b   :  { %10436 = vmatmul.mubr.bf16.vlgmr.msra.gmra.mrb[76].mxu1 %v3487_v17 }
0x1b2c   :  { %3714 = vmatpush1.bf16.msra.mxu1 %v11448_v38  ;;  %3745 = vmatprep.mubr.bf16.mxu1 %v12011_v24 }
0x1b2d   :  { %3715 = vmatprep.subr.bf16.mxu1 %v11453_v18 }
0x1b30   :  { %3716 = vmatpush1.bf16.msra.mxu1 %v11451_v0 }
0x1b31   :  { %3782 = vmatprep.subr.bf16.mxu1 %v11464_v26  ;;  %v12785_v26 = vld [vmem:[#allocation8 + $0x270] sm:$0xff]  }
0x1b33   :  { %9069 = vmatmul.mubr.msk.bf16.vlgmr.msra.gmra.mrb[80].mxu1 %vm383_vm0, %v12491_v36  ;;  %v11461_v36 = vld [vmem:[#allocation8 + $0x158] sm:$0xff]  }
0x1b34   :  { %3814 = vmatprep.mubr.bf16.mxu1 %v12011_v24  ;;  %10454 = vmatpush3.bf16.msra.mxu0 %v11461_v36  ;;  %v3834_v36 = vrot.slane %v3825_v21, %v12185_v5 }
0x1b35   :  { %10471 = vmatprep.subr.bf16.mxu0 %v12012_v25  ;;  %3783 = vmatpush1.bf16.msra.mxu1 %v11462_v23  ;;  %v11475_v23 = vld [vmem:[#allocation8 + $0x178] sm:$0xff]  }
0x1b36   :  { %3784 = vmatprep.subr.bf16.mxu1 %v11467_v27  ;;  %v12788_v27 = vld [vmem:[#allocation8 + $0x278] sm:$0xff]  }
0x1b39   :  { %3785 = vmatpush1.bf16.msra.mxu1 %v11465_v28 }
0x1b3a   :  { %10459 = vmatprep.subr.bf16.mxu1 %v12012_v25 }
0x1bfe   :  { %v3522_v16 = vpop.f32.mrb[76].mxu1 }
0x1bff   :  { %v3523_v57 = vadd.f32 1e-05, %v3522_v16  ;;  %v10437_v2 = vpop.f32.mrb[77].mxu1  ;;  %v3830_v16 = vrot.slane %v3825_v21, %v12187_v7  ;;  %v3996_v21 = vld [vmem:[#allocation10 + $0x1a] ss:$8 sm:$0x7] }
0x1c00   :  { %v3525_v30 = vpop.f32.mrb[78].mxu1 }
0x1c01   :  { %11734 = vrsqrt.f32 %v3523_v57  ;;  %v3526_v32 = vadd.f32 1e-05, %v3525_v30  ;;  %v10438_v35 = vpop.f32.mrb[79].mxu1 }
0x1c03   :  { %11736 = vrsqrt.f32 %v3526_v32 }
0x1c0b   :  { %v11735_v40 = vpop.eup %11734 }
0x1c0c   :  { %v3531_v45 = vmul.f32 %v11735_v40, %v3483_v6 }
0x1c0d   :  { %v11737_v48 = vpop.eup %11736 }
0x1c0e   :  { %v3532_v37 = vmul.f32 %v11737_v48, %v3484_v10  ;;  %v3540_v43 = vmul.f32 %v3538_v22, %v3531_v45 }
0x1c10   :  { %v3541_v62 = vmul.f32 %v3538_v22, %v3532_v37  ;;  %v3549_v50 = vadd.f32 %v3547_v59, %v3540_v43 }
0x1c12   :  { %v3550_v51 = vadd.f32 %v3547_v59, %v3541_v62 }
0x1c14   :  { %v3567_v52 = vpack.c.bf16 %v3550_v51, %v3549_v50  ;;  %v11472_v50 = vld [vmem:[#allocation8 + $0x160] sm:$0xff]   ;;  %v11473_v51 = vld [vmem:[#allocation8 + $0x168] sm:$0xff]  }
0x1c16   :  { %10456 = vmatmul.mubr.bf16.vlgmr.msra.gmra.mrb[84].mxu0 %v3567_v52  ;;  %v11474_v52 = vld [vmem:[#allocation8 + $0x170] sm:$0xff]  }
0x1c17   :  { %10479 = vmatprep.mubr.msk.bf16.mxu0 %vm12015_vm1, %v12012_v25  ;;  %10472 = vmatpush3.bf16.msra.mxu0 %v11468_v19 }
0x1c18   :  { %10473 = vmatprep.subr.bf16.mxu0 %v12012_v25 }
0x1c1b   :  { %10474 = vmatpush3.bf16.msra.mxu0 %v11469_v11 }
0x1c1c   :  { %10475 = vmatprep.subr.bf16.mxu0 %v12012_v25 }
0x1c1f   :  { %10476 = vmatpush3.bf16.msra.mxu0 %v11470_v20 }
0x1c20   :  { %10477 = vmatprep.subr.bf16.mxu0 %v12012_v25 }
0x1c23   :  { %10478 = vmatpush3.bf16.msra.mxu0 %v11471_v1 }
0x1c24   :  { %10495 = vmatprep.subr.bf16.mxu0 %v12012_v25 }
0x1ce9   :  { %v3657_v29 = vpop.f32.mrb[84].mxu0 }
0x1cea   :  { %v3658_v55 = vadd.f32 %v3657_v29, %v3573_v54  ;;  %v10457_v56 = vpop.f32.mrb[85].mxu0 }
0x1ceb   :  { %v3660_v33 = vpop.f32.mrb[86].mxu0 }
0x1cec   :  { %v9063_v3 = vmul.f32 -1.442695, %v3658_v55  ;;  %v3661_v13 = vadd.f32 %v3660_v33, %v3573_v54  ;;  %v10458_v15 = vpop.f32.mrb[87].mxu0 }
0x1cee   :  { %11738 = vpow2.f32 %v9063_v3  ;;  %v9064_v44 = vmul.f32 -1.442695, %v3661_v13 }
0x1cf0   :  { %11740 = vpow2.f32 %v9064_v44 }
0x1cf8   :  { %v11739_v4 = vpop.eup %11738 }
0x1cf9   :  { %v3670_v6 = vadd.f32 1.0, %v11739_v4 }
0x1cfa   :  { %v11741_v8 = vpop.eup %11740 }
0x1cfb   :  { %11742 = vrcp.f32 %v3670_v6  ;;  %v3671_v9 = vadd.f32 1.0, %v11741_v8 }
0x1cfd   :  { %11744 = vrcp.f32 %v3671_v9 }
0x1d05   :  { %v12745_v10 = vpop.eup %11742 }
0x1d06   :  { %v3682_v38 = vmul.f32 %v12745_v10, %v3677_v61 }
0x1d07   :  { %v12747_v12 = vpop.eup %11744 }
0x1d08   :  { %v3683_v17 = vmul.f32 %v12747_v12, %v3679_v63 }
0x1d0a   :  { %v3688_v18 = vpack.c.bf16 %v3683_v17, %v3682_v38 }
0x1d0c   :  { %3757 = vrot.lane.b32.xlu0 %v3688_v18, %s12014_s10 }
0x1d10   :  { %4073 = vrot.lane.b32.xlu0 %v3682_v38, %s12014_s10 }
0x1d14   :  { %5162 = vrot.lane.b32.xlu0 %v12206_v39, %s12013_s4 }
0x1d7e   :  { %v3758_v0 = vpop.permute.xlu0 %3757 }
0x1d7f   :  { %9074 = vmatmul.mubr.msk.bf16.vlgmr.msra.gmra.mrb[80].mxu1 %vm383_vm0, %v3758_v0 }
0x1d80   :  { %10467 = vmatprep.mubr.msk.bf16.mxu1 %vm12015_vm1, %v12012_v25  ;;  %10460 = vmatpush3.bf16.msra.mxu1 %v11468_v19 }
0x1d81   :  { %10461 = vmatprep.subr.bf16.mxu1 %v12012_v25 }
0x1d84   :  { %10462 = vmatpush3.bf16.msra.mxu1 %v11469_v11 }
0x1d85   :  { %10463 = vmatprep.subr.bf16.mxu1 %v12012_v25 }
0x1d88   :  { %10464 = vmatpush3.bf16.msra.mxu1 %v11470_v20  ;;  %v12801_v20 = vld [vmem:[#allocation8 + $0x280] sm:$0xff]  }
0x1d89   :  { %10465 = vmatprep.subr.bf16.mxu1 %v12012_v25 }
0x1d8c   :  { %10466 = vmatpush3.bf16.msra.mxu1 %v11471_v1  ;;  %v12807_v1 = vld [vmem:[#allocation8 + $0x288] sm:$0xff]  }
0x1d8d   :  { %10483 = vmatprep.subr.bf16.mxu1 %v12012_v25 }
0x1e52   :  { %v3816_v57 = vpop.f32.mrb[80].mxu1 }
0x1e53   :  { %v3818_v2 = vpop.f32.mrb[81].mxu1  ;;  %v3837_v35 = vadd.f32 %v3830_v16, %v3816_v57 }
0x1e54   :  { %v12768_v30 = vadd.f32 %v3834_v36, %v3818_v2  ;;  %v3820_v32 = vpop.f32.mrb[82].mxu1 }
0x1e55   :  { %v3839_v31 = vadd.f32 %v3830_v16, %v3820_v32  ;;  %v3822_v22 = vpop.f32.mrb[83].mxu1  ;;  %v4074_v16 = vpop.permute.xlu0 %4073 }
0x1e56   :  { %v3840_v40 = vadd.f32 %v3834_v36, %v3822_v22  ;;  %v4001_v36 = vrot.slane %v3996_v21, %v12187_v7  ;;  %v11484_v21 = vld [vmem:[#allocation8 + $0x1a0] sm:$0xff]  }
0x1e57   :  { %v3841_v41 = vsub.f32 %v3837_v35, %v3839_v31 }
0x1e58   :  { %v3842_v45 = vsub.f32 %v12768_v30, %v3840_v40 }
0x1e59   :  { %3852 = vrot.lane.b32.xlu1 %v3841_v41, %s12002_s1 }
0x1e5d   :  { %4075 = vrot.lane.b32.xlu1 %v3683_v17, %s12014_s10 }
0x1e61   :  { %5164 = vrot.lane.b32.xlu1 %v12208_v42, %s12013_s4 }
0x1ecb   :  { %v3853_v48 = vpop.permute.xlu1 %3852 }
0x1ecc   :  { %v3855_v37 = vmul.f32 %v3853_v48, %v3837_v35  ;;  %v3931_v43 = vmul.f32 %v3853_v48, %v3839_v31 }
0x1ece   :  { %v3856_v59 = vpack.c.bf16 %v3855_v37, %v3855_v37  ;;  %v3932_v62 = vpack.c.bf16 %v3931_v43, %v3931_v43 }
0x1ecf   :  { %v4076_v2 = vpop.permute.xlu1 %4075 }
0x1ed0   :  { %10468 = vmatmul.mubr.msk.bf16.vlgmr.msra.gmra.mrb[84].mxu1 %vm919_vm2, %v3856_v59  ;;  %10480 = vmatmul.mubr.msk.bf16.vlgmr.msra.gmra.mrb[88].mxu0 %vm919_vm2, %v3932_v62  ;;  %v4080_v41 = vsel %vm383_vm0, %v4076_v2, %v12648_v60  ;;  %v11480_v60 = vld [vmem:[#allocation8 + $0x180] sm:$0xff]  }
0x1ed1   :  { %10491 = vmatprep.mubr.msk.bf16.mxu1 %vm12015_vm1, %v12012_v25  ;;  %10503 = vmatprep.mubr.msk.bf16.mxu0 %vm12015_vm1, %v12012_v25 }
0x1ed2   :  { %10484 = vmatpush3.bf16.msra.mxu1 %v11472_v50  ;;  %10496 = vmatpush3.bf16.msra.mxu0 %v12785_v26 }
0x1ed3   :  { %10485 = vmatprep.subr.bf16.mxu1 %v12012_v25  ;;  %10497 = vmatprep.subr.bf16.mxu0 %v12012_v25 }
0x1ed6   :  { %10486 = vmatpush3.bf16.msra.mxu1 %v11473_v51  ;;  %10498 = vmatpush3.bf16.msra.mxu0 %v12788_v27 }
0x1ed7   :  { %10487 = vmatprep.subr.bf16.mxu1 %v12012_v25  ;;  %10499 = vmatprep.subr.bf16.mxu0 %v12012_v25 }
0x1eda   :  { %10488 = vmatpush3.bf16.msra.mxu1 %v11474_v52  ;;  %10500 = vmatpush3.bf16.msra.mxu0 %v12801_v20 }
0x1edb   :  { %10489 = vmatprep.subr.bf16.mxu1 %v12012_v25  ;;  %10501 = vmatprep.subr.bf16.mxu0 %v12012_v25 }
0x1ede   :  { %10490 = vmatpush3.bf16.msra.mxu1 %v11475_v23  ;;  %10502 = vmatpush3.bf16.msra.mxu0 %v12807_v1 }
0x1edf   :  { %10507 = vmatprep.subr.bf16.mxu1 %v12012_v25  ;;  %10519 = vmatprep.subr.bf16.mxu0 %v12012_v25 }
0x1fa3   :  { %v3918_v28 = vpop.f32.mrb[84].mxu1  ;;  %v3970_v53 = vpop.f32.mrb[88].mxu0 }
0x1fa4   :  { %v9080_v54 = vmul.f32 -0.25, %v3918_v28  ;;  %v9082_v29 = vmul.f32 0.25, %v3970_v53  ;;  %v10469_v55 = vpop.f32.mrb[85].mxu1  ;;  %v10481_v56 = vpop.f32.mrb[89].mxu0  ;;  %v11481_v53 = vld [vmem:[#allocation8 + $0x188] sm:$0xff]  }
0x1fa5   :  { %v3921_v33 = vpop.f32.mrb[86].mxu1  ;;  %v3973_v3 = vpop.f32.mrb[90].mxu0 }
0x1fa6   :  { %v3926_v13 = vmul.f32 1.442695, %v9080_v54  ;;  %v3978_v15 = vmul.f32 1.442695, %v9082_v29  ;;  %v10470_v44 = vpop.f32.mrb[87].mxu1  ;;  %v10482_v4 = vpop.f32.mrb[91].mxu0 }
0x1fa7   :  { %v11482_v54 = vld [vmem:[#allocation8 + $0x190] sm:$0xff]   ;;  %v11483_v29 = vld [vmem:[#allocation8 + $0x198] sm:$0xff]  }
0x1fa8   :  { %11746 = vpow2.f32 %v3926_v13  ;;  %v4213_v44 = vld [vmem:[#allocation10 + $0x1b] ss:$8 sm:$0x7] }
0x1fa9   :  { %11748 = vpow2.f32 %v3978_v15  ;;  %v4218_v4 = vrot.slane %v4213_v44, %v12187_v7  ;;  %v12862_v44 = vpack.c.bf16 %v12208_v42, %v12206_v39 }
0x1fb2   :  { %v11747_v6 = vpop.eup %11746 }
0x1fb3   :  { %v11749_v8 = vpop.eup %11748  ;;  %v3928_v9 = vadd.f32 1.0, %v11747_v6 }
0x1fb4   :  { %v3980_v61 = vadd.f32 1.0, %v11749_v8  ;;  %v4222_v8 = vld [vmem:[#allocation10 + $0x1c] ss:$8 sm:$0x7] }
0x1fb5   :  { %11750 = vrcp.f32 %v3928_v9 }
0x1fb6   :  { %11752 = vrcp.f32 %v3980_v61 }
0x1fbf   :  { %v11751_v63 = vpop.eup %11750 }
0x1fc0   :  { %v11753_v38 = vpop.eup %11752  ;;  %v3983_v17 = vmul.f32 %v11751_v63, %v3842_v45 }
0x1fc1   :  { %v3985_v18 = vmul.f32 %v11753_v38, %v3842_v45 }
0x1fc2   :  { %v3984_v0 = vadd.f32 %v3983_v17, %v3840_v40  ;;  %v4079_v40 = vsel %vm383_vm0, %v4074_v16, %v12646_v58  ;;  %v4227_v17 = vrot.slane %v4222_v8, %v12187_v7  ;;  %v4240_v16 = vld [vmem:[#allocation10 + $0x1d] ss:$8 sm:$0x7] }
0x1fc3   :  { %v3986_v19 = vsub.f32 %v12768_v30, %v3985_v18  ;;  %v11495_v8 = vld [vmem:[#allocation8 + $0x1b8] sm:$0xff]  }
0x1fc5   :  { %v3995_v11 = vpack.c.bf16 %v3986_v19, %v3984_v0 }
0x1fc7   :  { %10492 = vmatmul.mubr.msk.bf16.vlgmr.msra.gmra.mrb[88].mxu1 %vm919_vm2, %v3995_v11 }
0x1fc8   :  { %10508 = vmatpush3.bf16.msra.mxu1 %v12785_v26  ;;  %10515 = vmatprep.mubr.msk.bf16.mxu1 %vm12015_vm1, %v12012_v25 }
0x1fc9   :  { %10509 = vmatprep.subr.bf16.mxu1 %v12012_v25 }
0x1fcc   :  { %10510 = vmatpush3.bf16.msra.mxu1 %v12788_v27 }
0x1fcd   :  { %10511 = vmatprep.subr.bf16.mxu1 %v12012_v25 }
0x1fd0   :  { %10512 = vmatpush3.bf16.msra.mxu1 %v12801_v20 }
0x1fd1   :  { %10513 = vmatprep.subr.bf16.mxu1 %v12012_v25 }
0x1fd4   :  { %10514 = vmatpush3.bf16.msra.mxu1 %v12807_v1 }
0x1fd5   :  { %10531 = vmatprep.subr.bf16.mxu1 %v12012_v25 }
0x209a   :  { %v4064_v57 = vpop.f32.mrb[88].mxu1 }
0x209b   :  { %v4065_v30 = vadd.f32 %v4064_v57, %v4001_v36  ;;  %v10493_v32 = vpop.f32.mrb[89].mxu1  ;;  %v4245_v57 = vrot.slane %v4240_v16, %v12187_v7  ;;  %v4494_v16 = vld [vmem:[#allocation10 + $0x30] ss:$8 sm:$0x7] }
0x209c   :  { %v4067_v35 = vpop.f32.mrb[90].mxu1 }
0x209d   :  { %v4068_v31 = vadd.f32 %v4067_v35, %v4001_v36  ;;  %v10494_v22 = vpop.f32.mrb[91].mxu1  ;;  %v4081_v45 = vadd.f32 %v4079_v40, %v4065_v30  ;;  %v11485_v36 = vld [vmem:[#allocation8 + $0x1a8] sm:$0xff]  }
0x209f   :  { %v4082_v48 = vadd.f32 %v4080_v41, %v4068_v31 }
0x20a1   :  { %v4091_v37 = vpack.c.bf16 %v4082_v48, %v4081_v45 }
0x20a3   :  { %10504 = vmatmul.mubr.msk.bf16.vlgmr.msra.gmra.mrb[92].mxu0 %vm919_vm2, %v4091_v37 }
0x20a4   :  { %10527 = vmatprep.mubr.msk.bf16.mxu0 %vm12015_vm1, %v12012_v25  ;;  %10520 = vmatpush3.bf16.msra.mxu0 %v11480_v60 }
0x20a5   :  { %10521 = vmatprep.subr.bf16.mxu0 %v12012_v25 }
0x20a8   :  { %10522 = vmatpush3.bf16.msra.mxu0 %v11481_v53 }
0x20a9   :  { %10523 = vmatprep.subr.bf16.mxu0 %v12012_v25 }
0x20ac   :  { %10524 = vmatpush3.bf16.msra.mxu0 %v11482_v54 }
0x20ad   :  { %10525 = vmatprep.subr.bf16.mxu0 %v12012_v25 }
0x20b0   :  { %10526 = vmatpush3.bf16.msra.mxu0 %v11483_v29 }
0x20b1   :  { %10539 = vmatprep.subr.bf16.mxu0 %v12012_v25 }
0x2176   :  { %v4153_v43 = vpop.f32.mrb[92].mxu0 }
0x2177   :  { %v4160_v59 = vsub.f32 %v4081_v45, %v4153_v43  ;;  %v10505_v62 = vpop.f32.mrb[93].mxu0 }
0x2178   :  { %v4156_v50 = vpop.f32.mrb[94].mxu0 }
0x2179   :  { %v4161_v51 = vsub.f32 %v4082_v48, %v4156_v50  ;;  %v10506_v52 = vpop.f32.mrb[95].mxu0  ;;  %v4162_v23 = vmul.f32 %v4160_v59, %v4160_v59  ;;  %v4322_v48 = vld [vmem:[#allocation10 + $0x1e] ss:$8 sm:$0x7] }
0x217a   :  { %v4327_v37 = vrot.slane %v4322_v48, %v12187_v7 }
0x217b   :  { %v4163_v28 = vmul.f32 %v4161_v51, %v4161_v51 }
0x217d   :  { %v4164_v58 = vpack.c.bf16 %v4163_v28, %v4162_v23 }
0x217f   :  { %10516 = vmatmul.mubr.msk.bf16.vlgmr.msra.gmra.mrb[92].mxu1 %vm919_vm2, %v4164_v58 }
0x2180   :  { %10535 = vmatprep.mubr.msk.bf16.mxu1 %vm12015_vm1, %v12012_v25  ;;  %10532 = vmatpush3.bf16.msra.mxu1 %v11484_v21 }
0x2181   :  { %10533 = vmatprep.subr.bf16.mxu1 %v12012_v25 }
0x2184   :  { %10534 = vmatpush3.bf16.msra.mxu1 %v11485_v36 }
0x2185   :  { %10551 = vmatprep.subr.bf16.mxu1 %v12012_v25 }
0x2252   :  { %v4202_v55 = vpop.f32.mrb[92].mxu1 }
0x2253   :  { %v4203_v56 = vadd.f32 1e-05, %v4202_v55  ;;  %v10517_v33 = vpop.f32.mrb[93].mxu1 }
0x2254   :  { %v4205_v3 = vpop.f32.mrb[94].mxu1 }
0x2255   :  { %11754 = vrsqrt.f32 %v4203_v56  ;;  %v4206_v13 = vadd.f32 1e-05, %v4205_v3  ;;  %v10518_v15 = vpop.f32.mrb[95].mxu1  ;;  %v11486_v56 = vld [vmem:[#allocation7 + $0x30] ss:$12 sps:$4 sm:$0xff]  }
0x2256   :  { %v11491_v3 = vld [vmem:[#allocation7 + $0x4c] ss:$12 sps:$4 sm:$0xff]  }
0x2257   :  { %11756 = vrsqrt.f32 %v4206_v13  ;;  %v11489_v13 = vld [vmem:[#allocation7 + $0x48] ss:$12 sps:$4 sm:$0xff]   ;;  %v11492_v15 = vld [vmem:[#allocation7 + $0x38] ss:$12 sps:$4 sm:$0xff]  }
0x225f   :  { %v11755_v6 = vpop.eup %11754 }
0x2260   :  { %v4211_v9 = vmul.f32 %v11755_v6, %v4160_v59  ;;  %v11494_v6 = vld [vmem:[#allocation8 + $0x1b0] sm:$0xff]  }
0x2261   :  { %v11757_v61 = vpop.eup %11756 }
0x2262   :  { %v4220_v63 = vmul.f32 %v4218_v4, %v4211_v9  ;;  %v4212_v38 = vmul.f32 %v11757_v61, %v4161_v51  ;;  %v11496_v9 = vld [vmem:[#allocation8 + $0x1c0] sm:$0xff]   ;;  %v11497_v61 = vld [vmem:[#allocation8 + $0x1c8] sm:$0xff]  }
0x2264   :  { %v4221_v18 = vmul.f32 %v4218_v4, %v4212_v38  ;;  %v4229_v0 = vadd.f32 %v4227_v17, %v4220_v63  ;;  %v11493_v4 = vld [vmem:[#allocation7 + $0x50] ss:$12 sps:$4 sm:$0xff]  }
0x2266   :  { %v4230_v19 = vadd.f32 %v4227_v17, %v4221_v18 }
0x2268   :  { %v4239_v11 = vpack.c.bf16 %v4230_v19, %v4229_v0 }
0x226a   :  { %10528 = vmatmul.mubr.msk.bf16.vlgmr.msra.gmra.mrb[96].mxu0 %vm919_vm2, %v4239_v11  ;;  %v4485_v11 = vld [vmem:[#allocation10 + $0x1f] ss:$8 sm:$0x7] }
0x226b   :  { %10540 = vmatpush3.bf16.msra.mxu0 %v12785_v26  ;;  %10547 = vmatprep.mubr.msk.bf16.mxu0 %vm12015_vm1, %v12012_v25  ;;  %v4490_v21 = vrot.slane %v4485_v11, %v12187_v7 }
0x226c   :  { %10541 = vmatprep.subr.bf16.mxu0 %v12012_v25 }
0x226f   :  { %10542 = vmatpush3.bf16.msra.mxu0 %v12788_v27 }
0x2270   :  { %10543 = vmatprep.subr.bf16.mxu0 %v12012_v25 }
0x2273   :  { %10544 = vmatpush3.bf16.msra.mxu0 %v12801_v20 }
0x2274   :  { %10545 = vmatprep.subr.bf16.mxu0 %v12012_v25 }
0x2277   :  { %10546 = vmatpush3.bf16.msra.mxu0 %v12807_v1 }
0x2278   :  { %10563 = vmatprep.subr.bf16.mxu0 %v12012_v25 }
0x233d   :  { %v4308_v2 = vpop.f32.mrb[96].mxu0 }
0x233e   :  { %v4309_v30 = vadd.f32 %v4308_v2, %v4245_v57  ;;  %v10529_v32 = vpop.f32.mrb[97].mxu0 }
0x233f   :  { %v4311_v35 = vpop.f32.mrb[98].mxu0 }
0x2340   :  { %v4312_v31 = vadd.f32 %v4311_v35, %v4245_v57  ;;  %v10530_v22 = vpop.f32.mrb[99].mxu0  ;;  %v4315_v40 = vmax.f32 %v4309_v30, 0.0 }
0x2342   :  { %v4316_v41 = vmax.f32 %v4312_v31, 0.0  ;;  %v4499_v31 = vrot.slane %v4494_v16, %v12187_v7 }
0x2344   :  { %v4321_v45 = vpack.c.bf16 %v4316_v41, %v4315_v40 }
0x2346   :  { %10536 = vmatmul.mubr.msk.bf16.vlgmr.msra.gmra.mrb[96].mxu1 %vm383_vm0, %v4321_v45 }
0x2347   :  { %10552 = vmatpush3.bf16.msra.mxu1 %v12785_v26  ;;  %10559 = vmatprep.mubr.msk.bf16.mxu1 %vm12015_vm1, %v12012_v25 }
0x2348   :  { %10553 = vmatprep.subr.bf16.mxu1 %v12012_v25 }
0x234b   :  { %10554 = vmatpush3.bf16.msra.mxu1 %v12788_v27 }
0x234c   :  { %10555 = vmatprep.subr.bf16.mxu1 %v12012_v25 }
0x234f   :  { %10556 = vmatpush3.bf16.msra.mxu1 %v12801_v20  ;;  %v11488_v20 = vld [vmem:[#allocation7 + $0x34] ss:$12 sps:$4 sm:$0xff]  }
0x2350   :  { %10557 = vmatprep.subr.bf16.mxu1 %v12012_v25 }
0x2353   :  { %10558 = vmatpush3.bf16.msra.mxu1 %v12807_v1 }
0x2354   :  { %4653 = vmatprep.subr.bf16.mxu1 %v11488_v20 }
0x2419   :  { %v4378_v43 = vpop.f32.mrb[96].mxu1 }
0x241a   :  { %v4379_v26 = vadd.f32 %v4378_v43, %v4327_v37  ;;  %v10537_v59 = vpop.f32.mrb[97].mxu1 }
0x241b   :  { %v4381_v62 = vpop.f32.mrb[98].mxu1  ;;  %v11498_v59 = vld [vmem:[#allocation7] ss:$12 sps:$4 sm:$0xff]  }
0x241c   :  { %v4382_v50 = vadd.f32 %v4381_v62, %v4327_v37  ;;  %v10538_v51 = vpop.f32.mrb[99].mxu1  ;;  %v4385_v52 = vadd.f32 %v4379_v26, %v4229_v0  ;;  %v11500_v26 = vld [vmem:[#allocation7 + $0x4] ss:$12 sps:$4 sm:$0xff]   ;;  %v11501_v62 = vld [vmem:[#allocation7 + $0x8] ss:$12 sps:$4 sm:$0xff]  }
0x241d   :  { %v11502_v51 = vld [vmem:[#allocation7 + $0x18] ss:$12 sps:$4 sm:$0xff]  }
0x241e   :  { %v4386_v23 = vadd.f32 %v4382_v50, %v4230_v19  ;;  %v11504_v50 = vld [vmem:[#allocation7 + $0x1c] ss:$12 sps:$4 sm:$0xff]  }
0x2420   :  { %v4387_v27 = vpack.c.bf16 %v4386_v23, %v4385_v52 }
0x2422   :  { %10548 = vmatmul.mubr.msk.bf16.vlgmr.msra.gmra.mrb[100].mxu0 %vm919_vm2, %v4387_v27 }
0x2423   :  { %10571 = vmatprep.mubr.msk.bf16.mxu0 %vm12015_vm1, %v12012_v25  ;;  %10564 = vmatpush3.bf16.msra.mxu0 %v11494_v6 }
0x2424   :  { %10565 = vmatprep.subr.bf16.mxu0 %v12012_v25 }
0x2427   :  { %10566 = vmatpush3.bf16.msra.mxu0 %v11495_v8  ;;  %v11506_v8 = vld [vmem:[#allocation8 + $0x1d0] sm:$0xff]  }
0x2428   :  { %10567 = vmatprep.subr.bf16.mxu0 %v12012_v25 }
0x242b   :  { %10568 = vmatpush3.bf16.msra.mxu0 %v11496_v9  ;;  %v11512_v9 = vld [vmem:[#allocation8 + $0x200] sm:$0xff]  }
0x242c   :  { %10569 = vmatprep.subr.bf16.mxu0 %v12012_v25 }
0x242f   :  { %10570 = vmatpush3.bf16.msra.mxu0 %v11497_v61  ;;  %v11513_v61 = vld [vmem:[#allocation8 + $0x208] sm:$0xff]  }
0x2430   :  { %10583 = vmatprep.subr.bf16.mxu0 %v12012_v25 }
0x24f5   :  { %v4425_v1 = vpop.f32.mrb[100].mxu0 }
0x24f6   :  { %v4432_v28 = vsub.f32 %v4385_v52, %v4425_v1  ;;  %v10549_v58 = vpop.f32.mrb[101].mxu0  ;;  %v11505_v52 = vld [vmem:[#allocation7 + $0x20] ss:$12 sps:$4 sm:$0xff]  }
0x24f7   :  { %v4428_v60 = vpop.f32.mrb[102].mxu0 }
0x24f8   :  { %v4433_v53 = vsub.f32 %v4386_v23, %v4428_v60  ;;  %v10550_v54 = vpop.f32.mrb[103].mxu0  ;;  %v4434_v29 = vmul.f32 %v4432_v28, %v4432_v28  ;;  %v4512_v23 = vld [vmem:[#allocation10 + $0x31] ss:$8 sm:$0x7] }
0x24f9   :  { %v4517_v27 = vrot.slane %v4512_v23, %v12187_v7  ;;  %v4589_v54 = vsub.f32 1.0, %v12745_v10  ;;  %v11517_v23 = vld [vmem:[#allocation8 + $0x98] sm:$0xff]  }
0x24fa   :  { %v4435_v55 = vmul.f32 %v4433_v53, %v4433_v53 }
0x24fc   :  { %v4436_v33 = vpack.c.bf16 %v4435_v55, %v4434_v29  ;;  %v4590_v29 = vsub.f32 1.0, %v12747_v12 }
0x24fe   :  { %10560 = vmatmul.mubr.msk.bf16.vlgmr.msra.gmra.mrb[100].mxu1 %vm919_vm2, %v4436_v33 }
0x24ff   :  { %4654 = vmatpush1.bf16.msra.mxu1 %v11486_v56  ;;  %4685 = vmatprep.mubr.bf16.mxu1 %v12011_v24  ;;  %v4591_v56 = vmul.f32 %v4589_v54, %v12522_v34  ;;  %v12976_v54 = vld [vmem:[#allocation8 + $0x228] sm:$0xff]  }
0x2500   :  { %4655 = vmatprep.subr.bf16.mxu1 %v11491_v3 }
0x2503   :  { %4656 = vmatpush1.bf16.msra.mxu1 %v11489_v13 }
0x2504   :  { %10575 = vmatprep.subr.bf16.mxu1 %v12012_v25 }
0x2506   :  { %9115 = vmatmul.mubr.msk.bf16.vlgmr.msra.gmra.mrb[104].mxu1 %vm383_vm0, %v12862_v44 }
0x2507   :  { %10576 = vmatpush3.bf16.msra.mxu1 %v11492_v15  ;;  %10579 = vmatprep.mubr.msk.bf16.mxu1 %vm12015_vm1, %v12012_v25  ;;  %v4592_v15 = vmul.f32 %v4590_v29, %v12527_v47  ;;  %v11507_v47 = vld [vmem:[#allocation8 + $0x1d8] sm:$0xff]   ;;  %v12980_v29 = vld [vmem:[#allocation8 + $0x230] sm:$0xff]  }
0x2508   :  { %10577 = vmatprep.subr.bf16.mxu1 %v12012_v25 }
0x250b   :  { %10578 = vmatpush3.bf16.msra.mxu1 %v11493_v4 }
0x250c   :  { %4772 = vmatprep.subr.bf16.mxu1 %v11500_v26 }
0x250e   :  { %10580 = vmatmul.mubr.msk.bf16.vlgmr.msra.gmra.mrb[108].mxu1 %vm383_vm0, %v12862_v44 }
0x250f   :  { %4804 = vmatprep.mubr.bf16.mxu1 %v12011_v24  ;;  %4773 = vmatpush1.bf16.msra.mxu1 %v11498_v59 }
0x2510   :  { %4774 = vmatprep.subr.bf16.mxu1 %v11504_v50 }
0x2513   :  { %4775 = vmatpush1.bf16.msra.mxu1 %v11502_v51  ;;  %v11515_v51 = vld [vmem:[#allocation8 + $0x88] sm:$0xff]  }
0x2514   :  { %10611 = vmatprep.subr.bf16.mxu1 %v12012_v25 }
0x25d1   :  { %v4474_v63 = vpop.f32.mrb[100].mxu1 }
0x25d2   :  { %v4475_v38 = vadd.f32 1e-05, %v4474_v63  ;;  %v10561_v17 = vpop.f32.mrb[101].mxu1  ;;  %v4856_v63 = vld [vmem:[#allocation10] ss:$8 sm:$0x7] }
0x25d3   :  { %v4477_v18 = vpop.f32.mrb[102].mxu1  ;;  %v4869_v17 = vrot.slane %v4856_v63, %v12191_v14  ;;  %v4861_v11 = vrot.slane %v4856_v63, %v12187_v7 }
0x25d4   :  { %11758 = vrsqrt.f32 %v4475_v38  ;;  %v4478_v0 = vadd.f32 1e-05, %v4477_v18  ;;  %v10562_v19 = vpop.f32.mrb[103].mxu1  ;;  %v4865_v18 = vrot.slane %v4856_v63, %v12185_v5 }
0x25d6   :  { %11760 = vrsqrt.f32 %v4478_v0 }
0x25de   :  { %v11759_v36 = vpop.eup %11758 }
0x25df   :  { %v4483_v57 = vmul.f32 %v11759_v36, %v4432_v28 }
0x25e0   :  { %v11761_v2 = vpop.eup %11760 }
0x25e1   :  { %v4492_v30 = vmul.f32 %v4490_v21, %v4483_v57  ;;  %v4484_v32 = vmul.f32 %v11761_v2, %v4433_v53  ;;  %v12878_v35 = vpop.f32.mrb[108].mxu1 }
0x25e2   :  { %v10581_v22 = vpop.f32.mrb[109].mxu1 }
0x25e3   :  { %v4493_v40 = vmul.f32 %v4490_v21, %v4484_v32  ;;  %v12881_v41 = vpop.f32.mrb[110].mxu1  ;;  %v4501_v48 = vadd.f32 %v4499_v31, %v4492_v30 }
0x25e4   :  { %v10582_v45 = vpop.f32.mrb[111].mxu1 }
0x25e5   :  { %v4502_v37 = vadd.f32 %v4499_v31, %v4493_v40 }
0x25e7   :  { %v4511_v43 = vpack.c.bf16 %v4502_v37, %v4501_v48 }
0x25e9   :  { %10572 = vmatmul.mubr.msk.bf16.vlgmr.msra.gmra.mrb[104].mxu0 %vm919_vm2, %v4511_v43 }
0x25ea   :  { %10587 = vmatprep.mubr.msk.bf16.mxu0 %vm12015_vm1, %v12012_v25  ;;  %10584 = vmatpush3.bf16.msra.mxu0 %v11501_v62 }
0x25eb   :  { %10585 = vmatprep.subr.bf16.mxu0 %v12012_v25 }
0x25ee   :  { %10586 = vmatpush3.bf16.msra.mxu0 %v11505_v52  ;;  %v11516_v52 = vld [vmem:[#allocation8 + $0x90] sm:$0xff]  }
0x25ef   :  { %10591 = vmatprep.subr.bf16.mxu0 %v12012_v25 }
0x26bc   :  { %v4580_v20 = vpop.f32.mrb[104].mxu0 }
0x26bd   :  { %v4581_v1 = vadd.f32 %v4580_v20, %v4517_v27  ;;  %v10573_v28 = vpop.f32.mrb[105].mxu0  ;;  %v11519_v20 = vld [vmem:[#allocation8 + $0xa8] sm:$0xff]  }
0x26be   :  { %v4583_v58 = vpop.f32.mrb[106].mxu0  ;;  %v11521_v28 = vld [vmem:[#allocation8 + $0xb8] sm:$0xff]  }
0x26bf   :  { %11762 = vtanh.f32 %v4581_v1  ;;  %v4584_v60 = vadd.f32 %v4583_v58, %v4517_v27  ;;  %v10574_v53 = vpop.f32.mrb[107].mxu0  ;;  %v11518_v27 = vld [vmem:[#allocation8 + $0xa0] sm:$0xff]   ;;  %v11520_v1 = vld [vmem:[#allocation8 + $0xb0] sm:$0xff]  }
0x26c0   :  { %v12965_v58 = vld [vmem:[#allocation8 + $0x210] sm:$0xff]   ;;  %v12972_v53 = vld [vmem:[#allocation8 + $0x220] sm:$0xff]  }
0x26c1   :  { %11764 = vtanh.f32 %v4584_v60  ;;  %v12968_v60 = vld [vmem:[#allocation8 + $0x218] sm:$0xff]  }
0x26c9   :  { %v11763_v55 = vpop.eup %11762 }
0x26ca   :  { %v4593_v33 = vmul.f32 %v11763_v55, %v12745_v10  ;;  %v11510_v10 = vld [vmem:[#allocation8 + $0x1f0] sm:$0xff]   ;;  %v12984_v55 = vld [vmem:[#allocation8 + $0x238] sm:$0xff]  }
0x26cb   :  { %v11765_v3 = vpop.eup %11764 }
0x26cc   :  { %v12894_v13 = vadd.f32 %v4593_v33, %v4591_v56  ;;  %v4594_v4 = vmul.f32 %v11765_v3, %v12747_v12  ;;  %v11511_v12 = vld [vmem:[#allocation8 + $0x1f8] sm:$0xff]  }
0x26ce   :  { %4598 = vst.msk [vmem:[#allocation11 + $0x10] sm:$0xff] %vm383_vm0, %v12894_v13  ;;  %v12900_v6 = vadd.f32 %v4594_v4, %v4592_v15  ;;  %5170 = vrot.lane.b32.xlu0 %v12894_v13, %s12002_s1 }
0x26d0   :  { %4599 = vst.msk [vmem:[#allocation11 + $0x18] sm:$0xff] %vm383_vm0, %v12900_v6  ;;  %5172 = vrot.lane.b32.xlu1 %v12900_v6, %s12002_s1  ;;  %v4608_v34 = vpack.c.bf16 %v12900_v6, %v12894_v13 }
0x26d2   :  { %5176 = vrot.lane.b32.xlu0 %v12206_v39, %s12014_s10  ;;  %9123 = vmatmul.mubr.msk.bf16.vlgmr.msra.gmra.mrb[104].mxu1 %vm383_vm0, %v4608_v34  ;;  %v11508_v39 = vld [vmem:[#allocation8 + $0x1e0] sm:$0xff]  }
0x26d3   :  { %10588 = vmatmul.mubr.msk.bf16.vlgmr.msra.gmra.mrb[108].mxu0 %vm383_vm0, %v4608_v34  ;;  %10612 = vmatpush3.bf16.msra.mxu1 %v11506_v8 }
0x26d4   :  { %5178 = vrot.lane.b32.xlu1 %v12208_v42, %s12014_s10  ;;  %10592 = vmatpush3.bf16.msra.mxu0 %v11506_v8  ;;  %v11509_v42 = vld [vmem:[#allocation8 + $0x1e8] sm:$0xff]  }
0x26d5   :  { %10593 = vmatprep.subr.bf16.mxu0 %v12012_v25  ;;  %10613 = vmatprep.subr.bf16.mxu1 %v12012_v25 }
0x26d6   :  { %5800 = vrot.lane.b32.xlu0 %v12894_v13, %s12013_s4  ;;  %10607 = vmatprep.mubr.msk.bf16.mxu0 %vm12015_vm1, %v12012_v25 }
0x26d7   :  { %10614 = vmatpush3.bf16.msra.mxu1 %v11507_v47  ;;  %10627 = vmatprep.mubr.msk.bf16.mxu1 %vm12015_vm1, %v12012_v25 }
0x26d8   :  { %5802 = vrot.lane.b32.xlu1 %v12900_v6, %s12013_s4  ;;  %10594 = vmatpush3.bf16.msra.mxu0 %v11507_v47 }
0x26d9   :  { %10595 = vmatprep.subr.bf16.mxu0 %v12012_v25  ;;  %10615 = vmatprep.subr.bf16.mxu1 %v12012_v25 }
0x26db   :  { %10616 = vmatpush3.bf16.msra.mxu1 %v11508_v39 }
0x26dc   :  { %10596 = vmatpush3.bf16.msra.mxu0 %v11508_v39  ;;  %10617 = vmatprep.subr.bf16.mxu1 %v12012_v25 }
0x26dd   :  { %10597 = vmatprep.subr.bf16.mxu0 %v12012_v25 }
0x26df   :  { %10618 = vmatpush3.bf16.msra.mxu1 %v11509_v42 }
0x26e0   :  { %10598 = vmatpush3.bf16.msra.mxu0 %v11509_v42  ;;  %10619 = vmatprep.subr.bf16.mxu1 %v12012_v25 }
0x26e1   :  { %10599 = vmatprep.subr.bf16.mxu0 %v12012_v25 }
0x26e3   :  { %10620 = vmatpush3.bf16.msra.mxu1 %v11510_v10 }
0x26e4   :  { %10600 = vmatpush3.bf16.msra.mxu0 %v11510_v10  ;;  %10621 = vmatprep.subr.bf16.mxu1 %v12012_v25 }
0x26e5   :  { %10601 = vmatprep.subr.bf16.mxu0 %v12012_v25 }
0x26e7   :  { %10622 = vmatpush3.bf16.msra.mxu1 %v11511_v12 }
0x26e8   :  { %10602 = vmatpush3.bf16.msra.mxu0 %v11511_v12  ;;  %10623 = vmatprep.subr.bf16.mxu1 %v12012_v25 }
0x26e9   :  { %10603 = vmatprep.subr.bf16.mxu0 %v12012_v25 }
0x26eb   :  { %10624 = vmatpush3.bf16.msra.mxu1 %v11512_v9 }
0x26ec   :  { %10604 = vmatpush3.bf16.msra.mxu0 %v11512_v9  ;;  %10625 = vmatprep.subr.bf16.mxu1 %v12012_v25 }
0x26ed   :  { %10605 = vmatprep.subr.bf16.mxu0 %v12012_v25 }
0x26ef   :  { %10626 = vmatpush3.bf16.msra.mxu1 %v11513_v61 }
0x26f0   :  { %10606 = vmatpush3.bf16.msra.mxu0 %v11513_v61  ;;  %10651 = vmatprep.subr.bf16.mxu1 %v12012_v25 }
0x26f1   :  { %10631 = vmatprep.subr.bf16.mxu0 %v12012_v25 }
0x27a5   :  { %v4806_v38 = vpop.f32.mrb[104].mxu1 }
0x27a6   :  { %v4849_v0 = vpop.f32.mrb[108].mxu0  ;;  %v4808_v19 = vpop.f32.mrb[105].mxu1  ;;  %v4873_v45 = vadd.f32 %v4861_v11, %v4806_v38 }
0x27a7   :  { %v4850_v21 = vadd.f32 %v4849_v0, %v12878_v35  ;;  %v10589_v36 = vpop.f32.mrb[109].mxu0  ;;  %v4810_v16 = vpop.f32.mrb[106].mxu1  ;;  %v4874_v32 = vadd.f32 %v4865_v18, %v4808_v19 }
0x27a8   :  { %v4852_v57 = vpop.f32.mrb[110].mxu0  ;;  %v4812_v2 = vpop.f32.mrb[107].mxu1  ;;  %v4876_v48 = vadd.f32 %v4861_v11, %v4810_v16  ;;  %v13007_v16 = vld [vmem:[#allocation8 + $0x240] sm:$0xff]  }
0x27a9   :  { %v12944_v30 = vadd.f32 %v4869_v17, %v4850_v21  ;;  %v4853_v31 = vadd.f32 %v4852_v57, %v12881_v41  ;;  %v4877_v22 = vadd.f32 %v4865_v18, %v4812_v2  ;;  %v10590_v40 = vpop.f32.mrb[111].mxu0  ;;  %v11514_v41 = vld [vmem:[#allocation8 + $0x80] sm:$0xff]   ;;  %v13013_v57 = vld [vmem:[#allocation8 + $0x248] sm:$0xff]   ;;  %v13019_v2 = vpop.permute.xlu0 %5162 }
0x27ab   :  { %v12947_v37 = vadd.f32 %v4869_v17, %v4853_v31  ;;  %v4879_v43 = vsub.f32 %v4874_v32, %v4877_v22  ;;  %v5064_v31 = vld [vmem:[#allocation10 + $0x1] ss:$8 sm:$0x7] }
0x27ac   :  { %v5069_v40 = vrot.slane %v5064_v31, %v12187_v7 }
0x27ad   :  { %v12951_v26 = vsub.f32 %v12944_v30, %v12947_v37  ;;  %v4897_v35 = vmul.f32 %v4879_v43, %v4873_v45  ;;  %v4994_v59 = vmul.f32 %v4879_v43, %v4876_v48  ;;  %v5171_v32 = vpop.permute.xlu0 %5170 }
0x27af   :  { %v4898_v62 = vpack.c.bf16 %v4897_v35, %v4897_v35  ;;  %v4995_v50 = vpack.c.bf16 %v4994_v59, %v4994_v59  ;;  %v5182_v35 = vsel %vm383_vm0, %v12894_v13, %v13019_v2 }
0x27b1   :  { %10608 = vmatmul.mubr.bf16.vlgmr.msra.gmra.mrb[112].mxu0 %v4898_v62  ;;  %10628 = vmatmul.mubr.bf16.vlgmr.msra.gmra.mrb[112].mxu1 %v4995_v50  ;;  %v5177_v45 = vpop.permute.xlu0 %5176  ;;  %v5184_v50 = vsel %vm919_vm2, %v5182_v35, %v5171_v32 }
0x27b2   :  { %10647 = vmatprep.mubr.msk.bf16.mxu0 %vm12015_vm1, %v12012_v25  ;;  %10667 = vmatprep.mubr.msk.bf16.mxu1 %vm12015_vm1, %v12012_v25 }
0x27b3   :  { %10632 = vmatpush3.bf16.msra.mxu0 %v11514_v41  ;;  %10652 = vmatpush3.bf16.msra.mxu1 %v12965_v58 }
0x27b4   :  { %10633 = vmatprep.subr.bf16.mxu0 %v12012_v25  ;;  %10653 = vmatprep.subr.bf16.mxu1 %v12012_v25 }
0x27b7   :  { %10634 = vmatpush3.bf16.msra.mxu0 %v11515_v51  ;;  %10654 = vmatpush3.bf16.msra.mxu1 %v12968_v60 }
0x27b8   :  { %10635 = vmatprep.subr.bf16.mxu0 %v12012_v25  ;;  %10655 = vmatprep.subr.bf16.mxu1 %v12012_v25 }
0x27bb   :  { %10636 = vmatpush3.bf16.msra.mxu0 %v11516_v52  ;;  %10656 = vmatpush3.bf16.msra.mxu1 %v12972_v53 }
0x27bc   :  { %10637 = vmatprep.subr.bf16.mxu0 %v12012_v25  ;;  %10657 = vmatprep.subr.bf16.mxu1 %v12012_v25 }
0x27bf   :  { %10638 = vmatpush3.bf16.msra.mxu0 %v11517_v23  ;;  %10658 = vmatpush3.bf16.msra.mxu1 %v12976_v54  ;;  %v5186_v23 = vsel %vm922_vm3, %v5184_v50, %v5177_v45 }
0x27c0   :  { %10639 = vmatprep.subr.bf16.mxu0 %v12012_v25  ;;  %10659 = vmatprep.subr.bf16.mxu1 %v12012_v25 }
0x27c3   :  { %10640 = vmatpush3.bf16.msra.mxu0 %v11518_v27  ;;  %10660 = vmatpush3.bf16.msra.mxu1 %v12980_v29 }
0x27c4   :  { %10641 = vmatprep.subr.bf16.mxu0 %v12012_v25  ;;  %10661 = vmatprep.subr.bf16.mxu1 %v12012_v25 }
0x27c7   :  { %10642 = vmatpush3.bf16.msra.mxu0 %v11519_v20  ;;  %10662 = vmatpush3.bf16.msra.mxu1 %v12984_v55 }
0x27c8   :  { %10643 = vmatprep.subr.bf16.mxu0 %v12012_v25  ;;  %10663 = vmatprep.subr.bf16.mxu1 %v12012_v25 }
0x27cb   :  { %10644 = vmatpush3.bf16.msra.mxu0 %v11520_v1  ;;  %10664 = vmatpush3.bf16.msra.mxu1 %v13007_v16 }
0x27cc   :  { %10645 = vmatprep.subr.bf16.mxu0 %v12012_v25  ;;  %10665 = vmatprep.subr.bf16.mxu1 %v12012_v25 }
0x27cf   :  { %10646 = vmatpush3.bf16.msra.mxu0 %v11521_v28  ;;  %10666 = vmatpush3.bf16.msra.mxu1 %v13013_v57 }
0x27d0   :  { %10671 = vmatprep.subr.bf16.mxu0 %v12012_v25  ;;  %10691 = vmatprep.subr.bf16.mxu1 %v12012_v25 }
0x2884   :  { %v4981_v56 = vpop.f32.mrb[112].mxu0  ;;  %v5030_v33 = vpop.f32.mrb[112].mxu1 }
0x2885   :  { %v9133_v3 = vmul.f32 -0.25, %v4981_v56  ;;  %v9134_v15 = vmul.f32 0.25, %v5030_v33  ;;  %v10609_v4 = vpop.f32.mrb[113].mxu0  ;;  %v10629_v8 = vpop.f32.mrb[113].mxu1  ;;  %v11530_v56 = vld [vmem:[#allocation8 + $0xc0] sm:$0xff]   ;;  %v11531_v33 = vld [vmem:[#allocation8 + $0xc8] sm:$0xff]  }
0x2886   :  { %v4984_v34 = vpop.f32.mrb[114].mxu0  ;;  %v5033_v47 = vpop.f32.mrb[114].mxu1 }
0x2887   :  { %v4989_v39 = vmul.f32 1.442695, %v9133_v3  ;;  %v5038_v42 = vmul.f32 1.442695, %v9134_v15  ;;  %v10610_v10 = vpop.f32.mrb[115].mxu0  ;;  %v10630_v12 = vpop.f32.mrb[115].mxu1 }
0x2888   :  { %v11532_v12 = vld [vmem:[#allocation8 + $0xd0] sm:$0xff]  }
0x2889   :  { %11766 = vpow2.f32 %v4989_v39 }
0x288a   :  { %11768 = vpow2.f32 %v5038_v42 }
0x2893   :  { %v11767_v9 = vpop.eup %11766 }
0x2894   :  { %v11769_v61 = vpop.eup %11768  ;;  %v4991_v63 = vadd.f32 1.0, %v11767_v9  ;;  %v11533_v9 = vld [vmem:[#allocation8 + $0xd8] sm:$0xff]  }
0x2895   :  { %v5040_v38 = vadd.f32 1.0, %v11769_v61  ;;  %v11534_v61 = vld [vmem:[#allocation8 + $0xe0] sm:$0xff]  }
0x2896   :  { %11770 = vrcp.f32 %v4991_v63  ;;  %v11535_v63 = vld [vmem:[#allocation8 + $0xe8] sm:$0xff]  }
0x2897   :  { %11772 = vrcp.f32 %v5040_v38  ;;  %v11536_v38 = vld [vmem:[#allocation8 + $0xf0] sm:$0xff]  }
0x28a0   :  { %v11771_v17 = vpop.eup %11770 }
0x28a1   :  { %v11773_v18 = vpop.eup %11772  ;;  %v5043_v0 = vmul.f32 %v11771_v17, %v12951_v26  ;;  %v11537_v17 = vld [vmem:[#allocation8 + $0xf8] sm:$0xff]  }
0x28a2   :  { %v5045_v19 = vmul.f32 %v11773_v18, %v12951_v26  ;;  %v11538_v18 = vld [vmem:[#allocation8 + $0x100] sm:$0xff]  }
0x28a3   :  { %v5044_v11 = vadd.f32 %v5043_v0, %v12947_v37  ;;  %v11539_v0 = vld [vmem:[#allocation8 + $0x108] sm:$0xff]  }
0x28a4   :  { %v5046_v21 = vsub.f32 %v12944_v30, %v5045_v19  ;;  %v13021_v30 = vpop.permute.xlu1 %5164 }
0x28a5   :  { %v5183_v59 = vsel %vm383_vm0, %v12900_v6, %v13021_v30 }
0x28a6   :  { %v5063_v36 = vpack.c.bf16 %v5046_v21, %v5044_v11 }
0x28a8   :  { %10648 = vmatmul.mubr.bf16.vlgmr.msra.gmra.mrb[116].mxu0 %v5063_v36  ;;  %v5173_v22 = vpop.permute.xlu1 %5172 }
0x28a9   :  { %10672 = vmatpush3.bf16.msra.mxu0 %v12965_v58  ;;  %10687 = vmatprep.mubr.msk.bf16.mxu0 %vm12015_vm1, %v12012_v25  ;;  %v5185_v41 = vsel %vm919_vm2, %v5183_v59, %v5173_v22  ;;  %v5346_v22 = vld [vmem:[#allocation10 + $0x2] ss:$8 sm:$0x7] }
0x28aa   :  { %10673 = vmatprep.subr.bf16.mxu0 %v12012_v25 }
0x28ac   :  { %v5179_v37 = vpop.permute.xlu1 %5178 }
0x28ad   :  { %10674 = vmatpush3.bf16.msra.mxu0 %v12968_v60  ;;  %v5187_v27 = vsel %vm922_vm3, %v5185_v41, %v5179_v37 }
0x28ae   :  { %10675 = vmatprep.subr.bf16.mxu0 %v12012_v25 }
0x28b1   :  { %10676 = vmatpush3.bf16.msra.mxu0 %v12972_v53 }
0x28b2   :  { %10677 = vmatprep.subr.bf16.mxu0 %v12012_v25 }
0x28b5   :  { %10678 = vmatpush3.bf16.msra.mxu0 %v12976_v54 }
0x28b6   :  { %10679 = vmatprep.subr.bf16.mxu0 %v12012_v25 }
0x28b9   :  { %10680 = vmatpush3.bf16.msra.mxu0 %v12980_v29 }
0x28ba   :  { %10681 = vmatprep.subr.bf16.mxu0 %v12012_v25 }
0x28bd   :  { %10682 = vmatpush3.bf16.msra.mxu0 %v12984_v55 }
0x28be   :  { %10683 = vmatprep.subr.bf16.mxu0 %v12012_v25 }
0x28c1   :  { %10684 = vmatpush3.bf16.msra.mxu0 %v13007_v16 }
0x28c2   :  { %10685 = vmatprep.subr.bf16.mxu0 %v12012_v25 }
0x28c5   :  { %10686 = vmatpush3.bf16.msra.mxu0 %v13013_v57 }
0x28c6   :  { %10711 = vmatprep.subr.bf16.mxu0 %v12012_v25 }
0x297b   :  { %v5153_v48 = vpop.f32.mrb[116].mxu0 }
0x297c   :  { %v5154_v43 = vadd.f32 %v5153_v48, %v5069_v40  ;;  %v10649_v26 = vpop.f32.mrb[117].mxu0  ;;  %v5355_v48 = vld [vmem:[#allocation10 + $0x3] ss:$8 sm:$0x7] }
0x297d   :  { %v5156_v62 = vpop.f32.mrb[118].mxu0  ;;  %v5360_v59 = vrot.slane %v5355_v48, %v12187_v7  ;;  %v11553_v48 = vld [vmem:[#allocation8 + $0x148] sm:$0xff]  }
0x297e   :  { %v5157_v51 = vadd.f32 %v5156_v62, %v5069_v40  ;;  %v10650_v52 = vpop.f32.mrb[119].mxu0  ;;  %v5188_v20 = vadd.f32 %v5186_v23, %v5154_v43  ;;  %v5351_v40 = vrot.slane %v5346_v22, %v12187_v7  ;;  %v11541_v23 = vld [vmem:[#allocation8 + $0x118] sm:$0xff]   ;;  %v11550_v22 = vld [vmem:[#allocation8 + $0x130] sm:$0xff]  }
0x297f   :  { %v11540_v52 = vld [vmem:[#allocation8 + $0x110] sm:$0xff]  }
0x2980   :  { %v5189_v1 = vadd.f32 %v5187_v27, %v5157_v51  ;;  %v5381_v27 = vld [vmem:[#allocation10 + $0x4] ss:$8 sm:$0x7] }
0x2982   :  { %v5206_v28 = vpack.c.bf16 %v5189_v1, %v5188_v20 }
0x2984   :  { %10668 = vmatmul.mubr.bf16.vlgmr.msra.gmra.mrb[116].mxu1 %v5206_v28 }
0x2985   :  { %10707 = vmatprep.mubr.msk.bf16.mxu1 %vm12015_vm1, %v12012_v25  ;;  %10692 = vmatpush3.bf16.msra.mxu1 %v11530_v56 }
0x2986   :  { %10693 = vmatprep.subr.bf16.mxu1 %v12012_v25 }
0x2989   :  { %10694 = vmatpush3.bf16.msra.mxu1 %v11531_v33 }
0x298a   :  { %10695 = vmatprep.subr.bf16.mxu1 %v12012_v25 }
0x298d   :  { %10696 = vmatpush3.bf16.msra.mxu1 %v11532_v12 }
0x298e   :  { %10697 = vmatprep.subr.bf16.mxu1 %v12012_v25 }
0x2991   :  { %10698 = vmatpush3.bf16.msra.mxu1 %v11533_v9  ;;  %v11549_v9 = vld [vmem:[#allocation8 + $0x128] sm:$0xff]  }
0x2992   :  { %10699 = vmatprep.subr.bf16.mxu1 %v12012_v25 }
0x2995   :  { %10700 = vmatpush3.bf16.msra.mxu1 %v11534_v61 }
0x2996   :  { %10701 = vmatprep.subr.bf16.mxu1 %v12012_v25 }
0x2999   :  { %10702 = vmatpush3.bf16.msra.mxu1 %v11535_v63 }
0x299a   :  { %10703 = vmatprep.subr.bf16.mxu1 %v12012_v25 }
0x299d   :  { %10704 = vmatpush3.bf16.msra.mxu1 %v11536_v38 }
0x299e   :  { %10705 = vmatprep.subr.bf16.mxu1 %v12012_v25 }
0x29a1   :  { %10706 = vmatpush3.bf16.msra.mxu1 %v11537_v17 }
0x29a2   :  { %10723 = vmatprep.subr.bf16.mxu1 %v12012_v25 }
0x2a57   :  { %v5289_v3 = vpop.f32.mrb[116].mxu1 }
0x2a58   :  { %v5296_v15 = vsub.f32 %v5188_v20, %v5289_v3  ;;  %v10669_v4 = vpop.f32.mrb[117].mxu1  ;;  %v5386_v20 = vrot.slane %v5381_v27, %v12187_v7 }
0x2a59   :  { %v5292_v8 = vpop.f32.mrb[118].mxu1 }
0x2a5a   :  { %v5297_v34 = vsub.f32 %v5189_v1, %v5292_v8  ;;  %v10670_v47 = vpop.f32.mrb[119].mxu1  ;;  %v5298_v39 = vmul.f32 %v5296_v15, %v5296_v15 }
0x2a5c   :  { %v5299_v42 = vmul.f32 %v5297_v34, %v5297_v34 }
0x2a5e   :  { %v5300_v10 = vpack.c.bf16 %v5299_v42, %v5298_v39 }
0x2a60   :  { %10688 = vmatmul.mubr.bf16.vlgmr.msra.gmra.mrb[120].mxu0 %v5300_v10 }
0x2a61   :  { %10719 = vmatprep.mubr.msk.bf16.mxu0 %vm12015_vm1, %v12012_v25  ;;  %10712 = vmatpush3.bf16.msra.mxu0 %v11538_v18 }
0x2a62   :  { %10713 = vmatprep.subr.bf16.mxu0 %v12012_v25 }
0x2a65   :  { %10714 = vmatpush3.bf16.msra.mxu0 %v11539_v0 }
0x2a66   :  { %10715 = vmatprep.subr.bf16.mxu0 %v12012_v25 }
0x2a69   :  { %10716 = vmatpush3.bf16.msra.mxu0 %v11540_v52 }
0x2a6a   :  { %10717 = vmatprep.subr.bf16.mxu0 %v12012_v25 }
0x2a6d   :  { %10718 = vmatpush3.bf16.msra.mxu0 %v11541_v23  ;;  %v5666_v23 = vld [vmem:[#allocation10 + $0x7] ss:$8 sm:$0x7] }
0x2a6e   :  { %10743 = vmatprep.subr.bf16.mxu0 %v12012_v25 }
0x2b33   :  { %v5335_v19 = vpop.f32.mrb[120].mxu0 }
0x2b34   :  { %v5336_v11 = vadd.f32 1e-05, %v5335_v19  ;;  %v10689_v21 = vpop.f32.mrb[121].mxu0 }
0x2b35   :  { %v5338_v36 = vpop.f32.mrb[122].mxu0  ;;  %v11542_v21 = vld [vmem:[#allocation7 + $0x90] ss:$12 sps:$4 sm:$0xff]  }
0x2b36   :  { %11774 = vrsqrt.f32 %v5336_v11  ;;  %v5339_v32 = vadd.f32 1e-05, %v5338_v36  ;;  %v10690_v31 = vpop.f32.mrb[123].mxu0 }
0x2b37   :  { %v11545_v31 = vld [vmem:[#allocation7 + $0xa8] ss:$12 sps:$4 sm:$0xff]  }
0x2b38   :  { %11776 = vrsqrt.f32 %v5339_v32  ;;  %v11547_v32 = vld [vmem:[#allocation7 + $0xac] ss:$12 sps:$4 sm:$0xff]  }
0x2b40   :  { %v11775_v45 = vpop.eup %11774 }
0x2b41   :  { %v5344_v37 = vmul.f32 %v11775_v45, %v5296_v15  ;;  %v11552_v45 = vld [vmem:[#allocation8 + $0x140] sm:$0xff]  }
0x2b42   :  { %v11777_v43 = vpop.eup %11776 }
0x2b43   :  { %v5345_v26 = vmul.f32 %v11777_v43, %v5297_v34  ;;  %v5353_v35 = vmul.f32 %v5351_v40, %v5344_v37  ;;  %v11554_v37 = vld [vmem:[#allocation8 + $0x150] sm:$0xff]  }
0x2b45   :  { %v5354_v62 = vmul.f32 %v5351_v40, %v5345_v26  ;;  %v13050_v50 = vadd.f32 %v5360_v59, %v5353_v35  ;;  %v11551_v40 = vld [vmem:[#allocation8 + $0x138] sm:$0xff]  }
0x2b47   :  { %v13052_v41 = vadd.f32 %v5360_v59, %v5354_v62 }
0x2b49   :  { %v5380_v51 = vpack.c.bf16 %v13052_v41, %v13050_v50 }
0x2b4b   :  { %10708 = vmatmul.mubr.bf16.vlgmr.msra.gmra.mrb[120].mxu1 %v5380_v51 }
0x2b4c   :  { %10724 = vmatpush3.bf16.msra.mxu1 %v12965_v58  ;;  %10739 = vmatprep.mubr.msk.bf16.mxu1 %vm12015_vm1, %v12012_v25 }
0x2b4d   :  { %10725 = vmatprep.subr.bf16.mxu1 %v12012_v25 }
0x2b50   :  { %10726 = vmatpush3.bf16.msra.mxu1 %v12968_v60 }
0x2b51   :  { %10727 = vmatprep.subr.bf16.mxu1 %v12012_v25 }
0x2b54   :  { %10728 = vmatpush3.bf16.msra.mxu1 %v12972_v53 }
0x2b55   :  { %10729 = vmatprep.subr.bf16.mxu1 %v12012_v25 }
0x2b58   :  { %10730 = vmatpush3.bf16.msra.mxu1 %v12976_v54 }
0x2b59   :  { %10731 = vmatprep.subr.bf16.mxu1 %v12012_v25 }
0x2b5c   :  { %10732 = vmatpush3.bf16.msra.mxu1 %v12980_v29 }
0x2b5d   :  { %10733 = vmatprep.subr.bf16.mxu1 %v12012_v25 }
0x2b60   :  { %10734 = vmatpush3.bf16.msra.mxu1 %v12984_v55 }
0x2b61   :  { %10735 = vmatprep.subr.bf16.mxu1 %v12012_v25 }
0x2b64   :  { %10736 = vmatpush3.bf16.msra.mxu1 %v13007_v16 }
0x2b65   :  { %10737 = vmatprep.subr.bf16.mxu1 %v12012_v25 }
0x2b68   :  { %10738 = vmatpush3.bf16.msra.mxu1 %v13013_v57 }
0x2b69   :  { %10763 = vmatprep.subr.bf16.mxu1 %v12012_v25 }
0x2c1e   :  { %v5470_v1 = vpop.f32.mrb[120].mxu1 }
0x2c1f   :  { %v5471_v28 = vadd.f32 %v5470_v1, %v5386_v20  ;;  %v10709_v56 = vpop.f32.mrb[121].mxu1 }
0x2c20   :  { %v5473_v33 = vpop.f32.mrb[122].mxu1  ;;  %v5671_v56 = vrot.slane %v5666_v23, %v12187_v7 }
0x2c21   :  { %v5474_v3 = vadd.f32 %v5473_v33, %v5386_v20  ;;  %v10710_v15 = vpop.f32.mrb[123].mxu1  ;;  %v5477_v4 = vmax.f32 %v5471_v28, 0.0 }
0x2c23   :  { %v5478_v8 = vmax.f32 %v5474_v3, 0.0 }
0x2c25   :  { %v5487_v34 = vpack.c.bf16 %v5478_v8, %v5477_v4  ;;  %v11556_v8 = vld [vmem:[#allocation7 + $0x60] ss:$12 sps:$4 sm:$0xff]  }
0x2c27   :  { %10720 = vmatmul.mubr.msk.bf16.vlgmr.msra.gmra.mrb[124].mxu0 %vm919_vm2, %v5487_v34  ;;  %v11558_v34 = vld [vmem:[#allocation7 + $0x64] ss:$12 sps:$4 sm:$0xff]  }
0x2c28   :  { %10744 = vmatpush3.bf16.msra.mxu0 %v12965_v58  ;;  %10759 = vmatprep.mubr.msk.bf16.mxu0 %vm12015_vm1, %v12012_v25  ;;  %v5488_v58 = vld [vmem:[#allocation10 + $0x5] ss:$8 sm:$0x7] }
0x2c29   :  { %10745 = vmatprep.subr.bf16.mxu0 %v12012_v25 }
0x2c2c   :  { %10746 = vmatpush3.bf16.msra.mxu0 %v12968_v60  ;;  %v5493_v60 = vrot.slane %v5488_v58, %v12187_v7  ;;  %v11561_v58 = vld [vmem:[#allocation7 + $0x7c] ss:$12 sps:$4 sm:$0xff]  }
0x2c2d   :  { %10747 = vmatprep.subr.bf16.mxu0 %v12012_v25 }
0x2c30   :  { %10748 = vmatpush3.bf16.msra.mxu0 %v12972_v53 }
0x2c31   :  { %10749 = vmatprep.subr.bf16.mxu0 %v12012_v25 }
0x2c34   :  { %10750 = vmatpush3.bf16.msra.mxu0 %v12976_v54 }
0x2c35   :  { %10751 = vmatprep.subr.bf16.mxu0 %v12012_v25 }
0x2c38   :  { %10752 = vmatpush3.bf16.msra.mxu0 %v12980_v29 }
0x2c39   :  { %10753 = vmatprep.subr.bf16.mxu0 %v12012_v25 }
0x2c3c   :  { %10754 = vmatpush3.bf16.msra.mxu0 %v12984_v55 }
0x2c3d   :  { %10755 = vmatprep.subr.bf16.mxu0 %v12012_v25 }
0x2c40   :  { %10756 = vmatpush3.bf16.msra.mxu0 %v13007_v16  ;;  %v11544_v16 = vld [vmem:[#allocation7 + $0x94] ss:$12 sps:$4 sm:$0xff]  }
0x2c41   :  { %10757 = vmatprep.subr.bf16.mxu0 %v12012_v25 }
0x2c44   :  { %10758 = vmatpush3.bf16.msra.mxu0 %v13013_v57  ;;  %v11548_v57 = vld [vmem:[#allocation8 + $0x120] sm:$0xff]  }
0x2c45   :  { %5837 = vmatprep.subr.bf16.mxu0 %v11544_v16 }
0x2cfa   :  { %v5556_v53 = vpop.f32.mrb[124].mxu0 }
0x2cfb   :  { %v5557_v54 = vadd.f32 %v5556_v53, %v5493_v60  ;;  %v10721_v47 = vpop.f32.mrb[125].mxu0  ;;  %v5692_v53 = vld [vmem:[#allocation10 + $0x18] ss:$8 sm:$0x7] }
0x2cfc   :  { %v5559_v39 = vpop.f32.mrb[126].mxu0 }
0x2cfd   :  { %v5560_v29 = vadd.f32 %v5559_v39, %v5493_v60  ;;  %v10722_v42 = vpop.f32.mrb[127].mxu0  ;;  %v5563_v10 = vadd.f32 %v5557_v54, %v13050_v50  ;;  %v11559_v60 = vld [vmem:[#allocation7 + $0x78] ss:$12 sps:$4 sm:$0xff]   ;;  %v5697_v54 = vrot.slane %v5692_v53, %v12187_v7 }
0x2cff   :  { %v5564_v55 = vadd.f32 %v5560_v29, %v13052_v41  ;;  %v5657_v41 = vld [vmem:[#allocation10 + $0x6] ss:$8 sm:$0x7] }
0x2d00   :  { %v5662_v51 = vrot.slane %v5657_v41, %v12187_v7 }
0x2d01   :  { %v5565_v12 = vpack.c.bf16 %v5564_v55, %v5563_v10 }
0x2d03   :  { %10740 = vmatmul.mubr.bf16.vlgmr.msra.gmra.mrb[124].mxu1 %v5565_v12 }
0x2d04   :  { %10779 = vmatprep.mubr.msk.bf16.mxu1 %vm12015_vm1, %v12012_v25  ;;  %10764 = vmatpush3.bf16.msra.mxu1 %v11548_v57 }
0x2d05   :  { %10765 = vmatprep.subr.bf16.mxu1 %v12012_v25 }
0x2d08   :  { %10766 = vmatpush3.bf16.msra.mxu1 %v11549_v9 }
0x2d09   :  { %10767 = vmatprep.subr.bf16.mxu1 %v12012_v25 }
0x2d0c   :  { %10768 = vmatpush3.bf16.msra.mxu1 %v11550_v22  ;;  %v11564_v22 = vld [vmem:[#allocation8 + $0x260] sm:$0xff]  }
0x2d0d   :  { %10769 = vmatprep.subr.bf16.mxu1 %v12012_v25 }
0x2d10   :  { %10770 = vmatpush3.bf16.msra.mxu1 %v11551_v40  ;;  %v11565_v40 = vld [vmem:[#allocation8 + $0x268] sm:$0xff]  }
0x2d11   :  { %10771 = vmatprep.subr.bf16.mxu1 %v12012_v25 }
0x2d14   :  { %10772 = vmatpush3.bf16.msra.mxu1 %v11552_v45  ;;  %v5949_v45 = vld [vmem:[#allocation10 + $0x19] ss:$8 sm:$0x7] }
0x2d15   :  { %10773 = vmatprep.subr.bf16.mxu1 %v12012_v25 }
0x2d18   :  { %10774 = vmatpush3.bf16.msra.mxu1 %v11553_v48  ;;  %v5958_v48 = vrot.slane %v5949_v45, %v12185_v5 }
0x2d19   :  { %10775 = vmatprep.subr.bf16.mxu1 %v12012_v25 }
0x2d1c   :  { %10776 = vmatpush3.bf16.msra.mxu1 %v11554_v37  ;;  %v5954_v37 = vrot.slane %v5949_v45, %v12187_v7 }
0x2d1d   :  { %10777 = vmatprep.subr.bf16.mxu1 %v12012_v25 }
0x2dd6   :  { %v5600_v61 = vpop.f32.mrb[124].mxu1 }
0x2dd7   :  { %v5607_v63 = vsub.f32 %v5563_v10, %v5600_v61  ;;  %v10741_v38 = vpop.f32.mrb[125].mxu1 }
0x2dd8   :  { %v5603_v17 = vpop.f32.mrb[126].mxu1 }
0x2dd9   :  { %v5608_v18 = vsub.f32 %v5564_v55, %v5603_v17  ;;  %v10742_v0 = vpop.f32.mrb[127].mxu1  ;;  %v5609_v19 = vmul.f32 %v5607_v63, %v5607_v63 }
0x2dda   :  { %v5803_v0 = vpop.permute.xlu1 %5802 }
0x2ddb   :  { %v5610_v11 = vmul.f32 %v5608_v18, %v5608_v18 }
0x2ddd   :  { %v5611_v36 = vpack.c.bf16 %v5610_v11, %v5609_v19 }
0x2ddf   :  { %10760 = vmatmul.mubr.bf16.vlgmr.msra.gmra.mrb[128].mxu0 %v5611_v36 }
0x2de0   :  { %5838 = vmatpush1.bf16.msra.mxu0 %v11542_v21  ;;  %5869 = vmatprep.mubr.bf16.mxu0 %v12011_v24 }
0x2de1   :  { %5839 = vmatprep.subr.bf16.mxu0 %v11547_v32  ;;  %v11562_v32 = vld [vmem:[#allocation8 + $0x250] sm:$0xff]  }
0x2de4   :  { %5840 = vmatpush1.bf16.msra.mxu0 %v11545_v31  ;;  %v11563_v31 = vld [vmem:[#allocation8 + $0x258] sm:$0xff]  }
0x2de5   :  { %5906 = vmatprep.subr.bf16.mxu0 %v11558_v34 }
0x2de7   :  { %9178 = vmatmul.mubr.msk.bf16.vlgmr.msra.gmra.mrb[132].mxu0 %vm383_vm0, %v12862_v44  ;;  %v11555_v44 = vld [vmem:[#allocation8 + $0x158] sm:$0xff]  }
0x2de8   :  { %5938 = vmatprep.mubr.bf16.mxu0 %v12011_v24  ;;  %10778 = vmatpush3.bf16.msra.mxu1 %v11555_v44 }
0x2de9   :  { %10795 = vmatprep.subr.bf16.mxu1 %v12012_v25  ;;  %5907 = vmatpush1.bf16.msra.mxu0 %v11556_v8  ;;  %v13161_v8 = vld [vmem:[#allocation8 + $0x278] sm:$0xff]  }
0x2dea   :  { %5908 = vmatprep.subr.bf16.mxu0 %v11561_v58 }
0x2ded   :  { %5909 = vmatpush1.bf16.msra.mxu0 %v11559_v60 }
0x2dee   :  { %10783 = vmatprep.subr.bf16.mxu0 %v12012_v25 }
0x2eb2   :  { %v5646_v43 = vpop.f32.mrb[128].mxu0 }
0x2eb3   :  { %v5647_v26 = vadd.f32 1e-05, %v5646_v43  ;;  %v10761_v35 = vpop.f32.mrb[129].mxu0 }
0x2eb4   :  { %v5649_v59 = vpop.f32.mrb[130].mxu0 }
0x2eb5   :  { %11778 = vrsqrt.f32 %v5647_v26  ;;  %v5650_v62 = vadd.f32 1e-05, %v5649_v59  ;;  %v10762_v50 = vpop.f32.mrb[131].mxu0 }
0x2eb7   :  { %11780 = vrsqrt.f32 %v5650_v62 }
0x2ebf   :  { %v11779_v52 = vpop.eup %11778 }
0x2ec0   :  { %v5655_v27 = vmul.f32 %v11779_v52, %v5607_v63 }
0x2ec1   :  { %v11781_v20 = vpop.eup %11780 }
0x2ec2   :  { %v5656_v1 = vmul.f32 %v11781_v20, %v5608_v18  ;;  %v5664_v28 = vmul.f32 %v5662_v51, %v5655_v27  ;;  %v5801_v18 = vpop.permute.xlu0 %5800 }
0x2ec4   :  { %v5665_v33 = vmul.f32 %v5662_v51, %v5656_v1  ;;  %v5673_v3 = vadd.f32 %v5671_v56, %v5664_v28 }
0x2ec6   :  { %v5674_v15 = vadd.f32 %v5671_v56, %v5665_v33  ;;  %v11566_v56 = vld [vmem:[#allocation8 + $0x160] sm:$0xff]   ;;  %v11567_v33 = vld [vmem:[#allocation8 + $0x168] sm:$0xff]  }
0x2ec8   :  { %v5691_v4 = vpack.c.bf16 %v5674_v15, %v5673_v3  ;;  %v11568_v3 = vld [vmem:[#allocation8 + $0x170] sm:$0xff]   ;;  %v11569_v15 = vld [vmem:[#allocation8 + $0x178] sm:$0xff]  }
0x2eca   :  { %10780 = vmatmul.mubr.bf16.vlgmr.msra.gmra.mrb[128].mxu1 %v5691_v4  ;;  %v13158_v4 = vld [vmem:[#allocation8 + $0x270] sm:$0xff]  }
0x2ecb   :  { %10803 = vmatprep.mubr.msk.bf16.mxu1 %vm12015_vm1, %v12012_v25  ;;  %10796 = vmatpush3.bf16.msra.mxu1 %v11562_v32 }
0x2ecc   :  { %10797 = vmatprep.subr.bf16.mxu1 %v12012_v25 }
0x2ecf   :  { %10798 = vmatpush3.bf16.msra.mxu1 %v11563_v31 }
0x2ed0   :  { %10799 = vmatprep.subr.bf16.mxu1 %v12012_v25 }
0x2ed3   :  { %10800 = vmatpush3.bf16.msra.mxu1 %v11564_v22 }
0x2ed4   :  { %10801 = vmatprep.subr.bf16.mxu1 %v12012_v25 }
0x2ed7   :  { %10802 = vmatpush3.bf16.msra.mxu1 %v11565_v40 }
0x2ed8   :  { %10819 = vmatprep.subr.bf16.mxu1 %v12012_v25 }
0x2f9d   :  { %v5781_v47 = vpop.f32.mrb[128].mxu1 }
0x2f9e   :  { %v5782_v39 = vadd.f32 %v5781_v47, %v5697_v54  ;;  %v10781_v29 = vpop.f32.mrb[129].mxu1 }
0x2f9f   :  { %v5784_v42 = vpop.f32.mrb[130].mxu1 }
0x2fa0   :  { %v9172_v10 = vmul.f32 -1.442695, %v5782_v39  ;;  %v5785_v55 = vadd.f32 %v5784_v42, %v5697_v54  ;;  %v10782_v12 = vpop.f32.mrb[131].mxu1 }
0x2fa2   :  { %11782 = vpow2.f32 %v9172_v10  ;;  %v9173_v16 = vmul.f32 -1.442695, %v5785_v55 }
0x2fa4   :  { %11784 = vpow2.f32 %v9173_v16 }
0x2fac   :  { %v11783_v57 = vpop.eup %11782 }
0x2fad   :  { %v5794_v9 = vadd.f32 1.0, %v11783_v57 }
0x2fae   :  { %v11785_v61 = vpop.eup %11784 }
0x2faf   :  { %11786 = vrcp.f32 %v5794_v9  ;;  %v5795_v63 = vadd.f32 1.0, %v11785_v61 }
0x2fb1   :  { %11788 = vrcp.f32 %v5795_v63 }
0x2fb9   :  { %v13118_v38 = vpop.eup %11786 }
0x2fba   :  { %v5806_v19 = vmul.f32 %v13118_v38, %v5801_v18 }
0x2fbb   :  { %v13120_v17 = vpop.eup %11788 }
0x2fbc   :  { %v5807_v11 = vmul.f32 %v13120_v17, %v5803_v0 }
0x2fbe   :  { %v5812_v21 = vpack.c.bf16 %v5807_v11, %v5806_v19 }
0x2fc0   :  { %5881 = vrot.lane.b32.xlu0 %v5812_v21, %s12014_s10 }
0x2fc4   :  { %6197 = vrot.lane.b32.xlu0 %v5806_v19, %s12014_s10 }
0x2fc8   :  { %7286 = vrot.lane.b32.xlu0 %v12210_v46, %s12013_s4 }
0x3032   :  { %v5882_v36 = vpop.permute.xlu0 %5881 }
0x3033   :  { %9183 = vmatmul.mubr.msk.bf16.vlgmr.msra.gmra.mrb[132].mxu0 %vm383_vm0, %v5882_v36 }
0x3034   :  { %10791 = vmatprep.mubr.msk.bf16.mxu0 %vm12015_vm1, %v12012_v25  ;;  %10784 = vmatpush3.bf16.msra.mxu0 %v11562_v32  ;;  %v13174_v32 = vld [vmem:[#allocation8 + $0x280] sm:$0xff]  }
0x3035   :  { %10785 = vmatprep.subr.bf16.mxu0 %v12012_v25 }
0x3036   :  { %v6198_v45 = vpop.permute.xlu0 %6197 }
0x3038   :  { %10786 = vmatpush3.bf16.msra.mxu0 %v11563_v31  ;;  %v13180_v31 = vld [vmem:[#allocation8 + $0x288] sm:$0xff]  }
0x3039   :  { %10787 = vmatprep.subr.bf16.mxu0 %v12012_v25 }
0x303c   :  { %10788 = vmatpush3.bf16.msra.mxu0 %v11564_v22  ;;  %v6120_v22 = vld [vmem:[#allocation10 + $0x1a] ss:$8 sm:$0x7] }
0x303d   :  { %10789 = vmatprep.subr.bf16.mxu0 %v12012_v25 }
0x3040   :  { %10790 = vmatpush3.bf16.msra.mxu0 %v11565_v40  ;;  %v6125_v40 = vrot.slane %v6120_v22, %v12187_v7  ;;  %v6364_v22 = vld [vmem:[#allocation10 + $0x1d] ss:$8 sm:$0x7] }
0x3041   :  { %10807 = vmatprep.subr.bf16.mxu0 %v12012_v25 }
0x3106   :  { %v5940_v44 = vpop.f32.mrb[132].mxu0 }
0x3107   :  { %v5942_v43 = vpop.f32.mrb[133].mxu0  ;;  %v5961_v59 = vadd.f32 %v5954_v37, %v5940_v44 }
0x3108   :  { %v13141_v26 = vadd.f32 %v5958_v48, %v5942_v43  ;;  %v5944_v35 = vpop.f32.mrb[134].mxu0 }
0x3109   :  { %v5963_v62 = vadd.f32 %v5954_v37, %v5944_v35  ;;  %v5946_v50 = vpop.f32.mrb[135].mxu0 }
0x310a   :  { %v5964_v41 = vadd.f32 %v5958_v48, %v5946_v50 }
0x310b   :  { %v5965_v51 = vsub.f32 %v5961_v59, %v5963_v62 }
0x310c   :  { %v5966_v52 = vsub.f32 %v13141_v26, %v5964_v41 }
0x310d   :  { %5976 = vrot.lane.b32.xlu1 %v5965_v51, %s12002_s1 }
0x3111   :  { %6199 = vrot.lane.b32.xlu1 %v5807_v11, %s12014_s10 }
0x3115   :  { %7288 = vrot.lane.b32.xlu1 %v12212_v49, %s12013_s4 }
0x317f   :  { %v5977_v23 = vpop.permute.xlu1 %5976 }
0x3180   :  { %v5979_v27 = vmul.f32 %v5977_v23, %v5961_v59  ;;  %v6055_v20 = vmul.f32 %v5977_v23, %v5963_v62  ;;  %v6203_v62 = vsel %vm383_vm0, %v6198_v45, %v13019_v2 }
0x3182   :  { %v5980_v1 = vpack.c.bf16 %v5979_v27, %v5979_v27  ;;  %v6056_v28 = vpack.c.bf16 %v6055_v20, %v6055_v20 }
0x3183   :  { %v6200_v37 = vpop.permute.xlu1 %6199 }
0x3184   :  { %10792 = vmatmul.mubr.msk.bf16.vlgmr.msra.gmra.mrb[136].mxu0 %vm919_vm2, %v5980_v1  ;;  %10804 = vmatmul.mubr.msk.bf16.vlgmr.msra.gmra.mrb[132].mxu1 %vm919_vm2, %v6056_v28  ;;  %v6204_v50 = vsel %vm383_vm0, %v6200_v37, %v13021_v30  ;;  %v11574_v30 = vld [vmem:[#allocation8 + $0x180] sm:$0xff]  }
0x3185   :  { %10815 = vmatprep.mubr.msk.bf16.mxu0 %vm12015_vm1, %v12012_v25  ;;  %10827 = vmatprep.mubr.msk.bf16.mxu1 %vm12015_vm1, %v12012_v25 }
0x3186   :  { %10808 = vmatpush3.bf16.msra.mxu0 %v11566_v56  ;;  %10820 = vmatpush3.bf16.msra.mxu1 %v13158_v4 }
0x3187   :  { %10809 = vmatprep.subr.bf16.mxu0 %v12012_v25  ;;  %10821 = vmatprep.subr.bf16.mxu1 %v12012_v25 }
0x318a   :  { %10810 = vmatpush3.bf16.msra.mxu0 %v11567_v33  ;;  %10822 = vmatpush3.bf16.msra.mxu1 %v13161_v8 }
0x318b   :  { %10811 = vmatprep.subr.bf16.mxu0 %v12012_v25  ;;  %10823 = vmatprep.subr.bf16.mxu1 %v12012_v25 }
0x318e   :  { %10812 = vmatpush3.bf16.msra.mxu0 %v11568_v3  ;;  %10824 = vmatpush3.bf16.msra.mxu1 %v13174_v32 }
0x318f   :  { %10813 = vmatprep.subr.bf16.mxu0 %v12012_v25  ;;  %10825 = vmatprep.subr.bf16.mxu1 %v12012_v25 }
0x3192   :  { %10814 = vmatpush3.bf16.msra.mxu0 %v11569_v15  ;;  %10826 = vmatpush3.bf16.msra.mxu1 %v13180_v31  ;;  %v11575_v15 = vld [vmem:[#allocation8 + $0x188] sm:$0xff]  }
0x3193   :  { %10831 = vmatprep.subr.bf16.mxu0 %v12012_v25  ;;  %10843 = vmatprep.subr.bf16.mxu1 %v12012_v25 }
0x3257   :  { %v6042_v34 = vpop.f32.mrb[136].mxu0  ;;  %v6094_v58 = vpop.f32.mrb[132].mxu1 }
0x3258   :  { %v9189_v60 = vmul.f32 -0.25, %v6042_v34  ;;  %v9191_v53 = vmul.f32 0.25, %v6094_v58  ;;  %v10793_v54 = vpop.f32.mrb[137].mxu0  ;;  %v10805_v47 = vpop.f32.mrb[133].mxu1  ;;  %v11576_v34 = vld [vmem:[#allocation8 + $0x190] sm:$0xff]   ;;  %v11577_v58 = vld [vmem:[#allocation8 + $0x198] sm:$0xff]  }
0x3259   :  { %v6045_v39 = vpop.f32.mrb[138].mxu0  ;;  %v6097_v29 = vpop.f32.mrb[134].mxu1 }
0x325a   :  { %v6050_v42 = vmul.f32 1.442695, %v9189_v60  ;;  %v6102_v10 = vmul.f32 1.442695, %v9191_v53  ;;  %v10794_v55 = vpop.f32.mrb[139].mxu0  ;;  %v10806_v12 = vpop.f32.mrb[135].mxu1 }
0x325b   :  { %v6346_v12 = vld [vmem:[#allocation10 + $0x1c] ss:$8 sm:$0x7] }
0x325c   :  { %11790 = vpow2.f32 %v6050_v42  ;;  %v6337_v42 = vld [vmem:[#allocation10 + $0x1b] ss:$8 sm:$0x7] }
0x325d   :  { %11792 = vpow2.f32 %v6102_v10  ;;  %v6342_v10 = vrot.slane %v6337_v42, %v12187_v7  ;;  %v11588_v42 = vld [vmem:[#allocation8 + $0x1b0] sm:$0xff]  }
0x3266   :  { %v11791_v16 = vpop.eup %11790 }
0x3267   :  { %v11793_v57 = vpop.eup %11792  ;;  %v6052_v9 = vadd.f32 1.0, %v11791_v16 }
0x3268   :  { %v6104_v61 = vadd.f32 1.0, %v11793_v57 }
0x3269   :  { %11794 = vrcp.f32 %v6052_v9 }
0x326a   :  { %11796 = vrcp.f32 %v6104_v61 }
0x3273   :  { %v11795_v63 = vpop.eup %11794 }
0x3274   :  { %v11797_v18 = vpop.eup %11796  ;;  %v6107_v0 = vmul.f32 %v11795_v63, %v5966_v52  ;;  %v6351_v63 = vrot.slane %v6346_v12, %v12187_v7  ;;  %v11591_v12 = vld [vmem:[#allocation8 + $0x1c8] sm:$0xff]  }
0x3275   :  { %v6109_v19 = vmul.f32 %v11797_v18, %v5966_v52 }
0x3276   :  { %v6108_v11 = vadd.f32 %v6107_v0, %v5964_v41 }
0x3277   :  { %v6110_v21 = vsub.f32 %v13141_v26, %v6109_v19 }
0x3279   :  { %v6119_v36 = vpack.c.bf16 %v6110_v21, %v6108_v11  ;;  %v11578_v21 = vld [vmem:[#allocation8 + $0x1a0] sm:$0xff]  }
0x327b   :  { %10816 = vmatmul.mubr.msk.bf16.vlgmr.msra.gmra.mrb[140].mxu0 %vm919_vm2, %v6119_v36  ;;  %v11579_v36 = vld [vmem:[#allocation8 + $0x1a8] sm:$0xff]  }
0x327c   :  { %10832 = vmatpush3.bf16.msra.mxu0 %v13158_v4  ;;  %10839 = vmatprep.mubr.msk.bf16.mxu0 %vm12015_vm1, %v12012_v25 }
0x327d   :  { %10833 = vmatprep.subr.bf16.mxu0 %v12012_v25 }
0x3280   :  { %10834 = vmatpush3.bf16.msra.mxu0 %v13161_v8 }
0x3281   :  { %10835 = vmatprep.subr.bf16.mxu0 %v12012_v25 }
0x3284   :  { %10836 = vmatpush3.bf16.msra.mxu0 %v13174_v32 }
0x3285   :  { %10837 = vmatprep.subr.bf16.mxu0 %v12012_v25 }
0x3288   :  { %10838 = vmatpush3.bf16.msra.mxu0 %v13180_v31 }
0x3289   :  { %10855 = vmatprep.subr.bf16.mxu0 %v12012_v25 }
0x334e   :  { %v6188_v48 = vpop.f32.mrb[140].mxu0 }
0x334f   :  { %v6189_v44 = vadd.f32 %v6188_v48, %v6125_v40  ;;  %v10817_v43 = vpop.f32.mrb[141].mxu0 }
0x3350   :  { %v6191_v26 = vpop.f32.mrb[142].mxu0 }
0x3351   :  { %v6192_v35 = vadd.f32 %v6191_v26, %v6125_v40  ;;  %v10818_v59 = vpop.f32.mrb[143].mxu0  ;;  %v6205_v41 = vadd.f32 %v6203_v62, %v6189_v44  ;;  %v6369_v40 = vrot.slane %v6364_v22, %v12187_v7 }
0x3353   :  { %v6206_v51 = vadd.f32 %v6204_v50, %v6192_v35  ;;  %v6446_v50 = vld [vmem:[#allocation10 + $0x1e] ss:$8 sm:$0x7] }
0x3355   :  { %v6215_v52 = vpack.c.bf16 %v6206_v51, %v6205_v41 }
0x3357   :  { %10828 = vmatmul.mubr.msk.bf16.vlgmr.msra.gmra.mrb[136].mxu1 %vm919_vm2, %v6215_v52 }
0x3358   :  { %10851 = vmatprep.mubr.msk.bf16.mxu1 %vm12015_vm1, %v12012_v25  ;;  %10844 = vmatpush3.bf16.msra.mxu1 %v11574_v30 }
0x3359   :  { %10845 = vmatprep.subr.bf16.mxu1 %v12012_v25 }
0x335c   :  { %10846 = vmatpush3.bf16.msra.mxu1 %v11575_v15 }
0x335d   :  { %10847 = vmatprep.subr.bf16.mxu1 %v12012_v25 }
0x3360   :  { %10848 = vmatpush3.bf16.msra.mxu1 %v11576_v34 }
0x3361   :  { %10849 = vmatprep.subr.bf16.mxu1 %v12012_v25 }
0x3364   :  { %10850 = vmatpush3.bf16.msra.mxu1 %v11577_v58  ;;  %v11580_v58 = vld [vmem:[#allocation7 + $0x30] ss:$12 sps:$4 sm:$0xff]  }
0x3365   :  { %10863 = vmatprep.subr.bf16.mxu1 %v12012_v25 }
0x342a   :  { %v6277_v23 = vpop.f32.mrb[136].mxu1 }
0x342b   :  { %v6284_v27 = vsub.f32 %v6205_v41, %v6277_v23  ;;  %v10829_v20 = vpop.f32.mrb[137].mxu1  ;;  %v6451_v41 = vrot.slane %v6446_v50, %v12187_v7 }
0x342c   :  { %v6280_v1 = vpop.f32.mrb[138].mxu1 }
0x342d   :  { %v6285_v28 = vsub.f32 %v6206_v51, %v6280_v1  ;;  %v10830_v56 = vpop.f32.mrb[139].mxu1  ;;  %v6286_v33 = vmul.f32 %v6284_v27, %v6284_v27 }
0x342f   :  { %v6287_v3 = vmul.f32 %v6285_v28, %v6285_v28 }
0x3431   :  { %v6288_v2 = vpack.c.bf16 %v6287_v3, %v6286_v33 }
0x3433   :  { %10840 = vmatmul.mubr.msk.bf16.vlgmr.msra.gmra.mrb[144].mxu0 %vm919_vm2, %v6288_v2 }
0x3434   :  { %10859 = vmatprep.mubr.msk.bf16.mxu0 %vm12015_vm1, %v12012_v25  ;;  %10856 = vmatpush3.bf16.msra.mxu0 %v11578_v21  ;;  %v6618_v21 = vld [vmem:[#allocation10 + $0x30] ss:$8 sm:$0x7] }
0x3435   :  { %10857 = vmatprep.subr.bf16.mxu0 %v12012_v25 }
0x3438   :  { %10858 = vmatpush3.bf16.msra.mxu0 %v11579_v36 }
0x3439   :  { %10875 = vmatprep.subr.bf16.mxu0 %v12012_v25 }
0x3506   :  { %v6326_v60 = vpop.f32.mrb[144].mxu0 }
0x3507   :  { %v6327_v53 = vadd.f32 1e-05, %v6326_v60  ;;  %v10841_v54 = vpop.f32.mrb[145].mxu0 }
0x3508   :  { %v6329_v47 = vpop.f32.mrb[146].mxu0  ;;  %v11583_v54 = vld [vmem:[#allocation7 + $0x48] ss:$12 sps:$4 sm:$0xff]  }
0x3509   :  { %11798 = vrsqrt.f32 %v6327_v53  ;;  %v6330_v39 = vadd.f32 1e-05, %v6329_v47  ;;  %v10842_v29 = vpop.f32.mrb[147].mxu0  ;;  %v11585_v53 = vld [vmem:[#allocation7 + $0x4c] ss:$12 sps:$4 sm:$0xff]  }
0x350a   :  { %v11586_v47 = vld [vmem:[#allocation7 + $0x38] ss:$12 sps:$4 sm:$0xff]   ;;  %v11587_v29 = vld [vmem:[#allocation7 + $0x50] ss:$12 sps:$4 sm:$0xff]  }
0x350b   :  { %11800 = vrsqrt.f32 %v6330_v39  ;;  %v13235_v39 = vpack.c.bf16 %v12212_v49, %v12210_v46 }
0x3513   :  { %v11799_v55 = vpop.eup %11798 }
0x3514   :  { %v6335_v16 = vmul.f32 %v11799_v55, %v6284_v27  ;;  %v11590_v55 = vld [vmem:[#allocation8 + $0x1c0] sm:$0xff]  }
0x3515   :  { %v11801_v57 = vpop.eup %11800 }
0x3516   :  { %v6344_v9 = vmul.f32 %v6342_v10, %v6335_v16  ;;  %v6336_v61 = vmul.f32 %v11801_v57, %v6285_v28 }
0x3518   :  { %v6345_v18 = vmul.f32 %v6342_v10, %v6336_v61  ;;  %v6353_v0 = vadd.f32 %v6351_v63, %v6344_v9  ;;  %v11589_v10 = vld [vmem:[#allocation8 + $0x1b8] sm:$0xff]  }
0x351a   :  { %v6354_v19 = vadd.f32 %v6351_v63, %v6345_v18 }
0x351c   :  { %v6363_v11 = vpack.c.bf16 %v6354_v19, %v6353_v0 }
0x351e   :  { %10852 = vmatmul.mubr.msk.bf16.vlgmr.msra.gmra.mrb[140].mxu1 %vm919_vm2, %v6363_v11 }
0x351f   :  { %10864 = vmatpush3.bf16.msra.mxu1 %v13158_v4  ;;  %10871 = vmatprep.mubr.msk.bf16.mxu1 %vm12015_vm1, %v12012_v25 }
0x3520   :  { %10865 = vmatprep.subr.bf16.mxu1 %v12012_v25 }
0x3523   :  { %10866 = vmatpush3.bf16.msra.mxu1 %v13161_v8 }
0x3524   :  { %10867 = vmatprep.subr.bf16.mxu1 %v12012_v25 }
0x3527   :  { %10868 = vmatpush3.bf16.msra.mxu1 %v13174_v32 }
0x3528   :  { %10869 = vmatprep.subr.bf16.mxu1 %v12012_v25 }
0x352b   :  { %10870 = vmatpush3.bf16.msra.mxu1 %v13180_v31 }
0x352c   :  { %10887 = vmatprep.subr.bf16.mxu1 %v12012_v25 }
0x35f1   :  { %v6432_v45 = vpop.f32.mrb[140].mxu1 }
0x35f2   :  { %v6433_v48 = vadd.f32 %v6432_v45, %v6369_v40  ;;  %v10853_v37 = vpop.f32.mrb[141].mxu1 }
0x35f3   :  { %v6435_v44 = vpop.f32.mrb[142].mxu1  ;;  %v6623_v37 = vrot.slane %v6618_v21, %v12187_v7 }
0x35f4   :  { %v6436_v43 = vadd.f32 %v6435_v44, %v6369_v40  ;;  %v10854_v26 = vpop.f32.mrb[143].mxu1  ;;  %v6439_v35 = vmax.f32 %v6433_v48, 0.0 }
0x35f6   :  { %v6440_v59 = vmax.f32 %v6436_v43, 0.0 }
0x35f8   :  { %v6445_v62 = vpack.c.bf16 %v6440_v59, %v6439_v35 }
0x35fa   :  { %10860 = vmatmul.mubr.msk.bf16.vlgmr.msra.gmra.mrb[148].mxu0 %vm383_vm0, %v6445_v62 }
0x35fb   :  { %10876 = vmatpush3.bf16.msra.mxu0 %v13158_v4  ;;  %10883 = vmatprep.mubr.msk.bf16.mxu0 %vm12015_vm1, %v12012_v25 }
0x35fc   :  { %10877 = vmatprep.subr.bf16.mxu0 %v12012_v25 }
0x35ff   :  { %10878 = vmatpush3.bf16.msra.mxu0 %v13161_v8 }
0x3600   :  { %10879 = vmatprep.subr.bf16.mxu0 %v12012_v25 }
0x3603   :  { %10880 = vmatpush3.bf16.msra.mxu0 %v13174_v32  ;;  %v11582_v32 = vld [vmem:[#allocation7 + $0x34] ss:$12 sps:$4 sm:$0xff]  }
0x3604   :  { %10881 = vmatprep.subr.bf16.mxu0 %v12012_v25 }
0x3607   :  { %10882 = vmatpush3.bf16.msra.mxu0 %v13180_v31 }
0x3608   :  { %6777 = vmatprep.subr.bf16.mxu0 %v11582_v32 }
0x36cd   :  { %v6502_v51 = vpop.f32.mrb[148].mxu0 }
0x36ce   :  { %v6503_v4 = vadd.f32 %v6502_v51, %v6451_v41  ;;  %v10861_v52 = vpop.f32.mrb[149].mxu0  ;;  %v11592_v51 = vld [vmem:[#allocation7] ss:$12 sps:$4 sm:$0xff]  }
0x36cf   :  { %v6505_v23 = vpop.f32.mrb[150].mxu0  ;;  %v11598_v52 = vld [vmem:[#allocation7 + $0x1c] ss:$12 sps:$4 sm:$0xff]  }
0x36d0   :  { %v6506_v27 = vadd.f32 %v6505_v23, %v6451_v41  ;;  %v10862_v20 = vpop.f32.mrb[151].mxu0  ;;  %v6509_v1 = vadd.f32 %v6503_v4, %v6353_v0  ;;  %v6609_v0 = vld [vmem:[#allocation10 + $0x1f] ss:$8 sm:$0x7]  ;;  %v11594_v41 = vld [vmem:[#allocation7 + $0x4] ss:$12 sps:$4 sm:$0xff]  }
0x36d1   :  { %v11595_v4 = vld [vmem:[#allocation7 + $0x8] ss:$12 sps:$4 sm:$0xff]   ;;  %v11596_v23 = vld [vmem:[#allocation7 + $0x18] ss:$12 sps:$4 sm:$0xff]  }
0x36d2   :  { %v6510_v28 = vadd.f32 %v6506_v27, %v6354_v19  ;;  %v6614_v19 = vrot.slane %v6609_v0, %v12187_v7  ;;  %v11599_v27 = vld [vmem:[#allocation7 + $0x20] ss:$12 sps:$4 sm:$0xff]  }
0x36d3   :  { %v6636_v20 = vld [vmem:[#allocation10 + $0x31] ss:$8 sm:$0x7] }
0x36d4   :  { %v6511_v8 = vpack.c.bf16 %v6510_v28, %v6509_v1 }
0x36d6   :  { %10872 = vmatmul.mubr.msk.bf16.vlgmr.msra.gmra.mrb[144].mxu1 %vm919_vm2, %v6511_v8 }
0x36d7   :  { %10895 = vmatprep.mubr.msk.bf16.mxu1 %vm12015_vm1, %v12012_v25  ;;  %10888 = vmatpush3.bf16.msra.mxu1 %v11588_v42  ;;  %v11606_v42 = vld [vmem:[#allocation8 + $0x200] sm:$0xff]  }
0x36d8   :  { %10889 = vmatprep.subr.bf16.mxu1 %v12012_v25 }
0x36db   :  { %10890 = vmatpush3.bf16.msra.mxu1 %v11589_v10  ;;  %v11607_v10 = vld [vmem:[#allocation8 + $0x208] sm:$0xff]  }
0x36dc   :  { %10891 = vmatprep.subr.bf16.mxu1 %v12012_v25 }
0x36df   :  { %10892 = vmatpush3.bf16.msra.mxu1 %v11590_v55  ;;  %v6980_v55 = vld [vmem:[#allocation10] ss:$8 sm:$0x7] }
0x36e0   :  { %10893 = vmatprep.subr.bf16.mxu1 %v12012_v25 }
0x36e3   :  { %10894 = vmatpush3.bf16.msra.mxu1 %v11591_v12 }
0x36e4   :  { %10907 = vmatprep.subr.bf16.mxu1 %v12012_v25 }
0x37a9   :  { %v6549_v31 = vpop.f32.mrb[144].mxu1 }
0x37aa   :  { %v6556_v56 = vsub.f32 %v6509_v1, %v6549_v31  ;;  %v10873_v33 = vpop.f32.mrb[145].mxu1  ;;  %v6641_v1 = vrot.slane %v6636_v20, %v12187_v7  ;;  %v11614_v20 = vld [vmem:[#allocation8 + $0xb0] sm:$0xff]  }
0x37ab   :  { %v6552_v3 = vpop.f32.mrb[146].mxu1 }
0x37ac   :  { %v6557_v2 = vsub.f32 %v6510_v28, %v6552_v3  ;;  %v10874_v30 = vpop.f32.mrb[147].mxu1  ;;  %v6558_v15 = vmul.f32 %v6556_v56, %v6556_v56  ;;  %v6713_v3 = vsub.f32 1.0, %v13118_v38 }
0x37ae   :  { %v6559_v34 = vmul.f32 %v6557_v2, %v6557_v2 }
0x37b0   :  { %v6560_v60 = vpack.c.bf16 %v6559_v34, %v6558_v15  ;;  %v6715_v15 = vmul.f32 %v6713_v3, %v12894_v13 }
0x37b2   :  { %10884 = vmatmul.mubr.msk.bf16.vlgmr.msra.gmra.mrb[152].mxu0 %vm919_vm2, %v6560_v60 }
0x37b3   :  { %6778 = vmatpush1.bf16.msra.mxu0 %v11580_v58  ;;  %6809 = vmatprep.mubr.bf16.mxu0 %v12011_v24 }
0x37b4   :  { %6779 = vmatprep.subr.bf16.mxu0 %v11585_v53 }
0x37b7   :  { %6780 = vmatpush1.bf16.msra.mxu0 %v11583_v54 }
0x37b8   :  { %10899 = vmatprep.subr.bf16.mxu0 %v12012_v25 }
0x37ba   :  { %9224 = vmatmul.mubr.msk.bf16.vlgmr.msra.gmra.mrb[156].mxu0 %vm383_vm0, %v13235_v39 }
0x37bb   :  { %10900 = vmatpush3.bf16.msra.mxu0 %v11586_v47  ;;  %10903 = vmatprep.mubr.msk.bf16.mxu0 %vm12015_vm1, %v12012_v25 }
0x37bc   :  { %10901 = vmatprep.subr.bf16.mxu0 %v12012_v25 }
0x37bf   :  { %10902 = vmatpush3.bf16.msra.mxu0 %v11587_v29  ;;  %v11600_v29 = vld [vmem:[#allocation8 + $0x1d0] sm:$0xff]  }
0x37c0   :  { %6896 = vmatprep.subr.bf16.mxu0 %v11594_v41 }
0x37c2   :  { %10904 = vmatmul.mubr.msk.bf16.vlgmr.msra.gmra.mrb[160].mxu0 %vm383_vm0, %v13235_v39 }
0x37c3   :  { %6928 = vmatprep.mubr.bf16.mxu0 %v12011_v24  ;;  %6897 = vmatpush1.bf16.msra.mxu0 %v11592_v51  ;;  %v11609_v51 = vld [vmem:[#allocation8 + $0x88] sm:$0xff]  }
0x37c4   :  { %6898 = vmatprep.subr.bf16.mxu0 %v11598_v52  ;;  %v11611_v52 = vld [vmem:[#allocation8 + $0x98] sm:$0xff]  }
0x37c7   :  { %6899 = vmatpush1.bf16.msra.mxu0 %v11596_v23  ;;  %v11612_v23 = vld [vmem:[#allocation8 + $0xa0] sm:$0xff]  }
0x37c8   :  { %10935 = vmatprep.subr.bf16.mxu0 %v12012_v25 }
0x3885   :  { %v6598_v16 = vpop.f32.mrb[152].mxu0 }
0x3886   :  { %v6599_v57 = vadd.f32 1e-05, %v6598_v16  ;;  %v10885_v9 = vpop.f32.mrb[153].mxu0  ;;  %v6993_v16 = vrot.slane %v6980_v55, %v12191_v14 }
0x3887   :  { %v6601_v61 = vpop.f32.mrb[154].mxu0 }
0x3888   :  { %11802 = vrsqrt.f32 %v6599_v57  ;;  %v6602_v63 = vadd.f32 1e-05, %v6601_v61  ;;  %v10886_v18 = vpop.f32.mrb[155].mxu0  ;;  %v6989_v57 = vrot.slane %v6980_v55, %v12185_v5 }
0x388a   :  { %11804 = vrsqrt.f32 %v6602_v63  ;;  %v6985_v63 = vrot.slane %v6980_v55, %v12187_v7 }
0x3892   :  { %v11803_v11 = vpop.eup %11802 }
0x3893   :  { %v6607_v36 = vmul.f32 %v11803_v11, %v6556_v56 }
0x3894   :  { %v11805_v22 = vpop.eup %11804 }
0x3895   :  { %v6616_v40 = vmul.f32 %v6614_v19, %v6607_v36  ;;  %v6608_v45 = vmul.f32 %v11805_v22, %v6557_v2  ;;  %v13251_v48 = vpop.f32.mrb[160].mxu0  ;;  %v6714_v2 = vsub.f32 1.0, %v13120_v17 }
0x3896   :  { %v10905_v44 = vpop.f32.mrb[161].mxu0 }
0x3897   :  { %v6617_v43 = vmul.f32 %v6614_v19, %v6608_v45  ;;  %v13254_v26 = vpop.f32.mrb[162].mxu0  ;;  %v6625_v59 = vadd.f32 %v6623_v37, %v6616_v40  ;;  %v6716_v53 = vmul.f32 %v6714_v2, %v12900_v6  ;;  %v11601_v6 = vld [vmem:[#allocation8 + $0x1d8] sm:$0xff]  }
0x3898   :  { %v10906_v35 = vpop.f32.mrb[163].mxu0 }
0x3899   :  { %v6626_v62 = vadd.f32 %v6623_v37, %v6617_v43 }
0x389b   :  { %v6635_v50 = vpack.c.bf16 %v6626_v62, %v6625_v59 }
0x389d   :  { %10896 = vmatmul.mubr.msk.bf16.vlgmr.msra.gmra.mrb[148].mxu1 %vm919_vm2, %v6635_v50 }
0x389e   :  { %10911 = vmatprep.mubr.msk.bf16.mxu1 %vm12015_vm1, %v12012_v25  ;;  %10908 = vmatpush3.bf16.msra.mxu1 %v11595_v4  ;;  %v11610_v4 = vld [vmem:[#allocation8 + $0x90] sm:$0xff]  }
0x389f   :  { %10909 = vmatprep.subr.bf16.mxu1 %v12012_v25 }
0x38a2   :  { %10910 = vmatpush3.bf16.msra.mxu1 %v11599_v27  ;;  %v11613_v27 = vld [vmem:[#allocation8 + $0xa8] sm:$0xff]  }
0x38a3   :  { %10915 = vmatprep.subr.bf16.mxu1 %v12012_v25 }
0x3970   :  { %v6704_v28 = vpop.f32.mrb[148].mxu1 }
0x3971   :  { %v6705_v8 = vadd.f32 %v6704_v28, %v6641_v1  ;;  %v10897_v32 = vpop.f32.mrb[149].mxu1  ;;  %v13338_v28 = vld [vmem:[#allocation8 + $0x210] sm:$0xff]  }
0x3972   :  { %v6707_v31 = vpop.f32.mrb[150].mxu1  ;;  %v13345_v32 = vld [vmem:[#allocation8 + $0x220] sm:$0xff]  }
0x3973   :  { %11806 = vtanh.f32 %v6705_v8  ;;  %v6708_v56 = vadd.f32 %v6707_v31, %v6641_v1  ;;  %v10898_v33 = vpop.f32.mrb[151].mxu1  ;;  %v11615_v1 = vld [vmem:[#allocation8 + $0xb8] sm:$0xff]   ;;  %v13349_v31 = vld [vmem:[#allocation8 + $0x228] sm:$0xff]  }
0x3974   :  { %v13341_v8 = vld [vmem:[#allocation8 + $0x218] sm:$0xff]  }
0x3975   :  { %11808 = vtanh.f32 %v6708_v56  ;;  %v13353_v56 = vld [vmem:[#allocation8 + $0x230] sm:$0xff]   ;;  %v13357_v33 = vld [vmem:[#allocation8 + $0x238] sm:$0xff]  }
0x397d   :  { %v11807_v30 = vpop.eup %11806 }
0x397e   :  { %v6717_v34 = vmul.f32 %v11807_v30, %v13118_v38  ;;  %v11604_v38 = vld [vmem:[#allocation8 + $0x1f0] sm:$0xff]  }
0x397f   :  { %v11809_v58 = vpop.eup %11808 }
0x3980   :  { %v13267_v60 = vadd.f32 %v6717_v34, %v6715_v15  ;;  %v6718_v54 = vmul.f32 %v11809_v58, %v13120_v17  ;;  %v11605_v17 = vld [vmem:[#allocation8 + $0x1f8] sm:$0xff]  }
0x3982   :  { %6722 = vst.msk [vmem:[#allocation11 + $0x20] sm:$0xff] %vm383_vm0, %v13267_v60  ;;  %v13273_v47 = vadd.f32 %v6718_v54, %v6716_v53  ;;  %7294 = vrot.lane.b32.xlu0 %v13267_v60, %s12002_s1 }
0x3984   :  { %6723 = vst.msk [vmem:[#allocation11 + $0x28] sm:$0xff] %vm383_vm0, %v13273_v47  ;;  %7296 = vrot.lane.b32.xlu1 %v13273_v47, %s12002_s1  ;;  %v6732_v13 = vpack.c.bf16 %v13273_v47, %v13267_v60 }
0x3986   :  { %7300 = vrot.lane.b32.xlu0 %v12210_v46, %s12014_s10  ;;  %9232 = vmatmul.mubr.msk.bf16.vlgmr.msra.gmra.mrb[156].mxu0 %vm383_vm0, %v6732_v13  ;;  %v11602_v46 = vld [vmem:[#allocation8 + $0x1e0] sm:$0xff]  }
0x3987   :  { %10912 = vmatmul.mubr.msk.bf16.vlgmr.msra.gmra.mrb[152].mxu1 %vm383_vm0, %v6732_v13  ;;  %10936 = vmatpush3.bf16.msra.mxu0 %v11600_v29 }
0x3988   :  { %7302 = vrot.lane.b32.xlu1 %v12212_v49, %s12014_s10  ;;  %10916 = vmatpush3.bf16.msra.mxu1 %v11600_v29  ;;  %v11603_v49 = vld [vmem:[#allocation8 + $0x1e8] sm:$0xff]  }
0x3989   :  { %10917 = vmatprep.subr.bf16.mxu1 %v12012_v25  ;;  %10937 = vmatprep.subr.bf16.mxu0 %v12012_v25 }
0x398a   :  { %7924 = vrot.lane.b32.xlu0 %v13267_v60, %s12013_s4  ;;  %10931 = vmatprep.mubr.msk.bf16.mxu1 %vm12015_vm1, %v12012_v25 }
0x398b   :  { %10938 = vmatpush3.bf16.msra.mxu0 %v11601_v6  ;;  %10951 = vmatprep.mubr.msk.bf16.mxu0 %vm12015_vm1, %v12012_v25 }
0x398c   :  { %7926 = vrot.lane.b32.xlu1 %v13273_v47, %s12013_s4  ;;  %10918 = vmatpush3.bf16.msra.mxu1 %v11601_v6 }
0x398d   :  { %10919 = vmatprep.subr.bf16.mxu1 %v12012_v25  ;;  %10939 = vmatprep.subr.bf16.mxu0 %v12012_v25 }
0x398f   :  { %10940 = vmatpush3.bf16.msra.mxu0 %v11602_v46 }
0x3990   :  { %10920 = vmatpush3.bf16.msra.mxu1 %v11602_v46  ;;  %10941 = vmatprep.subr.bf16.mxu0 %v12012_v25 }
0x3991   :  { %10921 = vmatprep.subr.bf16.mxu1 %v12012_v25 }
0x3993   :  { %10942 = vmatpush3.bf16.msra.mxu0 %v11603_v49 }
0x3994   :  { %10922 = vmatpush3.bf16.msra.mxu1 %v11603_v49  ;;  %10943 = vmatprep.subr.bf16.mxu0 %v12012_v25 }
0x3995   :  { %10923 = vmatprep.subr.bf16.mxu1 %v12012_v25 }
0x3997   :  { %10944 = vmatpush3.bf16.msra.mxu0 %v11604_v38 }
0x3998   :  { %10924 = vmatpush3.bf16.msra.mxu1 %v11604_v38  ;;  %10945 = vmatprep.subr.bf16.mxu0 %v12012_v25 }
0x3999   :  { %10925 = vmatprep.subr.bf16.mxu1 %v12012_v25 }
0x399b   :  { %10946 = vmatpush3.bf16.msra.mxu0 %v11605_v17 }
0x399c   :  { %10926 = vmatpush3.bf16.msra.mxu1 %v11605_v17  ;;  %10947 = vmatprep.subr.bf16.mxu0 %v12012_v25 }
0x399d   :  { %10927 = vmatprep.subr.bf16.mxu1 %v12012_v25 }
0x399f   :  { %10948 = vmatpush3.bf16.msra.mxu0 %v11606_v42 }
0x39a0   :  { %10928 = vmatpush3.bf16.msra.mxu1 %v11606_v42  ;;  %10949 = vmatprep.subr.bf16.mxu0 %v12012_v25 }
0x39a1   :  { %10929 = vmatprep.subr.bf16.mxu1 %v12012_v25 }
0x39a3   :  { %10950 = vmatpush3.bf16.msra.mxu0 %v11607_v10 }
0x39a4   :  { %10930 = vmatpush3.bf16.msra.mxu1 %v11607_v10  ;;  %10975 = vmatprep.subr.bf16.mxu0 %v12012_v25 }
0x39a5   :  { %10955 = vmatprep.subr.bf16.mxu1 %v12012_v25 }
0x3a59   :  { %v6930_v12 = vpop.f32.mrb[156].mxu0 }
0x3a5a   :  { %v6973_v9 = vpop.f32.mrb[152].mxu1  ;;  %v6932_v61 = vpop.f32.mrb[157].mxu0  ;;  %v6997_v14 = vadd.f32 %v6985_v63, %v6930_v12 }
0x3a5b   :  { %v6974_v18 = vadd.f32 %v6973_v9, %v13251_v48  ;;  %v10913_v0 = vpop.f32.mrb[153].mxu1  ;;  %v6934_v19 = vpop.f32.mrb[158].mxu0  ;;  %v6998_v22 = vadd.f32 %v6989_v57, %v6932_v61 }
0x3a5c   :  { %v6976_v11 = vpop.f32.mrb[154].mxu1  ;;  %v6936_v21 = vpop.f32.mrb[159].mxu0  ;;  %v7000_v44 = vadd.f32 %v6985_v63, %v6934_v19  ;;  %v13380_v63 = vld [vmem:[#allocation8 + $0x240] sm:$0xff]  }
0x3a5d   :  { %v13317_v36 = vadd.f32 %v6993_v16, %v6974_v18  ;;  %v6977_v40 = vadd.f32 %v6976_v11, %v13254_v26  ;;  %v7001_v45 = vadd.f32 %v6989_v57, %v6936_v21  ;;  %v10914_v37 = vpop.f32.mrb[155].mxu1  ;;  %v11608_v26 = vld [vmem:[#allocation8 + $0x80] sm:$0xff]   ;;  %v13386_v18 = vld [vmem:[#allocation8 + $0x248] sm:$0xff]   ;;  %v13392_v0 = vpop.permute.xlu0 %7286 }
0x3a5e   :  { %v13394_v19 = vpop.permute.xlu1 %7288  ;;  %v7188_v21 = vld [vmem:[#allocation10 + $0x1] ss:$8 sm:$0x7] }
0x3a5f   :  { %v13320_v43 = vadd.f32 %v6993_v16, %v6977_v40  ;;  %v7003_v35 = vsub.f32 %v6998_v22, %v7001_v45  ;;  %v7193_v22 = vrot.slane %v7188_v21, %v12187_v7 }
0x3a61   :  { %v13324_v59 = vsub.f32 %v13317_v36, %v13320_v43  ;;  %v7021_v48 = vmul.f32 %v7003_v35, %v6997_v14  ;;  %v7118_v62 = vmul.f32 %v7003_v35, %v7000_v44  ;;  %v7295_v11 = vpop.permute.xlu0 %7294  ;;  %v7307_v35 = vsel %vm383_vm0, %v13273_v47, %v13394_v19 }
0x3a63   :  { %v7022_v50 = vpack.c.bf16 %v7021_v48, %v7021_v48  ;;  %v7119_v41 = vpack.c.bf16 %v7118_v62, %v7118_v62 }
0x3a65   :  { %10932 = vmatmul.mubr.bf16.vlgmr.msra.gmra.mrb[156].mxu1 %v7022_v50  ;;  %10952 = vmatmul.mubr.bf16.vlgmr.msra.gmra.mrb[164].mxu0 %v7119_v41  ;;  %v7301_v40 = vpop.permute.xlu0 %7300 }
0x3a66   :  { %10971 = vmatprep.mubr.msk.bf16.mxu1 %vm12015_vm1, %v12012_v25  ;;  %10991 = vmatprep.mubr.msk.bf16.mxu0 %vm12015_vm1, %v12012_v25 }
0x3a67   :  { %10956 = vmatpush3.bf16.msra.mxu1 %v11608_v26  ;;  %10976 = vmatpush3.bf16.msra.mxu0 %v13338_v28 }
0x3a68   :  { %10957 = vmatprep.subr.bf16.mxu1 %v12012_v25  ;;  %10977 = vmatprep.subr.bf16.mxu0 %v12012_v25 }
0x3a6b   :  { %10958 = vmatpush3.bf16.msra.mxu1 %v11609_v51  ;;  %10978 = vmatpush3.bf16.msra.mxu0 %v13341_v8 }
0x3a6c   :  { %10959 = vmatprep.subr.bf16.mxu1 %v12012_v25  ;;  %10979 = vmatprep.subr.bf16.mxu0 %v12012_v25 }
0x3a6f   :  { %10960 = vmatpush3.bf16.msra.mxu1 %v11610_v4  ;;  %10980 = vmatpush3.bf16.msra.mxu0 %v13345_v32 }
0x3a70   :  { %10961 = vmatprep.subr.bf16.mxu1 %v12012_v25  ;;  %10981 = vmatprep.subr.bf16.mxu0 %v12012_v25 }
0x3a73   :  { %10962 = vmatpush3.bf16.msra.mxu1 %v11611_v52  ;;  %10982 = vmatpush3.bf16.msra.mxu0 %v13349_v31 }
0x3a74   :  { %10963 = vmatprep.subr.bf16.mxu1 %v12012_v25  ;;  %10983 = vmatprep.subr.bf16.mxu0 %v12012_v25 }
0x3a77   :  { %10964 = vmatpush3.bf16.msra.mxu1 %v11612_v23  ;;  %10984 = vmatpush3.bf16.msra.mxu0 %v13353_v56 }
0x3a78   :  { %10965 = vmatprep.subr.bf16.mxu1 %v12012_v25  ;;  %10985 = vmatprep.subr.bf16.mxu0 %v12012_v25 }
0x3a7b   :  { %10966 = vmatpush3.bf16.msra.mxu1 %v11613_v27  ;;  %10986 = vmatpush3.bf16.msra.mxu0 %v13357_v33  ;;  %v11624_v27 = vld [vmem:[#allocation8 + $0xc0] sm:$0xff]  }
0x3a7c   :  { %10967 = vmatprep.subr.bf16.mxu1 %v12012_v25  ;;  %10987 = vmatprep.subr.bf16.mxu0 %v12012_v25 }
0x3a7f   :  { %10968 = vmatpush3.bf16.msra.mxu1 %v11614_v20  ;;  %10988 = vmatpush3.bf16.msra.mxu0 %v13380_v63  ;;  %v11625_v20 = vld [vmem:[#allocation8 + $0xc8] sm:$0xff]  }
0x3a80   :  { %10969 = vmatprep.subr.bf16.mxu1 %v12012_v25  ;;  %10989 = vmatprep.subr.bf16.mxu0 %v12012_v25 }
0x3a83   :  { %10970 = vmatpush3.bf16.msra.mxu1 %v11615_v1  ;;  %10990 = vmatpush3.bf16.msra.mxu0 %v13386_v18 }
0x3a84   :  { %10995 = vmatprep.subr.bf16.mxu1 %v12012_v25  ;;  %11015 = vmatprep.subr.bf16.mxu0 %v12012_v25 }
0x3b38   :  { %v7105_v3 = vpop.f32.mrb[156].mxu1  ;;  %v7154_v2 = vpop.f32.mrb[164].mxu0 }
0x3b39   :  { %v9242_v30 = vmul.f32 -0.25, %v7105_v3  ;;  %v9243_v15 = vmul.f32 0.25, %v7154_v2  ;;  %v10933_v34 = vpop.f32.mrb[157].mxu1  ;;  %v10953_v58 = vpop.f32.mrb[165].mxu0 }
0x3b3a   :  { %v7108_v53 = vpop.f32.mrb[158].mxu1  ;;  %v7157_v54 = vpop.f32.mrb[166].mxu0 }
0x3b3b   :  { %v7113_v29 = vmul.f32 1.442695, %v9242_v30  ;;  %v7162_v13 = vmul.f32 1.442695, %v9243_v15  ;;  %v10934_v6 = vpop.f32.mrb[159].mxu1  ;;  %v10954_v46 = vpop.f32.mrb[167].mxu0 }
0x3b3c   :  { %v11628_v6 = vld [vmem:[#allocation8 + $0xe0] sm:$0xff]   ;;  %v11629_v46 = vld [vmem:[#allocation8 + $0xe8] sm:$0xff]  }
0x3b3d   :  { %11810 = vpow2.f32 %v7113_v29  ;;  %v11626_v29 = vld [vmem:[#allocation8 + $0xd0] sm:$0xff]  }
0x3b3e   :  { %11812 = vpow2.f32 %v7162_v13  ;;  %v11627_v13 = vld [vmem:[#allocation8 + $0xd8] sm:$0xff]  }
0x3b47   :  { %v11811_v49 = vpop.eup %11810 }
0x3b48   :  { %v11813_v38 = vpop.eup %11812  ;;  %v7115_v17 = vadd.f32 1.0, %v11811_v49  ;;  %v11630_v49 = vld [vmem:[#allocation8 + $0xf0] sm:$0xff]  }
0x3b49   :  { %v7164_v42 = vadd.f32 1.0, %v11813_v38  ;;  %v11631_v38 = vld [vmem:[#allocation8 + $0xf8] sm:$0xff]  }
0x3b4a   :  { %11814 = vrcp.f32 %v7115_v17  ;;  %v11632_v17 = vld [vmem:[#allocation8 + $0x100] sm:$0xff]  }
0x3b4b   :  { %11816 = vrcp.f32 %v7164_v42  ;;  %v11633_v42 = vld [vmem:[#allocation8 + $0x108] sm:$0xff]  }
0x3b54   :  { %v11815_v10 = vpop.eup %11814 }
0x3b55   :  { %v11817_v55 = vpop.eup %11816  ;;  %v7167_v12 = vmul.f32 %v11815_v10, %v13324_v59 }
0x3b56   :  { %v7169_v16 = vmul.f32 %v11817_v55, %v13324_v59 }
0x3b57   :  { %v7168_v57 = vadd.f32 %v7167_v12, %v13320_v43  ;;  %v7306_v43 = vsel %vm383_vm0, %v13267_v60, %v13392_v0 }
0x3b58   :  { %v7170_v9 = vsub.f32 %v13317_v36, %v7169_v16  ;;  %v7297_v36 = vpop.permute.xlu1 %7296  ;;  %v7308_v48 = vsel %vm919_vm2, %v7306_v43, %v7295_v11 }
0x3b59   :  { %v7309_v62 = vsel %vm919_vm2, %v7307_v35, %v7297_v36  ;;  %v7310_v26 = vsel %vm922_vm3, %v7308_v48, %v7301_v40  ;;  %v7479_v36 = vld [vmem:[#allocation10 + $0x3] ss:$8 sm:$0x7] }
0x3b5a   :  { %v7187_v61 = vpack.c.bf16 %v7170_v9, %v7168_v57  ;;  %v11634_v48 = vld [vmem:[#allocation8 + $0x110] sm:$0xff]  }
0x3b5c   :  { %10972 = vmatmul.mubr.bf16.vlgmr.msra.gmra.mrb[160].mxu1 %v7187_v61  ;;  %v7303_v37 = vpop.permute.xlu1 %7302  ;;  %v7470_v61 = vld [vmem:[#allocation10 + $0x2] ss:$8 sm:$0x7] }
0x3b5d   :  { %10996 = vmatpush3.bf16.msra.mxu1 %v13338_v28  ;;  %11011 = vmatprep.mubr.msk.bf16.mxu1 %vm12015_vm1, %v12012_v25  ;;  %v7311_v51 = vsel %vm922_vm3, %v7309_v62, %v7303_v37  ;;  %v7475_v11 = vrot.slane %v7470_v61, %v12187_v7  ;;  %v11635_v62 = vld [vmem:[#allocation8 + $0x118] sm:$0xff]   ;;  %v11647_v61 = vld [vmem:[#allocation8 + $0x148] sm:$0xff]  }
0x3b5e   :  { %10997 = vmatprep.subr.bf16.mxu1 %v12012_v25 }
0x3b61   :  { %10998 = vmatpush3.bf16.msra.mxu1 %v13341_v8 }
0x3b62   :  { %10999 = vmatprep.subr.bf16.mxu1 %v12012_v25 }
0x3b65   :  { %11000 = vmatpush3.bf16.msra.mxu1 %v13345_v32 }
0x3b66   :  { %11001 = vmatprep.subr.bf16.mxu1 %v12012_v25 }
0x3b69   :  { %11002 = vmatpush3.bf16.msra.mxu1 %v13349_v31 }
0x3b6a   :  { %11003 = vmatprep.subr.bf16.mxu1 %v12012_v25 }
0x3b6d   :  { %11004 = vmatpush3.bf16.msra.mxu1 %v13353_v56 }
0x3b6e   :  { %11005 = vmatprep.subr.bf16.mxu1 %v12012_v25 }
0x3b71   :  { %11006 = vmatpush3.bf16.msra.mxu1 %v13357_v33 }
0x3b72   :  { %11007 = vmatprep.subr.bf16.mxu1 %v12012_v25 }
0x3b75   :  { %11008 = vmatpush3.bf16.msra.mxu1 %v13380_v63 }
0x3b76   :  { %11009 = vmatprep.subr.bf16.mxu1 %v12012_v25 }
0x3b79   :  { %11010 = vmatpush3.bf16.msra.mxu1 %v13386_v18 }
0x3b7a   :  { %11035 = vmatprep.subr.bf16.mxu1 %v12012_v25 }
0x3c2f   :  { %v7277_v45 = vpop.f32.mrb[160].mxu1 }
0x3c30   :  { %v7278_v14 = vadd.f32 %v7277_v45, %v7193_v22  ;;  %v10973_v44 = vpop.f32.mrb[161].mxu1 }
0x3c31   :  { %v7280_v59 = vpop.f32.mrb[162].mxu1 }
0x3c32   :  { %v7281_v50 = vadd.f32 %v7280_v59, %v7193_v22  ;;  %v10974_v41 = vpop.f32.mrb[163].mxu1  ;;  %v7312_v4 = vadd.f32 %v7310_v26, %v7278_v14  ;;  %v7484_v14 = vrot.slane %v7479_v36, %v12187_v7 }
0x3c34   :  { %v7313_v52 = vadd.f32 %v7311_v51, %v7281_v50  ;;  %v7505_v50 = vld [vmem:[#allocation10 + $0x4] ss:$8 sm:$0x7] }
0x3c35   :  { %v7510_v41 = vrot.slane %v7505_v50, %v12187_v7 }
0x3c36   :  { %v7330_v23 = vpack.c.bf16 %v7313_v52, %v7312_v4 }
0x3c38   :  { %10992 = vmatmul.mubr.bf16.vlgmr.msra.gmra.mrb[168].mxu0 %v7330_v23 }
0x3c39   :  { %11031 = vmatprep.mubr.msk.bf16.mxu0 %vm12015_vm1, %v12012_v25  ;;  %11016 = vmatpush3.bf16.msra.mxu0 %v11624_v27 }
0x3c3a   :  { %11017 = vmatprep.subr.bf16.mxu0 %v12012_v25 }
0x3c3d   :  { %11018 = vmatpush3.bf16.msra.mxu0 %v11625_v20 }
0x3c3e   :  { %11019 = vmatprep.subr.bf16.mxu0 %v12012_v25 }
0x3c41   :  { %11020 = vmatpush3.bf16.msra.mxu0 %v11626_v29 }
0x3c42   :  { %11021 = vmatprep.subr.bf16.mxu0 %v12012_v25 }
0x3c45   :  { %11022 = vmatpush3.bf16.msra.mxu0 %v11627_v13 }
0x3c46   :  { %11023 = vmatprep.subr.bf16.mxu0 %v12012_v25 }
0x3c49   :  { %11024 = vmatpush3.bf16.msra.mxu0 %v11628_v6 }
0x3c4a   :  { %11025 = vmatprep.subr.bf16.mxu0 %v12012_v25 }
0x3c4d   :  { %11026 = vmatpush3.bf16.msra.mxu0 %v11629_v46 }
0x3c4e   :  { %11027 = vmatprep.subr.bf16.mxu0 %v12012_v25 }
0x3c51   :  { %11028 = vmatpush3.bf16.msra.mxu0 %v11630_v49 }
0x3c52   :  { %11029 = vmatprep.subr.bf16.mxu0 %v12012_v25 }
0x3c55   :  { %11030 = vmatpush3.bf16.msra.mxu0 %v11631_v38 }
0x3c56   :  { %11047 = vmatprep.subr.bf16.mxu0 %v12012_v25 }
0x3d0b   :  { %v7413_v1 = vpop.f32.mrb[168].mxu0 }
0x3d0c   :  { %v7420_v3 = vsub.f32 %v7312_v4, %v7413_v1  ;;  %v10993_v2 = vpop.f32.mrb[169].mxu0 }
0x3d0d   :  { %v7416_v30 = vpop.f32.mrb[170].mxu0 }
0x3d0e   :  { %v7421_v15 = vsub.f32 %v7313_v52, %v7416_v30  ;;  %v10994_v34 = vpop.f32.mrb[171].mxu0  ;;  %v7422_v58 = vmul.f32 %v7420_v3, %v7420_v3 }
0x3d10   :  { %v7423_v53 = vmul.f32 %v7421_v15, %v7421_v15 }
0x3d12   :  { %v7424_v54 = vpack.c.bf16 %v7423_v53, %v7422_v58  ;;  %v11643_v53 = vld [vmem:[#allocation8 + $0x128] sm:$0xff]  }
0x3d14   :  { %11012 = vmatmul.mubr.bf16.vlgmr.msra.gmra.mrb[164].mxu1 %v7424_v54 }
0x3d15   :  { %11043 = vmatprep.mubr.msk.bf16.mxu1 %vm12015_vm1, %v12012_v25  ;;  %11036 = vmatpush3.bf16.msra.mxu1 %v11632_v17 }
0x3d16   :  { %11037 = vmatprep.subr.bf16.mxu1 %v12012_v25 }
0x3d19   :  { %11038 = vmatpush3.bf16.msra.mxu1 %v11633_v42  ;;  %v11636_v42 = vld [vmem:[#allocation7 + $0x90] ss:$12 sps:$4 sm:$0xff]  }
0x3d1a   :  { %11039 = vmatprep.subr.bf16.mxu1 %v12012_v25 }
0x3d1d   :  { %11040 = vmatpush3.bf16.msra.mxu1 %v11634_v48 }
0x3d1e   :  { %11041 = vmatprep.subr.bf16.mxu1 %v12012_v25 }
0x3d21   :  { %11042 = vmatpush3.bf16.msra.mxu1 %v11635_v62 }
0x3d22   :  { %11067 = vmatprep.subr.bf16.mxu1 %v12012_v25 }
0x3de7   :  { %v7459_v10 = vpop.f32.mrb[164].mxu1 }
0x3de8   :  { %v7460_v55 = vadd.f32 1e-05, %v7459_v10  ;;  %v11013_v12 = vpop.f32.mrb[165].mxu1 }
0x3de9   :  { %v7462_v16 = vpop.f32.mrb[166].mxu1  ;;  %v11639_v12 = vld [vmem:[#allocation7 + $0xa8] ss:$12 sps:$4 sm:$0xff]  }
0x3dea   :  { %11818 = vrsqrt.f32 %v7460_v55  ;;  %v7463_v57 = vadd.f32 1e-05, %v7462_v16  ;;  %v11014_v9 = vpop.f32.mrb[167].mxu1  ;;  %v11641_v55 = vld [vmem:[#allocation7 + $0xac] ss:$12 sps:$4 sm:$0xff]   ;;  %v11644_v16 = vld [vmem:[#allocation8 + $0x130] sm:$0xff]  }
0x3deb   :  { %v11646_v9 = vld [vmem:[#allocation8 + $0x140] sm:$0xff]  }
0x3dec   :  { %11820 = vrsqrt.f32 %v7463_v57  ;;  %v11645_v57 = vld [vmem:[#allocation8 + $0x138] sm:$0xff]  }
0x3df4   :  { %v11819_v21 = vpop.eup %11818 }
0x3df5   :  { %v7468_v22 = vmul.f32 %v11819_v21, %v7420_v3 }
0x3df6   :  { %v11821_v40 = vpop.eup %11820 }
0x3df7   :  { %v7469_v45 = vmul.f32 %v11821_v40, %v7421_v15  ;;  %v7477_v37 = vmul.f32 %v7475_v11, %v7468_v22 }
0x3df9   :  { %v7478_v44 = vmul.f32 %v7475_v11, %v7469_v45  ;;  %v13423_v43 = vadd.f32 %v7484_v14, %v7477_v37  ;;  %v11648_v11 = vld [vmem:[#allocation8 + $0x150] sm:$0xff]  }
0x3dfa   :  { %v7781_v37 = vld [vmem:[#allocation10 + $0x6] ss:$8 sm:$0x7] }
0x3dfb   :  { %v13425_v35 = vadd.f32 %v7484_v14, %v7478_v44  ;;  %v7786_v14 = vrot.slane %v7781_v37, %v12187_v7 }
0x3dfd   :  { %v7504_v59 = vpack.c.bf16 %v13425_v35, %v13423_v43 }
0x3dff   :  { %11032 = vmatmul.mubr.bf16.vlgmr.msra.gmra.mrb[172].mxu0 %v7504_v59 }
0x3e00   :  { %11048 = vmatpush3.bf16.msra.mxu0 %v13338_v28  ;;  %11063 = vmatprep.mubr.msk.bf16.mxu0 %vm12015_vm1, %v12012_v25 }
0x3e01   :  { %11049 = vmatprep.subr.bf16.mxu0 %v12012_v25 }
0x3e04   :  { %11050 = vmatpush3.bf16.msra.mxu0 %v13341_v8 }
0x3e05   :  { %11051 = vmatprep.subr.bf16.mxu0 %v12012_v25 }
0x3e08   :  { %11052 = vmatpush3.bf16.msra.mxu0 %v13345_v32 }
0x3e09   :  { %11053 = vmatprep.subr.bf16.mxu0 %v12012_v25 }
0x3e0c   :  { %11054 = vmatpush3.bf16.msra.mxu0 %v13349_v31 }
0x3e0d   :  { %11055 = vmatprep.subr.bf16.mxu0 %v12012_v25 }
0x3e10   :  { %11056 = vmatpush3.bf16.msra.mxu0 %v13353_v56 }
0x3e11   :  { %11057 = vmatprep.subr.bf16.mxu0 %v12012_v25 }
0x3e14   :  { %11058 = vmatpush3.bf16.msra.mxu0 %v13357_v33 }
0x3e15   :  { %11059 = vmatprep.subr.bf16.mxu0 %v12012_v25 }
0x3e18   :  { %11060 = vmatpush3.bf16.msra.mxu0 %v13380_v63 }
0x3e19   :  { %11061 = vmatprep.subr.bf16.mxu0 %v12012_v25 }
0x3e1c   :  { %11062 = vmatpush3.bf16.msra.mxu0 %v13386_v18 }
0x3e1d   :  { %11087 = vmatprep.subr.bf16.mxu0 %v12012_v25 }
0x3ed2   :  { %v7594_v26 = vpop.f32.mrb[172].mxu0 }
0x3ed3   :  { %v7595_v51 = vadd.f32 %v7594_v26, %v7510_v41  ;;  %v11033_v4 = vpop.f32.mrb[173].mxu0 }
0x3ed4   :  { %v7597_v52 = vpop.f32.mrb[174].mxu0 }
0x3ed5   :  { %v7598_v23 = vadd.f32 %v7597_v52, %v7510_v41  ;;  %v11034_v27 = vpop.f32.mrb[175].mxu0  ;;  %v7601_v20 = vmax.f32 %v7595_v51, 0.0  ;;  %v11650_v52 = vld [vmem:[#allocation7 + $0x60] ss:$12 sps:$4 sm:$0xff]  }
0x3ed6   :  { %v11655_v27 = vld [vmem:[#allocation7 + $0x7c] ss:$12 sps:$4 sm:$0xff]  }
0x3ed7   :  { %v7602_v1 = vmax.f32 %v7598_v23, 0.0  ;;  %v11652_v23 = vld [vmem:[#allocation7 + $0x64] ss:$12 sps:$4 sm:$0xff]  }
0x3ed9   :  { %v7611_v3 = vpack.c.bf16 %v7602_v1, %v7601_v20  ;;  %v11653_v20 = vld [vmem:[#allocation7 + $0x78] ss:$12 sps:$4 sm:$0xff]  }
0x3eda   :  { %v7816_v1 = vld [vmem:[#allocation10 + $0x18] ss:$8 sm:$0x7] }
0x3edb   :  { %11044 = vmatmul.mubr.msk.bf16.vlgmr.msra.gmra.mrb[168].mxu1 %vm919_vm2, %v7611_v3  ;;  %v7821_v3 = vrot.slane %v7816_v1, %v12187_v7 }
0x3edc   :  { %11068 = vmatpush3.bf16.msra.mxu1 %v13338_v28  ;;  %11083 = vmatprep.mubr.msk.bf16.mxu1 %vm12015_vm1, %v12012_v25  ;;  %v7612_v28 = vld [vmem:[#allocation10 + $0x5] ss:$8 sm:$0x7] }
0x3edd   :  { %11069 = vmatprep.subr.bf16.mxu1 %v12012_v25 }
0x3ee0   :  { %11070 = vmatpush3.bf16.msra.mxu1 %v13341_v8  ;;  %v7617_v8 = vrot.slane %v7612_v28, %v12187_v7 }
0x3ee1   :  { %11071 = vmatprep.subr.bf16.mxu1 %v12012_v25 }
0x3ee4   :  { %11072 = vmatpush3.bf16.msra.mxu1 %v13345_v32 }
0x3ee5   :  { %11073 = vmatprep.subr.bf16.mxu1 %v12012_v25 }
0x3ee8   :  { %11074 = vmatpush3.bf16.msra.mxu1 %v13349_v31 }
0x3ee9   :  { %11075 = vmatprep.subr.bf16.mxu1 %v12012_v25 }
0x3eec   :  { %11076 = vmatpush3.bf16.msra.mxu1 %v13353_v56 }
0x3eed   :  { %11077 = vmatprep.subr.bf16.mxu1 %v12012_v25 }
0x3ef0   :  { %11078 = vmatpush3.bf16.msra.mxu1 %v13357_v33 }
0x3ef1   :  { %11079 = vmatprep.subr.bf16.mxu1 %v12012_v25 }
0x3ef4   :  { %11080 = vmatpush3.bf16.msra.mxu1 %v13380_v63  ;;  %v11638_v63 = vld [vmem:[#allocation7 + $0x94] ss:$12 sps:$4 sm:$0xff]  }
0x3ef5   :  { %11081 = vmatprep.subr.bf16.mxu1 %v12012_v25 }
0x3ef8   :  { %11082 = vmatpush3.bf16.msra.mxu1 %v13386_v18  ;;  %v11642_v18 = vld [vmem:[#allocation8 + $0x120] sm:$0xff]  }
0x3ef9   :  { %7961 = vmatprep.subr.bf16.mxu1 %v11638_v63 }
0x3fae   :  { %v7680_v32 = vpop.f32.mrb[168].mxu1 }
0x3faf   :  { %v7681_v31 = vadd.f32 %v7680_v32, %v7617_v8  ;;  %v11045_v2 = vpop.f32.mrb[169].mxu1 }
0x3fb0   :  { %v7683_v30 = vpop.f32.mrb[170].mxu1 }
0x3fb1   :  { %v7684_v56 = vadd.f32 %v7683_v30, %v7617_v8  ;;  %v11046_v15 = vpop.f32.mrb[171].mxu1  ;;  %v7687_v34 = vadd.f32 %v7681_v31, %v13423_v43  ;;  %v7790_v43 = vld [vmem:[#allocation10 + $0x7] ss:$8 sm:$0x7] }
0x3fb2   :  { %v7795_v50 = vrot.slane %v7790_v43, %v12187_v7  ;;  %v11660_v43 = vld [vmem:[#allocation8 + $0x160] sm:$0xff]  }
0x3fb3   :  { %v7688_v33 = vadd.f32 %v7684_v56, %v13425_v35 }
0x3fb5   :  { %v7689_v58 = vpack.c.bf16 %v7688_v33, %v7687_v34 }
0x3fb7   :  { %11064 = vmatmul.mubr.bf16.vlgmr.msra.gmra.mrb[176].mxu0 %v7689_v58 }
0x3fb8   :  { %11103 = vmatprep.mubr.msk.bf16.mxu0 %vm12015_vm1, %v12012_v25  ;;  %11088 = vmatpush3.bf16.msra.mxu0 %v11642_v18 }
0x3fb9   :  { %11089 = vmatprep.subr.bf16.mxu0 %v12012_v25 }
0x3fbc   :  { %11090 = vmatpush3.bf16.msra.mxu0 %v11643_v53 }
0x3fbd   :  { %11091 = vmatprep.subr.bf16.mxu0 %v12012_v25 }
0x3fc0   :  { %11092 = vmatpush3.bf16.msra.mxu0 %v11644_v16 }
0x3fc1   :  { %11093 = vmatprep.subr.bf16.mxu0 %v12012_v25 }
0x3fc4   :  { %11094 = vmatpush3.bf16.msra.mxu0 %v11645_v57 }
0x3fc5   :  { %11095 = vmatprep.subr.bf16.mxu0 %v12012_v25 }
0x3fc8   :  { %11096 = vmatpush3.bf16.msra.mxu0 %v11646_v9 }
0x3fc9   :  { %11097 = vmatprep.subr.bf16.mxu0 %v12012_v25 }
0x3fcc   :  { %11098 = vmatpush3.bf16.msra.mxu0 %v11647_v61 }
0x3fcd   :  { %11099 = vmatprep.subr.bf16.mxu0 %v12012_v25 }
0x3fd0   :  { %11100 = vmatpush3.bf16.msra.mxu0 %v11648_v11 }
0x3fd1   :  { %11101 = vmatprep.subr.bf16.mxu0 %v12012_v25 }
0x408a   :  { %v7724_v54 = vpop.f32.mrb[176].mxu0 }
0x408b   :  { %v7731_v29 = vsub.f32 %v7687_v34, %v7724_v54  ;;  %v11065_v13 = vpop.f32.mrb[177].mxu0  ;;  %v7925_v54 = vpop.permute.xlu0 %7924 }
0x408c   :  { %v7727_v6 = vpop.f32.mrb[178].mxu0 }
0x408d   :  { %v7732_v46 = vsub.f32 %v7688_v33, %v7727_v6  ;;  %v11066_v49 = vpop.f32.mrb[179].mxu0  ;;  %v7733_v38 = vmul.f32 %v7731_v29, %v7731_v29 }
0x408f   :  { %v7734_v17 = vmul.f32 %v7732_v46, %v7732_v46 }
0x4091   :  { %v7735_v10 = vpack.c.bf16 %v7734_v17, %v7733_v38  ;;  %v11656_v38 = vld [vmem:[#allocation8 + $0x250] sm:$0xff]   ;;  %v11657_v17 = vld [vmem:[#allocation8 + $0x258] sm:$0xff]  }
0x4093   :  { %11084 = vmatmul.mubr.bf16.vlgmr.msra.gmra.mrb[172].mxu1 %v7735_v10  ;;  %v11659_v10 = vld [vmem:[#allocation8 + $0x268] sm:$0xff]  }
0x4094   :  { %7962 = vmatpush1.bf16.msra.mxu1 %v11636_v42  ;;  %7993 = vmatprep.mubr.bf16.mxu1 %v12011_v24  ;;  %v11658_v42 = vld [vmem:[#allocation8 + $0x260] sm:$0xff]  }
0x4095   :  { %7963 = vmatprep.subr.bf16.mxu1 %v11641_v55  ;;  %v8073_v55 = vld [vmem:[#allocation10 + $0x19] ss:$8 sm:$0x7] }
0x4096   :  { %v8078_v16 = vrot.slane %v8073_v55, %v12187_v7 }
0x4098   :  { %7964 = vmatpush1.bf16.msra.mxu1 %v11639_v12  ;;  %v8082_v12 = vrot.slane %v8073_v55, %v12185_v5 }
0x4099   :  { %8030 = vmatprep.subr.bf16.mxu1 %v11652_v23 }
0x409b   :  { %9287 = vmatmul.mubr.msk.bf16.vlgmr.msra.gmra.mrb[176].mxu1 %vm383_vm0, %v13235_v39  ;;  %v11649_v39 = vld [vmem:[#allocation8 + $0x158] sm:$0xff]  }
0x409c   :  { %8062 = vmatprep.mubr.bf16.mxu1 %v12011_v24  ;;  %11102 = vmatpush3.bf16.msra.mxu0 %v11649_v39 }
0x409d   :  { %11119 = vmatprep.subr.bf16.mxu0 %v12012_v25  ;;  %8031 = vmatpush1.bf16.msra.mxu1 %v11650_v52 }
0x409e   :  { %8032 = vmatprep.subr.bf16.mxu1 %v11655_v27 }
0x40a1   :  { %8033 = vmatpush1.bf16.msra.mxu1 %v11653_v20 }
0x40a2   :  { %11107 = vmatprep.subr.bf16.mxu1 %v12012_v25 }
0x4166   :  { %v7770_v24 = vpop.f32.mrb[172].mxu1 }
0x4167   :  { %v7771_v21 = vadd.f32 1e-05, %v7770_v24  ;;  %v11085_v36 = vpop.f32.mrb[173].mxu1 }
0x4168   :  { %v7773_v22 = vpop.f32.mrb[174].mxu1 }
0x4169   :  { %11822 = vrsqrt.f32 %v7771_v21  ;;  %v7774_v40 = vadd.f32 1e-05, %v7773_v22  ;;  %v11086_v45 = vpop.f32.mrb[175].mxu1 }
0x416b   :  { %11824 = vrsqrt.f32 %v7774_v40 }
0x4173   :  { %v11823_v44 = vpop.eup %11822 }
0x4174   :  { %v7779_v35 = vmul.f32 %v11823_v44, %v7731_v29  ;;  %v7927_v29 = vpop.permute.xlu1 %7926 }
0x4175   :  { %v11825_v59 = vpop.eup %11824 }
0x4176   :  { %v7780_v48 = vmul.f32 %v11825_v59, %v7732_v46  ;;  %v7788_v62 = vmul.f32 %v7786_v14, %v7779_v35  ;;  %v11661_v35 = vld [vmem:[#allocation8 + $0x168] sm:$0xff]   ;;  %v11662_v59 = vld [vmem:[#allocation8 + $0x170] sm:$0xff]  }
0x4178   :  { %v7789_v41 = vmul.f32 %v7786_v14, %v7780_v48  ;;  %v7797_v26 = vadd.f32 %v7795_v50, %v7788_v62  ;;  %v11663_v48 = vld [vmem:[#allocation8 + $0x178] sm:$0xff]   ;;  %v13527_v62 = vld [vmem:[#allocation8 + $0x270] sm:$0xff]  }
0x417a   :  { %v7798_v51 = vadd.f32 %v7795_v50, %v7789_v41  ;;  %v13530_v50 = vld [vmem:[#allocation8 + $0x278] sm:$0xff]  }
0x417c   :  { %v7815_v4 = vpack.c.bf16 %v7798_v51, %v7797_v26 }
0x417e   :  { %11104 = vmatmul.mubr.bf16.vlgmr.msra.gmra.mrb[180].mxu0 %v7815_v4 }
0x417f   :  { %11127 = vmatprep.mubr.msk.bf16.mxu0 %vm12015_vm1, %v12012_v25  ;;  %11120 = vmatpush3.bf16.msra.mxu0 %v11656_v38 }
0x4180   :  { %11121 = vmatprep.subr.bf16.mxu0 %v12012_v25 }
0x4183   :  { %11122 = vmatpush3.bf16.msra.mxu0 %v11657_v17 }
0x4184   :  { %11123 = vmatprep.subr.bf16.mxu0 %v12012_v25 }
0x4187   :  { %11124 = vmatpush3.bf16.msra.mxu0 %v11658_v42 }
0x4188   :  { %11125 = vmatprep.subr.bf16.mxu0 %v12012_v25 }
0x418b   :  { %11126 = vmatpush3.bf16.msra.mxu0 %v11659_v10 }
0x418c   :  { %11143 = vmatprep.subr.bf16.mxu0 %v12012_v25 }
0x4251   :  { %v7905_v28 = vpop.f32.mrb[180].mxu0 }
0x4252   :  { %v7906_v8 = vadd.f32 %v7905_v28, %v7821_v3  ;;  %v11105_v32 = vpop.f32.mrb[181].mxu0 }
0x4253   :  { %v7908_v31 = vpop.f32.mrb[182].mxu0 }
0x4254   :  { %v9281_v2 = vmul.f32 -1.442695, %v7906_v8  ;;  %v7909_v30 = vadd.f32 %v7908_v31, %v7821_v3  ;;  %v11106_v56 = vpop.f32.mrb[183].mxu0 }
0x4256   :  { %11826 = vpow2.f32 %v9281_v2  ;;  %v9282_v15 = vmul.f32 -1.442695, %v7909_v30 }
0x4258   :  { %11828 = vpow2.f32 %v9282_v15 }
0x4260   :  { %v11827_v34 = vpop.eup %11826 }
0x4261   :  { %v7918_v33 = vadd.f32 1.0, %v11827_v34 }
0x4262   :  { %v11829_v58 = vpop.eup %11828 }
0x4263   :  { %11830 = vrcp.f32 %v7918_v33  ;;  %v7919_v63 = vadd.f32 1.0, %v11829_v58 }
0x4265   :  { %11832 = vrcp.f32 %v7919_v63 }
0x426d   :  { %v13491_v18 = vpop.eup %11830 }
0x426e   :  { %v7930_v13 = vmul.f32 %v13491_v18, %v7925_v54 }
0x426f   :  { %v13493_v53 = vpop.eup %11832 }
0x4270   :  { %v7931_v6 = vmul.f32 %v13493_v53, %v7927_v29  ;;  %v13543_v29 = vld [vmem:[#allocation8 + $0x280] sm:$0xff]  }
0x4272   :  { %v7936_v46 = vpack.c.bf16 %v7931_v6, %v7930_v13 }
0x4274   :  { %8005 = vrot.lane.b32.xlu0 %v7936_v46, %s12014_s10 }
0x4278   :  { %8321 = vrot.lane.b32.xlu0 %v7930_v13, %s12014_s10  ;;  %v13549_v13 = vld [vmem:[#allocation8 + $0x288] sm:$0xff]  }
0x42e6   :  { %v8006_v49 = vpop.permute.xlu0 %8005 }
0x42e7   :  { %9292 = vmatmul.mubr.msk.bf16.vlgmr.msra.gmra.mrb[176].mxu1 %vm383_vm0, %v8006_v49 }
0x42e8   :  { %11115 = vmatprep.mubr.msk.bf16.mxu1 %vm12015_vm1, %v12012_v25  ;;  %11108 = vmatpush3.bf16.msra.mxu1 %v11656_v38 }
0x42e9   :  { %11109 = vmatprep.subr.bf16.mxu1 %v12012_v25 }
0x42ea   :  { %v8322_v49 = vpop.permute.xlu0 %8321 }
0x42ec   :  { %11110 = vmatpush3.bf16.msra.mxu1 %v11657_v17 }
0x42ed   :  { %11111 = vmatprep.subr.bf16.mxu1 %v12012_v25 }
0x42f0   :  { %11112 = vmatpush3.bf16.msra.mxu1 %v11658_v42 }
0x42f1   :  { %11113 = vmatprep.subr.bf16.mxu1 %v12012_v25 }
0x42f4   :  { %11114 = vmatpush3.bf16.msra.mxu1 %v11659_v10 }
0x42f5   :  { %11131 = vmatprep.subr.bf16.mxu1 %v12012_v25 }
0x43ba   :  { %v8064_v57 = vpop.f32.mrb[176].mxu1 }
0x43bb   :  { %v8066_v9 = vpop.f32.mrb[177].mxu1  ;;  %v8085_v39 = vadd.f32 %v8078_v16, %v8064_v57  ;;  %v8327_v57 = vsel %vm383_vm0, %v8322_v49, %v13392_v0 }
0x43bc   :  { %v13512_v61 = vadd.f32 %v8082_v12, %v8066_v9  ;;  %v8068_v11 = vpop.f32.mrb[178].mxu1 }
0x43bd   :  { %v8087_v24 = vadd.f32 %v8078_v16, %v8068_v11  ;;  %v8070_v21 = vpop.f32.mrb[179].mxu1 }
0x43be   :  { %v8088_v36 = vadd.f32 %v8082_v12, %v8070_v21 }
0x43bf   :  { %v8089_v22 = vsub.f32 %v8085_v39, %v8087_v24 }
0x43c0   :  { %v8090_v40 = vsub.f32 %v13512_v61, %v8088_v36 }
0x43c1   :  { %8100 = vrot.lane.b32.xlu1 %v8089_v22, %s12002_s1  ;;  %s12016_s1 = smov [#allocation11]  }
0x43c2   :  { %s8853_s11 = sshll.u32 %s12016_s1, 4  ;;  %s8854_s11 = int_to_ptr.vmem [resolvable:$true] %s8853_s11 }
0x43c3   :  { %s11968_s12 = scalar_lea.vmem %s8854_s11, 1024  ;;  %p11973_p13 = scmp.lt.s32.totalorder %s8854_s11, %s8854_s11 }
0x43c4   :  { %p11969_p12 = scmp.ne.s32.totalorder %s8854_s11, %s11968_s12  ;;  %p11974_p0 = scmp.lt.s32.totalorder %s11968_s12, %s11968_s12 }
0x43c5   :  { %8323 = vrot.lane.b32.xlu1 %v7931_v6, %s12014_s10  ;;  %v8244_v6 = vld [vmem:[#allocation10 + $0x1a] ss:$8 sm:$0x7] }
0x43c6   :  { %v8249_v46 = vrot.slane %v8244_v6, %v12187_v7  ;;  %p11975_p1 = por %p11974_p0, %p11973_p13 }
0x43c8   :  { %p11976_p2 = pnand %p11975_p1, %p11969_p12 }
0x4433   :  { %v8101_v45 = vpop.permute.xlu1 %8100 }
0x4434   :  { %v8103_v5 = vmul.f32 %v8101_v45, %v8085_v39  ;;  %v8179_v37 = vmul.f32 %v8101_v45, %v8087_v24 }
0x4436   :  { %v8104_v14 = vpack.c.bf16 %v8103_v5, %v8103_v5  ;;  %v8180_v44 = vpack.c.bf16 %v8179_v37, %v8179_v37 }
0x4437   :  { %v8324_v17 = vpop.permute.xlu1 %8323 }
0x4438   :  { %11116 = vmatmul.mubr.msk.bf16.vlgmr.msra.gmra.mrb[180].mxu1 %vm919_vm2, %v8104_v14  ;;  %11128 = vmatmul.mubr.msk.bf16.vlgmr.msra.gmra.mrb[184].mxu0 %vm919_vm2, %v8180_v44  ;;  %v8328_v9 = vsel %vm383_vm0, %v8324_v17, %v13394_v19  ;;  %v11668_v19 = vld [vmem:[#allocation8 + $0x180] sm:$0xff]   ;;  %v11669_v14 = vld [vmem:[#allocation8 + $0x188] sm:$0xff]   ;;  %v11670_v44 = vld [vmem:[#allocation8 + $0x190] sm:$0xff]  }
0x4439   :  { %11139 = vmatprep.mubr.msk.bf16.mxu1 %vm12015_vm1, %v12012_v25  ;;  %11151 = vmatprep.mubr.msk.bf16.mxu0 %vm12015_vm1, %v12012_v25 }
0x443a   :  { %11132 = vmatpush3.bf16.msra.mxu1 %v11660_v43  ;;  %11144 = vmatpush3.bf16.msra.mxu0 %v13527_v62  ;;  %v11671_v43 = vld [vmem:[#allocation8 + $0x198] sm:$0xff]  }
0x443b   :  { %11133 = vmatprep.subr.bf16.mxu1 %v12012_v25  ;;  %11145 = vmatprep.subr.bf16.mxu0 %v12012_v25 }
0x443e   :  { %11134 = vmatpush3.bf16.msra.mxu1 %v11661_v35  ;;  %11146 = vmatpush3.bf16.msra.mxu0 %v13530_v50 }
0x443f   :  { %11135 = vmatprep.subr.bf16.mxu1 %v12012_v25  ;;  %11147 = vmatprep.subr.bf16.mxu0 %v12012_v25 }
0x4442   :  { %11136 = vmatpush3.bf16.msra.mxu1 %v11662_v59  ;;  %11148 = vmatpush3.bf16.msra.mxu0 %v13543_v29 }
0x4443   :  { %11137 = vmatprep.subr.bf16.mxu1 %v12012_v25  ;;  %11149 = vmatprep.subr.bf16.mxu0 %v12012_v25 }
0x4446   :  { %11138 = vmatpush3.bf16.msra.mxu1 %v11663_v48  ;;  %11150 = vmatpush3.bf16.msra.mxu0 %v13549_v13 }
0x4447   :  { %11155 = vmatprep.subr.bf16.mxu1 %v12012_v25  ;;  %11167 = vmatprep.subr.bf16.mxu0 %v12012_v25 }
0x450b   :  { %v8166_v41 = vpop.f32.mrb[180].mxu1  ;;  %v8218_v26 = vpop.f32.mrb[184].mxu0 }
0x450c   :  { %v9298_v51 = vmul.f32 -0.25, %v8166_v41  ;;  %v9300_v4 = vmul.f32 0.25, %v8218_v26  ;;  %v11117_v52 = vpop.f32.mrb[181].mxu1  ;;  %v11129_v23 = vpop.f32.mrb[185].mxu0 }
0x450d   :  { %v8169_v27 = vpop.f32.mrb[182].mxu1  ;;  %v8221_v20 = vpop.f32.mrb[186].mxu0 }
0x450e   :  { %v8174_v1 = vmul.f32 1.442695, %v9298_v51  ;;  %v8226_v3 = vmul.f32 1.442695, %v9300_v4  ;;  %v11118_v28 = vpop.f32.mrb[183].mxu1  ;;  %v11130_v8 = vpop.f32.mrb[187].mxu0 }
0x450f   :  { %v8461_v4 = vld [vmem:[#allocation10 + $0x1b] ss:$8 sm:$0x7]  ;;  %v8470_v27 = vld [vmem:[#allocation10 + $0x1c] ss:$8 sm:$0x7] }
0x4510   :  { %11834 = vpow2.f32 %v8174_v1  ;;  %v8466_v52 = vrot.slane %v8461_v4, %v12187_v7  ;;  %v8475_v8 = vrot.slane %v8470_v27, %v12187_v7 }
0x4511   :  { %11836 = vpow2.f32 %v8226_v3 }
0x451a   :  { %v11835_v32 = vpop.eup %11834 }
0x451b   :  { %v11837_v31 = vpop.eup %11836  ;;  %v8176_v2 = vadd.f32 1.0, %v11835_v32 }
0x451c   :  { %v8228_v30 = vadd.f32 1.0, %v11837_v31 }
0x451d   :  { %11838 = vrcp.f32 %v8176_v2 }
0x451e   :  { %11840 = vrcp.f32 %v8228_v30 }
0x4527   :  { %v11839_v56 = vpop.eup %11838 }
0x4528   :  { %v11841_v15 = vpop.eup %11840  ;;  %v8231_v34 = vmul.f32 %v11839_v56, %v8090_v40  ;;  %v11672_v56 = vld [vmem:[#allocation8 + $0x1a0] sm:$0xff]  }
0x4529   :  { %v8233_v33 = vmul.f32 %v11841_v15, %v8090_v40  ;;  %v11673_v15 = vld [vmem:[#allocation8 + $0x1a8] sm:$0xff]  }
0x452a   :  { %v8232_v58 = vadd.f32 %v8231_v34, %v8088_v36  ;;  %v8488_v34 = vld [vmem:[#allocation10 + $0x1d] ss:$8 sm:$0x7] }
0x452b   :  { %v8234_v63 = vsub.f32 %v13512_v61, %v8233_v33  ;;  %v8493_v33 = vrot.slane %v8488_v34, %v12187_v7 }
0x452d   :  { %v8243_v54 = vpack.c.bf16 %v8234_v63, %v8232_v58 }
0x452f   :  { %11140 = vmatmul.mubr.msk.bf16.vlgmr.msra.gmra.mrb[184].mxu1 %vm919_vm2, %v8243_v54 }
0x4530   :  { %11156 = vmatpush3.bf16.msra.mxu1 %v13527_v62  ;;  %11163 = vmatprep.mubr.msk.bf16.mxu1 %vm12015_vm1, %v12012_v25 }
0x4531   :  { %11157 = vmatprep.subr.bf16.mxu1 %v12012_v25 }
0x4534   :  { %11158 = vmatpush3.bf16.msra.mxu1 %v13530_v50 }
0x4535   :  { %11159 = vmatprep.subr.bf16.mxu1 %v12012_v25 }
0x4538   :  { %11160 = vmatpush3.bf16.msra.mxu1 %v13543_v29 }
0x4539   :  { %11161 = vmatprep.subr.bf16.mxu1 %v12012_v25 }
0x453c   :  { %11162 = vmatpush3.bf16.msra.mxu1 %v13549_v13 }
0x453d   :  { %11179 = vmatprep.subr.bf16.mxu1 %v12012_v25 }
0x4602   :  { %v8312_v38 = vpop.f32.mrb[184].mxu1 }
0x4603   :  { %v8313_v42 = vadd.f32 %v8312_v38, %v8249_v46  ;;  %v11141_v10 = vpop.f32.mrb[185].mxu1 }
0x4604   :  { %v8315_v55 = vpop.f32.mrb[186].mxu1  ;;  %v8570_v10 = vld [vmem:[#allocation10 + $0x1e] ss:$8 sm:$0x7] }
0x4605   :  { %v8316_v12 = vadd.f32 %v8315_v55, %v8249_v46  ;;  %v11142_v16 = vpop.f32.mrb[187].mxu1  ;;  %v8329_v61 = vadd.f32 %v8327_v57, %v8313_v42  ;;  %v8575_v55 = vrot.slane %v8570_v10, %v12187_v7 }
0x4607   :  { %v8330_v11 = vadd.f32 %v8328_v9, %v8316_v12 }
0x4609   :  { %v8339_v39 = vpack.c.bf16 %v8330_v11, %v8329_v61 }
0x460b   :  { %11152 = vmatmul.mubr.msk.bf16.vlgmr.msra.gmra.mrb[188].mxu0 %vm919_vm2, %v8339_v39 }
0x460c   :  { %11175 = vmatprep.mubr.msk.bf16.mxu0 %vm12015_vm1, %v12012_v25  ;;  %11168 = vmatpush3.bf16.msra.mxu0 %v11668_v19  ;;  %v11676_v19 = vld [vmem:[#allocation8 + $0x1c0] sm:$0xff]  }
0x460d   :  { %11169 = vmatprep.subr.bf16.mxu0 %v12012_v25 }
0x4610   :  { %11170 = vmatpush3.bf16.msra.mxu0 %v11669_v14  ;;  %v11677_v14 = vld [vmem:[#allocation8 + $0x1c8] sm:$0xff]  }
0x4611   :  { %11171 = vmatprep.subr.bf16.mxu0 %v12012_v25 }
0x4614   :  { %11172 = vmatpush3.bf16.msra.mxu0 %v11670_v44 }
0x4615   :  { %11173 = vmatprep.subr.bf16.mxu0 %v12012_v25 }
0x4618   :  { %11174 = vmatpush3.bf16.msra.mxu0 %v11671_v43 }
0x4619   :  { %11187 = vmatprep.subr.bf16.mxu0 %v12012_v25 }
0x46de   :  { %v8401_v24 = vpop.f32.mrb[188].mxu0 }
0x46df   :  { %v8408_v21 = vsub.f32 %v8329_v61, %v8401_v24  ;;  %v11153_v36 = vpop.f32.mrb[189].mxu0 }
0x46e0   :  { %v8404_v22 = vpop.f32.mrb[190].mxu0 }
0x46e1   :  { %v8409_v40 = vsub.f32 %v8330_v11, %v8404_v22  ;;  %v11154_v45 = vpop.f32.mrb[191].mxu0  ;;  %v8410_v5 = vmul.f32 %v8408_v21, %v8408_v21 }
0x46e3   :  { %v8411_v37 = vmul.f32 %v8409_v40, %v8409_v40 }
0x46e5   :  { %v8412_v0 = vpack.c.bf16 %v8411_v37, %v8410_v5  ;;  %v11674_v37 = vld [vmem:[#allocation8 + $0x1b0] sm:$0xff]  }
0x46e7   :  { %11164 = vmatmul.mubr.msk.bf16.vlgmr.msra.gmra.mrb[188].mxu1 %vm919_vm2, %v8412_v0  ;;  %v11675_v0 = vld [vmem:[#allocation8 + $0x1b8] sm:$0xff]  }
0x46e8   :  { %11183 = vmatprep.mubr.msk.bf16.mxu1 %vm12015_vm1, %v12012_v25  ;;  %11180 = vmatpush3.bf16.msra.mxu1 %v11672_v56 }
0x46e9   :  { %11181 = vmatprep.subr.bf16.mxu1 %v12012_v25 }
0x46ec   :  { %11182 = vmatpush3.bf16.msra.mxu1 %v11673_v15 }
0x46ed   :  { %11199 = vmatprep.subr.bf16.mxu1 %v12012_v25 }
0x47ba   :  { %v8450_v35 = vpop.f32.mrb[188].mxu1 }
0x47bb   :  { %v8451_v59 = vadd.f32 1e-05, %v8450_v35  ;;  %v11165_v48 = vpop.f32.mrb[189].mxu1 }
0x47bc   :  { %v8453_v41 = vpop.f32.mrb[190].mxu1 }
0x47bd   :  { %11842 = vrsqrt.f32 %v8451_v59  ;;  %v8454_v26 = vadd.f32 1e-05, %v8453_v41  ;;  %v11166_v51 = vpop.f32.mrb[191].mxu1 }
0x47bf   :  { %11844 = vrsqrt.f32 %v8454_v26  ;;  %v8733_v26 = vld [vmem:[#allocation10 + $0x1f] ss:$8 sm:$0x7] }
0x47c0   :  { %v8738_v51 = vrot.slane %v8733_v26, %v12187_v7 }
0x47c7   :  { %v11843_v23 = vpop.eup %11842 }
0x47c8   :  { %v8459_v20 = vmul.f32 %v11843_v23, %v8408_v21 }
0x47c9   :  { %v11845_v1 = vpop.eup %11844 }
0x47ca   :  { %v8468_v3 = vmul.f32 %v8466_v52, %v8459_v20  ;;  %v8460_v28 = vmul.f32 %v11845_v1, %v8409_v40 }
0x47cc   :  { %v8469_v32 = vmul.f32 %v8466_v52, %v8460_v28  ;;  %v8477_v31 = vadd.f32 %v8475_v8, %v8468_v3  ;;  %v8742_v52 = vld [vmem:[#allocation10 + $0x30] ss:$8 sm:$0x7] }
0x47ce   :  { %v8478_v2 = vadd.f32 %v8475_v8, %v8469_v32 }
0x47d0   :  { %v8487_v30 = vpack.c.bf16 %v8478_v2, %v8477_v31 }
0x47d2   :  { %11176 = vmatmul.mubr.msk.bf16.vlgmr.msra.gmra.mrb[192].mxu0 %vm919_vm2, %v8487_v30 }
0x47d3   :  { %11188 = vmatpush3.bf16.msra.mxu0 %v13527_v62  ;;  %11195 = vmatprep.mubr.msk.bf16.mxu0 %vm12015_vm1, %v12012_v25 }
0x47d4   :  { %11189 = vmatprep.subr.bf16.mxu0 %v12012_v25 }
0x47d7   :  { %11190 = vmatpush3.bf16.msra.mxu0 %v13530_v50 }
0x47d8   :  { %11191 = vmatprep.subr.bf16.mxu0 %v12012_v25 }
0x47db   :  { %11192 = vmatpush3.bf16.msra.mxu0 %v13543_v29 }
0x47dc   :  { %11193 = vmatprep.subr.bf16.mxu0 %v12012_v25 }
0x47df   :  { %11194 = vmatpush3.bf16.msra.mxu0 %v13549_v13 }
0x47e0   :  { %11211 = vmatprep.subr.bf16.mxu0 %v12012_v25 }
0x48a5   :  { %v8556_v58 = vpop.f32.mrb[192].mxu0 }
0x48a6   :  { %v8557_v63 = vadd.f32 %v8556_v58, %v8493_v33  ;;  %v11177_v54 = vpop.f32.mrb[193].mxu0 }
0x48a7   :  { %v8559_v6 = vpop.f32.mrb[194].mxu0  ;;  %v8838_v54 = vsub.f32 1.0, %v13493_v53 }
0x48a8   :  { %v8560_v46 = vadd.f32 %v8559_v6, %v8493_v33  ;;  %v11178_v49 = vpop.f32.mrb[195].mxu0  ;;  %v8563_v38 = vmax.f32 %v8557_v63, 0.0  ;;  %v8837_v63 = vsub.f32 1.0, %v13491_v18 }
0x48aa   :  { %v8564_v17 = vmax.f32 %v8560_v46, 0.0  ;;  %v8839_v46 = vmul.f32 %v8837_v63, %v13267_v60 }
0x48ac   :  { %v8569_v42 = vpack.c.bf16 %v8564_v17, %v8563_v38  ;;  %v8840_v17 = vmul.f32 %v8838_v54, %v13273_v47 }
0x48ae   :  { %11184 = vmatmul.mubr.msk.bf16.vlgmr.msra.gmra.mrb[192].mxu1 %vm383_vm0, %v8569_v42 }
0x48af   :  { %11200 = vmatpush3.bf16.msra.mxu1 %v13527_v62  ;;  %11207 = vmatprep.mubr.msk.bf16.mxu1 %vm12015_vm1, %v12012_v25 }
0x48b0   :  { %11201 = vmatprep.subr.bf16.mxu1 %v12012_v25 }
0x48b3   :  { %11202 = vmatpush3.bf16.msra.mxu1 %v13530_v50 }
0x48b4   :  { %11203 = vmatprep.subr.bf16.mxu1 %v12012_v25 }
0x48b7   :  { %11204 = vmatpush3.bf16.msra.mxu1 %v13543_v29 }
0x48b8   :  { %11205 = vmatprep.subr.bf16.mxu1 %v12012_v25 }
0x48bb   :  { %11206 = vmatpush3.bf16.msra.mxu1 %v13549_v13 }
0x4981   :  { %v8626_v12 = vpop.f32.mrb[192].mxu1 }
0x4982   :  { %v8627_v62 = vadd.f32 %v8626_v12, %v8575_v55  ;;  %v11185_v16 = vpop.f32.mrb[193].mxu1 }
0x4983   :  { %v8629_v57 = vpop.f32.mrb[194].mxu1 }
0x4984   :  { %v8630_v9 = vadd.f32 %v8629_v57, %v8575_v55  ;;  %v11186_v61 = vpop.f32.mrb[195].mxu1  ;;  %v8633_v11 = vadd.f32 %v8627_v62, %v8477_v31  ;;  %v8760_v31 = vld [vmem:[#allocation10 + $0x31] ss:$8 sm:$0x7] }
0x4986   :  { %v8634_v39 = vadd.f32 %v8630_v9, %v8478_v2  ;;  %v8765_v2 = vrot.slane %v8760_v31, %v12187_v7 }
0x4988   :  { %v8635_v50 = vpack.c.bf16 %v8634_v39, %v8633_v11 }
0x498a   :  { %11196 = vmatmul.mubr.msk.bf16.vlgmr.msra.gmra.mrb[196].mxu0 %vm919_vm2, %v8635_v50 }
0x498b   :  { %11219 = vmatprep.mubr.msk.bf16.mxu0 %vm12015_vm1, %v12012_v25  ;;  %11212 = vmatpush3.bf16.msra.mxu0 %v11674_v37 }
0x498c   :  { %11213 = vmatprep.subr.bf16.mxu0 %v12012_v25 }
0x498f   :  { %11214 = vmatpush3.bf16.msra.mxu0 %v11675_v0 }
0x4990   :  { %11215 = vmatprep.subr.bf16.mxu0 %v12012_v25 }
0x4993   :  { %11216 = vmatpush3.bf16.msra.mxu0 %v11676_v19 }
0x4994   :  { %11217 = vmatprep.subr.bf16.mxu0 %v12012_v25  ;;  %v8747_v25 = vrot.slane %v8742_v52, %v12187_v7 }
0x4997   :  { %11218 = vmatpush3.bf16.msra.mxu0 %v11677_v14 }
0x4a5d   :  { %v8673_v29 = vpop.f32.mrb[196].mxu0 }
0x4a5e   :  { %v8680_v24 = vsub.f32 %v8633_v11, %v8673_v29  ;;  %v11197_v13 = vpop.f32.mrb[197].mxu0 }
0x4a5f   :  { %v8676_v21 = vpop.f32.mrb[198].mxu0 }
0x4a60   :  { %v8681_v36 = vsub.f32 %v8634_v39, %v8676_v21  ;;  %v11198_v22 = vpop.f32.mrb[199].mxu0  ;;  %v8682_v40 = vmul.f32 %v8680_v24, %v8680_v24 }
0x4a62   :  { %v8683_v45 = vmul.f32 %v8681_v36, %v8681_v36 }
0x4a64   :  { %v8684_v5 = vpack.c.bf16 %v8683_v45, %v8682_v40 }
0x4a66   :  { %11208 = vmatmul.mubr.msk.bf16.vlgmr.msra.gmra.mrb[196].mxu1 %vm919_vm2, %v8684_v5 }
0x4b39   :  { %v8722_v44 = vpop.f32.mrb[196].mxu1 }
0x4b3a   :  { %v8723_v43 = vadd.f32 1e-05, %v8722_v44  ;;  %v11209_v35 = vpop.f32.mrb[197].mxu1 }
0x4b3b   :  { %v8725_v59 = vpop.f32.mrb[198].mxu1 }
0x4b3c   :  { %11846 = vrsqrt.f32 %v8723_v43  ;;  %v8726_v48 = vadd.f32 1e-05, %v8725_v59  ;;  %v11210_v41 = vpop.f32.mrb[199].mxu1 }
0x4b3e   :  { %11848 = vrsqrt.f32 %v8726_v48 }
0x4b46   :  { %v11847_v4 = vpop.eup %11846 }
0x4b47   :  { %v8731_v23 = vmul.f32 %v11847_v4, %v8680_v24 }
0x4b48   :  { %v11849_v27 = vpop.eup %11848 }
0x4b49   :  { %v8740_v20 = vmul.f32 %v8738_v51, %v8731_v23  ;;  %v8732_v1 = vmul.f32 %v11849_v27, %v8681_v36 }
0x4b4b   :  { %v8741_v3 = vmul.f32 %v8738_v51, %v8732_v1  ;;  %v8749_v28 = vadd.f32 %v8747_v25, %v8740_v20 }
0x4b4d   :  { %v8750_v8 = vadd.f32 %v8747_v25, %v8741_v3 }
0x4b4f   :  { %v8759_v32 = vpack.c.bf16 %v8750_v8, %v8749_v28 }
0x4b51   :  { %11220 = vmatmul.mubr.msk.bf16.vlgmr.msra.gmra.mrb[200].mxu0 %vm919_vm2, %v8759_v32 }
0x4c24   :  { %v8828_v30 = vpop.f32.mrb[200].mxu0 }
0x4c25   :  { %v8829_v56 = vadd.f32 %v8828_v30, %v8765_v2  ;;  %v11221_v15 = vpop.f32.mrb[201].mxu0 }
0x4c26   :  { %v8831_v34 = vpop.f32.mrb[202].mxu0 }
0x4c27   :  { %11850 = vtanh.f32 %v8829_v56  ;;  %v8832_v33 = vadd.f32 %v8831_v34, %v8765_v2  ;;  %v11222_v58 = vpop.f32.mrb[203].mxu0 }
0x4c29   :  { %11852 = vtanh.f32 %v8832_v33 }
0x4c31   :  { %v11851_v6 = vpop.eup %11850 }
0x4c32   :  { %v8841_v49 = vmul.f32 %v11851_v6, %v13491_v18 }
0x4c33   :  { %v11853_v38 = vpop.eup %11852 }
0x4c34   :  { %v8843_v7 = vadd.f32 %v8841_v49, %v8839_v46  ;;  %v8842_v42 = vmul.f32 %v11853_v38, %v13493_v53 }
0x4c36   :  { %8846 = vst.msk [vmem:[#allocation11 + $0x30] sm:$0xff] %vm383_vm0, %v8843_v7  ;;  %v8844_v10 = vadd.f32 %v8842_v42, %v8840_v17 }
0x4c38   :  { %8847 = vst.msk [vmem:[#allocation11 + $0x38] sm:$0xff] %vm383_vm0, %v8844_v10 }
0x4c39   :  { %11979 = shalt.err (!%p11976_p2)
}
0x4c3a   :  { %s11980_s15 = scalar_lea.hbm %s13636_s5, 1024 }
0x4c3b   :  { %p11981_p3 = scmp.ne.s32.totalorder %s13636_s5, %s11980_s15  ;;  %p11984_p4 = scmp.lt.u32.totalorder %s11980_s15, %s13636_s5 }
0x4c3d   :  { %p11986_p5 = pnand %p11984_p4, %p11981_p3 }
0x4c3f   :  { %11989 = shalt.err (!%p11986_p5)
}
0x4c40   :  { %8859 = dma.vmem_to_hbm [thread:$0]  %s8854_s11, 1024, %s13636_s5, [#allocation4], %s12000_s30, %s12000_s30, %s12001_s6  }
0x4c41   :  { %11996 = dma.done.wait [#allocation4], 1024  }
0x4c42   :  { %11997 = vsyncadd [#allocation4], 4294966272 }
0x4c43   :  { %8863 = vsyncpa [#allocation3], 1 }
0x4c44   :  { %8864 = vsyncpa [#allocation6], 1 }
0x4c45   :  { %8865 = vsyncpa [#allocation9], 1 }
0x4c46   :  { %8866 = vsyncpa [#allocation4], 1 }

</bundles_post_ra>
